<compile_context>
chip_gen: v5e
topology: v5e:2x2
jax: 0.10.0
libtpu: 0.0.40
codegen_flags: <defaults>
</compile_context>

<pallas_src>
import functools

import jax
import jax.numpy as jnp
from jax.experimental import pallas as pl
from jax.experimental.pallas import tpu as pltpu

_LANES = 128
_SUBLANES = 8


def _round_up(n, m):
    return ((n + m - 1) // m) * m


def _mtl_kernel(hw, x_ref, wenc_ref, benc_ref, wh_ref, bh_ref, out_ref, acc_ref):
    """Fused stand-in encoder + global average pool + concatenated heads.

    x_ref:    (1, S, 128)      f32  lane-dense spatial tile of one batch
    wenc_ref: (C, 1)           f32  stand-in 1x1 conv weight (1 -> C channels)
    benc_ref: (C, 1)           f32  stand-in conv bias
    wh_ref:   (C, NOUT_pad)    f32  concatenated, lane-padded head weights
    bh_ref:   (1, NOUT_pad)    f32  concatenated, lane-padded head biases
    out_ref:  (1, 8, NOUT_pad) f32  logits for this batch (row replicated on sublanes)
    acc_ref:  (C, 128)         f32  per-lane channel accumulator (VMEM scratch)
    """
    k = pl.program_id(1)
    S = x_ref.shape[1]
    L = x_ref.shape[2]
    C = wenc_ref.shape[0]

    @pl.when(k == 0)
    def _init():
        acc_ref[...] = jnp.zeros_like(acc_ref)

    # Loop-invariant lane-broadcasts of the encoder params (hoisted once/step).
    w_b = jnp.broadcast_to(wenc_ref[...], (C, L))        # (C, 128)
    b_b = jnp.broadcast_to(benc_ref[...], (C, L))        # (C, 128)

    x_t = x_ref[0]                                       # (S, 128) lane-dense

    # Validity mask: padded spatial positions get a zero pool coefficient.
    base = k * (S * L)
    pos = (base
           + jax.lax.broadcasted_iota(jnp.int32, (S, L), 0) * L
           + jax.lax.broadcasted_iota(jnp.int32, (S, L), 1))
    maskf = (pos < hw).astype(jnp.float32)               # (S, 128)

    # Stand-in encoder (1x1 conv 1->C + ReLU) fused with the spatial-sum
    # reduction: each x row (128 positions) yields a (C, 128) chunk that is
    # added straight into the accumulator -- no (P, C) feature map, no MXU.
    for r in range(S):                                   # static, small S
        xb = jnp.broadcast_to(x_t[r:r + 1, :], (C, L))   # sublane broadcast
        mb = maskf[r:r + 1, :]                           # (1, 128)
        fm = jnp.maximum(xb * w_b + b_b, 0.0)            # (C, 128) VPU
        acc_ref[...] += fm * mb                          # masked accumulate

    @pl.when(k == pl.num_programs(1) - 1)
    def _finalize():
        # Global average pool: lane-sum of the accumulator, scale by 1/HW.
        pooled = jnp.sum(acc_ref[...], axis=1, keepdims=True) * jnp.float32(1.0 / hw)  # (C, 1)
        # All heads at once: (C, NOUT_pad) * pooled column, sublane-sum + bias.
        logits = jnp.sum(wh_ref[...] * pooled, axis=0, keepdims=True) + bh_ref[...]    # (1, NOUT_pad)
        out_ref[0, :, :] = jnp.broadcast_to(logits, (out_ref.shape[1], out_ref.shape[2]))


def mtl_forward(x, w_enc, b_enc, w_heads, b_heads,
                num_initials, num_finals, num_tones):
    """x: (B, 1, F, T) float32 -> (initials, finals, tones, sanity) logits."""
    B, Cin, F, T = x.shape
    assert Cin == 1
    HW = F * T
    C = w_enc.shape[0]
    NOUT = w_heads.shape[1]
    NOUT_pad = _round_up(NOUT, _LANES)                   # lane-dense output/head width

    # ---- wrapper-side layout plumbing (free) ------------------------------
    # Lane-dense spatial layout: HW flattened to (rows, 128), zero-padded; the
    # kernel masks padded positions so they contribute nothing to the pool.
    rows_needed = pl.cdiv(HW, _LANES)
    S = min(_round_up(rows_needed, _SUBLANES), 32)       # sublane rows per tile
    n_tiles = pl.cdiv(rows_needed, S)
    rows_pad = n_tiles * S
    HW_pad = rows_pad * _LANES

    x2d = x.reshape(B, HW).astype(jnp.float32)
    x_pad = jnp.zeros((B, HW_pad), jnp.float32).at[:, :HW].set(x2d)
    x_tiles = x_pad.reshape(B, rows_pad, _LANES)

    # Lane-padded concatenated head parameters (zero columns sliced off later).
    w_heads_p = jnp.zeros((C, NOUT_pad), jnp.float32).at[:, :NOUT].set(w_heads)
    b_heads_p = jnp.zeros((1, NOUT_pad), jnp.float32).at[:, :NOUT].set(
        b_heads.reshape(1, NOUT))

    flops = (4 * B * HW_pad * C                          # encoder mul/add/relu + masked acc
             + B * (C * _LANES + 2 * C * NOUT_pad))      # pool lane-sum + heads
    bytes_accessed = 4 * (x_tiles.size + w_enc.size + b_enc.size
                          + w_heads_p.size + b_heads_p.size
                          + B * _SUBLANES * NOUT_pad)

    kernel = functools.partial(_mtl_kernel, HW)

    out = pl.pallas_call(
        kernel,
        out_shape=jax.ShapeDtypeStruct((B, _SUBLANES, NOUT_pad), jnp.float32),
        grid=(B, n_tiles),
        in_specs=[
            pl.BlockSpec((1, S, _LANES), lambda b, k: (b, k, 0)),   # x tile
            pl.BlockSpec((C, 1), lambda b, k: (0, 0)),              # encoder weight
            pl.BlockSpec((C, 1), lambda b, k: (0, 0)),              # encoder bias
            pl.BlockSpec((C, NOUT_pad), lambda b, k: (0, 0)),       # head weights
            pl.BlockSpec((1, NOUT_pad), lambda b, k: (0, 0)),       # head biases
        ],
        out_specs=pl.BlockSpec((1, _SUBLANES, NOUT_pad), lambda b, k: (b, 0, 0)),
        scratch_shapes=[pltpu.VMEM((C, _LANES), jnp.float32)],
        compiler_params=pltpu.CompilerParams(
            dimension_semantics=("parallel", "arbitrary"),          # batch || , HW reduce
            vmem_limit_bytes=32 * 1024 * 1024),
        cost_estimate=pl.CostEstimate(flops=int(flops), transcendentals=0,
                                      bytes_accessed=int(bytes_accessed)),
    )(x_tiles, w_enc, b_enc, w_heads_p, b_heads_p)

    logits = out[:, 0, :NOUT]
    initials_out = logits[:, :num_initials]
    finals_out = logits[:, num_initials:num_initials + num_finals]
    tones_out = logits[:, num_initials + num_finals:
                       num_initials + num_finals + num_tones]
    sanity_out = tones_out  # forward() uses tone_head for sanity_out as well
    return initials_out, finals_out, tones_out, sanity_out


def _reference_forward(x, w_enc, b_enc, w_heads, b_heads, num_initials,
                       num_finals, num_tones):
    """Plain-JAX reference matching the PyTorch forward semantics."""
    B = x.shape[0]
    x2d = x.reshape(B, -1)                                    # (B, HW)
    w = w_enc[:, 0]
    bb = b_enc[:, 0]
    fm = jnp.maximum(x2d[:, :, None] * w[None, None, :] + bb[None, None, :],
                     0.0)                                     # (B, HW, C)
    pooled = jnp.mean(fm, axis=1)                             # (B, C)
    logits = pooled @ w_heads + b_heads.reshape(1, -1)        # (B, NOUT)
    i = logits[:, :num_initials]
    f = logits[:, num_initials:num_initials + num_finals]
    t = logits[:, num_initials + num_finals:
               num_initials + num_finals + num_tones]
    return i, f, t, t


if __name__ == "__main__":
    # Small, module-consistent shapes.
    B, F, T = 2, 16, 16          # batch, freq_bins, time_steps (channel = 1)
    C = 256 * 2                  # heads expect 512-dim pooled features
    num_initials, num_finals, num_tones = 8, 16, 5
    NOUT = num_initials + num_finals + num_tones

    key = jax.random.PRNGKey(0)
    kx, kwe, kbe, kwi, kbi, kwf, kbf, kwt, kbt = jax.random.split(key, 9)

    x = jax.random.normal(kx, (B, 1, F, T), dtype=jnp.float32)

    # Stand-in encoder parameters (1x1 conv: 1 -> C channels), channels on sublanes.
    w_enc = jax.random.normal(kwe, (C, 1), dtype=jnp.float32) * 0.5
    b_enc = jax.random.normal(kbe, (C, 1), dtype=jnp.float32) * 0.1

    # Head parameters, nn.Linear-style scale 1/sqrt(fan_in), stored (C, out).
    scale = 1.0 / jnp.sqrt(jnp.float32(C))
    w_init = jax.random.uniform(kwi, (C, num_initials), jnp.float32, -scale, scale)
    b_init = jax.random.uniform(kbi, (num_initials,), jnp.float32, -scale, scale)
    w_fin = jax.random.uniform(kwf, (C, num_finals), jnp.float32, -scale, scale)
    b_fin = jax.random.uniform(kbf, (num_finals,), jnp.float32, -scale, scale)
    w_tone = jax.random.uniform(kwt, (C, num_tones), jnp.float32, -scale, scale)
    b_tone = jax.random.uniform(kbt, (num_tones,), jnp.float32, -scale, scale)

    w_heads = jnp.concatenate([w_init, w_fin, w_tone], axis=1)           # (C, NOUT)
    b_heads = jnp.concatenate([b_init, b_fin, b_tone], axis=0)[None, :]  # (1, NOUT)

    outs = mtl_forward(x, w_enc, b_enc, w_heads, b_heads,
                       num_initials, num_finals, num_tones)
    outs = jax.block_until_ready(outs)

    refs = _reference_forward(x, w_enc, b_enc, w_heads, b_heads,
                              num_initials, num_finals, num_tones)
    for o, r in zip(outs, refs):
        assert o.shape == r.shape
        assert jnp.allclose(o, r, atol=2e-4, rtol=1e-4), "mismatch vs reference"

    print("KERNEL_OK")
</pallas_src>

<mosaic_0001>
module attributes {stable_mosaic.version = 11 : i64} {
  func.func @_mtl_kernel(%arg0: i32, %arg1: i32, %arg2: memref<1x8x128xf32, #tpu.memory_space<vmem>>, %arg3: memref<512x1xf32, #tpu.memory_space<vmem>>, %arg4: memref<512x1xf32, #tpu.memory_space<vmem>>, %arg5: memref<512x128xf32, #tpu.memory_space<vmem>>, %arg6: memref<1x128xf32, #tpu.memory_space<vmem>>, %arg7: memref<1x8x128xf32, #tpu.memory_space<vmem>>, %arg8: memref<512x128xf32, #tpu.memory_space<vmem>>) attributes {dimension_semantics = [#tpu.dimension_semantics<parallel>, #tpu.dimension_semantics<arbitrary>], iteration_bounds = array<i64: 2, 1>, scalar_prefetch = 0 : i64, scratch_operands = 1 : i64, tpu.core_type = #tpu.core_type<tc>, window_params = [{transform_indices = @transform_0, window_bounds = array<i64: 1, 8, 128>}, {pipeline_mode = #tpu.pipeline_mode<synchronous>, transform_indices = @transform_1, window_bounds = array<i64: 512, 1>}, {pipeline_mode = #tpu.pipeline_mode<synchronous>, transform_indices = @transform_2, window_bounds = array<i64: 512, 1>}, {pipeline_mode = #tpu.pipeline_mode<synchronous>, transform_indices = @transform_3, window_bounds = array<i64: 512, 128>}, {pipeline_mode = #tpu.pipeline_mode<synchronous>, transform_indices = @transform_4, window_bounds = array<i64: 1, 128>}, {transform_indices = @transform_5, window_bounds = array<i64: 1, 8, 128>}]} {
    %c0_i32 = arith.constant 0 : i32
    %0 = arith.cmpi eq, %arg1, %c0_i32 : i32
    %1 = arith.extui %0 : i1 to i32
    %c0_i32_0 = arith.constant 0 : i32
    %2 = arith.cmpi ne, %1, %c0_i32_0 : i32
    scf.if %2 {
      %cst_48 = arith.constant 0.000000e+00 : f32
      %130 = vector.broadcast %cst_48 : f32 to vector<512x128xf32>
      %c0_49 = arith.constant 0 : index
      %c0_50 = arith.constant 0 : index
      %131 = vector.load %arg8[%c0_49, %c0_50] : memref<512x128xf32, #tpu.memory_space<vmem>>, vector<512x128xf32>
      tpu.vector_store %arg8[%c0_49, %c0_50], %130 {strides = array<i32>} : memref<512x128xf32, #tpu.memory_space<vmem>>, vector<512x128xf32>,
    } else {
    }
    %c0 = arith.constant 0 : index
    %c0_1 = arith.constant 0 : index
    %3 = vector.load %arg3[%c0, %c0_1] : memref<512x1xf32, #tpu.memory_space<vmem>>, vector<512x1xf32>
    %4 = vector.shape_cast %3 : vector<512x1xf32> to vector<512x1xf32>
    %5 = vector.broadcast %4 : vector<512x1xf32> to vector<512x128xf32>
    %c0_2 = arith.constant 0 : index
    %c0_3 = arith.constant 0 : index
    %6 = vector.load %arg4[%c0_2, %c0_3] : memref<512x1xf32, #tpu.memory_space<vmem>>, vector<512x1xf32>
    %7 = vector.shape_cast %6 : vector<512x1xf32> to vector<512x1xf32>
    %8 = vector.broadcast %7 : vector<512x1xf32> to vector<512x128xf32>
    %c0_4 = arith.constant 0 : index
    %c0_5 = arith.constant 0 : index
    %c0_6 = arith.constant 0 : index
    %9 = vector.load %arg2[%c0_4, %c0_5, %c0_6] : memref<1x8x128xf32, #tpu.memory_space<vmem>>, vector<1x8x128xf32>
    %10 = vector.shape_cast %9 : vector<1x8x128xf32> to vector<8x128xf32>
    %c1024_i32 = arith.constant 1024 : i32
    %11 = arith.muli %arg1, %c1024_i32 : i32
    %12 = tpu.iota {dimensions = array<i32: 0>} : vector<8x128xi32>
    %c128_i32 = arith.constant 128 : i32
    %13 = vector.broadcast %c128_i32 : i32 to vector<8x128xi32>
    %14 = arith.muli %12, %13 : vector<8x128xi32>
    %15 = vector.broadcast %11 : i32 to vector<8x128xi32>
    %16 = arith.addi %15, %14 : vector<8x128xi32>
    %17 = tpu.iota {dimensions = array<i32: 1>} : vector<8x128xi32>
    %18 = arith.addi %16, %17 : vector<8x128xi32>
    %c256_i32 = arith.constant 256 : i32
    %19 = vector.broadcast %c256_i32 : i32 to vector<8x128xi32>
    %20 = arith.cmpi slt, %18, %19 : vector<8x128xi32>
    %21 = arith.extui %20 : vector<8x128xi1> to vector<8x128xi32>
    %22 = arith.sitofp %21 : vector<8x128xi32> to vector<8x128xf32>
    %23 = vector.extract_strided_slice %10 {offsets = [0, 0], sizes = [1, 128], strides = [1, 1]} : vector<8x128xf32> to vector<1x128xf32>
    %24 = vector.shape_cast %23 : vector<1x128xf32> to vector<1x128xf32>
    %25 = vector.broadcast %24 : vector<1x128xf32> to vector<512x128xf32>
    %26 = vector.extract_strided_slice %22 {offsets = [0, 0], sizes = [1, 128], strides = [1, 1]} : vector<8x128xf32> to vector<1x128xf32>
    %27 = arith.mulf %25, %5 : vector<512x128xf32>
    %28 = arith.addf %27, %8 : vector<512x128xf32>
    %cst = arith.constant 0.000000e+00 : f32
    %29 = vector.broadcast %cst : f32 to vector<512x128xf32>
    %30 = arith.maximumf %28, %29 : vector<512x128xf32>
    %c0_7 = arith.constant 0 : index
    %c0_8 = arith.constant 0 : index
    %31 = vector.load %arg8[%c0_7, %c0_8] : memref<512x128xf32, #tpu.memory_space<vmem>>, vector<512x128xf32>
    %32 = vector.broadcast %26 : vector<1x128xf32> to vector<512x128xf32>
    %33 = arith.mulf %30, %32 : vector<512x128xf32>
    %34 = arith.addf %31, %33 : vector<512x128xf32>
    %c0_9 = arith.constant 0 : index
    %c0_10 = arith.constant 0 : index
    %35 = vector.load %arg8[%c0_9, %c0_10] : memref<512x128xf32, #tpu.memory_space<vmem>>, vector<512x128xf32>
    tpu.vector_store %arg8[%c0_9, %c0_10], %34 {strides = array<i32>} : memref<512x128xf32, #tpu.memory_space<vmem>>, vector<512x128xf32>,
    %36 = vector.extract_strided_slice %10 {offsets = [1, 0], sizes = [1, 128], strides = [1, 1]} : vector<8x128xf32> to vector<1x128xf32>
    %37 = vector.shape_cast %36 : vector<1x128xf32> to vector<1x128xf32>
    %38 = vector.broadcast %37 : vector<1x128xf32> to vector<512x128xf32>
    %39 = vector.extract_strided_slice %22 {offsets = [1, 0], sizes = [1, 128], strides = [1, 1]} : vector<8x128xf32> to vector<1x128xf32>
    %40 = arith.mulf %38, %5 : vector<512x128xf32>
    %41 = arith.addf %40, %8 : vector<512x128xf32>
    %cst_11 = arith.constant 0.000000e+00 : f32
    %42 = vector.broadcast %cst_11 : f32 to vector<512x128xf32>
    %43 = arith.maximumf %41, %42 : vector<512x128xf32>
    %c0_12 = arith.constant 0 : index
    %c0_13 = arith.constant 0 : index
    %44 = vector.load %arg8[%c0_12, %c0_13] : memref<512x128xf32, #tpu.memory_space<vmem>>, vector<512x128xf32>
    %45 = vector.broadcast %39 : vector<1x128xf32> to vector<512x128xf32>
    %46 = arith.mulf %43, %45 : vector<512x128xf32>
    %47 = arith.addf %44, %46 : vector<512x128xf32>
    %c0_14 = arith.constant 0 : index
    %c0_15 = arith.constant 0 : index
    %48 = vector.load %arg8[%c0_14, %c0_15] : memref<512x128xf32, #tpu.memory_space<vmem>>, vector<512x128xf32>
    tpu.vector_store %arg8[%c0_14, %c0_15], %47 {strides = array<i32>} : memref<512x128xf32, #tpu.memory_space<vmem>>, vector<512x128xf32>,
    %49 = vector.extract_strided_slice %10 {offsets = [2, 0], sizes = [1, 128], strides = [1, 1]} : vector<8x128xf32> to vector<1x128xf32>
    %50 = vector.shape_cast %49 : vector<1x128xf32> to vector<1x128xf32>
    %51 = vector.broadcast %50 : vector<1x128xf32> to vector<512x128xf32>
    %52 = vector.extract_strided_slice %22 {offsets = [2, 0], sizes = [1, 128], strides = [1, 1]} : vector<8x128xf32> to vector<1x128xf32>
    %53 = arith.mulf %51, %5 : vector<512x128xf32>
    %54 = arith.addf %53, %8 : vector<512x128xf32>
    %cst_16 = arith.constant 0.000000e+00 : f32
    %55 = vector.broadcast %cst_16 : f32 to vector<512x128xf32>
    %56 = arith.maximumf %54, %55 : vector<512x128xf32>
    %c0_17 = arith.constant 0 : index
    %c0_18 = arith.constant 0 : index
    %57 = vector.load %arg8[%c0_17, %c0_18] : memref<512x128xf32, #tpu.memory_space<vmem>>, vector<512x128xf32>
    %58 = vector.broadcast %52 : vector<1x128xf32> to vector<512x128xf32>
    %59 = arith.mulf %56, %58 : vector<512x128xf32>
    %60 = arith.addf %57, %59 : vector<512x128xf32>
    %c0_19 = arith.constant 0 : index
    %c0_20 = arith.constant 0 : index
    %61 = vector.load %arg8[%c0_19, %c0_20] : memref<512x128xf32, #tpu.memory_space<vmem>>, vector<512x128xf32>
    tpu.vector_store %arg8[%c0_19, %c0_20], %60 {strides = array<i32>} : memref<512x128xf32, #tpu.memory_space<vmem>>, vector<512x128xf32>,
    %62 = vector.extract_strided_slice %10 {offsets = [3, 0], sizes = [1, 128], strides = [1, 1]} : vector<8x128xf32> to vector<1x128xf32>
    %63 = vector.shape_cast %62 : vector<1x128xf32> to vector<1x128xf32>
    %64 = vector.broadcast %63 : vector<1x128xf32> to vector<512x128xf32>
    %65 = vector.extract_strided_slice %22 {offsets = [3, 0], sizes = [1, 128], strides = [1, 1]} : vector<8x128xf32> to vector<1x128xf32>
    %66 = arith.mulf %64, %5 : vector<512x128xf32>
    %67 = arith.addf %66, %8 : vector<512x128xf32>
    %cst_21 = arith.constant 0.000000e+00 : f32
    %68 = vector.broadcast %cst_21 : f32 to vector<512x128xf32>
    %69 = arith.maximumf %67, %68 : vector<512x128xf32>
    %c0_22 = arith.constant 0 : index
    %c0_23 = arith.constant 0 : index
    %70 = vector.load %arg8[%c0_22, %c0_23] : memref<512x128xf32, #tpu.memory_space<vmem>>, vector<512x128xf32>
    %71 = vector.broadcast %65 : vector<1x128xf32> to vector<512x128xf32>
    %72 = arith.mulf %69, %71 : vector<512x128xf32>
    %73 = arith.addf %70, %72 : vector<512x128xf32>
    %c0_24 = arith.constant 0 : index
    %c0_25 = arith.constant 0 : index
    %74 = vector.load %arg8[%c0_24, %c0_25] : memref<512x128xf32, #tpu.memory_space<vmem>>, vector<512x128xf32>
    tpu.vector_store %arg8[%c0_24, %c0_25], %73 {strides = array<i32>} : memref<512x128xf32, #tpu.memory_space<vmem>>, vector<512x128xf32>,
    %75 = vector.extract_strided_slice %10 {offsets = [4, 0], sizes = [1, 128], strides = [1, 1]} : vector<8x128xf32> to vector<1x128xf32>
    %76 = vector.shape_cast %75 : vector<1x128xf32> to vector<1x128xf32>
    %77 = vector.broadcast %76 : vector<1x128xf32> to vector<512x128xf32>
    %78 = vector.extract_strided_slice %22 {offsets = [4, 0], sizes = [1, 128], strides = [1, 1]} : vector<8x128xf32> to vector<1x128xf32>
    %79 = arith.mulf %77, %5 : vector<512x128xf32>
    %80 = arith.addf %79, %8 : vector<512x128xf32>
    %cst_26 = arith.constant 0.000000e+00 : f32
    %81 = vector.broadcast %cst_26 : f32 to vector<512x128xf32>
    %82 = arith.maximumf %80, %81 : vector<512x128xf32>
    %c0_27 = arith.constant 0 : index
    %c0_28 = arith.constant 0 : index
    %83 = vector.load %arg8[%c0_27, %c0_28] : memref<512x128xf32, #tpu.memory_space<vmem>>, vector<512x128xf32>
    %84 = vector.broadcast %78 : vector<1x128xf32> to vector<512x128xf32>
    %85 = arith.mulf %82, %84 : vector<512x128xf32>
    %86 = arith.addf %83, %85 : vector<512x128xf32>
    %c0_29 = arith.constant 0 : index
    %c0_30 = arith.constant 0 : index
    %87 = vector.load %arg8[%c0_29, %c0_30] : memref<512x128xf32, #tpu.memory_space<vmem>>, vector<512x128xf32>
    tpu.vector_store %arg8[%c0_29, %c0_30], %86 {strides = array<i32>} : memref<512x128xf32, #tpu.memory_space<vmem>>, vector<512x128xf32>,
    %88 = vector.extract_strided_slice %10 {offsets = [5, 0], sizes = [1, 128], strides = [1, 1]} : vector<8x128xf32> to vector<1x128xf32>
    %89 = vector.shape_cast %88 : vector<1x128xf32> to vector<1x128xf32>
    %90 = vector.broadcast %89 : vector<1x128xf32> to vector<512x128xf32>
    %91 = vector.extract_strided_slice %22 {offsets = [5, 0], sizes = [1, 128], strides = [1, 1]} : vector<8x128xf32> to vector<1x128xf32>
    %92 = arith.mulf %90, %5 : vector<512x128xf32>
    %93 = arith.addf %92, %8 : vector<512x128xf32>
    %cst_31 = arith.constant 0.000000e+00 : f32
    %94 = vector.broadcast %cst_31 : f32 to vector<512x128xf32>
    %95 = arith.maximumf %93, %94 : vector<512x128xf32>
    %c0_32 = arith.constant 0 : index
    %c0_33 = arith.constant 0 : index
    %96 = vector.load %arg8[%c0_32, %c0_33] : memref<512x128xf32, #tpu.memory_space<vmem>>, vector<512x128xf32>
    %97 = vector.broadcast %91 : vector<1x128xf32> to vector<512x128xf32>
    %98 = arith.mulf %95, %97 : vector<512x128xf32>
    %99 = arith.addf %96, %98 : vector<512x128xf32>
    %c0_34 = arith.constant 0 : index
    %c0_35 = arith.constant 0 : index
    %100 = vector.load %arg8[%c0_34, %c0_35] : memref<512x128xf32, #tpu.memory_space<vmem>>, vector<512x128xf32>
    tpu.vector_store %arg8[%c0_34, %c0_35], %99 {strides = array<i32>} : memref<512x128xf32, #tpu.memory_space<vmem>>, vector<512x128xf32>,
    %101 = vector.extract_strided_slice %10 {offsets = [6, 0], sizes = [1, 128], strides = [1, 1]} : vector<8x128xf32> to vector<1x128xf32>
    %102 = vector.shape_cast %101 : vector<1x128xf32> to vector<1x128xf32>
    %103 = vector.broadcast %102 : vector<1x128xf32> to vector<512x128xf32>
    %104 = vector.extract_strided_slice %22 {offsets = [6, 0], sizes = [1, 128], strides = [1, 1]} : vector<8x128xf32> to vector<1x128xf32>
    %105 = arith.mulf %103, %5 : vector<512x128xf32>
    %106 = arith.addf %105, %8 : vector<512x128xf32>
    %cst_36 = arith.constant 0.000000e+00 : f32
    %107 = vector.broadcast %cst_36 : f32 to vector<512x128xf32>
    %108 = arith.maximumf %106, %107 : vector<512x128xf32>
    %c0_37 = arith.constant 0 : index
    %c0_38 = arith.constant 0 : index
    %109 = vector.load %arg8[%c0_37, %c0_38] : memref<512x128xf32, #tpu.memory_space<vmem>>, vector<512x128xf32>
    %110 = vector.broadcast %104 : vector<1x128xf32> to vector<512x128xf32>
    %111 = arith.mulf %108, %110 : vector<512x128xf32>
    %112 = arith.addf %109, %111 : vector<512x128xf32>
    %c0_39 = arith.constant 0 : index
    %c0_40 = arith.constant 0 : index
    %113 = vector.load %arg8[%c0_39, %c0_40] : memref<512x128xf32, #tpu.memory_space<vmem>>, vector<512x128xf32>
    tpu.vector_store %arg8[%c0_39, %c0_40], %112 {strides = array<i32>} : memref<512x128xf32, #tpu.memory_space<vmem>>, vector<512x128xf32>,
    %114 = vector.extract_strided_slice %10 {offsets = [7, 0], sizes = [1, 128], strides = [1, 1]} : vector<8x128xf32> to vector<1x128xf32>
    %115 = vector.shape_cast %114 : vector<1x128xf32> to vector<1x128xf32>
    %116 = vector.broadcast %115 : vector<1x128xf32> to vector<512x128xf32>
    %117 = vector.extract_strided_slice %22 {offsets = [7, 0], sizes = [1, 128], strides = [1, 1]} : vector<8x128xf32> to vector<1x128xf32>
    %118 = arith.mulf %116, %5 : vector<512x128xf32>
    %119 = arith.addf %118, %8 : vector<512x128xf32>
    %cst_41 = arith.constant 0.000000e+00 : f32
    %120 = vector.broadcast %cst_41 : f32 to vector<512x128xf32>
    %121 = arith.maximumf %119, %120 : vector<512x128xf32>
    %c0_42 = arith.constant 0 : index
    %c0_43 = arith.constant 0 : index
    %122 = vector.load %arg8[%c0_42, %c0_43] : memref<512x128xf32, #tpu.memory_space<vmem>>, vector<512x128xf32>
    %123 = vector.broadcast %117 : vector<1x128xf32> to vector<512x128xf32>
    %124 = arith.mulf %121, %123 : vector<512x128xf32>
    %125 = arith.addf %122, %124 : vector<512x128xf32>
    %c0_44 = arith.constant 0 : index
    %c0_45 = arith.constant 0 : index
    %126 = vector.load %arg8[%c0_44, %c0_45] : memref<512x128xf32, #tpu.memory_space<vmem>>, vector<512x128xf32>
    tpu.vector_store %arg8[%c0_44, %c0_45], %125 {strides = array<i32>} : memref<512x128xf32, #tpu.memory_space<vmem>>, vector<512x128xf32>,
    %c0_i32_46 = arith.constant 0 : i32
    %127 = arith.cmpi eq, %arg1, %c0_i32_46 : i32
    %128 = arith.extui %127 : i1 to i32
    %c0_i32_47 = arith.constant 0 : i32
    %129 = arith.cmpi ne, %128, %c0_i32_47 : i32
    scf.if %129 {
      %c0_48 = arith.constant 0 : index
      %c0_49 = arith.constant 0 : index
      %130 = vector.load %arg8[%c0_48, %c0_49] : memref<512x128xf32, #tpu.memory_space<vmem>>, vector<512x128xf32>
      %cst_50 = arith.constant dense<0.000000e+00> : vector<512xf32>
      %131 = vector.multi_reduction <add>, %130, %cst_50 [1] : vector<512x128xf32> to vector<512xf32>
      %132 = vector.shape_cast %131 : vector<512xf32> to vector<512x1xf32>
      %cst_51 = arith.constant 3.906250e-03 : f32
      %133 = vector.broadcast %cst_51 : f32 to vector<512x1xf32>
      %134 = arith.mulf %132, %133 : vector<512x1xf32>
      %c0_52 = arith.constant 0 : index
      %c0_53 = arith.constant 0 : index
      %135 = vector.load %arg5[%c0_52, %c0_53] : memref<512x128xf32, #tpu.memory_space<vmem>>, vector<512x128xf32>
      %136 = vector.broadcast %134 : vector<512x1xf32> to vector<512x128xf32>
      %137 = arith.mulf %135, %136 : vector<512x128xf32>
      %cst_54 = arith.constant dense<0.000000e+00> : vector<128xf32>
      %138 = vector.multi_reduction <add>, %137, %cst_54 [0] : vector<512x128xf32> to vector<128xf32>
      %139 = vector.shape_cast %138 : vector<128xf32> to vector<1x128xf32>
      %c0_55 = arith.constant 0 : index
      %c0_56 = arith.constant 0 : index
      %140 = vector.load %arg6[%c0_55, %c0_56] : memref<1x128xf32, #tpu.memory_space<vmem>>, vector<1x128xf32>
      %141 = arith.addf %139, %140 : vector<1x128xf32>
      %142 = vector.shape_cast %141 : vector<1x128xf32> to vector<1x128xf32>
      %143 = vector.broadcast %142 : vector<1x128xf32> to vector<8x128xf32>
      %c0_57 = arith.constant 0 : index
      %c0_58 = arith.constant 0 : index
      %c0_59 = arith.constant 0 : index
      %144 = vector.load %arg7[%c0_57, %c0_58, %c0_59] : memref<1x8x128xf32, #tpu.memory_space<vmem>>, vector<1x8x128xf32>
      %145 = vector.shape_cast %144 : vector<1x8x128xf32> to vector<8x128xf32>
      %146 = vector.shape_cast %143 : vector<8x128xf32> to vector<1x8x128xf32>
      tpu.vector_store %arg7[%c0_57, %c0_58, %c0_59], %146 {strides = array<i32>} : memref<1x8x128xf32, #tpu.memory_space<vmem>>, vector<1x8x128xf32>,
    } else {
    }
    return
  }
  func.func @transform_0(%arg0: i32, %arg1: i32) -> (i32, i32, i32) {
    %c0_i32 = arith.constant 0 : i32
    %c0_i32_0 = arith.constant 0 : i32
    return %arg0, %arg1, %c0_i32 : i32, i32, i32
  }
  func.func @transform_1(%arg0: i32, %arg1: i32) -> (i32, i32) {
    %c0_i32 = arith.constant 0 : i32
    %c0_i32_0 = arith.constant 0 : i32
    %c0_i32_1 = arith.constant 0 : i32
    return %c0_i32, %c0_i32_0 : i32, i32
  }
  func.func @transform_2(%arg0: i32, %arg1: i32) -> (i32, i32) {
    %c0_i32 = arith.constant 0 : i32
    %c0_i32_0 = arith.constant 0 : i32
    %c0_i32_1 = arith.constant 0 : i32
    return %c0_i32, %c0_i32_0 : i32, i32
  }
  func.func @transform_3(%arg0: i32, %arg1: i32) -> (i32, i32) {
    %c0_i32 = arith.constant 0 : i32
    %c0_i32_0 = arith.constant 0 : i32
    %c0_i32_1 = arith.constant 0 : i32
    return %c0_i32, %c0_i32_0 : i32, i32
  }
  func.func @transform_4(%arg0: i32, %arg1: i32) -> (i32, i32) {
    %c0_i32 = arith.constant 0 : i32
    %c0_i32_0 = arith.constant 0 : i32
    %c0_i32_1 = arith.constant 0 : i32
    return %c0_i32, %c0_i32_0 : i32, i32
  }
  func.func @transform_5(%arg0: i32, %arg1: i32) -> (i32, i32, i32) {
    %c0_i32 = arith.constant 0 : i32
    %c0_i32_0 = arith.constant 0 : i32
    %c0_i32_1 = arith.constant 0 : i32
    return %arg0, %c0_i32, %c0_i32_0 : i32, i32, i32
  }
}

</mosaic_0001>

<bundles_post_ra>
// kernel: tpu_custom_call.1
= control target key start
LH: loop header
LB: loop body
LE: loop exit
PB: predicated region body
PF: predicated region fallthrough
CT: control target
= control target key end

     0   :  { %10 = vsyncpa [#allocation4], 0  ;;  %s9644_s0 = inlined_call_operand.vmem [shape: f32[2,8,128], index: 0, kind: input, shape index: {}]   ;;  %s9645_s1 = inlined_call_operand.vmem [shape: f32[512,1], index: 1, kind: input, shape index: {}]   ;;  %s9646_s2 = inlined_call_operand.vmem [shape: f32[512,1], index: 2, kind: input, shape index: {}]   ;;  %s9647_s3 = inlined_call_operand.vmem [shape: f32[512,128], index: 3, kind: input, shape index: {}]   ;;  %s9648_s4 = inlined_call_operand.vmem [shape: f32[1,128], index: 4, kind: input, shape index: {}]   ;;  %s9649_s5 = inlined_call_operand.hbm [shape: f32[2,8,128], index: 5, kind: output, shape index: {}]  }
   0x1   :  { %12 = vsyncpa [#allocation4 + $0x1], 0  ;;  %s5422_s18 = smov 0   ;;  %s5424_s19 = smov 0  }
   0x2   :  { %s5426_s20 = smov 0   ;;  %s5428_s21 = smov 0  }
   0x3   :  { %s5430_s22 = smov 0   ;;  %s5432_s23 = smov 0  }
   0x4 LB: > { %s5238_s24 = sadd.s32 4294967295, %s5388_s23   ;;  %s5239_s25 = sadd.s32 4294967294, %s5388_s23   ;;  %s5388_s23 = sphi %s5432_s23, %s18_s23   ;;  %s5384_s22 = sphi %s5430_s22, %s10637_s22   ;;  %s5380_s21 = sphi %s5428_s21, %s10636_s21   ;;  %s5376_s20 = sphi %s5426_s20, %s10635_s20   ;;  %s5372_s19 = sphi %s5424_s19, %s10634_s19   ;;  %s5368_s18 = sphi %s5422_s18, %s10633_s18  }
   0x5   : > { %s30_s26 = sadd.s32 1, %s5384_s22  ;;  %s149_s27 = sadd.s32 1, %s5376_s20 }
   0x6   : > { %p32_p0 = scmp.ge.s32.totalorder %s30_s26, 2  ;;  %p159_p1 = scmp.ne.s32.totalorder %s5376_s20, %s5372_s19 }
   0x7   : > { %p160_p2 = scmp.eq.s32.totalorder %s5238_s24, 1  ;;  %p165_p3 = scmp.ne.s32.totalorder %s5372_s19, %s5368_s18 }
   0x8   : > { %s10639_s26 = smov (%p32_p0, %s30_s26), 0  ;;  %p166_p5 = scmp.eq.s32.totalorder %s5239_s25, 1 }
   0x9   : > { %p5462_p4 = por %p160_p2, %p159_p1  ;;  %s146_s29 = ssub.s32 %s5384_s22, %s10639_s26 }
   0xa   : > { %p5242_p6 = scmp.ge.s32.totalorder %s5388_s23, 1  ;;  %p147_p7 = scmp.eq.s32.totalorder %s146_s29, 0 }
   0xb   : > { %p5469_p8 = por %p166_p5, %p165_p3  ;;  %p206_p9 = scmp.lt.s32.totalorder %s5388_s23, 3 }
   0xc   : > { %s5475_s6 = scalar_select %p147_p7, %s5376_s20, %s149_s27  }
   0xd   : > { %p207_p10 = pnand %p5242_p6, %p206_p9 }
   0xf   : > { %210 = sbr.rel (%p207_p10) target bundleno = 1168 (0x490), region = 40 }
  0x14   : > { %v315_v0 = vld [vmem:[%s9645_s1 + $0x20] sm:$0xff]  ;;  %v313_v1 = vld [vmem:[%s9645_s1 + $0x10] sm:$0xff]  ;;  %v5390_v3 = vmov 0   ;;  %v316_v4 = vld [vmem:[%s9645_s1 + $0x28] sm:$0xff]  ;;  %p236_p11 = scmp.lt.s32.totalorder %s5380_s21, 1  ;;  %s233_s29 = sand.u32 1, %s5372_s19  }
  0x15   : > { %v311_v2 = vld [vmem:[%s9645_s1] sm:$0xff]  ;;  %5309 = vset.pattern.permute.xlu2 %v5390_v3  ;;  %5308 = vset.pattern.permute.xlu1 %v5390_v3  ;;  %v314_v5 = vld [vmem:[%s9645_s1 + $0x18] sm:$0xff]  ;;  %v312_v6 = vld [vmem:[%s9645_s1 + $0x8] sm:$0xff]  ;;  %s5243_s7 = sshll.u32 %s233_s29, 3  ;;  %s5247_s8 = sshll.u32 %s5380_s21, 3 }
  0x16   : > { %5307 = vset.pattern.permute.xlu0 %v5390_v3  ;;  %397 = vperm.xlu2 %5309, %v315_v0   ;;  %v319_v7 = vld [vmem:[%s9645_s1 + $0x40] sm:$0xff]  ;;  %v318_v8 = vld [vmem:[%s9645_s1 + $0x38] sm:$0xff]  ;;  %v317_v9 = vld [vmem:[%s9645_s1 + $0x30] sm:$0xff]  ;;  %s237_s10 = scalar_select %p236_p11, %s5380_s21, 1 }
  0x17   : > { %387 = vperm.xlu1 %5308, %v313_v1   ;;  %377 = vperm.xlu0 %5307, %v311_v2   ;;  %v322_v10 = vld [vmem:[%s9645_s1 + $0x58] sm:$0xff]  ;;  %v321_v11 = vld [vmem:[%s9645_s1 + $0x50] sm:$0xff]  ;;  %v320_v12 = vld [vmem:[%s9645_s1 + $0x48] sm:$0xff]  ;;  %s235_s14 = scalar_lea.vmem [#allocation3], %s5243_s7  ;;  %s5153_s21 = scalar_lea.sflag [#allocation4], %s233_s29 }
  0x18   : > { %v325_v13 = vld [vmem:[%s9645_s1 + $0x70] sm:$0xff]  ;;  %v324_v14 = vld [vmem:[%s9645_s1 + $0x68] sm:$0xff]  ;;  %v323_v15 = vld [vmem:[%s9645_s1 + $0x60] sm:$0xff]  ;;  %s5244_s11 = sshll.u32 %s237_s10, 3  ;;  %s5165_s15 = sshll.u32 %s235_s14, 4  ;;  %s5166_s15 = int_to_ptr.vmem [resolvable:$true] %s5165_s15 }
  0x19   : > { %v328_v16 = vld [vmem:[%s9645_s1 + $0x88] sm:$0xff]  ;;  %v327_v17 = vld [vmem:[%s9645_s1 + $0x80] sm:$0xff]  ;;  %v326_v18 = vld [vmem:[%s9645_s1 + $0x78] sm:$0xff]  ;;  %s242_s16 = scalar_lea.vmem %s9644_s0, %s5244_s11  ;;  %s5163_s11 = scalar_lea.hbm %s9649_s5, %s5247_s8 }
  0x1a   : > { %v331_v19 = vld [vmem:[%s9645_s1 + $0xa0] sm:$0xff]  ;;  %v330_v20 = vld [vmem:[%s9645_s1 + $0x98] sm:$0xff]  ;;  %v329_v21 = vld [vmem:[%s9645_s1 + $0x90] sm:$0xff]  ;;  %s5330_s8 = scalar_lea.hbm %s9649_s5, 16 }
  0x1b   : > { %v334_v22 = vld [vmem:[%s9645_s1 + $0xb8] sm:$0xff]  ;;  %v333_v23 = vld [vmem:[%s9645_s1 + $0xb0] sm:$0xff]  ;;  %v332_v24 = vld [vmem:[%s9645_s1 + $0xa8] sm:$0xff] }
  0x1c   : > { %v337_v25 = vld [vmem:[%s9645_s1 + $0xd0] sm:$0xff]  ;;  %v336_v26 = vld [vmem:[%s9645_s1 + $0xc8] sm:$0xff]  ;;  %v335_v27 = vld [vmem:[%s9645_s1 + $0xc0] sm:$0xff] }
  0x1d   : > { %v340_v28 = vld [vmem:[%s9645_s1 + $0xe8] sm:$0xff]  ;;  %v339_v29 = vld [vmem:[%s9645_s1 + $0xe0] sm:$0xff]  ;;  %v338_v30 = vld [vmem:[%s9645_s1 + $0xd8] sm:$0xff] }
  0x1e   : > { %402 = vperm.xlu2 %5309, %v316_v4   ;;  %v343_v31 = vld [vmem:[%s9645_s1 + $0x100] sm:$0xff]  ;;  %v342_v32 = vld [vmem:[%s9645_s1 + $0xf8] sm:$0xff]  ;;  %v341_v33 = vld [vmem:[%s9645_s1 + $0xf0] sm:$0xff] }
  0x1f   : > { %392 = vperm.xlu1 %5308, %v314_v5   ;;  %382 = vperm.xlu0 %5307, %v312_v6   ;;  %v346_v34 = vld [vmem:[%s9645_s1 + $0x118] sm:$0xff]  ;;  %v345_v35 = vld [vmem:[%s9645_s1 + $0x110] sm:$0xff]  ;;  %v344_v36 = vld [vmem:[%s9645_s1 + $0x108] sm:$0xff] }
  0x20   : > { %v349_v38 = vld [vmem:[%s9645_s1 + $0x130] sm:$0xff]  ;;  %v348_v39 = vld [vmem:[%s9645_s1 + $0x128] sm:$0xff]  ;;  %v347_v40 = vld [vmem:[%s9645_s1 + $0x120] sm:$0xff] }
  0x21   : > { %v352_v42 = vld [vmem:[%s9645_s1 + $0x148] sm:$0xff]  ;;  %v351_v43 = vld [vmem:[%s9645_s1 + $0x140] sm:$0xff]  ;;  %v350_v44 = vld [vmem:[%s9645_s1 + $0x138] sm:$0xff] }
  0x22   : > { %v355_v46 = vld [vmem:[%s9645_s1 + $0x160] sm:$0xff]  ;;  %v354_v47 = vld [vmem:[%s9645_s1 + $0x158] sm:$0xff]  ;;  %v353_v48 = vld [vmem:[%s9645_s1 + $0x150] sm:$0xff] }
  0x23   : > { %v358_v52 = vld [vmem:[%s9645_s1 + $0x178] sm:$0xff]  ;;  %v357_v53 = vld [vmem:[%s9645_s1 + $0x170] sm:$0xff]  ;;  %v356_v54 = vld [vmem:[%s9645_s1 + $0x168] sm:$0xff] }
  0x24   : > { %v361_v58 = vld [vmem:[%s9645_s1 + $0x190] sm:$0xff]  ;;  %v360_v59 = vld [vmem:[%s9645_s1 + $0x188] sm:$0xff]  ;;  %v359_v60 = vld [vmem:[%s9645_s1 + $0x180] sm:$0xff] }
  0x25   : > { %v364_v0 = vld [vmem:[%s9645_s1 + $0x1a8] sm:$0xff]  ;;  %v363_v1 = vld [vmem:[%s9645_s1 + $0x1a0] sm:$0xff]  ;;  %v362_v2 = vld [vmem:[%s9645_s1 + $0x198] sm:$0xff] }
  0x26   : > { %417 = vperm.xlu2 %5309, %v319_v7   ;;  %v367_v6 = vld [vmem:[%s9645_s1 + $0x1c0] sm:$0xff]  ;;  %v366_v7 = vld [vmem:[%s9645_s1 + $0x1b8] sm:$0xff] }
  0x27   : > { %412 = vperm.xlu1 %5308, %v318_v8   ;;  %407 = vperm.xlu0 %5307, %v317_v9   ;;  %v365_v8 = vld [vmem:[%s9645_s1 + $0x1b0] sm:$0xff] }
  0x2e   : > { %432 = vperm.xlu2 %5309, %v322_v10  }
  0x2f   : > { %427 = vperm.xlu1 %5308, %v321_v11   ;;  %422 = vperm.xlu0 %5307, %v320_v12   ;;  %v370_v12 = vld [vmem:[%s9645_s1 + $0x1d8] sm:$0xff] }
  0x36   : > { %447 = vperm.xlu2 %5309, %v325_v13   ;;  %v369_v13 = vld [vmem:[%s9645_s1 + $0x1d0] sm:$0xff] }
  0x37   : > { %442 = vperm.xlu1 %5308, %v324_v14   ;;  %437 = vperm.xlu0 %5307, %v323_v15   ;;  %v368_v14 = vld [vmem:[%s9645_s1 + $0x1c8] sm:$0xff] }
  0x3e   : > { %462 = vperm.xlu2 %5309, %v328_v16  }
  0x3f   : > { %457 = vperm.xlu1 %5308, %v327_v17   ;;  %452 = vperm.xlu0 %5307, %v326_v18   ;;  %v373_v18 = vld [vmem:[%s9645_s1 + $0x1f0] sm:$0xff] }
  0x46   : > { %477 = vperm.xlu2 %5309, %v331_v19   ;;  %v372_v19 = vld [vmem:[%s9645_s1 + $0x1e8] sm:$0xff] }
  0x47   : > { %472 = vperm.xlu1 %5308, %v330_v20   ;;  %467 = vperm.xlu0 %5307, %v329_v21   ;;  %v371_v20 = vld [vmem:[%s9645_s1 + $0x1e0] sm:$0xff] }
  0x4e   : > { %492 = vperm.xlu2 %5309, %v334_v22  }
  0x4f   : > { %487 = vperm.xlu1 %5308, %v333_v23   ;;  %482 = vperm.xlu0 %5307, %v332_v24   ;;  %v696_v24 = vld [vmem:[%s9646_s2 + $0x8] sm:$0xff] }
  0x56   : > { %507 = vperm.xlu2 %5309, %v337_v25   ;;  %v695_v25 = vld [vmem:[%s9646_s2] sm:$0xff] }
  0x57   : > { %502 = vperm.xlu1 %5308, %v336_v26   ;;  %497 = vperm.xlu0 %5307, %v335_v27   ;;  %v374_v26 = vld [vmem:[%s9645_s1 + $0x1f8] sm:$0xff] }
  0x5e   : > { %522 = vperm.xlu2 %5309, %v340_v28  }
  0x5f   : > { %517 = vperm.xlu1 %5308, %v339_v29   ;;  %512 = vperm.xlu0 %5307, %v338_v30   ;;  %v699_v30 = vld [vmem:[%s9646_s2 + $0x20] sm:$0xff] }
  0x66   : > { %537 = vperm.xlu2 %5309, %v343_v31   ;;  %v698_v31 = vld [vmem:[%s9646_s2 + $0x18] sm:$0xff] }
  0x67   : > { %532 = vperm.xlu1 %5308, %v342_v32   ;;  %527 = vperm.xlu0 %5307, %v341_v33   ;;  %v697_v32 = vld [vmem:[%s9646_s2 + $0x10] sm:$0xff] }
  0x6e   : > { %552 = vperm.xlu2 %5309, %v346_v34  }
  0x6f   : > { %547 = vperm.xlu1 %5308, %v345_v35   ;;  %542 = vperm.xlu0 %5307, %v344_v36   ;;  %v702_v36 = vld [vmem:[%s9646_s2 + $0x38] sm:$0xff] }
  0x70   : > { %v5585_v37 = vpop.permute.xlu2 %397 }
  0x76   : > { %567 = vperm.xlu2 %5309, %v349_v38   ;;  %v701_v38 = vld [vmem:[%s9646_s2 + $0x30] sm:$0xff] }
  0x77   : > { %562 = vperm.xlu1 %5308, %v348_v39   ;;  %557 = vperm.xlu0 %5307, %v347_v40   ;;  %v700_v39 = vld [vmem:[%s9646_s2 + $0x28] sm:$0xff]  ;;  %v1079_v40 = vld [vmem:[%s242_s16] sm:$0xff]  ;;  %s5167_s16 = sshll.u32 %s5163_s11, 4  ;;  %s5168_s16 = int_to_ptr.hbm [resolvable:$true] %s5167_s16 }
  0x78   : > { %v5596_v41 = vpop.permute.xlu2 %402  ;;  %s5324_s17 = sshra.s32 %s5168_s16, 4  ;;  %s5325_s17 = int_to_ptr.hbm [resolvable:$true] %s5324_s17 }
  0x79   : > { %s5326_s24 = scalar_lea.hbm %s5325_s17, 8  ;;  %p5331_p1 = scmp.lt.s32.totalorder %s5325_s17, %s9649_s5 }
  0x7a   : > { %p5327_p12 = scmp.ne.s32.totalorder %s5325_s17, %s5326_s24  ;;  %p5332_p2 = scmp.lt.s32.totalorder %s5330_s8, %s5326_s24 }
  0x7c   : > { %p5328_p13 = pnand %p5327_p12, %p5462_p4  ;;  %p5333_p3 = por %p5332_p2, %p5331_p1 }
  0x7e   : > { %582 = vperm.xlu2 %5309, %v352_v42   ;;  %p5329_p0 = pneg %p5328_p13 }
  0x7f   : > { %577 = vperm.xlu1 %5308, %v351_v43   ;;  %572 = vperm.xlu0 %5307, %v350_v44  }
  0x80   : > { %v5607_v45 = vpop.permute.xlu2 %417  ;;  %p5334_p5 = pnand %p5333_p3, %p5329_p0 }
  0x86   : > { %597 = vperm.xlu2 %5309, %v355_v46   ;;  %v5764_v46 = vperm.slane %v1079_v40, 0 }
  0x87   : > { %592 = vperm.xlu1 %5308, %v354_v47   ;;  %587 = vperm.xlu0 %5307, %v353_v48   ;;  %v5766_v47 = vperm.slane %v1079_v40, 1  ;;  %v5768_v48 = vperm.slane %v1079_v40, 2 }
  0x88   : > { %v5618_v49 = vpop.permute.xlu2 %432 }
  0x89   : > { %v5620_v50 = vpop.permute.xlu1 %387  ;;  %v5622_v51 = vpop.permute.xlu0 %377  ;;  %9833 = vst [vmem:[#allocation17_spill] sm:$0xff] %v5768_v48 }
  0x8e   : > { %612 = vperm.xlu2 %5309, %v358_v52   ;;  %v5770_v52 = vperm.slane %v1079_v40, 3 }
  0x8f   : > { %607 = vperm.xlu1 %5308, %v357_v53   ;;  %602 = vperm.xlu0 %5307, %v356_v54   ;;  %v5772_v53 = vperm.slane %v1079_v40, 4  ;;  %v705_v54 = vld [vmem:[%s9646_s2 + $0x50] sm:$0xff] }
  0x90   : > { %v5633_v55 = vpop.permute.xlu2 %447  ;;  %9834 = vst [vmem:[#allocation18_spill] sm:$0xff] %v5770_v52 }
  0x91   : > { %v5635_v56 = vpop.permute.xlu1 %392  ;;  %v5637_v57 = vpop.permute.xlu0 %382  ;;  %9835 = vst [vmem:[#allocation19_spill] sm:$0xff] %v5772_v53 }
  0x96   : > { %627 = vperm.xlu2 %5309, %v361_v58   ;;  %v5777_v58 = vperm.slane %v1079_v40, 5 }
  0x97   : > { %622 = vperm.xlu1 %5308, %v360_v59   ;;  %617 = vperm.xlu0 %5307, %v359_v60   ;;  %v5779_v59 = vperm.slane %v1079_v40, 6  ;;  %v5781_v60 = vperm.slane %v1079_v40, 7  ;;  %v5865_v40 = vmul.f32 %v5766_v47, %v5622_v51 }
  0x98   : > { %v5648_v61 = vpop.permute.xlu2 %462  ;;  %9836 = vst [vmem:[#allocation20_spill] sm:$0xff] %v5777_v58 }
  0x99   : > { %v5650_v62 = vpop.permute.xlu1 %412  ;;  %v5652_v63 = vpop.permute.xlu0 %407  ;;  %9837 = vst [vmem:[#allocation21_spill] sm:$0xff] %v5779_v59 }
  0x9a   : > { %9838 = vst [vmem:[#allocation22_spill] sm:$0xff] %v5781_v60 }
  0x9b   : > { %9853 = vst [vmem:[#allocation37_spill] sm:$0xff] %v5865_v40  ;;  %v6023_v40 = vmul.f32 %v5772_v53, %v5607_v45 }
  0x9d   : > { %9883 = vst [vmem:[#allocation67_spill] sm:$0xff] %v6023_v40  ;;  %v6045_v40 = vmul.f32 %v5766_v47, %v5652_v63 }
  0x9e   : > { %642 = vperm.xlu2 %5309, %v364_v0   ;;  %v704_v0 = vld [vmem:[%s9646_s2 + $0x48] sm:$0xff] }
  0x9f   : > { %637 = vperm.xlu1 %5308, %v363_v1   ;;  %632 = vperm.xlu0 %5307, %v362_v2   ;;  %v703_v1 = vld [vmem:[%s9646_s2 + $0x40] sm:$0xff]  ;;  %v5791_v2 = vmul.f32 %v5764_v46, %v5585_v37  ;;  %9887 = vst [vmem:[#allocation71_spill] sm:$0xff] %v6045_v40  ;;  %v6069_v40 = vmul.f32 %v5779_v59, %v5652_v63 }
  0xa0   : > { %v5663_v3 = vpop.permute.xlu2 %477 }
  0xa1   : > { %v5665_v4 = vpop.permute.xlu1 %427  ;;  %v5667_v5 = vpop.permute.xlu0 %422  ;;  %9893 = vst [vmem:[#allocation77_spill] sm:$0xff] %v6069_v40 }
  0xa6   : > { %657 = vperm.xlu2 %5309, %v367_v6   ;;  %v5795_v6 = vmul.f32 %v5766_v47, %v5585_v37 }
  0xa7   : > { %652 = vperm.xlu1 %5308, %v366_v7   ;;  %647 = vperm.xlu0 %5307, %v365_v8   ;;  %v5799_v7 = vmul.f32 %v5768_v48, %v5585_v37  ;;  %v5803_v8 = vmul.f32 %v5770_v52, %v5585_v37 }
  0xa8   : > { %v5678_v9 = vpop.permute.xlu2 %492 }
  0xa9   : > { %9822 = vst [vmem:[#allocation6_spill] sm:$0xff] %v5678_v9  ;;  %v5680_v10 = vpop.permute.xlu1 %442  ;;  %v5682_v11 = vpop.permute.xlu0 %437 }
  0xae   : > { %672 = vperm.xlu2 %5309, %v370_v12   ;;  %v5807_v12 = vmul.f32 %v5772_v53, %v5585_v37 }
  0xaf   : > { %667 = vperm.xlu1 %5308, %v369_v13   ;;  %662 = vperm.xlu0 %5307, %v368_v14   ;;  %v5811_v13 = vmul.f32 %v5777_v58, %v5585_v37  ;;  %v5815_v14 = vmul.f32 %v5779_v59, %v5585_v37 }
  0xb0   : > { %v5693_v15 = vpop.permute.xlu2 %507 }
  0xb1   : > { %9823 = vst [vmem:[#allocation7_spill] sm:$0xff] %v5693_v15  ;;  %v5695_v16 = vpop.permute.xlu1 %457  ;;  %v5697_v17 = vpop.permute.xlu0 %452 }
  0xb2   : > { %9839 = vst [vmem:[#allocation23_spill] sm:$0xff] %v5815_v14  ;;  %v6061_v14 = vmul.f32 %v5772_v53, %v5652_v63 }
  0xb4   : > { %9891 = vst [vmem:[#allocation75_spill] sm:$0xff] %v6061_v14  ;;  %v6081_v14 = vmul.f32 %v5766_v47, %v5650_v62 }
  0xb6   : > { %687 = vperm.xlu2 %5309, %v373_v18   ;;  %v5819_v18 = vmul.f32 %v5781_v60, %v5585_v37 }
  0xb7   : > { %682 = vperm.xlu1 %5308, %v372_v19   ;;  %677 = vperm.xlu0 %5307, %v371_v20   ;;  %v5825_v20 = vmul.f32 %v5764_v46, %v5596_v41 }
  0xb8   : > { %v5708_v21 = vpop.permute.xlu2 %522  ;;  %9840 = vst [vmem:[#allocation24_spill] sm:$0xff] %v5819_v18  ;;  %v6057_v18 = vmul.f32 %v5770_v52, %v5652_v63 }
  0xb9   : > { %9824 = vst [vmem:[#allocation8_spill] sm:$0xff] %v5708_v21  ;;  %v5710_v22 = vpop.permute.xlu1 %472  ;;  %v5712_v23 = vpop.permute.xlu0 %467 }
  0xba   : > { %9842 = vst [vmem:[#allocation26_spill] sm:$0xff] %v5825_v20  ;;  %v5914_v20 = vmul.f32 %v5770_v52, %v5620_v50 }
  0xbb   : > { %9890 = vst [vmem:[#allocation74_spill] sm:$0xff] %v6057_v18  ;;  %v6103_v18 = vmul.f32 %v5764_v46, %v5678_v9 }
  0xbc   : > { %9863 = vst [vmem:[#allocation47_spill] sm:$0xff] %v5914_v20  ;;  %v5934_v20 = vmul.f32 %v5764_v46, %v5635_v56 }
  0xbd   : > { %9899 = vst [vmem:[#allocation83_spill] sm:$0xff] %v6103_v18  ;;  %v6135_v18 = vmul.f32 %v5781_v60, %v5650_v62 }
  0xbe   : > { %766 = vperm.xlu2 %5309, %v696_v24   ;;  %v5829_v24 = vmul.f32 %v5766_v47, %v5596_v41  ;;  %9868 = vst [vmem:[#allocation52_spill] sm:$0xff] %v5934_v20  ;;  %v6000_v20 = vmul.f32 %v5781_v60, %v5637_v57 }
  0xbf   : > { %761 = vperm.xlu1 %5308, %v695_v25   ;;  %692 = vperm.xlu0 %5307, %v374_v26   ;;  %v5833_v25 = vmul.f32 %v5768_v48, %v5596_v41  ;;  %v5837_v26 = vmul.f32 %v5770_v52, %v5596_v41  ;;  %9908 = vst [vmem:[#allocation92_spill] sm:$0xff] %v6135_v18 }
  0xc0   : > { %v5723_v27 = vpop.permute.xlu2 %537  ;;  %9843 = vst [vmem:[#allocation27_spill] sm:$0xff] %v5829_v24  ;;  %v5906_v24 = vmul.f32 %v5766_v47, %v5620_v50  ;;  %v6180_v18 = vmul.f32 %v5764_v46, %v5667_v5 }
  0xc1   : > { %9825 = vst [vmem:[#allocation9_spill] sm:$0xff] %v5723_v27  ;;  %v5726_v28 = vpop.permute.xlu1 %487  ;;  %v5728_v29 = vpop.permute.xlu0 %482 }
  0xc2   : > { %9826 = vst [vmem:[#allocation10_spill] sm:$0xff] %v5726_v28 }
  0xc3   : > { %9844 = vst [vmem:[#allocation28_spill] sm:$0xff] %v5833_v25  ;;  %v5902_v25 = vmul.f32 %v5764_v46, %v5620_v50 }
  0xc4   : > { %9845 = vst [vmem:[#allocation29_spill] sm:$0xff] %v5837_v26  ;;  %v706_v26 = vld [vmem:[%s9646_s2 + $0x58] sm:$0xff] }
  0xc5   : > { %9860 = vst [vmem:[#allocation44_spill] sm:$0xff] %v5902_v25  ;;  %v5926_v25 = vmul.f32 %v5779_v59, %v5620_v50 }
  0xc6   : > { %781 = vperm.xlu2 %5309, %v699_v30   ;;  %9861 = vst [vmem:[#allocation45_spill] sm:$0xff] %v5906_v24  ;;  %v5930_v24 = vmul.f32 %v5781_v60, %v5620_v50 }
  0xc7   : > { %776 = vperm.xlu1 %5308, %v698_v31   ;;  %771 = vperm.xlu0 %5307, %v697_v32   ;;  %v5845_v31 = vmul.f32 %v5772_v53, %v5596_v41  ;;  %v5849_v32 = vmul.f32 %v5777_v58, %v5596_v41  ;;  %9866 = vst [vmem:[#allocation50_spill] sm:$0xff] %v5926_v25 }
  0xc8   : > { %v5740_v33 = vpop.permute.xlu2 %552  ;;  %9867 = vst [vmem:[#allocation51_spill] sm:$0xff] %v5930_v24  ;;  %v5946_v25 = vmul.f32 %v5770_v52, %v5635_v56  ;;  %v5958_v24 = vmul.f32 %v5779_v59, %v5635_v56 }
  0xc9   : > { %9827 = vst [vmem:[#allocation11_spill] sm:$0xff] %v5740_v33  ;;  %v5742_v34 = vpop.permute.xlu1 %502  ;;  %v5744_v35 = vpop.permute.xlu0 %497 }
  0xca   : > { %9828 = vst [vmem:[#allocation12_spill] sm:$0xff] %v5742_v34 }
  0xcb   : > { %9829 = vst [vmem:[#allocation13_spill] sm:$0xff] %v5744_v35 }
  0xcc   : > { %9848 = vst [vmem:[#allocation32_spill] sm:$0xff] %v5845_v31  ;;  %v707_v31 = vld [vmem:[%s9646_s2 + $0x60] sm:$0xff] }
  0xcd   : > { %9849 = vst [vmem:[#allocation33_spill] sm:$0xff] %v5849_v32  ;;  %v5892_v32 = vmul.f32 %v5781_v60, %v5622_v51 }
  0xce   : > { %796 = vperm.xlu2 %5309, %v702_v36   ;;  %v5853_v36 = vmul.f32 %v5779_v59, %v5596_v41  ;;  %9871 = vst [vmem:[#allocation55_spill] sm:$0xff] %v5946_v25  ;;  %v5992_v25 = vmul.f32 %v5777_v58, %v5637_v57 }
  0xcf   : > { %791 = vperm.xlu1 %5308, %v701_v38   ;;  %786 = vperm.xlu0 %5307, %v700_v39   ;;  %v5857_v38 = vmul.f32 %v5781_v60, %v5596_v41  ;;  %v5861_v39 = vmul.f32 %v5764_v46, %v5622_v51  ;;  %v708_v41 = vld [vmem:[%s9646_s2 + $0x68] sm:$0xff]  ;;  %9859 = vst [vmem:[#allocation43_spill] sm:$0xff] %v5892_v32 }
  0xd0   : > { %v5758_v42 = vpop.permute.xlu2 %567  ;;  %9850 = vst [vmem:[#allocation34_spill] sm:$0xff] %v5853_v36  ;;  %v5888_v36 = vmul.f32 %v5779_v59, %v5622_v51  ;;  %v5918_v32 = vmul.f32 %v5772_v53, %v5620_v50 }
  0xd1   : > { %9830 = vst [vmem:[#allocation14_spill] sm:$0xff] %v5758_v42  ;;  %v5760_v43 = vpop.permute.xlu1 %517  ;;  %v5762_v44 = vpop.permute.xlu0 %512 }
  0xd2   : > { %9831 = vst [vmem:[#allocation15_spill] sm:$0xff] %v5760_v43 }
  0xd3   : > { %9832 = vst [vmem:[#allocation16_spill] sm:$0xff] %v5762_v44 }
  0xd4   : > { %9851 = vst [vmem:[#allocation35_spill] sm:$0xff] %v5857_v38  ;;  %v5884_v38 = vmul.f32 %v5777_v58, %v5622_v51 }
  0xd5   : > { %9852 = vst [vmem:[#allocation36_spill] sm:$0xff] %v5861_v39  ;;  %v6041_v39 = vmul.f32 %v5764_v46, %v5652_v63 }
  0xd6   : > { %811 = vperm.xlu2 %5309, %v705_v54   ;;  %v5869_v54 = vmul.f32 %v5768_v48, %v5622_v51  ;;  %9857 = vst [vmem:[#allocation41_spill] sm:$0xff] %v5884_v38  ;;  %v6004_v38 = vmul.f32 %v5764_v46, %v5607_v45 }
  0xd7   : > { %806 = vperm.xlu1 %5308, %v704_v0   ;;  %801 = vperm.xlu0 %5307, %v703_v1   ;;  %v5873_v0 = vmul.f32 %v5770_v52, %v5622_v51  ;;  %v5880_v1 = vmul.f32 %v5772_v53, %v5622_v51  ;;  %9858 = vst [vmem:[#allocation42_spill] sm:$0xff] %v5888_v36 }
  0xd8   : > { %v5821_v19 = vpop.permute.xlu2 %582  ;;  %9854 = vst [vmem:[#allocation38_spill] sm:$0xff] %v5869_v54  ;;  %v5910_v51 = vmul.f32 %v5768_v48, %v5620_v50  ;;  %v5922_v36 = vmul.f32 %v5777_v58, %v5620_v50  ;;  %v5950_v50 = vmul.f32 %v5772_v53, %v5635_v56  ;;  %v711_v54 = vld [vmem:[%s9646_s2 + $0x80] sm:$0xff] }
  0xd9   : > { %9841 = vst [vmem:[#allocation25_spill] sm:$0xff] %v5821_v19  ;;  %v5839_v37 = vpop.permute.xlu1 %532  ;;  %v5841_v30 = vpop.permute.xlu0 %527 }
  0xda   : > { %9846 = vst [vmem:[#allocation30_spill] sm:$0xff] %v5839_v37 }
  0xdb   : > { %9847 = vst [vmem:[#allocation31_spill] sm:$0xff] %v5841_v30 }
  0xdc   : > { %9855 = vst [vmem:[#allocation39_spill] sm:$0xff] %v5873_v0  ;;  %v6012_v0 = vmul.f32 %v5768_v48, %v5607_v45 }
  0xdd   : > { %9856 = vst [vmem:[#allocation40_spill] sm:$0xff] %v5880_v1  ;;  %v6008_v1 = vmul.f32 %v5766_v47, %v5607_v45 }
  0xde   : > { %9862 = vst [vmem:[#allocation46_spill] sm:$0xff] %v5910_v51  ;;  %826 = vperm.xlu2 %5309, %v708_v41   ;;  %v5954_v41 = vmul.f32 %v5777_v58, %v5635_v56 }
  0xdf   : > { %9864 = vst [vmem:[#allocation48_spill] sm:$0xff] %v5918_v32  ;;  %v5938_v32 = vmul.f32 %v5766_v47, %v5635_v56  ;;  %821 = vperm.xlu1 %5308, %v707_v31   ;;  %816 = vperm.xlu0 %5307, %v706_v26   ;;  %v5968_v26 = vmul.f32 %v5764_v46, %v5637_v57 }
  0xe0   : > { %9865 = vst [vmem:[#allocation49_spill] sm:$0xff] %v5922_v36  ;;  %v5942_v36 = vmul.f32 %v5768_v48, %v5635_v56  ;;  %v5960_v51 = vpop.permute.xlu2 %597  ;;  %v5972_v31 = vmul.f32 %v5766_v47, %v5637_v57 }
  0xe1   : > { %9869 = vst [vmem:[#allocation53_spill] sm:$0xff] %v5938_v32  ;;  %v5996_v32 = vmul.f32 %v5779_v59, %v5637_v57 }
  0xe2   : > { %9870 = vst [vmem:[#allocation54_spill] sm:$0xff] %v5942_v36  ;;  %v5964_v36 = vmul.f32 %v5781_v60, %v5635_v56  ;;  %v5984_v56 = vmul.f32 %v5770_v52, %v5637_v57 }
  0xe3   : > { %9872 = vst [vmem:[#allocation56_spill] sm:$0xff] %v5950_v50  ;;  %v5978_v50 = vpop.permute.xlu1 %547 }
  0xe4   : > { %9873 = vst [vmem:[#allocation57_spill] sm:$0xff] %v5954_v41  ;;  %v5976_v41 = vmul.f32 %v5768_v48, %v5637_v57 }
  0xe5   : > { %9874 = vst [vmem:[#allocation58_spill] sm:$0xff] %v5958_v24  ;;  %v5980_v24 = vpop.permute.xlu0 %542 }
  0xe6   : > { %9875 = vst [vmem:[#allocation59_spill] sm:$0xff] %v5960_v51  ;;  %841 = vperm.xlu2 %5309, %v711_v54   ;;  %v6089_v54 = vmul.f32 %v5764_v46, %v5663_v3 }
  0xe7   : > { %9876 = vst [vmem:[#allocation60_spill] sm:$0xff] %v5964_v36  ;;  %v5988_v36 = vmul.f32 %v5772_v53, %v5637_v57  ;;  %v6019_v57 = vmul.f32 %v5770_v52, %v5607_v45 }
  0xe8   : > { %9877 = vst [vmem:[#allocation61_spill] sm:$0xff] %v5978_v50  ;;  %v6099_v40 = vpop.permute.xlu2 %612 }
  0xe9   : > { %9878 = vst [vmem:[#allocation62_spill] sm:$0xff] %v5980_v24 }
  0xea   : > { %9879 = vst [vmem:[#allocation63_spill] sm:$0xff] %v6004_v38  ;;  %v6027_v38 = vmul.f32 %v5777_v58, %v5607_v45 }
  0xeb   : > { %9880 = vst [vmem:[#allocation64_spill] sm:$0xff] %v6008_v1  ;;  %v6031_v1 = vmul.f32 %v5779_v59, %v5607_v45 }
  0xec   : > { %9881 = vst [vmem:[#allocation65_spill] sm:$0xff] %v6012_v0  ;;  %v710_v0 = vld [vmem:[%s9646_s2 + $0x78] sm:$0xff] }
  0xed   : > { %9882 = vst [vmem:[#allocation66_spill] sm:$0xff] %v6019_v57  ;;  %v709_v57 = vld [vmem:[%s9646_s2 + $0x70] sm:$0xff]  ;;  %836 = vperm.xlu1 %5308, %v710_v0   ;;  %v6107_v0 = vmul.f32 %v5766_v47, %v5678_v9  ;;  %v6127_v9 = vmul.f32 %v5766_v47, %v5693_v15 }
  0xee   : > { %9884 = vst [vmem:[#allocation68_spill] sm:$0xff] %v6027_v38  ;;  %v6049_v38 = vmul.f32 %v5768_v48, %v5652_v63  ;;  %831 = vperm.xlu0 %5307, %v709_v57   ;;  %v6111_v57 = vmul.f32 %v5772_v53, %v5650_v62 }
  0xef   : > { %9885 = vst [vmem:[#allocation69_spill] sm:$0xff] %v6031_v1  ;;  %v6053_v1 = vmul.f32 %v5781_v60, %v5607_v45  ;;  %v6073_v45 = vmul.f32 %v5781_v60, %v5652_v63 }
  0xf0   : > { %9886 = vst [vmem:[#allocation70_spill] sm:$0xff] %v6041_v39  ;;  %v6065_v39 = vmul.f32 %v5777_v58, %v5652_v63  ;;  %v6093_v63 = vmul.f32 %v5766_v47, %v5663_v3 }
  0xf1   : > { %9888 = vst [vmem:[#allocation72_spill] sm:$0xff] %v6049_v38  ;;  %v6119_v38 = vpop.permute.xlu0 %557 }
  0xf2   : > { %9889 = vst [vmem:[#allocation73_spill] sm:$0xff] %v6053_v1  ;;  %v6077_v1 = vmul.f32 %v5764_v46, %v5650_v62 }
  0xf3   : > { %9892 = vst [vmem:[#allocation76_spill] sm:$0xff] %v6065_v39  ;;  %v6085_v39 = vmul.f32 %v5768_v48, %v5650_v62 }
  0xf4   : > { %9894 = vst [vmem:[#allocation78_spill] sm:$0xff] %v6073_v45  ;;  %v6097_v45 = vmul.f32 %v5770_v52, %v5650_v62 }
  0xf5   : > { %9895 = vst [vmem:[#allocation79_spill] sm:$0xff] %v6089_v54  ;;  %v6117_v54 = vpop.permute.xlu1 %562 }
  0xf6   : > { %9896 = vst [vmem:[#allocation80_spill] sm:$0xff] %v6093_v63  ;;  %v6115_v63 = vmul.f32 %v5777_v58, %v5650_v62 }
  0xf7   : > { %9897 = vst [vmem:[#allocation81_spill] sm:$0xff] %v6097_v45  ;;  %v6123_v45 = vmul.f32 %v5764_v46, %v5693_v15  ;;  %v6147_v15 = vmul.f32 %v5768_v48, %v5618_v49 }
  0xf8   : > { %9898 = vst [vmem:[#allocation82_spill] sm:$0xff] %v6099_v40 }
  0xf9   : > { %9900 = vst [vmem:[#allocation84_spill] sm:$0xff] %v6107_v0  ;;  %v6131_v0 = vmul.f32 %v5779_v59, %v5650_v62  ;;  %v714_v62 = vld [vmem:[%s9646_s2 + $0x98] sm:$0xff] }
  0xfa   : > { %9901 = vst [vmem:[#allocation85_spill] sm:$0xff] %v6111_v57  ;;  %v6143_v57 = vmul.f32 %v5766_v47, %v5618_v49  ;;  %856 = vperm.xlu2 %5309, %v714_v62   ;;  %v6232_v62 = vmul.f32 %v5764_v46, %v5723_v27 }
  0xfb   : > { %9902 = vst [vmem:[#allocation86_spill] sm:$0xff] %v6115_v63  ;;  %v6139_v63 = vmul.f32 %v5764_v46, %v5618_v49 }
  0xfc   : > { %9903 = vst [vmem:[#allocation87_spill] sm:$0xff] %v6117_v54 }
  0xfd   : > { %9904 = vst [vmem:[#allocation88_spill] sm:$0xff] %v6119_v38 }
  0xfe   : > { %9905 = vst [vmem:[#allocation89_spill] sm:$0xff] %v6123_v45  ;;  %v6158_v45 = vmul.f32 %v5772_v53, %v5618_v49 }
  0xff   : > { %9906 = vst [vmem:[#allocation90_spill] sm:$0xff] %v6127_v9  ;;  %v6151_v9 = vmul.f32 %v5770_v52, %v5618_v49 }
 0x100   : > { %9907 = vst [vmem:[#allocation91_spill] sm:$0xff] %v6131_v0  ;;  %v6200_v0 = vmul.f32 %v5777_v58, %v5667_v5 }
 0x101   : > { %9909 = vst [vmem:[#allocation93_spill] sm:$0xff] %v6139_v63  ;;  %v6162_v63 = vmul.f32 %v5777_v58, %v5618_v49 }
 0x102   : > { %9910 = vst [vmem:[#allocation94_spill] sm:$0xff] %v6143_v57  ;;  %v6166_v57 = vmul.f32 %v5779_v59, %v5618_v49 }
 0x103   : > { %9911 = vst [vmem:[#allocation95_spill] sm:$0xff] %v6147_v15  ;;  %v6170_v15 = vmul.f32 %v5781_v60, %v5618_v49  ;;  %v6188_v49 = vmul.f32 %v5768_v48, %v5667_v5 }
 0x104   : > { %9912 = vst [vmem:[#allocation96_spill] sm:$0xff] %v6151_v9  ;;  %v713_v9 = vld [vmem:[%s9646_s2 + $0x90] sm:$0xff] }
 0x105   : > { %9913 = vst [vmem:[#allocation97_spill] sm:$0xff] %v6158_v45  ;;  %v712_v45 = vld [vmem:[%s9646_s2 + $0x88] sm:$0xff]  ;;  %851 = vperm.xlu1 %5308, %v713_v9   ;;  %v6246_v9 = vmul.f32 %v5766_v47, %v5726_v28 }
 0x106   : > { %9914 = vst [vmem:[#allocation98_spill] sm:$0xff] %v6162_v63  ;;  %v6184_v63 = vmul.f32 %v5766_v47, %v5667_v5  ;;  %846 = vperm.xlu0 %5307, %v712_v45   ;;  %v6250_v45 = vmul.f32 %v5764_v46, %v5728_v29 }
 0x107   : > { %9915 = vst [vmem:[#allocation99_spill] sm:$0xff] %v6166_v57  ;;  %v6196_v57 = vmul.f32 %v5772_v53, %v5667_v5 }
 0x108   : > { %9916 = vst [vmem:[#allocation100_spill] sm:$0xff] %v6170_v15  ;;  %v6192_v15 = vmul.f32 %v5770_v52, %v5667_v5 }
 0x109   : > { %9917 = vst [vmem:[#allocation101_spill] sm:$0xff] %v6180_v18  ;;  %v6204_v18 = vmul.f32 %v5779_v59, %v5667_v5 }
 0x10a   : > { %9918 = vst [vmem:[#allocation102_spill] sm:$0xff] %v6184_v63  ;;  %v6208_v63 = vmul.f32 %v5781_v60, %v5667_v5  ;;  %v6228_v5 = vmul.f32 %v5766_v47, %v5710_v22 }
 0x10b   : > { %9919 = vst [vmem:[#allocation103_spill] sm:$0xff] %v6188_v49  ;;  %v6270_v49 = vmul.f32 %v5770_v52, %v5665_v4 }
 0x10c   : > { %9920 = vst [vmem:[#allocation104_spill] sm:$0xff] %v6192_v15  ;;  %v6212_v15 = vmul.f32 %v5764_v46, %v5710_v22 }
 0x10d   : > { %9921 = vst [vmem:[#allocation105_spill] sm:$0xff] %v6196_v57  ;;  %v6216_v57 = vmul.f32 %v5764_v46, %v5708_v21 }
 0x10e   : > { %9922 = vst [vmem:[#allocation106_spill] sm:$0xff] %v6200_v0  ;;  %v6220_v0 = vmul.f32 %v5766_v47, %v5708_v21  ;;  %v6238_v21 = vpop.permute.xlu2 %627 }
 0x10f   : > { %9923 = vst [vmem:[#allocation107_spill] sm:$0xff] %v6204_v18  ;;  %v6224_v18 = vmul.f32 %v5764_v46, %v5665_v4 }
 0x110   : > { %9924 = vst [vmem:[#allocation108_spill] sm:$0xff] %v6208_v63  ;;  %v6266_v63 = vmul.f32 %v5768_v48, %v5665_v4 }
 0x111   : > { %9925 = vst [vmem:[#allocation109_spill] sm:$0xff] %v6216_v57  ;;  %v6236_v57 = vmul.f32 %v5766_v47, %v5723_v27  ;;  %v6256_v27 = vpop.permute.xlu1 %577 }
 0x112   : > { %9926 = vst [vmem:[#allocation110_spill] sm:$0xff] %v6220_v0  ;;  %v6242_v0 = vmul.f32 %v5764_v46, %v5726_v28 }
 0x113   : > { %9927 = vst [vmem:[#allocation111_spill] sm:$0xff] %v6224_v18  ;;  %v6262_v18 = vmul.f32 %v5766_v47, %v5665_v4 }
 0x114   : > { %9928 = vst [vmem:[#allocation112_spill] sm:$0xff] %v6232_v62  ;;  %v6254_v62 = vmul.f32 %v5766_v47, %v5728_v29 }
 0x115   : > { %9929 = vst [vmem:[#allocation113_spill] sm:$0xff] %v6236_v57  ;;  %v6258_v57 = vpop.permute.xlu0 %572 }
 0x116   : > { %9930 = vst [vmem:[#allocation114_spill] sm:$0xff] %v6238_v21 }
 0x117   : > { %9931 = vst [vmem:[#allocation115_spill] sm:$0xff] %v6246_v9  ;;  %v6282_v9 = vmul.f32 %v5766_v47, %v5740_v33 }
 0x118   : > { %9932 = vst [vmem:[#allocation116_spill] sm:$0xff] %v6250_v45  ;;  %v6274_v45 = vmul.f32 %v5772_v53, %v5665_v4 }
 0x119   : > { %9933 = vst [vmem:[#allocation117_spill] sm:$0xff] %v6254_v62  ;;  %v6278_v62 = vmul.f32 %v5764_v46, %v5740_v33  ;;  %v6301_v33 = vmul.f32 %v5766_v47, %v5742_v34 }
 0x11a   : > { %9934 = vst [vmem:[#allocation118_spill] sm:$0xff] %v6256_v27 }
 0x11b   : > { %9935 = vst [vmem:[#allocation119_spill] sm:$0xff] %v6258_v57 }
 0x11c   : > { %9936 = vst [vmem:[#allocation120_spill] sm:$0xff] %v6262_v18  ;;  %v6286_v18 = vmul.f32 %v5777_v58, %v5665_v4 }
 0x11d   : > { %9937 = vst [vmem:[#allocation121_spill] sm:$0xff] %v6266_v63  ;;  %v6290_v63 = vmul.f32 %v5779_v59, %v5665_v4 }
 0x11e   : > { %9938 = vst [vmem:[#allocation122_spill] sm:$0xff] %v6270_v49  ;;  %v6297_v49 = vmul.f32 %v5764_v46, %v5742_v34  ;;  %v6319_v34 = vmul.f32 %v5766_v47, %v5744_v35 }
 0x11f   : > { %9939 = vst [vmem:[#allocation123_spill] sm:$0xff] %v6274_v45  ;;  %v717_v45 = vld [vmem:[%s9646_s2 + $0xb0] sm:$0xff] }
 0x120   : > { %9940 = vst [vmem:[#allocation124_spill] sm:$0xff] %v6278_v62  ;;  %v6309_v62 = vmul.f32 %v5781_v60, %v5665_v4  ;;  %v6327_v4 = vmul.f32 %v5766_v47, %v5633_v55  ;;  %871 = vperm.xlu2 %5309, %v717_v45   ;;  %v6363_v45 = vmul.f32 %v5764_v46, %v5760_v43 }
 0x121   : > { %9941 = vst [vmem:[#allocation125_spill] sm:$0xff] %v6282_v9  ;;  %v6305_v9 = vmul.f32 %v5764_v46, %v5744_v35  ;;  %v6339_v35 = vmul.f32 %v5772_v53, %v5633_v55 }
 0x122   : > { %9942 = vst [vmem:[#allocation126_spill] sm:$0xff] %v6286_v18  ;;  %v715_v18 = vld [vmem:[%s9646_s2 + $0xa0] sm:$0xff] }
 0x123   : > { %9943 = vst [vmem:[#allocation127_spill] sm:$0xff] %v6290_v63  ;;  %v716_v63 = vld [vmem:[%s9646_s2 + $0xa8] sm:$0xff]  ;;  %861 = vperm.xlu0 %5307, %v715_v18   ;;  %v6381_v18 = vmul.f32 %v5764_v46, %v5682_v11 }
 0x124   : > { %9944 = vst [vmem:[#allocation128_spill] sm:$0xff] %v6297_v49  ;;  %v6335_v49 = vmul.f32 %v5770_v52, %v5633_v55  ;;  %866 = vperm.xlu1 %5308, %v716_v63  }
 0x125   : > { %9945 = vst [vmem:[#allocation129_spill] sm:$0xff] %v6301_v33  ;;  %v1081_v33 = vlaneseq }
 0x126   : > { %9946 = vst [vmem:[#allocation130_spill] sm:$0xff] %v6305_v9  ;;  %v6323_v9 = vmul.f32 %v5764_v46, %v5633_v55 }
 0x127   : > { %9947 = vst [vmem:[#allocation131_spill] sm:$0xff] %v6309_v62  ;;  %v6331_v62 = vmul.f32 %v5768_v48, %v5633_v55  ;;  %v1082_v63 = vshrl.u32 %v1081_v33, 7 }
 0x128   : > { %9948 = vst [vmem:[#allocation132_spill] sm:$0xff] %v6319_v34  ;;  %v6343_v34 = vmul.f32 %v5777_v58, %v5633_v55 }
 0x129   : > { %9949 = vst [vmem:[#allocation133_spill] sm:$0xff] %v6323_v9  ;;  %v6373_v9 = vpop.permute.xlu2 %642 }
 0x12a   : > { %9950 = vst [vmem:[#allocation134_spill] sm:$0xff] %v6327_v4  ;;  %v6347_v4 = vmul.f32 %v5764_v46, %v5758_v42 }
 0x12b   : > { %9951 = vst [vmem:[#allocation135_spill] sm:$0xff] %v6331_v62  ;;  %v6351_v62 = vmul.f32 %v5766_v47, %v5758_v42  ;;  %v6371_v42 = vmul.f32 %v5764_v46, %v5762_v44 }
 0x12c   : > { %9952 = vst [vmem:[#allocation136_spill] sm:$0xff] %v6335_v49  ;;  %v6355_v49 = vmul.f32 %v5779_v59, %v5633_v55 }
 0x12d   : > { %9953 = vst [vmem:[#allocation137_spill] sm:$0xff] %v6339_v35  ;;  %v6359_v35 = vmul.f32 %v5781_v60, %v5633_v55  ;;  %v6377_v55 = vmul.f32 %v5766_v47, %v5762_v44  ;;  %v6397_v44 = vmul.f32 %v5770_v52, %v5682_v11 }
 0x12e   : > { %9954 = vst [vmem:[#allocation138_spill] sm:$0xff] %v6343_v34  ;;  %v6367_v34 = vmul.f32 %v5766_v47, %v5760_v43  ;;  %v6387_v43 = vpop.permute.xlu1 %592 }
 0x12f   : > { %9955 = vst [vmem:[#allocation139_spill] sm:$0xff] %v6347_v4  ;;  %v6401_v4 = vmul.f32 %v5772_v53, %v5682_v11 }
 0x130   : > { %9956 = vst [vmem:[#allocation140_spill] sm:$0xff] %v6351_v62  ;;  %v6393_v62 = vmul.f32 %v5768_v48, %v5682_v11 }
 0x131   : > { %9957 = vst [vmem:[#allocation141_spill] sm:$0xff] %v6355_v49  ;;  %v6389_v49 = vpop.permute.xlu0 %587 }
 0x132   : > { %9958 = vst [vmem:[#allocation142_spill] sm:$0xff] %v6359_v35  ;;  %v6385_v35 = vmul.f32 %v5766_v47, %v5682_v11 }
 0x133   : > { %9959 = vst [vmem:[#allocation143_spill] sm:$0xff] %v6371_v42  ;;  %v6432_v42 = vmul.f32 %v5764_v46, %v5841_v30 }
 0x134   : > { %9960 = vst [vmem:[#allocation144_spill] sm:$0xff] %v6373_v9 }
 0x135   : > { %9961 = vst [vmem:[#allocation145_spill] sm:$0xff] %v6377_v55  ;;  %v6413_v55 = vmul.f32 %v5779_v59, %v5682_v11 }
 0x136   : > { %9962 = vst [vmem:[#allocation146_spill] sm:$0xff] %v6381_v18  ;;  %v6405_v18 = vmul.f32 %v5777_v58, %v5682_v11 }
 0x137   : > { %9963 = vst [vmem:[#allocation147_spill] sm:$0xff] %v6385_v35  ;;  %v6409_v35 = vmul.f32 %v5764_v46, %v5839_v37 }
 0x138   : > { %9964 = vst [vmem:[#allocation148_spill] sm:$0xff] %v6387_v43 }
 0x139   : > { %9965 = vst [vmem:[#allocation149_spill] sm:$0xff] %v6389_v49 }
 0x13a   : > { %9966 = vst [vmem:[#allocation150_spill] sm:$0xff] %v6393_v62  ;;  %v6417_v62 = vmul.f32 %v5781_v60, %v5682_v11  ;;  %v6436_v11 = vmul.f32 %v5766_v47, %v5841_v30  ;;  %v6454_v30 = vmul.f32 %v5770_v52, %v5680_v10 }
 0x13b   : > { %9967 = vst [vmem:[#allocation151_spill] sm:$0xff] %v6397_v44  ;;  %v6421_v44 = vmul.f32 %v5764_v46, %v5680_v10 }
 0x13c   : > { %9968 = vst [vmem:[#allocation152_spill] sm:$0xff] %v6401_v4  ;;  %v6428_v4 = vmul.f32 %v5766_v47, %v5839_v37  ;;  %v718_v37 = vld [vmem:[%s9646_s2 + $0xb8] sm:$0xff] }
 0x13d   : > { %9969 = vst [vmem:[#allocation153_spill] sm:$0xff] %v6405_v18  ;;  %v720_v18 = vld [vmem:[%s9646_s2 + $0xc8] sm:$0xff]  ;;  %876 = vperm.xlu0 %5307, %v718_v37   ;;  %v6524_v37 = vmul.f32 %v5764_v46, %v5821_v19 }
 0x13e   : > { %9970 = vst [vmem:[#allocation154_spill] sm:$0xff] %v6413_v55  ;;  %v1083_v55 = vmul.u32 128, %v1082_v63  ;;  %v6466_v63 = vmul.f32 %v5764_v46, %v5980_v24  ;;  %886 = vperm.xlu2 %5309, %v720_v18   ;;  %v6494_v18 = vmul.f32 %v5766_v47, %v6099_v40 }
 0x13f   : > { %9971 = vst [vmem:[#allocation155_spill] sm:$0xff] %v6417_v62  ;;  %v6440_v62 = vmul.f32 %v5766_v47, %v5680_v10 }
 0x140   : > { %9972 = vst [vmem:[#allocation156_spill] sm:$0xff] %v6421_v44  ;;  %v719_v44 = vld [vmem:[%s9646_s2 + $0xc0] sm:$0xff] }
 0x141   : > { %9973 = vst [vmem:[#allocation157_spill] sm:$0xff] %v6428_v4  ;;  %v1087_v4 = vand.u32 127, %v1081_v33  ;;  %v6470_v33 = vmul.f32 %v5766_v47, %v5980_v24  ;;  %v6490_v24 = vmul.f32 %v5764_v46, %v6099_v40  ;;  %881 = vperm.xlu1 %5308, %v719_v44   ;;  %v6520_v44 = vmul.f32 %v5766_v47, %v6119_v38 }
 0x142   : > { %9974 = vst [vmem:[#allocation158_spill] sm:$0xff] %v6432_v42  ;;  %v6450_v42 = vmul.f32 %v5768_v48, %v5680_v10 }
 0x143   : > { %9975 = vst [vmem:[#allocation159_spill] sm:$0xff] %v6436_v11  ;;  %v6462_v11 = vmul.f32 %v5766_v47, %v5978_v50 }
 0x144   : > { %9976 = vst [vmem:[#allocation160_spill] sm:$0xff] %v6440_v62  ;;  %v6458_v62 = vmul.f32 %v5764_v46, %v5978_v50  ;;  %v6482_v50 = vmul.f32 %v5779_v59, %v5680_v10 }
 0x145   : > { %9977 = vst [vmem:[#allocation161_spill] sm:$0xff] %v6450_v42  ;;  %v6478_v42 = vmul.f32 %v5777_v58, %v5680_v10 }
 0x146   : > { %9978 = vst [vmem:[#allocation162_spill] sm:$0xff] %v6454_v30  ;;  %v6474_v30 = vmul.f32 %v5772_v53, %v5680_v10 }
 0x147   : > { %9979 = vst [vmem:[#allocation163_spill] sm:$0xff] %v6466_v63  ;;  %v6486_v63 = vmul.f32 %v5781_v60, %v5680_v10  ;;  %v6504_v10 = vmul.f32 %v5764_v46, %v6117_v54 }
 0x148   : > { %9980 = vst [vmem:[#allocation164_spill] sm:$0xff] %v6470_v33 }
 0x149   : > { %9981 = vst [vmem:[#allocation165_spill] sm:$0xff] %v6474_v30  ;;  %v6498_v30 = vmul.f32 %v5768_v48, %v6099_v40  ;;  %v6516_v40 = vpop.permute.xlu0 %602 }
 0x14a   : > { %9982 = vst [vmem:[#allocation166_spill] sm:$0xff] %v6478_v42  ;;  %v6500_v42 = vpop.permute.xlu2 %657 }
 0x14b   : > { %9983 = vst [vmem:[#allocation167_spill] sm:$0xff] %v6482_v50  ;;  %v6514_v50 = vpop.permute.xlu1 %607  ;;  %v6699_v33 = vmul.f32 %v5764_v46, %v6500_v42 }
 0x14c   : > { %9984 = vst [vmem:[#allocation168_spill] sm:$0xff] %v6486_v63  ;;  %v6508_v63 = vmul.f32 %v5766_v47, %v6117_v54  ;;  %v6540_v54 = vmul.f32 %v5766_v47, %v5697_v17 }
 0x14d   : > { %9985 = vst [vmem:[#allocation169_spill] sm:$0xff] %v6490_v24  ;;  %v1088_v24 = vadd.s32 %v1087_v4, %v1083_v55  ;;  %v6532_v4 = vmul.f32 %v5764_v46, %v5648_v61  ;;  %v6536_v55 = vmul.f32 %v5764_v46, %v5697_v17 }
 0x14e   : > { %9986 = vst [vmem:[#allocation170_spill] sm:$0xff] %v6494_v18  ;;  %v6512_v18 = vmul.f32 %v5764_v46, %v6119_v38  ;;  %v6544_v38 = vmul.f32 %v5768_v48, %v5697_v17 }
 0x14f   : > { %9987 = vst [vmem:[#allocation171_spill] sm:$0xff] %v6498_v30  ;;  %v6528_v30 = vmul.f32 %v5766_v47, %v5821_v19  ;;  %v6548_v19 = vmul.f32 %v5766_v47, %v5648_v61  ;;  %vm1089_vm0 = vcmp.lt.s32.totalorder %v1088_v24, 256  ;;  %v6650_v24 = vmul.f32 %v5768_v48, %v6373_v9 }
 0x150   : > { %9988 = vst [vmem:[#allocation172_spill] sm:$0xff] %v6500_v42 }
 0x151   : > { %9989 = vst [vmem:[#allocation173_spill] sm:$0xff] %v6508_v63  ;;  %v6733_v63 = vmul.f32 %v5768_v48, %v6514_v50 }
 0x152   : > { %9990 = vst [vmem:[#allocation174_spill] sm:$0xff] %v6512_v18  ;;  %v6695_v18 = vmul.f32 %v5770_v52, %v5695_v16 }
 0x153   : > { %9991 = vst [vmem:[#allocation175_spill] sm:$0xff] %v6514_v50 }
 0x154   : > { %9992 = vst [vmem:[#allocation176_spill] sm:$0xff] %v6516_v40 }
 0x155   : > { %9993 = vst [vmem:[#allocation177_spill] sm:$0xff] %v6520_v44  ;;  %v6593_v44 = vmul.f32 %v5772_v53, %v5648_v61 }
 0x156   : > { %9994 = vst [vmem:[#allocation178_spill] sm:$0xff] %v6524_v37  ;;  %v6559_v37 = vmul.f32 %v5772_v53, %v5697_v17 }
 0x157   : > { %9995 = vst [vmem:[#allocation179_spill] sm:$0xff] %v6528_v30  ;;  %v6555_v30 = vmul.f32 %v5770_v52, %v5697_v17 }
 0x158   : > { %9996 = vst [vmem:[#allocation180_spill] sm:$0xff] %v6532_v4  ;;  %v723_v4 = vld [vmem:[%s9646_s2 + $0xe0] sm:$0xff] }
 0x159   : > { %9997 = vst [vmem:[#allocation181_spill] sm:$0xff] %v6536_v55  ;;  %v6589_v55 = vmul.f32 %v5770_v52, %v5648_v61  ;;  %901 = vperm.xlu2 %5309, %v723_v4   ;;  %v6625_v4 = vmul.f32 %v5766_v47, %v6256_v27 }
 0x15a   : > { %9998 = vst [vmem:[#allocation182_spill] sm:$0xff] %v6540_v54  ;;  %v6563_v54 = vmul.f32 %v5777_v58, %v5697_v17 }
 0x15b   : > { %9999 = vst [vmem:[#allocation183_spill] sm:$0xff] %v6544_v38  ;;  %v6567_v38 = vmul.f32 %v5779_v59, %v5697_v17 }
 0x15c   : > { %10000 = vst [vmem:[#allocation184_spill] sm:$0xff] %v6548_v19  ;;  %v722_v19 = vld [vmem:[%s9646_s2 + $0xd8] sm:$0xff] }
 0x15d   : > { %10001 = vst [vmem:[#allocation185_spill] sm:$0xff] %v6555_v30  ;;  %v721_v30 = vld [vmem:[%s9646_s2 + $0xd0] sm:$0xff]  ;;  %896 = vperm.xlu1 %5308, %v722_v19   ;;  %v6636_v19 = vmul.f32 %v5766_v47, %v6373_v9 }
 0x15e   : > { %10002 = vst [vmem:[#allocation186_spill] sm:$0xff] %v6559_v37  ;;  %v6577_v37 = vmul.f32 %v5781_v60, %v5697_v17  ;;  %v6597_v17 = vmul.f32 %v5777_v58, %v5648_v61  ;;  %891 = vperm.xlu0 %5307, %v721_v30   ;;  %v6638_v30 = vpop.permute.xlu2 %672 }
 0x15f   : > { %10003 = vst [vmem:[#allocation187_spill] sm:$0xff] %v6563_v54  ;;  %v6581_v54 = vmul.f32 %v5764_v46, %v5695_v16 }
 0x160   : > { %10004 = vst [vmem:[#allocation188_spill] sm:$0xff] %v6567_v38  ;;  %v6585_v38 = vmul.f32 %v5768_v48, %v5648_v61 }
 0x161   : > { %10005 = vst [vmem:[#allocation189_spill] sm:$0xff] %v6577_v37  ;;  %v6601_v37 = vmul.f32 %v5764_v46, %v6238_v21 }
 0x162   : > { %10006 = vst [vmem:[#allocation190_spill] sm:$0xff] %v6581_v54  ;;  %v6605_v54 = vmul.f32 %v5766_v47, %v6238_v21 }
 0x163   : > { %10007 = vst [vmem:[#allocation191_spill] sm:$0xff] %v6585_v38  ;;  %v6621_v38 = vmul.f32 %v5764_v46, %v6256_v27  ;;  %v6654_v27 = vpop.permute.xlu0 %617 }
 0x164   : > { %10008 = vst [vmem:[#allocation192_spill] sm:$0xff] %v6589_v55  ;;  %v6609_v55 = vmul.f32 %v5779_v59, %v5648_v61 }
 0x165   : > { %10009 = vst [vmem:[#allocation193_spill] sm:$0xff] %v6593_v44  ;;  %v6613_v44 = vmul.f32 %v5781_v60, %v5648_v61  ;;  %v6632_v61 = vmul.f32 %v5764_v46, %v6373_v9 }
 0x166   : > { %10010 = vst [vmem:[#allocation194_spill] sm:$0xff] %v6597_v17  ;;  %v6617_v17 = vmul.f32 %v5768_v48, %v6238_v21  ;;  %v6642_v21 = vmul.f32 %v5764_v46, %v6258_v57 }
 0x167   : > { %10011 = vst [vmem:[#allocation195_spill] sm:$0xff] %v6601_v37 }
 0x168   : > { %10012 = vst [vmem:[#allocation196_spill] sm:$0xff] %v6605_v54  ;;  %v5391_v54 = vmov 0.0  }
 0x169   : > { %10013 = vst [vmem:[#allocation197_spill] sm:$0xff] %v6609_v55  ;;  %v6628_v55 = vsel %vm1089_vm0, 1.0, %v5391_v54  ;;  %v6652_v54 = vpop.permute.xlu1 %622 }
 0x16a   : > { %10014 = vst [vmem:[#allocation198_spill] sm:$0xff] %v6613_v44  ;;  %v6669_v44 = vperm.slane %v6628_v55, 0  ;;  %v6672_v9 = vperm.slane %v6628_v55, 1  ;;  %v6678_v37 = vperm.slane %v6628_v55, 3 }
 0x16b   : > { %10015 = vst [vmem:[#allocation199_spill] sm:$0xff] %v6617_v17  ;;  %v6646_v17 = vmul.f32 %v5766_v47, %v6258_v57  ;;  %v6666_v57 = vmul.f32 %v5766_v47, %v5695_v16 }
 0x16c   : > { %10016 = vst [vmem:[#allocation200_spill] sm:$0xff] %v6621_v38  ;;  %v6729_v38 = vmul.f32 %v5766_v47, %v6514_v50 }
 0x16d   : > { %10017 = vst [vmem:[#allocation201_spill] sm:$0xff] %v6625_v4  ;;  %v6713_v4 = vmul.f32 %v5772_v53, %v5695_v16 }
 0x16e   : > { %10018 = vst [vmem:[#allocation202_spill] sm:$0xff] %v6632_v61  ;;  %v6662_v61 = vmul.f32 %v5766_v47, %v6387_v43 }
 0x16f   : > { %10019 = vst [vmem:[#allocation203_spill] sm:$0xff] %v6636_v19  ;;  %v6658_v19 = vmul.f32 %v5764_v46, %v6387_v43  ;;  %v726_v43 = vld [vmem:[%s9646_s2 + $0xf8] sm:$0xff] }
 0x170   : > { %10020 = vst [vmem:[#allocation204_spill] sm:$0xff] %v6638_v30  ;;  %916 = vperm.xlu2 %5309, %v726_v43   ;;  %v6764_v43 = vmul.f32 %v5770_v52, %v5663_v3 }
 0x171   : > { %10021 = vst [vmem:[#allocation205_spill] sm:$0xff] %v6642_v21  ;;  %v6691_v21 = vmul.f32 %v5768_v48, %v5695_v16 }
 0x172   : > { %10022 = vst [vmem:[#allocation206_spill] sm:$0xff] %v6646_v17  ;;  %v6684_v17 = vperm.slane %v6628_v55, 4 }
 0x173   : > { %10023 = vst [vmem:[#allocation207_spill] sm:$0xff] %v6650_v24  ;;  %v6675_v24 = vperm.slane %v6628_v55, 2 }
 0x174   : > { %10024 = vst [vmem:[#allocation208_spill] sm:$0xff] %v6652_v54 }
 0x175   : > { %10025 = vst [vmem:[#allocation209_spill] sm:$0xff] %v6654_v27 }
 0x176   : > { %10026 = vst [vmem:[#allocation210_spill] sm:$0xff] %v6658_v19  ;;  %v725_v19 = vld [vmem:[%s9646_s2 + $0xf0] sm:$0xff] }
 0x177   : > { %10027 = vst [vmem:[#allocation211_spill] sm:$0xff] %v6662_v61  ;;  %v6703_v61 = vmul.f32 %v5766_v47, %v6500_v42  ;;  %911 = vperm.xlu1 %5308, %v725_v19   ;;  %v6774_v19 = vmul.f32 %v5777_v58, %v5663_v3 }
 0x178   : > { %10028 = vst [vmem:[#allocation212_spill] sm:$0xff] %v6666_v57  ;;  %v6687_v57 = vperm.slane %v6628_v55, 5 }
 0x179   : > { %10029 = vst [vmem:[#allocation213_spill] sm:$0xff] %v6691_v21  ;;  %v724_v21 = vld [vmem:[%s9646_s2 + $0xe8] sm:$0xff] }
 0x17a   : > { %10030 = vst [vmem:[#allocation214_spill] sm:$0xff] %v6695_v18  ;;  %v6717_v18 = vmul.f32 %v5777_v58, %v5695_v16  ;;  %906 = vperm.xlu0 %5307, %v724_v21   ;;  %v6770_v21 = vmul.f32 %v5772_v53, %v5663_v3 }
 0x17b   : > { %10031 = vst [vmem:[#allocation215_spill] sm:$0xff] %v6699_v33  ;;  %v6721_v33 = vmul.f32 %v5768_v48, %v6500_v42  ;;  %v6741_v42 = vmul.f32 %v5766_v47, %v6516_v40 }
 0x17c   : > { %10032 = vst [vmem:[#allocation216_spill] sm:$0xff] %v6703_v61  ;;  %v6725_v61 = vmul.f32 %v5764_v46, %v6514_v50  ;;  %v6752_v50 = vperm.slane %v6628_v55, 6 }
 0x17d   : > { %10033 = vst [vmem:[#allocation217_spill] sm:$0xff] %v6713_v4  ;;  %v6737_v4 = vmul.f32 %v5764_v46, %v6516_v40 }
 0x17e   : > { %10034 = vst [vmem:[#allocation218_spill] sm:$0xff] %v6717_v18  ;;  %v6749_v18 = vmul.f32 %v5779_v59, %v5695_v16 }
 0x17f   : > { %10035 = vst [vmem:[#allocation219_spill] sm:$0xff] %v6721_v33  ;;  %v6745_v33 = vmul.f32 %v5768_v48, %v6516_v40  ;;  %v6766_v40 = vpop.permute.xlu2 %687 }
 0x180   : > { %10036 = vst [vmem:[#allocation220_spill] sm:$0xff] %v6733_v63  ;;  %v6756_v63 = vmul.f32 %v5781_v60, %v5695_v16  ;;  %v6778_v16 = vmul.f32 %v5779_v59, %v5663_v3 }
 0x181   : > { %10037 = vst [vmem:[#allocation221_spill] sm:$0xff] %v6737_v4  ;;  %v6871_v4 = vmul.f32 %v5777_v58, %v5712_v23 }
 0x182   : > { %10038 = vst [vmem:[#allocation222_spill] sm:$0xff] %v6741_v42  ;;  %v6760_v42 = vmul.f32 %v5768_v48, %v5663_v3 }
 0x183   : > { %10039 = vst [vmem:[#allocation223_spill] sm:$0xff] %v6745_v33  ;;  %v6782_v33 = vmul.f32 %v5781_v60, %v5663_v3  ;;  %v6802_v3 = vpop.permute.xlu0 %632 }
 0x184   : > { %10040 = vst [vmem:[#allocation224_spill] sm:$0xff] %v6749_v18  ;;  %v6837_v18 = vmul.f32 %v5766_v47, %v5960_v51 }
 0x185   : > { %10041 = vst [vmem:[#allocation225_spill] sm:$0xff] %v6756_v63  ;;  %v729_v63 = vld [vmem:[%s9646_s2 + $0x110] sm:$0xff] }
 0x186   : > { %10042 = vst [vmem:[#allocation226_spill] sm:$0xff] %v6760_v42  ;;  %v6790_v42 = vmul.f32 %v5766_v47, %v6638_v30  ;;  %931 = vperm.xlu2 %5309, %v729_v63   ;;  %v6906_v63 = vperm.slane %v6628_v55, 7 }
 0x187   : > { %10043 = vst [vmem:[#allocation227_spill] sm:$0xff] %v6764_v43  ;;  %v6786_v43 = vmul.f32 %v5764_v46, %v6638_v30 }
 0x188   : > { %10044 = vst [vmem:[#allocation228_spill] sm:$0xff] %v6766_v40 }
 0x189   : > { %10045 = vst [vmem:[#allocation229_spill] sm:$0xff] %v6770_v21  ;;  %v6794_v21 = vmul.f32 %v5768_v48, %v6638_v30  ;;  %v6814_v30 = vmul.f32 %v5764_v46, %v6654_v27 }
 0x18a   : > { %10046 = vst [vmem:[#allocation230_spill] sm:$0xff] %v6774_v19  ;;  %v6798_v19 = vmul.f32 %v5764_v46, %v6652_v54 }
 0x18b   : > { %10047 = vst [vmem:[#allocation231_spill] sm:$0xff] %v6778_v16  ;;  %v6800_v16 = vpop.permute.xlu1 %637  ;;  %v6926_v55 = vpop.permute.xlu0 %647 }
 0x18c   : > { %10048 = vst [vmem:[#allocation232_spill] sm:$0xff] %v6782_v33  ;;  %v6806_v33 = vmul.f32 %v5766_v47, %v6652_v54 }
 0x18d   : > { %10049 = vst [vmem:[#allocation233_spill] sm:$0xff] %v6786_v43  ;;  %v6810_v43 = vmul.f32 %v5768_v48, %v6652_v54  ;;  %v6829_v54 = vmul.f32 %v5764_v46, %v6389_v49 }
 0x18e   : > { %10050 = vst [vmem:[#allocation234_spill] sm:$0xff] %v6790_v42  ;;  %v6822_v42 = vmul.f32 %v5768_v48, %v6654_v27 }
 0x18f   : > { %10051 = vst [vmem:[#allocation235_spill] sm:$0xff] %v6794_v21  ;;  %v6818_v21 = vmul.f32 %v5766_v47, %v6654_v27  ;;  %v728_v27 = vld [vmem:[%s9646_s2 + $0x108] sm:$0xff] }
 0x190   : > { %10052 = vst [vmem:[#allocation236_spill] sm:$0xff] %v6800_v16  ;;  %926 = vperm.xlu1 %5308, %v728_v27   ;;  %v6922_v27 = vmul.f32 %v5768_v48, %v5710_v22 }
 0x191   : > { %10053 = vst [vmem:[#allocation237_spill] sm:$0xff] %v6802_v3 }
 0x192   : > { %10054 = vst [vmem:[#allocation238_spill] sm:$0xff] %v6806_v33 }
 0x193   : > { %10055 = vst [vmem:[#allocation239_spill] sm:$0xff] %v6810_v43  ;;  %v6833_v43 = vmul.f32 %v5764_v46, %v5960_v51  ;;  %v6855_v51 = vmul.f32 %v5766_v47, %v5712_v23 }
 0x194   : > { %10056 = vst [vmem:[#allocation240_spill] sm:$0xff] %v6814_v30  ;;  %v6851_v30 = vmul.f32 %v5764_v46, %v5712_v23 }
 0x195   : > { %10057 = vst [vmem:[#allocation241_spill] sm:$0xff] %v6818_v21  ;;  %v6847_v21 = vmul.f32 %v5766_v47, %v6389_v49  ;;  %v6867_v49 = vmul.f32 %v5772_v53, %v5712_v23 }
 0x196   : > { %10058 = vst [vmem:[#allocation242_spill] sm:$0xff] %v6822_v42  ;;  %v727_v42 = vld [vmem:[%s9646_s2 + $0x100] sm:$0xff] }
 0x197   : > { %10059 = vst [vmem:[#allocation243_spill] sm:$0xff] %v6829_v54  ;;  %921 = vperm.xlu0 %5307, %v727_v42   ;;  %v6924_v42 = vpop.permute.xlu1 %652 }
 0x198   : > { %10060 = vst [vmem:[#allocation244_spill] sm:$0xff] %v6833_v43  ;;  %v6863_v43 = vmul.f32 %v5770_v52, %v5712_v23 }
 0x199   : > { %10061 = vst [vmem:[#allocation245_spill] sm:$0xff] %v6837_v18  ;;  %v6859_v18 = vmul.f32 %v5768_v48, %v5712_v23 }
 0x19a   : > { %10062 = vst [vmem:[#allocation246_spill] sm:$0xff] %v6847_v21 }
 0x19b   : > { %10063 = vst [vmem:[#allocation247_spill] sm:$0xff] %v6851_v30  ;;  %v6875_v30 = vmul.f32 %v5779_v59, %v5712_v23 }
 0x19c   : > { %10064 = vst [vmem:[#allocation248_spill] sm:$0xff] %v6855_v51  ;;  %v6879_v51 = vmul.f32 %v5764_v46, %v6766_v40 }
 0x19d   : > { %10065 = vst [vmem:[#allocation249_spill] sm:$0xff] %v6859_v18  ;;  %v6883_v18 = vmul.f32 %v5766_v47, %v6766_v40 }
 0x19e   : > { %10066 = vst [vmem:[#allocation250_spill] sm:$0xff] %v6863_v43  ;;  %v6887_v43 = vmul.f32 %v5768_v48, %v6766_v40  ;;  %v6914_v40 = vmul.f32 %v5766_v47, %v6802_v3 }
 0x19f   : > { %10067 = vst [vmem:[#allocation251_spill] sm:$0xff] %v6867_v49 }
 0x1a0   : > { %10068 = vst [vmem:[#allocation252_spill] sm:$0xff] %v6871_v4  ;;  %v6891_v4 = vmul.f32 %v5781_v60, %v5712_v23  ;;  %v6910_v23 = vmul.f32 %v5764_v46, %v6802_v3 }
 0x1a1   : > { %10069 = vst [vmem:[#allocation253_spill] sm:$0xff] %v6875_v30  ;;  %v6895_v30 = vmul.f32 %v5764_v46, %v6800_v16 }
 0x1a2   : > { %10070 = vst [vmem:[#allocation254_spill] sm:$0xff] %v6879_v51  ;;  %v6899_v51 = vmul.f32 %v5766_v47, %v6800_v16 }
 0x1a3   : > { %10071 = vst [vmem:[#allocation255_spill] sm:$0xff] %v6883_v18  ;;  %v6903_v18 = vmul.f32 %v5768_v48, %v6800_v16 }
 0x1a4   : > { %10072 = vst [vmem:[#allocation256_spill] sm:$0xff] %v6887_v43  ;;  %v6918_v43 = vmul.f32 %v5768_v48, %v6802_v3  ;;  %v6934_v3 = vmul.f32 %v5770_v52, %v5710_v22 }
 0x1a5   : > { %10073 = vst [vmem:[#allocation257_spill] sm:$0xff] %v6891_v4  ;;  %v767_v4 = vpop.permute.xlu2 %766 }
 0x1a6   : > { %10074 = vst [vmem:[#allocation258_spill] sm:$0xff] %v6895_v30  ;;  %v1158_v16 = vadd.f32 %v5968_v26, %v767_v4  ;;  %v2058_v49 = vadd.f32 %v5976_v41, %v767_v4  ;;  %v6946_v26 = vmul.f32 %v5779_v59, %v5710_v22  ;;  %v6950_v41 = vmul.f32 %v5764_v46, %v6924_v42 }
 0x1a7   : > { %10075 = vst [vmem:[#allocation259_spill] sm:$0xff] %v6899_v51  ;;  %v2958_v21 = vadd.f32 %v5988_v36, %v767_v4  ;;  %v6973_v30 = vmul.f32 %v5768_v48, %v6924_v42 }
 0x1a8   : > { %10076 = vst [vmem:[#allocation260_spill] sm:$0xff] %v6903_v18  ;;  %v1608_v18 = vadd.f32 %v5972_v31, %v767_v4  ;;  %v6954_v31 = vmul.f32 %v5766_v47, %v6924_v42 }
 0x1a9   : > { %10077 = vst [vmem:[#allocation261_spill] sm:$0xff] %v6910_v23  ;;  %v2122_v23 = vmax.f32 %v2058_v49, 0.0  ;;  %v6977_v49 = vmul.f32 %v5764_v46, %v6926_v55  ;;  %v3022_v36 = vmax.f32 %v2958_v21, 0.0  ;;  %v6991_v21 = vmul.f32 %v5781_v60, %v5710_v22 }
 0x1aa   : > { %10078 = vst [vmem:[#allocation262_spill] sm:$0xff] %v6914_v40  ;;  %v2508_v40 = vadd.f32 %v5984_v56, %v767_v4  ;;  %v732_v56 = vld [vmem:[%s9646_s2 + $0x128] sm:$0xff] }
 0x1ab   : > { %10079 = vst [vmem:[#allocation263_spill] sm:$0xff] %v6918_v43  ;;  %v6938_v43 = vmul.f32 %v5772_v53, %v5710_v22  ;;  %946 = vperm.xlu2 %5309, %v732_v56  }
 0x1ac   : > { %10080 = vst [vmem:[#allocation264_spill] sm:$0xff] %v6922_v27  ;;  %v6942_v27 = vmul.f32 %v5777_v58, %v5710_v22 }
 0x1ad   : > { %10081 = vst [vmem:[#allocation265_spill] sm:$0xff] %v6924_v42  ;;  %v782_v42 = vpop.permute.xlu2 %781 }
 0x1ae   : > { %10082 = vst [vmem:[#allocation266_spill] sm:$0xff] %v6926_v55 }
 0x1af   : > { %10083 = vst [vmem:[#allocation267_spill] sm:$0xff] %v6934_v3  ;;  %v1672_v3 = vmax.f32 %v1608_v18, 0.0  ;;  %v3858_v18 = vadd.f32 %v5996_v32, %v767_v4 }
 0x1b0   : > { %10084 = vst [vmem:[#allocation268_spill] sm:$0xff] %v6938_v43  ;;  %v1222_v43 = vmax.f32 %v1158_v16, 0.0  ;;  %v4308_v16 = vadd.f32 %v6000_v20, %v767_v4  ;;  %v6982_v20 = vmul.f32 %v5766_v47, %v6926_v55 }
 0x1b1   : > { %10085 = vst [vmem:[#allocation269_spill] sm:$0xff] %v6942_v27  ;;  %v731_v27 = vld [vmem:[%s9646_s2 + $0x120] sm:$0xff]  ;;  %v1801_v51 = vmul.f32 %v6672_v9, %v1672_v3  ;;  %v3922_v3 = vmax.f32 %v3858_v18, 0.0 }
 0x1b2   : > { %10086 = vst [vmem:[#allocation270_spill] sm:$0xff] %v6946_v26  ;;  %v730_v26 = vld [vmem:[%s9646_s2 + $0x118] sm:$0xff]  ;;  %v1351_v54 = vmul.f32 %v6669_v44, %v1222_v43  ;;  %941 = vperm.xlu1 %5308, %v731_v27   ;;  %v2251_v43 = vmul.f32 %v6675_v24, %v2122_v23  ;;  %v4372_v32 = vmax.f32 %v4308_v16, 0.0  ;;  %v3151_v27 = vmul.f32 %v6684_v17, %v3022_v36 }
 0x1b3   : > { %10087 = vst [vmem:[#allocation271_spill] sm:$0xff] %v6950_v41  ;;  %v2572_v41 = vmax.f32 %v2508_v40, 0.0  ;;  %936 = vperm.xlu0 %5307, %v730_v26   ;;  %v4051_v22 = vmul.f32 %v6752_v50, %v3922_v3  ;;  %v734_v3 = vld [vmem:[%s9646_s2 + $0x138] sm:$0xff] }
 0x1b4   : > { %10088 = vst [vmem:[#allocation272_spill] sm:$0xff] %v6954_v31  ;;  %v3408_v31 = vadd.f32 %v5992_v25, %v767_v4  ;;  %v1865_v25 = vadd.f32 %v1801_v51, %v1351_v54  ;;  %v6986_v4 = vmul.f32 %v5768_v48, %v6926_v55  ;;  %v6993_v51 = vpop.permute.xlu1 %667  ;;  %v6995_v54 = vpop.permute.xlu0 %662  ;;  %v4501_v16 = vmul.f32 %v6906_v63, %v4372_v32  ;;  %v733_v32 = vld [vmem:[%s9646_s2 + $0x130] sm:$0xff] }
 0x1b5   : > { %10089 = vst [vmem:[#allocation273_spill] sm:$0xff] %v6973_v30  ;;  %v2701_v56 = vmul.f32 %v6678_v37, %v2572_v41  ;;  %v7002_v18 = vmul.f32 %v5764_v46, %v6993_v51  ;;  %v7006_v41 = vmul.f32 %v5766_v47, %v6993_v51  ;;  %v7016_v36 = vmul.f32 %v5764_v46, %v6995_v54 }
 0x1b6   : > { %10090 = vst [vmem:[#allocation274_spill] sm:$0xff] %v6977_v49  ;;  %v3472_v40 = vmax.f32 %v3408_v31, 0.0  ;;  %v2315_v23 = vadd.f32 %v2251_v43, %v1865_v25  ;;  %v1161_v31 = vadd.f32 %v5791_v2, %v782_v42  ;;  %v7012_v25 = vmul.f32 %v5768_v48, %v6993_v51  ;;  %v735_v2 = vld [vmem:[%s9646_s2 + $0x140] sm:$0xff] }
 0x1b7   : > { %10091 = vst [vmem:[#allocation275_spill] sm:$0xff] %v6982_v20  ;;  %v2511_v30 = vadd.f32 %v5803_v8, %v782_v42  ;;  %v2961_v55 = vadd.f32 %v5807_v12, %v782_v42  ;;  %961 = vperm.xlu2 %5309, %v735_v2   ;;  %v10101_v8 = vld [vmem:[#allocation24_spill] sm:$0xff]  ;;  %v7037_v12 = vmul.f32 %v5766_v47, %v6995_v54 }
 0x1b8   : > { %10092 = vst [vmem:[#allocation276_spill] sm:$0xff] %v6986_v4  ;;  %v3601_v26 = vmul.f32 %v6687_v57, %v3472_v40  ;;  %v2765_v40 = vadd.f32 %v2701_v56, %v2315_v23  ;;  %v1225_v43 = vmax.f32 %v1161_v31, 0.0  ;;  %v3411_v23 = vadd.f32 %v5811_v13, %v782_v42  ;;  %v10100_v31 = vld [vmem:[#allocation23_spill] sm:$0xff] }
 0x1b9   : > { %10093 = vst [vmem:[#allocation277_spill] sm:$0xff] %v6991_v21  ;;  %v2575_v21 = vmax.f32 %v2511_v30, 0.0  ;;  %v4311_v33 = vadd.f32 %v10101_v8, %v782_v42  ;;  %v7041_v13 = vmul.f32 %v5768_v48, %v6995_v54 }
 0x1ba   : > { %10094 = vst [vmem:[#allocation278_spill] sm:$0xff] %v6993_v51  ;;  %v1611_v51 = vadd.f32 %v5795_v6, %v782_v42  ;;  %v3215_v4 = vadd.f32 %v3151_v27, %v2765_v40  ;;  %v1354_v56 = vmul.f32 %v6669_v44, %v1225_v43  ;;  %956 = vperm.xlu1 %5308, %v734_v3   ;;  %v7043_v27 = vpop.permute.xlu2 %796  ;;  %v737_v3 = vld [vmem:[%s9646_s2 + $0x150] sm:$0xff] }
 0x1bb   : > { %10095 = vst [vmem:[#allocation279_spill] sm:$0xff] %v6995_v54  ;;  %951 = vperm.xlu0 %5307, %v733_v32   ;;  %v736_v32 = vld [vmem:[%s9646_s2 + $0x148] sm:$0xff]  ;;  %v10126_v54 = vld [vmem:[#allocation38_spill] sm:$0xff] }
 0x1bc   : > { %10096 = vst [vmem:[#allocation280_spill] sm:$0xff] %v7002_v18  ;;  %v1675_v20 = vmax.f32 %v1611_v51, 0.0  ;;  %v3665_v6 = vadd.f32 %v3601_v26, %v3215_v4  ;;  %v7047_v51 = vpop.permute.xlu1 %682  ;;  %v7049_v4 = vpop.permute.xlu0 %677 }
 0x1bd   : > { %10097 = vst [vmem:[#allocation281_spill] sm:$0xff] %v7006_v41  ;;  %v3025_v41 = vmax.f32 %v2961_v55, 0.0  ;;  %v7055_v2 = vmul.f32 %v5764_v46, %v7047_v51  ;;  %v7059_v40 = vmul.f32 %v5766_v47, %v7047_v51 }
 0x1be   : > { %10098 = vst [vmem:[#allocation282_spill] sm:$0xff] %v7012_v25  ;;  %v2061_v25 = vadd.f32 %v5799_v7, %v782_v42  ;;  %v3475_v7 = vmax.f32 %v3411_v23, 0.0  ;;  %v1804_v30 = vmul.f32 %v6672_v9, %v1675_v20  ;;  %v4115_v26 = vadd.f32 %v4051_v22, %v3665_v6  ;;  %v738_v22 = vld [vmem:[%s9646_s2 + $0x158] sm:$0xff] }
 0x1bf   : > { %10099 = vst [vmem:[#allocation283_spill] sm:$0xff] %v7016_v36  ;;  %v3861_v36 = vadd.f32 %v10100_v31, %v782_v42  ;;  %v2704_v42 = vmul.f32 %v6678_v37, %v2575_v21  ;;  %v7069_v21 = vmul.f32 %v5768_v48, %v7047_v51  ;;  %v1164_v23 = vadd.f32 %v6077_v1, %v7043_v27 }
 0x1c0   : > { %v2125_v49 = vmax.f32 %v2061_v25, 0.0  ;;  %10102 = vst [vmem:[#allocation23_spill] sm:$0xff] %v7037_v12  ;;  %v3154_v25 = vmul.f32 %v6684_v17, %v3025_v41  ;;  %v7077_v41 = vmul.f32 %v5766_v47, %v7049_v4  ;;  %v1868_v43 = vadd.f32 %v1804_v30, %v1354_v56  ;;  %976 = vperm.xlu2 %5309, %v738_v22  }
 0x1c1   : > { %v3925_v18 = vmax.f32 %v3861_v36, 0.0  ;;  %10103 = vst [vmem:[#allocation24_spill] sm:$0xff] %v7041_v13  ;;  %v4375_v36 = vmax.f32 %v4311_v33, 0.0  ;;  %v7073_v33 = vmul.f32 %v5764_v46, %v7049_v4  ;;  %v1614_v31 = vadd.f32 %v6081_v14, %v7043_v27 }
 0x1c2   : > { %v2254_v55 = vmul.f32 %v6675_v24, %v2125_v49  ;;  %10104 = vst [vmem:[#allocation284_spill] sm:$0xff] %v7047_v51  ;;  %v7062_v49 = vmul.f32 %v6687_v57, %v3475_v7  ;;  %v2064_v56 = vadd.f32 %v6085_v39, %v7043_v27  ;;  %v7098_v6 = vadd.f32 %v4501_v16, %v4115_v26  ;;  %v7119_v26 = vpop.permute.xlu2 %811 }
 0x1c3   : > { %10105 = vst [vmem:[#allocation285_spill] sm:$0xff] %v7049_v4  ;;  %v7065_v20 = vmul.f32 %v6752_v50, %v3925_v18  ;;  %v7084_v18 = vmul.f32 %v5768_v48, %v7049_v4  ;;  %v7101_v8 = vmul.f32 %v6906_v63, %v4375_v36  ;;  %v7105_v30 = vmul.f32 %v5768_v48, %v5728_v29  ;;  %v10125_v4 = vld [vmem:[#allocation37_spill] sm:$0xff] }
 0x1c4   : > { %10106 = vst [vmem:[#allocation286_spill] sm:$0xff] %v7055_v2  ;;  %v2318_v7 = vadd.f32 %v2254_v55, %v1868_v43  ;;  %v1228_v51 = vmax.f32 %v1164_v23, 0.0  ;;  %v2128_v1 = vmax.f32 %v2064_v56, 0.0  ;;  %v7109_v14 = vmul.f32 %v5770_v52, %v5728_v29  ;;  %971 = vperm.xlu1 %5308, %v737_v3   ;;  %966 = vperm.xlu0 %5307, %v736_v32   ;;  %v762_v3 = vpop.permute.xlu1 %761  ;;  %v7135_v32 = vpop.permute.xlu0 %692  ;;  %v10183_v2 = vld [vmem:[#allocation102_spill] sm:$0xff] }
 0x1c5   : > { %10107 = vst [vmem:[#allocation287_spill] sm:$0xff] %v7059_v40  ;;  %v7113_v16 = vmul.f32 %v5772_v53, %v5728_v29  ;;  %v7117_v55 = vmul.f32 %v5777_v58, %v5728_v29  ;;  %v7129_v43 = vmul.f32 %v5779_v59, %v5728_v29  ;;  %v7150_v56 = vmul.f32 %v5764_v46, %v7135_v32  ;;  %v10127_v46 = vld [vmem:[#allocation39_spill] sm:$0xff] }
 0x1c6   : > { %10108 = vst [vmem:[#allocation288_spill] sm:$0xff] %v7069_v21  ;;  %v1678_v21 = vmax.f32 %v1614_v31, 0.0  ;;  %v2768_v39 = vadd.f32 %v2704_v42, %v2318_v7  ;;  %v7122_v36 = vmul.f32 %v6669_v44, %v1228_v51  ;;  %v7133_v42 = vmul.f32 %v5781_v60, %v5728_v29  ;;  %v10122_v29 = vld [vmem:[#allocation36_spill] sm:$0xff]  ;;  %v10130_v60 = vld [vmem:[#allocation42_spill] sm:$0xff] }
 0x1c7   : > { %10109 = vst [vmem:[#allocation289_spill] sm:$0xff] %v7073_v33  ;;  %v7138_v31 = vmul.f32 %v6675_v24, %v2128_v1  ;;  %v7142_v51 = vmul.f32 %v5768_v48, %v5726_v28  ;;  %v1157_v7 = vadd.f32 %v10122_v29, %v762_v3  ;;  %v7159_v1 = vmul.f32 %v5777_v58, %v5726_v28  ;;  %v740_v33 = vld [vmem:[%s9646_s2 + $0x168] sm:$0xff]  ;;  %v739_v58 = vld [vmem:[%s9646_s2 + $0x160] sm:$0xff] }
 0x1c8   : > { %10110 = vst [vmem:[#allocation290_spill] sm:$0xff] %v7077_v41  ;;  %v7125_v22 = vmul.f32 %v6672_v9, %v1678_v21  ;;  %v3218_v23 = vadd.f32 %v3154_v25, %v2768_v39  ;;  %v7146_v21 = vmul.f32 %v5770_v52, %v5726_v28  ;;  %v7155_v25 = vmul.f32 %v5772_v53, %v5726_v28  ;;  %v741_v39 = vld [vmem:[%s9646_s2 + $0x170] sm:$0xff]  ;;  %v10128_v41 = vld [vmem:[#allocation40_spill] sm:$0xff]  ;;  %v10129_v52 = vld [vmem:[#allocation41_spill] sm:$0xff] }
 0x1c9   : > { %10111 = vst [vmem:[#allocation291_spill] sm:$0xff] %v7084_v18  ;;  %v1607_v18 = vadd.f32 %v10125_v4, %v762_v3  ;;  %v2057_v13 = vadd.f32 %v10126_v54, %v762_v3  ;;  %v2957_v29 = vadd.f32 %v10128_v41, %v762_v3  ;;  %v1221_v53 = vmax.f32 %v1157_v7, 0.0  ;;  %v10131_v4 = vld [vmem:[#allocation43_spill] sm:$0xff]  ;;  %991 = vperm.xlu2 %5309, %v741_v39   ;;  %v10134_v7 = vld [vmem:[#allocation52_spill] sm:$0xff] }
 0x1ca   : > { %10112 = vst [vmem:[#allocation292_spill] sm:$0xff] %v7105_v30  ;;  %v3407_v12 = vadd.f32 %v10129_v52, %v762_v3  ;;  %v3857_v59 = vadd.f32 %v10130_v60, %v762_v3  ;;  %v4307_v28 = vadd.f32 %v10131_v4, %v762_v3  ;;  %v7184_v52 = vmul.f32 %v5768_v48, %v7135_v32  ;;  %v10136_v4 = vld [vmem:[#allocation54_spill] sm:$0xff]  ;;  %v10158_v30 = vld [vmem:[#allocation77_spill] sm:$0xff] }
 0x1cb   : > { %10113 = vst [vmem:[#allocation293_spill] sm:$0xff] %v7109_v14  ;;  %v1671_v54 = vmax.f32 %v1607_v18, 0.0  ;;  %v1350_v41 = vmul.f32 %v6669_v44, %v1221_v53  ;;  %v10148_v14 = vld [vmem:[#allocation49_spill] sm:$0xff] }
 0x1cc   : > { %10114 = vst [vmem:[#allocation294_spill] sm:$0xff] %v7113_v16  ;;  %986 = vperm.xlu1 %5308, %v740_v33   ;;  %981 = vperm.xlu0 %5307, %v739_v58   ;;  %v7198_v33 = vadd.f32 %v7062_v49, %v3218_v23  ;;  %v743_v23 = vld [vmem:[%s9646_s2 + $0x180] sm:$0xff]  ;;  %v10141_v16 = vld [vmem:[#allocation81_spill] sm:$0xff] }
 0x1cd   : > { %10115 = vst [vmem:[#allocation295_spill] sm:$0xff] %v7117_v55  ;;  %v1800_v60 = vmul.f32 %v6672_v9, %v1671_v54 }
 0x1ce   : > { %10116 = vst [vmem:[#allocation296_spill] sm:$0xff] %v7129_v43  ;;  %v7180_v43 = vmul.f32 %v5766_v47, %v7135_v32  ;;  %v777_v47 = vpop.permute.xlu1 %776 }
 0x1cf   : > { %10117 = vst [vmem:[#allocation297_spill] sm:$0xff] %v7133_v42  ;;  %v4371_v42 = vmax.f32 %v4307_v28, 0.0  ;;  %v1160_v39 = vadd.f32 %v10134_v7, %v777_v47  ;;  %v2060_v54 = vadd.f32 %v10136_v4, %v777_v47  ;;  %v742_v7 = vld [vmem:[%s9646_s2 + $0x178] sm:$0xff] }
 0x1d0   : > { %10118 = vst [vmem:[#allocation298_spill] sm:$0xff] %v7135_v32  ;;  %v10139_v32 = vld [vmem:[#allocation57_spill] sm:$0xff] }
 0x1d1   : > { %10119 = vst [vmem:[#allocation299_spill] sm:$0xff] %v7142_v51  ;;  %v3921_v51 = vmax.f32 %v3857_v59, 0.0  ;;  %v4500_v58 = vmul.f32 %v6906_v63, %v4371_v42  ;;  %v3410_v42 = vadd.f32 %v10139_v32, %v777_v47  ;;  %v7218_v32 = vadd.f32 %v7125_v22, %v7122_v36 }
 0x1d2   : > { %10120 = vst [vmem:[#allocation300_spill] sm:$0xff] %v7146_v21  ;;  %v3471_v21 = vmax.f32 %v3407_v12, 0.0  ;;  %v7193_v12 = vpop.permute.xlu0 %771 }
 0x1d3   : > { %10121 = vst [vmem:[#allocation301_spill] sm:$0xff] %v7150_v56  ;;  %v2507_v56 = vadd.f32 %v10127_v46, %v762_v3  ;;  %v1864_v3 = vadd.f32 %v1800_v60, %v1350_v41  ;;  %v10138_v60 = vld [vmem:[#allocation56_spill] sm:$0xff] }
 0x1d4   : > { %10123 = vst [vmem:[#allocation36_spill] sm:$0xff] %v7155_v25  ;;  %v3021_v25 = vmax.f32 %v2957_v29, 0.0  ;;  %v3600_v59 = vmul.f32 %v6687_v57, %v3471_v21  ;;  %v744_v21 = vld [vmem:[%s9646_s2 + $0x188] sm:$0xff]  ;;  %1001 = vperm.xlu1 %5308, %v743_v23   ;;  %996 = vperm.xlu0 %5307, %v742_v7  }
 0x1d5   : > { %10124 = vst [vmem:[#allocation302_spill] sm:$0xff] %v7159_v1  ;;  %v2121_v1 = vmax.f32 %v2057_v13, 0.0  ;;  %v2571_v46 = vmax.f32 %v2507_v56, 0.0  ;;  %v7187_v13 = vpop.permute.xlu2 %826  ;;  %v4050_v56 = vmul.f32 %v6752_v50, %v3921_v51  ;;  %v2960_v51 = vadd.f32 %v10138_v60, %v777_v47  ;;  %1006 = vperm.xlu2 %5309, %v744_v21  }
 0x1d6   : > { %10132 = vst [vmem:[#allocation37_spill] sm:$0xff] %v7180_v43  ;;  %v3150_v28 = vmul.f32 %v6684_v17, %v3021_v25  ;;  %v10137_v25 = vld [vmem:[#allocation55_spill] sm:$0xff] }
 0x1d7   : > { %10133 = vst [vmem:[#allocation38_spill] sm:$0xff] %v7184_v52  ;;  %v2250_v18 = vmul.f32 %v6675_v24, %v2121_v1  ;;  %v2700_v53 = vmul.f32 %v6678_v37, %v2571_v46  ;;  %v10135_v1 = vld [vmem:[#allocation53_spill] sm:$0xff]  ;;  %v2510_v46 = vadd.f32 %v10137_v25, %v777_v47  ;;  %v10140_v52 = vld [vmem:[#allocation58_spill] sm:$0xff]  ;;  %v2124_v25 = vmax.f32 %v2060_v54, 0.0 }
 0x1d8   : > { %v1610_v29 = vadd.f32 %v10135_v1, %v777_v47  ;;  %v3860_v49 = vadd.f32 %v10140_v52, %v777_v47  ;;  %v1224_v1 = vmax.f32 %v1160_v39, 0.0  ;;  %v7225_v39 = vadd.f32 %v10141_v16, %v7043_v27  ;;  %v7235_v16 = vpop.permute.xlu1 %791 }
 0x1d9   : > { %v2314_v41 = vadd.f32 %v2250_v18, %v1864_v3  ;;  %v2574_v43 = vmax.f32 %v2510_v46, 0.0  ;;  %v3024_v18 = vmax.f32 %v2960_v51, 0.0  ;;  %v3474_v3 = vmax.f32 %v3410_v42, 0.0  ;;  %v10143_v42 = vld [vmem:[#allocation44_spill] sm:$0xff] }
 0x1da   : > { %v1674_v4 = vmax.f32 %v1610_v29, 0.0  ;;  %v1353_v52 = vmul.f32 %v6669_v44, %v1224_v1  ;;  %v2253_v55 = vmul.f32 %v6675_v24, %v2124_v25  ;;  %v3924_v36 = vmax.f32 %v3860_v49, 0.0  ;;  %v7237_v23 = vpop.permute.xlu0 %786  ;;  %v10145_v49 = vld [vmem:[#allocation46_spill] sm:$0xff] }
 0x1db   : > { %v2764_v48 = vadd.f32 %v2700_v53, %v2314_v41  ;;  %v2703_v29 = vmul.f32 %v6678_v37, %v2574_v43  ;;  %v3153_v54 = vmul.f32 %v6684_v17, %v3024_v18  ;;  %v3603_v21 = vmul.f32 %v6687_v57, %v3474_v3  ;;  %v10142_v41 = vld [vmem:[#allocation60_spill] sm:$0xff]  ;;  %v10144_v43 = vld [vmem:[#allocation45_spill] sm:$0xff] }
 0x1dc   : > { %v1803_v60 = vmul.f32 %v6672_v9, %v1674_v4  ;;  %v4310_v51 = vadd.f32 %v10142_v41, %v777_v47  ;;  %v1159_v1 = vadd.f32 %v10143_v42, %v7193_v12  ;;  %v2059_v7 = vadd.f32 %v10145_v49, %v7193_v12  ;;  %v10146_v4 = vld [vmem:[#allocation47_spill] sm:$0xff]  ;;  %v747_v41 = vld [vmem:[%s9646_s2 + $0x1a0] sm:$0xff] }
 0x1dd   : > { %v3214_v53 = vadd.f32 %v3150_v28, %v2764_v48  ;;  %v7229_v22 = vpop.permute.xlu2 %841  ;;  %v1609_v28 = vadd.f32 %v10144_v43, %v7193_v12  ;;  %v2509_v25 = vadd.f32 %v10146_v4, %v7193_v12  ;;  %v746_v49 = vld [vmem:[%s9646_s2 + $0x198] sm:$0xff]  ;;  %1021 = vperm.xlu2 %5309, %v747_v41  }
 0x1de   : > { %v1867_v46 = vadd.f32 %v1803_v60, %v1353_v52  ;;  %v4374_v3 = vmax.f32 %v4310_v51, 0.0  ;;  %v1223_v47 = vmax.f32 %v1159_v1, 0.0  ;;  %v10147_v52 = vld [vmem:[#allocation48_spill] sm:$0xff]  ;;  %v2123_v42 = vmax.f32 %v2059_v7, 0.0  ;;  %1016 = vperm.xlu1 %5308, %v746_v49  }
 0x1df   : > { %v3664_v48 = vadd.f32 %v3600_v59, %v3214_v53  ;;  %v2959_v60 = vadd.f32 %v10147_v52, %v7193_v12  ;;  %v1673_v53 = vmax.f32 %v1609_v28, 0.0  ;;  %v2573_v43 = vmax.f32 %v2509_v25, 0.0 }
 0x1e0   : > { %v2317_v18 = vadd.f32 %v2253_v55, %v1867_v46  ;;  %v745_v55 = vld [vmem:[%s9646_s2 + $0x190] sm:$0xff]  ;;  %v4053_v51 = vmul.f32 %v6752_v50, %v3924_v36  ;;  %v4503_v1 = vmul.f32 %v6906_v63, %v4374_v3  ;;  %v1352_v4 = vmul.f32 %v6669_v44, %v1223_v47 }
 0x1e1   : > { %v4114_v59 = vadd.f32 %v4050_v56, %v3664_v48  ;;  %v1802_v56 = vmul.f32 %v6672_v9, %v1673_v53  ;;  %v2252_v48 = vmul.f32 %v6675_v24, %v2123_v42  ;;  %v3023_v28 = vmax.f32 %v2959_v60, 0.0  ;;  %v10149_v36 = vld [vmem:[#allocation50_spill] sm:$0xff]  ;;  %1011 = vperm.xlu0 %5307, %v745_v55   ;;  %v7281_v55 = vpop.permute.xlu1 %806 }
 0x1e2   : > { %v2767_v46 = vadd.f32 %v2703_v29, %v2317_v18  ;;  %v2702_v25 = vmul.f32 %v6678_v37, %v2573_v43  ;;  %v3409_v29 = vadd.f32 %v10148_v14, %v7193_v12  ;;  %v3859_v18 = vadd.f32 %v10149_v36, %v7193_v12  ;;  %v10152_v14 = vld [vmem:[#allocation70_spill] sm:$0xff] }
 0x1e3   : > { %v7259_v52 = vadd.f32 %v4500_v58, %v4114_v59  ;;  %v1866_v3 = vadd.f32 %v1802_v56, %v1352_v4  ;;  %v10150_v58 = vld [vmem:[#allocation51_spill] sm:$0xff]  ;;  %v4118_v59 = vadd.f32 %v7065_v20, %v7198_v33  ;;  %v1163_v43 = vadd.f32 %v10152_v14, %v7235_v16 }
 0x1e4   : > { %v3217_v7 = vadd.f32 %v3153_v54, %v2767_v46  ;;  %v4309_v47 = vadd.f32 %v10150_v58, %v7193_v12  ;;  %v3473_v53 = vmax.f32 %v3409_v29, 0.0  ;;  %v3923_v42 = vmax.f32 %v3859_v18, 0.0  ;;  %v7283_v12 = vpop.permute.xlu0 %801  ;;  %v10154_v58 = vld [vmem:[#allocation72_spill] sm:$0xff] }
 0x1e5   : > { %v7273_v54 = vpop.permute.xlu2 %856  ;;  %v2316_v46 = vadd.f32 %v2252_v48, %v1866_v3  ;;  %v3152_v20 = vmul.f32 %v6684_v17, %v3023_v28  ;;  %v7296_v36 = vadd.f32 %v7101_v8, %v4118_v59  ;;  %v1227_v48 = vmax.f32 %v1163_v43, 0.0  ;;  %v10153_v28 = vld [vmem:[#allocation71_spill] sm:$0xff]  ;;  %v10155_v8 = vld [vmem:[#allocation74_spill] sm:$0xff]  ;;  %v10157_v43 = vld [vmem:[#allocation76_spill] sm:$0xff] }
 0x1e6   : > { %10151 = vst [vmem:[#allocation39_spill] sm:$0xff] %v7273_v54  ;;  %v3667_v41 = vadd.f32 %v3603_v21, %v3217_v7  ;;  %v7279_v49 = vadd.f32 %v6212_v15, %v7273_v54  ;;  %v4373_v33 = vmax.f32 %v4309_v47, 0.0  ;;  %v7288_v21 = vadd.f32 %v6228_v5, %v7273_v54  ;;  %v750_v15 = vld [vmem:[%s9646_s2 + $0x1b8] sm:$0xff]  ;;  %v749_v5 = vld [vmem:[%s9646_s2 + $0x1b0] sm:$0xff] }
 0x1e7   : > { %v3602_v56 = vmul.f32 %v6687_v57, %v3473_v53  ;;  %v4052_v7 = vmul.f32 %v6752_v50, %v3923_v42  ;;  %v2766_v29 = vadd.f32 %v2702_v25, %v2316_v46  ;;  %v1613_v18 = vadd.f32 %v10153_v28, %v7235_v16  ;;  %v10156_v59 = vld [vmem:[#allocation75_spill] sm:$0xff]  ;;  %1036 = vperm.xlu2 %5309, %v750_v15  }
 0x1e8   : > { %v4117_v4 = vadd.f32 %v4053_v51, %v3667_v41  ;;  %v748_v51 = vld [vmem:[%s9646_s2 + $0x1a8] sm:$0xff]  ;;  %v4502_v3 = vmul.f32 %v6906_v63, %v4373_v33  ;;  %v2063_v25 = vadd.f32 %v10154_v58, %v7235_v16  ;;  %v2513_v47 = vadd.f32 %v10155_v8, %v7235_v16  ;;  %1031 = vperm.xlu1 %5308, %v749_v5  }
 0x1e9   : > { %v2963_v41 = vadd.f32 %v10156_v59, %v7235_v16  ;;  %v3216_v53 = vadd.f32 %v3152_v20, %v2766_v29  ;;  %v1356_v42 = vmul.f32 %v6669_v44, %v1227_v48  ;;  %v1677_v14 = vmax.f32 %v1613_v18, 0.0  ;;  %1026 = vperm.xlu0 %5307, %v748_v51   ;;  %v10159_v20 = vld [vmem:[#allocation78_spill] sm:$0xff] }
 0x1ea   : > { %v3413_v46 = vadd.f32 %v10157_v43, %v7235_v16  ;;  %v2127_v28 = vmax.f32 %v2063_v25, 0.0  ;;  %v2577_v60 = vmax.f32 %v2513_v47, 0.0  ;;  %v3863_v58 = vadd.f32 %v10158_v30, %v7235_v16  ;;  %v753_v43 = vld [vmem:[%s9646_s2 + $0x1d0] sm:$0xff] }
 0x1eb   : > { %v3027_v33 = vmax.f32 %v2963_v41, 0.0  ;;  %v3666_v8 = vadd.f32 %v3602_v56, %v3216_v53  ;;  %v1806_v54 = vmul.f32 %v6672_v9, %v1677_v14  ;;  %v4313_v29 = vadd.f32 %v10159_v20, %v7235_v16  ;;  %v7331_v56 = vpop.permute.xlu1 %821  ;;  %v10164_v14 = vld [vmem:[#allocation26_spill] sm:$0xff] }
 0x1ec   : > { %v3477_v59 = vmax.f32 %v3413_v46, 0.0  ;;  %v7323_v18 = vadd.f32 %v4503_v1, %v4117_v4  ;;  %v2256_v15 = vmul.f32 %v6675_v24, %v2127_v28  ;;  %v2706_v25 = vmul.f32 %v6678_v37, %v2577_v60  ;;  %v7333_v5 = vpop.permute.xlu0 %816  ;;  %v10162_v1 = vld [vmem:[#allocation115_spill] sm:$0xff]  ;;  %v10166_v28 = vld [vmem:[#allocation28_spill] sm:$0xff] }
 0x1ed   : > { %v7321_v48 = vpop.permute.xlu2 %871  ;;  %v3927_v47 = vmax.f32 %v3863_v58, 0.0  ;;  %v4116_v51 = vadd.f32 %v4052_v7, %v3666_v8  ;;  %v1870_v41 = vadd.f32 %v1806_v54, %v1356_v42  ;;  %v3156_v16 = vmul.f32 %v6684_v17, %v3027_v33  ;;  %v10165_v54 = vld [vmem:[#allocation27_spill] sm:$0xff]  ;;  %v752_v58 = vld [vmem:[%s9646_s2 + $0x1c8] sm:$0xff]  ;;  %v751_v8 = vld [vmem:[%s9646_s2 + $0x1c0] sm:$0xff] }
 0x1ee   : > { %10160 = vst [vmem:[#allocation40_spill] sm:$0xff] %v7321_v48  ;;  %v7329_v30 = vadd.f32 %v6242_v0, %v7321_v48  ;;  %v7338_v4 = vadd.f32 %v10162_v1, %v7321_v48  ;;  %v3606_v53 = vmul.f32 %v6687_v57, %v3477_v59  ;;  %v1162_v0 = vadd.f32 %v10164_v14, %v7237_v23 }
 0x1ef   : > { %v4056_v60 = vmul.f32 %v6752_v50, %v3927_v47  ;;  %v2320_v46 = vadd.f32 %v2256_v15, %v1870_v41  ;;  %v4377_v7 = vmax.f32 %v4313_v29, 0.0  ;;  %v1612_v42 = vadd.f32 %v10165_v54, %v7237_v23  ;;  %v10167_v15 = vld [vmem:[#allocation29_spill] sm:$0xff]  ;;  %v10168_v47 = vld [vmem:[#allocation32_spill] sm:$0xff]  ;;  %1051 = vperm.xlu2 %5309, %v753_v43  }
 0x1f0   : > { %10161 = vst [vmem:[#allocation41_spill] sm:$0xff] %v7329_v30  ;;  %v2062_v33 = vadd.f32 %v10166_v28, %v7237_v23  ;;  %v7357_v59 = vadd.f32 %v4502_v3, %v4116_v51  ;;  %v1226_v20 = vmax.f32 %v1162_v0, 0.0  ;;  %v2512_v29 = vadd.f32 %v10167_v15, %v7237_v23  ;;  %v10169_v28 = vld [vmem:[#allocation33_spill] sm:$0xff]  ;;  %v10170_v3 = vld [vmem:[#allocation34_spill] sm:$0xff]  ;;  %1046 = vperm.xlu1 %5308, %v752_v58  }
 0x1f1   : > { %10163 = vst [vmem:[#allocation42_spill] sm:$0xff] %v7338_v4  ;;  %v2962_v41 = vadd.f32 %v10168_v47, %v7237_v23  ;;  %v2770_v1 = vadd.f32 %v2706_v25, %v2320_v46  ;;  %v1676_v14 = vmax.f32 %v1612_v42, 0.0  ;;  %v3412_v48 = vadd.f32 %v10169_v28, %v7237_v23  ;;  %1041 = vperm.xlu0 %5307, %v751_v8  }
 0x1f2   : > { %v2126_v54 = vmax.f32 %v2062_v33, 0.0  ;;  %v1355_v4 = vmul.f32 %v6669_v44, %v1226_v20  ;;  %v2576_v30 = vmax.f32 %v2512_v29, 0.0  ;;  %v3862_v51 = vadd.f32 %v10170_v3, %v7237_v23  ;;  %v10172_v29 = vld [vmem:[#allocation35_spill] sm:$0xff]  ;;  %v756_v3 = vld [vmem:[%s9646_s2 + $0x1e8] sm:$0xff] }
 0x1f3   : > { %v3026_v40 = vmax.f32 %v2962_v41, 0.0  ;;  %v3220_v0 = vadd.f32 %v3156_v16, %v2770_v1  ;;  %v4506_v15 = vmul.f32 %v6906_v63, %v4377_v7  ;;  %v1805_v25 = vmul.f32 %v6672_v9, %v1676_v14  ;;  %v10173_v41 = vld [vmem:[#allocation128_spill] sm:$0xff]  ;;  %v7380_v16 = vpop.permute.xlu1 %836  ;;  %v10175_v14 = vld [vmem:[#allocation129_spill] sm:$0xff] }
 0x1f4   : > { %v3476_v46 = vmax.f32 %v3412_v48, 0.0  ;;  %v2255_v33 = vmul.f32 %v6675_v24, %v2126_v54  ;;  %v2705_v43 = vmul.f32 %v6678_v37, %v2576_v30  ;;  %v3926_v20 = vmax.f32 %v3862_v51, 0.0  ;;  %v7382_v7 = vpop.permute.xlu0 %831 }
 0x1f5   : > { %v7370_v42 = vpop.permute.xlu2 %886  ;;  %v4312_v47 = vadd.f32 %v10172_v29, %v7237_v23  ;;  %v3670_v8 = vadd.f32 %v3606_v53, %v3220_v0  ;;  %v1869_v48 = vadd.f32 %v1805_v25, %v1355_v4  ;;  %v3155_v1 = vmul.f32 %v6684_v17, %v3026_v40  ;;  %v10178_v0 = vld [vmem:[#allocation85_spill] sm:$0xff] }
 0x1f6   : > { %10171 = vst [vmem:[#allocation43_spill] sm:$0xff] %v7370_v42  ;;  %v7378_v58 = vadd.f32 %v10173_v41, %v7370_v42  ;;  %v7387_v54 = vadd.f32 %v10175_v14, %v7370_v42  ;;  %v3605_v30 = vmul.f32 %v6687_v57, %v3476_v46  ;;  %v2321_v23 = vadd.f32 %v7138_v31, %v7218_v32  ;;  %v755_v46 = vld [vmem:[%s9646_s2 + $0x1e0] sm:$0xff]  ;;  %v754_v31 = vld [vmem:[%s9646_s2 + $0x1d8] sm:$0xff] }
 0x1f7   : > { %v4376_v28 = vmax.f32 %v4312_v47, 0.0  ;;  %v2319_v51 = vadd.f32 %v2255_v33, %v1869_v48  ;;  %v4055_v53 = vmul.f32 %v6752_v50, %v3926_v20  ;;  %v10177_v4 = vmax.f32 %v7225_v39, 0.0  ;;  %v10179_v33 = vld [vmem:[#allocation86_spill] sm:$0xff]  ;;  %v10180_v20 = vld [vmem:[#allocation91_spill] sm:$0xff]  ;;  %v10181_v47 = vld [vmem:[#allocation92_spill] sm:$0xff]  ;;  %1066 = vperm.xlu2 %5309, %v756_v3  }
 0x1f8   : > { %10174 = vst [vmem:[#allocation52_spill] sm:$0xff] %v7378_v58  ;;  %v2964_v25 = vadd.f32 %v10178_v0, %v7043_v27  ;;  %v4120_v32 = vadd.f32 %v4056_v60, %v3670_v8  ;;  %v3414_v29 = vadd.f32 %v10179_v33, %v7043_v27  ;;  %v3864_v39 = vadd.f32 %v10180_v20, %v7043_v27  ;;  %v10182_v60 = vld [vmem:[#allocation101_spill] sm:$0xff] }
 0x1f9   : > { %10176 = vst [vmem:[#allocation53_spill] sm:$0xff] %v7387_v54  ;;  %v2707_v40 = vmul.f32 %v6678_v37, %v10177_v4  ;;  %v4314_v41 = vadd.f32 %v10181_v47, %v7043_v27  ;;  %v2769_v48 = vadd.f32 %v2705_v43, %v2319_v51  ;;  %v4505_v14 = vmul.f32 %v6906_v63, %v4376_v28 }
 0x1fa   : > { %v3028_v0 = vmax.f32 %v2964_v25, 0.0  ;;  %v3478_v42 = vmax.f32 %v3414_v29, 0.0  ;;  %v3928_v54 = vmax.f32 %v3864_v39, 0.0  ;;  %v1166_v8 = vadd.f32 %v10182_v60, %v7281_v55  ;;  %1061 = vperm.xlu1 %5308, %v755_v46   ;;  %1056 = vperm.xlu0 %5307, %v754_v31  }
 0x1fb   : > { %v2771_v4 = vadd.f32 %v2707_v40, %v2321_v23  ;;  %v4378_v58 = vmax.f32 %v4314_v41, 0.0  ;;  %v3219_v33 = vadd.f32 %v3155_v1, %v2769_v48  ;;  %v1616_v27 = vadd.f32 %v10183_v2, %v7281_v55  ;;  %v7429_v25 = vpop.permute.xlu1 %851  ;;  %v10188_v41 = vld [vmem:[#allocation105_spill] sm:$0xff] }
 0x1fc   : > { %v3157_v20 = vmul.f32 %v6684_v17, %v3028_v0  ;;  %v7421_v28 = vadd.f32 %v4506_v15, %v4120_v32  ;;  %v3607_v23 = vmul.f32 %v6687_v57, %v3478_v42  ;;  %v4057_v3 = vmul.f32 %v6752_v50, %v3928_v54  ;;  %v7431_v1 = vpop.permute.xlu0 %846  ;;  %v10186_v42 = vld [vmem:[#allocation103_spill] sm:$0xff]  ;;  %v10187_v54 = vld [vmem:[#allocation104_spill] sm:$0xff]  ;;  %v10189_v0 = vld [vmem:[#allocation106_spill] sm:$0xff] }
 0x1fd   : > { %v7419_v43 = vpop.permute.xlu2 %901  ;;  %v1230_v51 = vmax.f32 %v1166_v8, 0.0  ;;  %v3669_v46 = vadd.f32 %v3605_v30, %v3219_v33  ;;  %v4507_v2 = vmul.f32 %v6906_v63, %v4378_v58  ;;  %v1680_v32 = vmax.f32 %v1616_v27, 0.0  ;;  %v758_v58 = vld [vmem:[%s9646_s2 + $0x1f8] sm:$0xff] }
 0x1fe   : > { %10184 = vst [vmem:[#allocation54_spill] sm:$0xff] %v7419_v43  ;;  %v7427_v40 = vadd.f32 %v6363_v45, %v7419_v43  ;;  %v3221_v31 = vadd.f32 %v3157_v20, %v2771_v4  ;;  %v2066_v29 = vadd.f32 %v10186_v42, %v7281_v55  ;;  %v2516_v39 = vadd.f32 %v10187_v54, %v7281_v55  ;;  %v757_v4 = vld [vmem:[%s9646_s2 + $0x1f0] sm:$0xff] }
 0x1ff   : > { %v1359_v15 = vmul.f32 %v6669_v44, %v1230_v51  ;;  %v4119_v47 = vadd.f32 %v4055_v53, %v3669_v46  ;;  %v2966_v48 = vadd.f32 %v10188_v41, %v7281_v55  ;;  %v3416_v30 = vadd.f32 %v10189_v0, %v7281_v55  ;;  %v10190_v53 = vld [vmem:[#allocation107_spill] sm:$0xff] }
 0x200   : > { %10185 = vst [vmem:[#allocation55_spill] sm:$0xff] %v7427_v40  ;;  %v3671_v45 = vadd.f32 %v3607_v23, %v3221_v31  ;;  %v1809_v60 = vmul.f32 %v6672_v9, %v1680_v32  ;;  %v2130_v8 = vmax.f32 %v2066_v29, 0.0  ;;  %v2580_v33 = vmax.f32 %v2516_v39, 0.0 }
 0x201   : > { %v3866_v20 = vadd.f32 %v10190_v53, %v7281_v55  ;;  %v7454_v27 = vadd.f32 %v6367_v34, %v7419_v43  ;;  %v3030_v51 = vmax.f32 %v2966_v48, 0.0  ;;  %v3480_v46 = vmax.f32 %v3416_v30, 0.0 }
 0x202   : > { %v4121_v23 = vadd.f32 %v4057_v3, %v3671_v45  ;;  %v7456_v31 = vadd.f32 %v4505_v14, %v4119_v47  ;;  %v1873_v42 = vadd.f32 %v1809_v60, %v1359_v15  ;;  %v2259_v54 = vmul.f32 %v6675_v24, %v2130_v8  ;;  %1076 = vperm.xlu1 %5308, %v758_v58   ;;  %v10193_v14 = vld [vmem:[#allocation108_spill] sm:$0xff]  ;;  %v10194_v15 = vld [vmem:[#allocation63_spill] sm:$0xff]  ;;  %v10197_v8 = vld [vmem:[#allocation65_spill] sm:$0xff] }
 0x203   : > { %10191 = vst [vmem:[#allocation56_spill] sm:$0xff] %v7454_v27  ;;  %v3930_v41 = vmax.f32 %v3866_v20, 0.0  ;;  %1071 = vperm.xlu0 %5307, %v757_v4   ;;  %v2709_v29 = vmul.f32 %v6678_v37, %v2580_v33  ;;  %v3159_v39 = vmul.f32 %v6684_v17, %v3030_v51  ;;  %v3609_v3 = vmul.f32 %v6687_v57, %v3480_v46  ;;  %v10196_v4 = vld [vmem:[#allocation64_spill] sm:$0xff]  ;;  %v10202_v46 = vld [vmem:[#allocation79_spill] sm:$0xff] }
 0x204   : > { %v7459_v32 = vadd.f32 %v4507_v2, %v4121_v23  ;;  %v2323_v34 = vadd.f32 %v2259_v54, %v1873_v42  ;;  %v4316_v47 = vadd.f32 %v10193_v14, %v7281_v55  ;;  %v1165_v45 = vadd.f32 %v10194_v15, %v7283_v12  ;;  %v7474_v2 = vpop.permute.xlu1 %866  ;;  %v7476_v30 = vpop.permute.xlu0 %861  ;;  %v10198_v55 = vld [vmem:[#allocation157_spill] sm:$0xff]  ;;  %v10200_v20 = vld [vmem:[#allocation116_spill] sm:$0xff] }
 0x205   : > { %v7463_v0 = vpop.permute.xlu2 %916  ;;  %v4059_v58 = vmul.f32 %v6752_v50, %v3930_v41  ;;  %v1615_v60 = vadd.f32 %v10196_v4, %v7283_v12  ;;  %v2065_v33 = vadd.f32 %v10197_v8, %v7283_v12  ;;  %v10201_v23 = vld [vmem:[#allocation117_spill] sm:$0xff]  ;;  %v7497_v42 = vadd.f32 %v10202_v46, %v7476_v30  ;;  %v10204_v8 = vld [vmem:[#allocation66_spill] sm:$0xff] }
 0x206   : > { %10192 = vst [vmem:[#allocation57_spill] sm:$0xff] %v7463_v0  ;;  %v7472_v48 = vadd.f32 %v6409_v35, %v7463_v0  ;;  %v7485_v53 = vadd.f32 %v10198_v55, %v7463_v0  ;;  %v7489_v35 = vadd.f32 %v10200_v20, %v7474_v2  ;;  %v7493_v51 = vadd.f32 %v10201_v23, %v7474_v2  ;;  %v10205_v0 = vld [vmem:[#allocation67_spill] sm:$0xff]  ;;  %v10207_v23 = vld [vmem:[#allocation80_spill] sm:$0xff] }
 0x207   : > { %10203 = vst [vmem:[#allocation60_spill] sm:$0xff] %v7497_v42  ;;  %v2773_v54 = vadd.f32 %v2709_v29, %v2323_v34  ;;  %v4380_v41 = vmax.f32 %v4316_v47, 0.0  ;;  %v1229_v14 = vmax.f32 %v1165_v45, 0.0  ;;  %v1679_v15 = vmax.f32 %v1615_v60, 0.0 }
 0x208   : > { %10195 = vst [vmem:[#allocation58_spill] sm:$0xff] %v7472_v48  ;;  %v2129_v4 = vmax.f32 %v2065_v33, 0.0  ;;  %v2515_v55 = vadd.f32 %v10204_v8, %v7283_v12  ;;  %v2965_v20 = vadd.f32 %v10205_v0, %v7283_v12  ;;  %v7507_v43 = vadd.f32 %v10207_v23, %v7476_v30  ;;  %v10208_v0 = vld [vmem:[#allocation69_spill] sm:$0xff] }
 0x209   : > { %10199 = vst [vmem:[#allocation81_spill] sm:$0xff] %v7485_v53  ;;  %v10206_v53 = vld [vmem:[#allocation68_spill] sm:$0xff]  ;;  %v3223_v46 = vadd.f32 %v3159_v39, %v2773_v54  ;;  %v1358_v29 = vmul.f32 %v6669_v44, %v1229_v14  ;;  %v1808_v34 = vmul.f32 %v6672_v9, %v1679_v15  ;;  %v3865_v40 = vadd.f32 %v10208_v0, %v7283_v12  ;;  %v10211_v15 = vld [vmem:[#allocation111_spill] sm:$0xff] }
 0x20a   : > { %v3415_v48 = vadd.f32 %v10206_v53, %v7283_v12  ;;  %v2258_v47 = vmul.f32 %v6675_v24, %v2129_v4  ;;  %v2579_v45 = vmax.f32 %v2515_v55, 0.0  ;;  %v3029_v60 = vmax.f32 %v2965_v20, 0.0  ;;  %v10209_v53 = vld [vmem:[#allocation73_spill] sm:$0xff] }
 0x20b   : > { %v3673_v8 = vadd.f32 %v3609_v3, %v3223_v46  ;;  %v1872_v27 = vadd.f32 %v1808_v34, %v1358_v29  ;;  %v4315_v42 = vadd.f32 %v10209_v53, %v7283_v12  ;;  %v4509_v39 = vmul.f32 %v6906_v63, %v4380_v41  ;;  %v10216_v29 = vld [vmem:[#allocation130_spill] sm:$0xff]  ;;  %v10223_v53 = vld [vmem:[#allocation120_spill] sm:$0xff] }
 0x20c   : > { %v3479_v33 = vmax.f32 %v3415_v48, 0.0  ;;  %v2708_v54 = vmul.f32 %v6678_v37, %v2579_v45  ;;  %v3158_v14 = vmul.f32 %v6684_v17, %v3029_v60  ;;  %v1167_v4 = vadd.f32 %v10211_v15, %v7119_v26  ;;  %v7527_v48 = vpop.permute.xlu1 %881  ;;  %v7529_v55 = vpop.permute.xlu0 %876  ;;  %v10217_v45 = vld [vmem:[#allocation132_spill] sm:$0xff]  ;;  %v10219_v60 = vld [vmem:[#allocation83_spill] sm:$0xff] }
 0x20d   : > { %v7516_v23 = vpop.permute.xlu2 %931  ;;  %10213 = vst [vmem:[#allocation46_spill] sm:$0xff] %v7527_v48  ;;  %v4123_v12 = vadd.f32 %v4059_v58, %v3673_v8  ;;  %v2322_v20 = vadd.f32 %v2258_v47, %v1872_v27  ;;  %v7538_v34 = vadd.f32 %v10216_v29, %v7527_v48  ;;  %v7546_v0 = vadd.f32 %v10219_v60, %v7529_v55  ;;  %v10221_v27 = vld [vmem:[#allocation84_spill] sm:$0xff]  ;;  %v10224_v29 = vld [vmem:[#allocation121_spill] sm:$0xff] }
 0x20e   : > { %10210 = vst [vmem:[#allocation44_spill] sm:$0xff] %v7516_v23  ;;  %v7525_v3 = vadd.f32 %v6458_v62, %v7516_v23  ;;  %v3608_v46 = vmul.f32 %v6687_v57, %v3479_v33  ;;  %v7534_v41 = vadd.f32 %v6462_v11, %v7516_v23  ;;  %v7542_v62 = vadd.f32 %v10217_v45, %v7527_v48  ;;  %v10225_v45 = vld [vmem:[#allocation122_spill] sm:$0xff] }
 0x20f   : > { %10214 = vst [vmem:[#allocation47_spill] sm:$0xff] %v7529_v55  ;;  %v7550_v58 = vadd.f32 %v10221_v27, %v7529_v55  ;;  %v2772_v47 = vadd.f32 %v2708_v54, %v2322_v20  ;;  %v3929_v33 = vmax.f32 %v3865_v40, 0.0  ;;  %v4379_v11 = vmax.f32 %v4315_v42, 0.0  ;;  %v10226_v27 = vld [vmem:[#allocation123_spill] sm:$0xff] }
 0x210   : > { %10212 = vst [vmem:[#allocation45_spill] sm:$0xff] %v7525_v3  ;;  %v1231_v8 = vmax.f32 %v1167_v4, 0.0  ;;  %v1617_v15 = vadd.f32 %v10223_v53, %v7119_v26  ;;  %v2067_v23 = vadd.f32 %v10224_v29, %v7119_v26  ;;  %v7558_v3 = vadd.f32 %v4509_v39, %v4123_v12  ;;  %v10227_v29 = vld [vmem:[#allocation126_spill] sm:$0xff] }
 0x211   : > { %10215 = vst [vmem:[#allocation48_spill] sm:$0xff] %v7534_v41  ;;  %v2517_v41 = vadd.f32 %v10225_v45, %v7119_v26  ;;  %v3222_v60 = vadd.f32 %v3158_v14, %v2772_v47  ;;  %v2967_v54 = vadd.f32 %v10226_v27, %v7119_v26  ;;  %v10228_v45 = vld [vmem:[#allocation127_spill] sm:$0xff]  ;;  %v4508_v14 = vmul.f32 %v6906_v63, %v4379_v11 }
 0x212   : > { %10218 = vst [vmem:[#allocation49_spill] sm:$0xff] %v7542_v62  ;;  %v1360_v40 = vmul.f32 %v6669_v44, %v1231_v8  ;;  %v1681_v42 = vmax.f32 %v1617_v15, 0.0  ;;  %v2131_v4 = vmax.f32 %v2067_v23, 0.0  ;;  %v3867_v39 = vadd.f32 %v10228_v45, %v7119_v26  ;;  %v10230_v8 = vld [vmem:[#allocation131_spill] sm:$0xff] }
 0x213   : > { %10220 = vst [vmem:[#allocation50_spill] sm:$0xff] %v7546_v0  ;;  %v4058_v0 = vmul.f32 %v6752_v50, %v3929_v33  ;;  %v2581_v20 = vmax.f32 %v2517_v41, 0.0  ;;  %v3672_v53 = vadd.f32 %v3608_v46, %v3222_v60  ;;  %v3031_v55 = vmax.f32 %v2967_v54, 0.0  ;;  %v10232_v41 = vld [vmem:[#allocation173_spill] sm:$0xff] }
 0x214   : > { %10222 = vst [vmem:[#allocation51_spill] sm:$0xff] %v7550_v58  ;;  %v3417_v58 = vadd.f32 %v10227_v29, %v7119_v26  ;;  %v1810_v47 = vmul.f32 %v6672_v9, %v1681_v42  ;;  %v2260_v33 = vmul.f32 %v6675_v24, %v2131_v4  ;;  %v4317_v23 = vadd.f32 %v10230_v8, %v7119_v26  ;;  %v7583_v60 = vpop.permute.xlu1 %896  ;;  %v7585_v27 = vpop.permute.xlu0 %891  ;;  %v10236_v42 = vld [vmem:[#allocation143_spill] sm:$0xff]  ;;  %v10238_v26 = vld [vmem:[#allocation145_spill] sm:$0xff] }
 0x215   : > { %v7568_v12 = vpop.permute.xlu2 %946  ;;  %10234 = vst [vmem:[#allocation74_spill] sm:$0xff] %v7583_v60  ;;  %v4122_v11 = vadd.f32 %v4058_v0, %v3672_v53  ;;  %v2710_v54 = vmul.f32 %v6678_v37, %v2581_v20  ;;  %v7590_v4 = vadd.f32 %v10236_v42, %v7583_v60  ;;  %v7594_v29 = vadd.f32 %v10238_v26, %v7583_v60  ;;  %v10244_v42 = vld [vmem:[#allocation146_spill] sm:$0xff]  ;;  %v10245_v26 = vld [vmem:[#allocation147_spill] sm:$0xff] }
 0x216   : > { %10229 = vst [vmem:[#allocation70_spill] sm:$0xff] %v7568_v12  ;;  %v7577_v46 = vadd.f32 %v6504_v10, %v7568_v12  ;;  %v7581_v15 = vadd.f32 %v10232_v41, %v7568_v12  ;;  %v10240_v10 = vld [vmem:[#allocation89_spill] sm:$0xff]  ;;  %v3160_v8 = vmul.f32 %v6684_v17, %v3031_v55  ;;  %v10242_v41 = vld [vmem:[#allocation90_spill] sm:$0xff]  ;;  %v1874_v0 = vadd.f32 %v1810_v47, %v1360_v40 }
 0x217   : > { %10235 = vst [vmem:[#allocation75_spill] sm:$0xff] %v7585_v27  ;;  %v7598_v45 = vadd.f32 %v10240_v10, %v7585_v27  ;;  %v7603_v12 = vadd.f32 %v10242_v41, %v7585_v27  ;;  %v3481_v20 = vmax.f32 %v3417_v58, 0.0  ;;  %v3931_v53 = vmax.f32 %v3867_v39, 0.0  ;;  %v10247_v41 = vld [vmem:[#allocation151_spill] sm:$0xff] }
 0x218   : > { %10231 = vst [vmem:[#allocation71_spill] sm:$0xff] %v7577_v46  ;;  %v1169_v46 = vadd.f32 %v10244_v42, %v7331_v56  ;;  %v1619_v60 = vadd.f32 %v10245_v26, %v7331_v56  ;;  %v2324_v55 = vadd.f32 %v2260_v33, %v1874_v0  ;;  %v2519_v40 = vadd.f32 %v10247_v41, %v7331_v56  ;;  %v10248_v26 = vld [vmem:[#allocation152_spill] sm:$0xff] }
 0x219   : > { %10233 = vst [vmem:[#allocation72_spill] sm:$0xff] %v7581_v15  ;;  %v4381_v15 = vmax.f32 %v4317_v23, 0.0  ;;  %v4060_v58 = vmul.f32 %v6752_v50, %v3931_v53 }
 0x21a   : > { %10237 = vst [vmem:[#allocation76_spill] sm:$0xff] %v7590_v4  ;;  %v3610_v4 = vmul.f32 %v6687_v57, %v3481_v20  ;;  %v1233_v39 = vmax.f32 %v1169_v46, 0.0  ;;  %v1683_v47 = vmax.f32 %v1619_v60, 0.0  ;;  %v2774_v42 = vadd.f32 %v2710_v54, %v2324_v55  ;;  %v10251_v46 = vld [vmem:[#allocation154_spill] sm:$0xff]  ;;  %v10252_v54 = vld [vmem:[#allocation200_spill] sm:$0xff] }
 0x21b   : > { %10239 = vst [vmem:[#allocation77_spill] sm:$0xff] %v7594_v29  ;;  %v10246_v29 = vld [vmem:[#allocation150_spill] sm:$0xff]  ;;  %v2583_v27 = vmax.f32 %v2519_v40, 0.0  ;;  %v4510_v33 = vmul.f32 %v6906_v63, %v4381_v15  ;;  %v3869_v60 = vadd.f32 %v10251_v46, %v7331_v56 }
 0x21c   : > { %10241 = vst [vmem:[#allocation78_spill] sm:$0xff] %v7598_v45  ;;  %v2069_v10 = vadd.f32 %v10246_v29, %v7331_v56  ;;  %v7611_v45 = vadd.f32 %v4508_v14, %v4122_v11  ;;  %v10249_v29 = vld [vmem:[#allocation153_spill] sm:$0xff]  ;;  %v1362_v0 = vmul.f32 %v6669_v44, %v1233_v39  ;;  %v1812_v20 = vmul.f32 %v6672_v9, %v1683_v47  ;;  %v7636_v41 = vpop.permute.xlu1 %911  ;;  %v7638_v40 = vpop.permute.xlu0 %906  ;;  %v10257_v47 = vld [vmem:[#allocation158_spill] sm:$0xff] }
 0x21d   : > { %10243 = vst [vmem:[#allocation115_spill] sm:$0xff] %v7603_v12  ;;  %v2969_v12 = vadd.f32 %v10248_v26, %v7331_v56  ;;  %v3419_v14 = vadd.f32 %v10249_v29, %v7331_v56  ;;  %v7621_v11 = vpop.permute.xlu2 %961  ;;  %v3224_v15 = vadd.f32 %v3160_v8, %v2774_v42  ;;  %v7643_v26 = vadd.f32 %v10257_v47, %v7636_v41  ;;  %v10259_v29 = vld [vmem:[#allocation159_spill] sm:$0xff]  ;;  %v10264_v47 = vld [vmem:[#allocation93_spill] sm:$0xff] }
 0x21e   : > { %v2133_v23 = vmax.f32 %v2069_v10, 0.0  ;;  %10250 = vst [vmem:[#allocation26_spill] sm:$0xff] %v7621_v11  ;;  %v7630_v53 = vadd.f32 %v10252_v54, %v7621_v11  ;;  %v10254_v10 = vld [vmem:[#allocation201_spill] sm:$0xff]  ;;  %v7647_v46 = vadd.f32 %v10259_v29, %v7636_v41  ;;  %v3933_v42 = vmax.f32 %v3869_v60, 0.0  ;;  %v10265_v29 = vld [vmem:[#allocation94_spill] sm:$0xff] }
 0x21f   : > { %v7634_v55 = vadd.f32 %v10254_v10, %v7621_v11  ;;  %10256 = vst [vmem:[#allocation29_spill] sm:$0xff] %v7636_v41  ;;  %v10261_v54 = vld [vmem:[#allocation109_spill] sm:$0xff]  ;;  %v2712_v10 = vmul.f32 %v6678_v37, %v2583_v27  ;;  %v3674_v11 = vadd.f32 %v3610_v4, %v3224_v15  ;;  %v3033_v48 = vmax.f32 %v2969_v12, 0.0  ;;  %v10267_v15 = vld [vmem:[#allocation95_spill] sm:$0xff] }
 0x220   : > { %10253 = vst [vmem:[#allocation27_spill] sm:$0xff] %v7630_v53  ;;  %v2262_v39 = vmul.f32 %v6675_v24, %v2133_v23  ;;  %v7651_v53 = vadd.f32 %v10261_v54, %v7638_v40  ;;  %v3483_v8 = vmax.f32 %v3419_v14, 0.0  ;;  %v10263_v23 = vld [vmem:[#allocation155_spill] sm:$0xff]  ;;  %v1618_v41 = vadd.f32 %v10265_v29, %v7333_v5  ;;  %4759 = vadd.xlane.f32.xlu2 %v7259_v52 }
 0x221   : > { %10255 = vst [vmem:[#allocation28_spill] sm:$0xff] %v7634_v55  ;;  %v1876_v55 = vadd.f32 %v1812_v20, %v1362_v0  ;;  %v4319_v62 = vadd.f32 %v10263_v23, %v7331_v56  ;;  %v3162_v4 = vmul.f32 %v6684_v17, %v3033_v48  ;;  %v4062_v60 = vmul.f32 %v6752_v50, %v3933_v42 }
 0x222   : > { %10258 = vst [vmem:[#allocation32_spill] sm:$0xff] %v7643_v26  ;;  %v1168_v26 = vadd.f32 %v10264_v47, %v7333_v5  ;;  %v3612_v12 = vmul.f32 %v6687_v57, %v3483_v8  ;;  %v1682_v20 = vmax.f32 %v1618_v41, 0.0  ;;  %v2068_v23 = vadd.f32 %v10267_v15, %v7333_v5  ;;  %v10271_v41 = vld [vmem:[#allocation210_spill] sm:$0xff] }
 0x223   : > { %10260 = vst [vmem:[#allocation33_spill] sm:$0xff] %v7647_v46  ;;  %v10266_v46 = vld [vmem:[#allocation110_spill] sm:$0xff]  ;;  %v2326_v27 = vadd.f32 %v2262_v39, %v1876_v55  ;;  %v4383_v14 = vmax.f32 %v4319_v62, 0.0  ;;  %v10270_v55 = vld [vmem:[#allocation97_spill] sm:$0xff] }
 0x224   : > { %10262 = vst [vmem:[#allocation34_spill] sm:$0xff] %v7651_v53  ;;  %v7662_v54 = vadd.f32 %v10266_v46, %v7638_v40  ;;  %v4124_v53 = vadd.f32 %v4060_v58, %v3674_v11  ;;  %v1232_v0 = vmax.f32 %v1168_v26, 0.0  ;;  %v10268_v46 = vld [vmem:[#allocation96_spill] sm:$0xff]  ;;  %v1811_v62 = vmul.f32 %v6672_v9, %v1682_v20  ;;  %v7684_v26 = vpop.permute.xlu1 %926 }
 0x225   : > { %v2776_v56 = vadd.f32 %v2712_v10, %v2326_v27  ;;  %v2518_v47 = vadd.f32 %v10268_v46, %v7333_v5  ;;  %v7672_v58 = vpop.permute.xlu2 %976  ;;  %v2968_v52 = vadd.f32 %v10270_v55, %v7333_v5  ;;  %10273 = vst [vmem:[#allocation129_spill] sm:$0xff] %v7684_v26  ;;  %v7686_v10 = vpop.permute.xlu0 %921  ;;  %v4512_v42 = vmul.f32 %v6906_v63, %v4383_v14  ;;  %v10276_v27 = vld [vmem:[#allocation163_spill] sm:$0xff]  ;;  %v10277_v20 = vld [vmem:[#allocation164_spill] sm:$0xff] }
 0x226   : > { %10269 = vst [vmem:[#allocation35_spill] sm:$0xff] %v7672_v58  ;;  %v7674_v11 = vadd.f32 %v4510_v33, %v4124_v53  ;;  %v1361_v48 = vmul.f32 %v6669_v44, %v1232_v0  ;;  %v7682_v39 = vadd.f32 %v10271_v41, %v7672_v58  ;;  %v2132_v33 = vmax.f32 %v2068_v23, 0.0  ;;  %v10274_v53 = vld [vmem:[#allocation211_spill] sm:$0xff]  ;;  %v10279_v46 = vld [vmem:[#allocation112_spill] sm:$0xff] }
 0x227   : > { %v3226_v8 = vadd.f32 %v3162_v4, %v2776_v56  ;;  %v7691_v29 = vadd.f32 %v10274_v53, %v7672_v58  ;;  %v7695_v0 = vadd.f32 %v10276_v27, %v7684_v26  ;;  %v7699_v15 = vadd.f32 %v10277_v20, %v7684_v26  ;;  %v10280_v53 = vld [vmem:[#allocation98_spill] sm:$0xff]  ;;  %v10281_v27 = vld [vmem:[#allocation99_spill] sm:$0xff] }
 0x228   : > { %10272 = vst [vmem:[#allocation128_spill] sm:$0xff] %v7682_v39  ;;  %v7703_v55 = vadd.f32 %v10279_v46, %v7686_v10  ;;  %v1875_v56 = vadd.f32 %v1811_v62, %v1361_v48  ;;  %v2261_v14 = vmul.f32 %v6675_v24, %v2132_v33  ;;  %v2582_v23 = vmax.f32 %v2518_v47, 0.0  ;;  %v10282_v39 = vld [vmem:[#allocation100_spill] sm:$0xff]  ;;  %v10284_v62 = vld [vmem:[#allocation113_spill] sm:$0xff]  ;;  %4765 = vadd.xlane.f32.xlu2 %v7323_v18 }
 0x229   : > { %10275 = vst [vmem:[#allocation85_spill] sm:$0xff] %v7691_v29  ;;  %v3676_v4 = vadd.f32 %v3612_v12, %v3226_v8  ;;  %v3032_v41 = vmax.f32 %v2968_v52, 0.0  ;;  %v3418_v58 = vadd.f32 %v10280_v53, %v7333_v5  ;;  %v3868_v29 = vadd.f32 %v10281_v27, %v7333_v5  ;;  %v10283_v12 = vld [vmem:[#allocation156_spill] sm:$0xff] }
 0x22a   : > { %10278 = vst [vmem:[#allocation86_spill] sm:$0xff] %v7699_v15  ;;  %v4318_v20 = vadd.f32 %v10282_v39, %v7333_v5  ;;  %v2325_v15 = vadd.f32 %v2261_v14, %v1875_v56  ;;  %v2711_v46 = vmul.f32 %v6678_v37, %v2582_v23  ;;  %v1170_v48 = vadd.f32 %v10283_v12, %v7187_v13  ;;  %v10291_v12 = vld [vmem:[#allocation174_spill] sm:$0xff] }
 0x22b   : > { %v4126_v26 = vadd.f32 %v4062_v60, %v3676_v4  ;;  %v7717_v47 = vadd.f32 %v10284_v62, %v7686_v10  ;;  %v3482_v52 = vmax.f32 %v3418_v58, 0.0  ;;  %v3932_v8 = vmax.f32 %v3868_v29, 0.0  ;;  %v10285_v60 = vld [vmem:[#allocation160_spill] sm:$0xff]  ;;  %v10287_v58 = vld [vmem:[#allocation161_spill] sm:$0xff] }
 0x22c   : > { %v4382_v33 = vmax.f32 %v4318_v20, 0.0  ;;  %v2775_v53 = vadd.f32 %v2711_v46, %v2325_v15  ;;  %v3161_v27 = vmul.f32 %v6684_v17, %v3032_v41  ;;  %v1234_v5 = vmax.f32 %v1170_v48, 0.0  ;;  %v7735_v15 = vpop.permute.xlu1 %941  ;;  %4763 = vadd.xlane.f32.xlu1 %v7357_v59  ;;  %v10292_v48 = vld [vmem:[#allocation177_spill] sm:$0xff]  ;;  %v10293_v59 = vld [vmem:[#allocation124_spill] sm:$0xff] }
 0x22d   : > { %v1620_v39 = vadd.f32 %v10285_v60, %v7187_v13  ;;  %v7723_v4 = vpop.permute.xlu2 %991  ;;  %v7725_v56 = vadd.f32 %v4512_v42, %v4126_v26  ;;  %v3611_v14 = vmul.f32 %v6687_v57, %v3482_v52  ;;  %v4061_v23 = vmul.f32 %v6752_v50, %v3932_v8  ;;  %10289 = vst [vmem:[#allocation101_spill] sm:$0xff] %v7735_v15  ;;  %v7737_v41 = vpop.permute.xlu0 %936  ;;  %v10296_v60 = vld [vmem:[#allocation165_spill] sm:$0xff] }
 0x22e   : > { %10286 = vst [vmem:[#allocation91_spill] sm:$0xff] %v7723_v4  ;;  %v2070_v29 = vadd.f32 %v10287_v58, %v7187_v13  ;;  %v7733_v18 = vadd.f32 %v6725_v61, %v7723_v4  ;;  %4761 = vadd.xlane.f32.xlu0 %v7098_v6  ;;  %v3225_v26 = vadd.f32 %v3161_v27, %v2775_v53  ;;  %v10297_v58 = vld [vmem:[#allocation166_spill] sm:$0xff] }
 0x22f   : > { %v4511_v42 = vmul.f32 %v6906_v63, %v4382_v33  ;;  %v1684_v20 = vmax.f32 %v1620_v39, 0.0  ;;  %v7744_v46 = vadd.f32 %v6729_v38, %v7723_v4  ;;  %v7748_v61 = vadd.f32 %v10291_v12, %v7735_v15  ;;  %v10295_v38 = vld [vmem:[#allocation162_spill] sm:$0xff] }
 0x230   : > { %10288 = vst [vmem:[#allocation92_spill] sm:$0xff] %v7733_v18  ;;  %v7752_v62 = vadd.f32 %v10292_v48, %v7735_v15  ;;  %v7756_v52 = vadd.f32 %v10293_v59, %v7737_v41  ;;  %v3675_v6 = vadd.f32 %v3611_v14, %v3225_v26  ;;  %v1363_v8 = vmul.f32 %v6669_v44, %v1234_v5  ;;  %v10298_v48 = vld [vmem:[#allocation167_spill] sm:$0xff]  ;;  %v10299_v5 = vld [vmem:[#allocation168_spill] sm:$0xff] }
 0x231   : > { %10290 = vst [vmem:[#allocation102_spill] sm:$0xff] %v7744_v46  ;;  %v1813_v33 = vmul.f32 %v6672_v9, %v1684_v20  ;;  %v2134_v53 = vmax.f32 %v2070_v29, 0.0  ;;  %v2520_v27 = vadd.f32 %v10295_v38, %v7187_v13  ;;  %v2970_v39 = vadd.f32 %v10296_v60, %v7187_v13  ;;  %4767 = vadd.xlane.f32.xlu2 %v7296_v36  ;;  %v10304_v36 = vld [vmem:[#allocation238_spill] sm:$0xff] }
 0x232   : > { %10294 = vst [vmem:[#allocation103_spill] sm:$0xff] %v7756_v52  ;;  %v3420_v12 = vadd.f32 %v10297_v58, %v7187_v13  ;;  %v3870_v4 = vadd.f32 %v10298_v48, %v7187_v13  ;;  %v4125_v59 = vadd.f32 %v4061_v23, %v3675_v6  ;;  %v4320_v26 = vadd.f32 %v10299_v5, %v7187_v13  ;;  %v10300_v52 = vld [vmem:[#allocation125_spill] sm:$0xff]  ;;  %v10311_v5 = vld [vmem:[#allocation139_spill] sm:$0xff] }
 0x233   : > { %v1877_v46 = vadd.f32 %v1813_v33, %v1363_v8  ;;  %v2263_v14 = vmul.f32 %v6675_v24, %v2134_v53  ;;  %v2584_v29 = vmax.f32 %v2520_v27, 0.0  ;;  %v3034_v20 = vmax.f32 %v2970_v39, 0.0  ;;  %v10301_v23 = vld [vmem:[#allocation181_spill] sm:$0xff] }
 0x234   : > { %v3484_v18 = vmax.f32 %v3420_v12, 0.0  ;;  %v3934_v38 = vmax.f32 %v3870_v4, 0.0  ;;  %v7773_v60 = vadd.f32 %v10300_v52, %v7737_v41  ;;  %v4384_v15 = vmax.f32 %v4320_v26, 0.0  ;;  %v7793_v27 = vpop.permute.xlu1 %956  ;;  %4771 = vadd.xlane.f32.xlu1 %v7421_v28 }
 0x235   : > { %v2327_v58 = vadd.f32 %v2263_v14, %v1877_v46  ;;  %v1172_v6 = vadd.f32 %v10301_v23, %v7380_v16  ;;  %v7778_v8 = vpop.permute.xlu2 %1006  ;;  %v7780_v33 = vadd.f32 %v4511_v42, %v4125_v59  ;;  %v2713_v13 = vmul.f32 %v6678_v37, %v2584_v29  ;;  %10306 = vst [vmem:[#allocation107_spill] sm:$0xff] %v7793_v27  ;;  %v7795_v39 = vpop.permute.xlu0 %951  ;;  %v10315_v23 = vld [vmem:[#allocation185_spill] sm:$0xff] }
 0x236   : > { %10302 = vst [vmem:[#allocation104_spill] sm:$0xff] %v7778_v8  ;;  %v3163_v53 = vmul.f32 %v6684_v17, %v3034_v20  ;;  %v3613_v4 = vmul.f32 %v6687_v57, %v3484_v18  ;;  %v7787_v52 = vadd.f32 %v6798_v19, %v7778_v8  ;;  %v7791_v46 = vadd.f32 %v10304_v36, %v7778_v8  ;;  %v10307_v18 = vld [vmem:[#allocation205_spill] sm:$0xff]  ;;  %v10309_v19 = vld [vmem:[#allocation206_spill] sm:$0xff]  ;;  %v10314_v20 = vld [vmem:[#allocation183_spill] sm:$0xff] }
 0x237   : > { %4769 = vadd.xlane.f32.xlu0 %v7456_v31  ;;  %v4063_v42 = vmul.f32 %v6752_v50, %v3934_v38  ;;  %v7802_v12 = vadd.f32 %v10307_v18, %v7793_v27  ;;  %v7806_v48 = vadd.f32 %v10309_v19, %v7793_v27  ;;  %v4513_v59 = vmul.f32 %v6906_v63, %v4384_v15  ;;  %v10313_v31 = vld [vmem:[#allocation182_spill] sm:$0xff]  ;;  %v10317_v15 = vld [vmem:[#allocation187_spill] sm:$0xff]  ;;  %v10318_v8 = vld [vmem:[#allocation188_spill] sm:$0xff] }
 0x238   : > { %10303 = vst [vmem:[#allocation105_spill] sm:$0xff] %v7787_v52  ;;  %v1236_v14 = vmax.f32 %v1172_v6, 0.0  ;;  %v7811_v26 = vadd.f32 %v10311_v5, %v7795_v39  ;;  %v2777_v28 = vadd.f32 %v2713_v13, %v2327_v58  ;;  %v1622_v29 = vadd.f32 %v10313_v31, %v7380_v16  ;;  %v10316_v18 = vld [vmem:[#allocation186_spill] sm:$0xff]  ;;  %v10319_v31 = vld [vmem:[#allocation189_spill] sm:$0xff] }
 0x239   : > { %10305 = vst [vmem:[#allocation106_spill] sm:$0xff] %v7791_v46  ;;  %v2072_v38 = vadd.f32 %v10314_v20, %v7380_v16  ;;  %v2522_v36 = vadd.f32 %v10315_v23, %v7380_v16  ;;  %v2972_v19 = vadd.f32 %v10316_v18, %v7380_v16  ;;  %v3422_v6 = vadd.f32 %v10317_v15, %v7380_v16  ;;  %v10320_v23 = vld [vmem:[#allocation140_spill] sm:$0xff] }
 0x23a   : > { %10308 = vst [vmem:[#allocation108_spill] sm:$0xff] %v7802_v12  ;;  %v3872_v5 = vadd.f32 %v10318_v8, %v7380_v16  ;;  %v3227_v46 = vadd.f32 %v3163_v53, %v2777_v28  ;;  %v1686_v58 = vmax.f32 %v1622_v29, 0.0  ;;  %v4322_v52 = vadd.f32 %v10319_v31, %v7380_v16  ;;  %4773 = vadd.xlane.f32.xlu2 %v7459_v32  ;;  %v10324_v32 = vld [vmem:[#allocation259_spill] sm:$0xff] }
 0x23b   : > { %10310 = vst [vmem:[#allocation63_spill] sm:$0xff] %v7806_v48  ;;  %v2136_v13 = vmax.f32 %v2072_v38, 0.0  ;;  %v3036_v20 = vmax.f32 %v2972_v19, 0.0  ;;  %v3486_v27 = vmax.f32 %v3422_v6, 0.0  ;;  %v7829_v12 = vadd.f32 %v10320_v23, %v7795_v39  ;;  %v10331_v23 = vld [vmem:[#allocation178_spill] sm:$0xff] }
 0x23c   : > { %10312 = vst [vmem:[#allocation64_spill] sm:$0xff] %v7811_v26  ;;  %v2586_v26 = vmax.f32 %v2522_v36, 0.0  ;;  %v3936_v48 = vmax.f32 %v3872_v5, 0.0  ;;  %v3677_v18 = vadd.f32 %v3613_v4, %v3227_v46  ;;  %v1365_v15 = vmul.f32 %v6669_v44, %v1236_v14  ;;  %v10322_v36 = vld [vmem:[#allocation258_spill] sm:$0xff]  ;;  %v7848_v46 = vpop.permute.xlu1 %971  ;;  %4777 = vadd.xlane.f32.xlu1 %v7558_v3  ;;  %v10333_v3 = vld [vmem:[#allocation179_spill] sm:$0xff] }
 0x23d   : > { %v1815_v8 = vmul.f32 %v6672_v9, %v1686_v58  ;;  %v7834_v53 = vpop.permute.xlu2 %1021  ;;  %v2265_v28 = vmul.f32 %v6675_v24, %v2136_v13  ;;  %v3165_v29 = vmul.f32 %v6684_v17, %v3036_v20  ;;  %v3615_v38 = vmul.f32 %v6687_v57, %v3486_v27  ;;  %10326 = vst [vmem:[#allocation117_spill] sm:$0xff] %v7848_v46  ;;  %v7850_v14 = vpop.permute.xlu0 %966  ;;  %v10328_v27 = vld [vmem:[#allocation243_spill] sm:$0xff]  ;;  %v10329_v58 = vld [vmem:[#allocation246_spill] sm:$0xff] }
 0x23e   : > { %10321 = vst [vmem:[#allocation65_spill] sm:$0xff] %v7834_v53  ;;  %v2715_v16 = vmul.f32 %v6678_v37, %v2586_v26  ;;  %v7842_v19 = vadd.f32 %v10322_v36, %v7834_v53  ;;  %v7846_v4 = vadd.f32 %v10324_v32, %v7834_v53  ;;  %v4065_v26 = vmul.f32 %v6752_v50, %v3936_v48  ;;  %v10335_v48 = vld [vmem:[#allocation133_spill] sm:$0xff] }
 0x23f   : > { %10327 = vst [vmem:[#allocation79_spill] sm:$0xff] %v7850_v14  ;;  %4775 = vadd.xlane.f32.xlu0 %v7611_v45  ;;  %v4386_v6 = vmax.f32 %v4322_v52, 0.0  ;;  %v7857_v5 = vadd.f32 %v10328_v27, %v7848_v46  ;;  %v7861_v13 = vadd.f32 %v10329_v58, %v7848_v46  ;;  %v4127_v31 = vadd.f32 %v4063_v42, %v3677_v18  ;;  %v10336_v27 = vld [vmem:[#allocation134_spill] sm:$0xff]  ;;  %v10337_v58 = vld [vmem:[#allocation135_spill] sm:$0xff]  ;;  %v10338_v18 = vld [vmem:[#allocation136_spill] sm:$0xff] }
 0x240   : > { %10323 = vst [vmem:[#allocation157_spill] sm:$0xff] %v7842_v19  ;;  %v7866_v36 = vadd.f32 %v10331_v23, %v7850_v14  ;;  %v7870_v45 = vadd.f32 %v10333_v3, %v7850_v14  ;;  %v1879_v52 = vadd.f32 %v1815_v8, %v1365_v15  ;;  %v1171_v32 = vadd.f32 %v10335_v48, %v7382_v7  ;;  %v10339_v23 = vld [vmem:[#allocation137_spill] sm:$0xff]  ;;  %v10340_v3 = vld [vmem:[#allocation138_spill] sm:$0xff] }
 0x241   : > { %10325 = vst [vmem:[#allocation116_spill] sm:$0xff] %v7846_v4  ;;  %v1621_v53 = vadd.f32 %v10336_v27, %v7382_v7  ;;  %v2071_v42 = vadd.f32 %v10337_v58, %v7382_v7  ;;  %v2521_v20 = vadd.f32 %v10338_v18, %v7382_v7  ;;  %v2971_v4 = vadd.f32 %v10339_v23, %v7382_v7  ;;  %v10341_v8 = vld [vmem:[#allocation141_spill] sm:$0xff] }
 0x242   : > { %10330 = vst [vmem:[#allocation66_spill] sm:$0xff] %v7861_v13  ;;  %v2329_v19 = vadd.f32 %v2265_v28, %v1879_v52  ;;  %v3421_v15 = vadd.f32 %v10340_v3, %v7382_v7  ;;  %v3871_v48 = vadd.f32 %v10341_v8, %v7382_v7  ;;  %4779 = vadd.xlane.f32.xlu2 %v7674_v11 }
 0x243   : > { %10332 = vst [vmem:[#allocation67_spill] sm:$0xff] %v7866_v36  ;;  %v1235_v36 = vmax.f32 %v1171_v32, 0.0  ;;  %v1685_v14 = vmax.f32 %v1621_v53, 0.0  ;;  %v2585_v27 = vmax.f32 %v2521_v20, 0.0  ;;  %v3035_v46 = vmax.f32 %v2971_v4, 0.0  ;;  %v10343_v20 = vld [vmem:[#allocation271_spill] sm:$0xff] }
 0x244   : > { %10334 = vst [vmem:[#allocation68_spill] sm:$0xff] %v7870_v45  ;;  %v2135_v45 = vmax.f32 %v2071_v42, 0.0  ;;  %v4577_v58 = vadd.f32 %v4513_v59, %v4127_v31  ;;  %v2779_v13 = vadd.f32 %v2715_v16, %v2329_v19  ;;  %v4515_v18 = vmul.f32 %v6906_v63, %v4386_v6  ;;  %v7898_v11 = vpop.permute.xlu1 %986  ;;  %4783 = vadd.xlane.f32.xlu1 %v7725_v56  ;;  %v10347_v6 = vld [vmem:[#allocation272_spill] sm:$0xff]  ;;  %v10350_v42 = vld [vmem:[#allocation222_spill] sm:$0xff]  ;;  %v10358_v56 = vld [vmem:[#allocation213_spill] sm:$0xff] }
 0x245   : > { %v1364_v23 = vmul.f32 %v6669_v44, %v1235_v36  ;;  %v7889_v28 = vpop.permute.xlu2 %1036  ;;  %v1814_v52 = vmul.f32 %v6672_v9, %v1685_v14  ;;  %v2714_v3 = vmul.f32 %v6678_v37, %v2585_v27  ;;  %v3485_v53 = vmax.f32 %v3421_v15, 0.0  ;;  %10345 = vst [vmem:[#allocation73_spill] sm:$0xff] %v7898_v11  ;;  %v7900_v59 = vpop.permute.xlu0 %981  ;;  %v10349_v36 = vld [vmem:[#allocation221_spill] sm:$0xff]  ;;  %v10355_v27 = vld [vmem:[#allocation142_spill] sm:$0xff] }
 0x246   : > { %10342 = vst [vmem:[#allocation80_spill] sm:$0xff] %v7889_v28  ;;  %v2264_v32 = vmul.f32 %v6675_v24, %v2135_v45  ;;  %v7896_v4 = vadd.f32 %v10343_v20, %v7889_v28  ;;  %v3229_v16 = vadd.f32 %v3165_v29, %v2779_v13  ;;  %v3164_v19 = vmul.f32 %v6684_v17, %v3035_v46  ;;  %v10353_v46 = vld [vmem:[#allocation245_spill] sm:$0xff] }
 0x247   : > { %10346 = vst [vmem:[#allocation111_spill] sm:$0xff] %v7900_v59  ;;  %4781 = vadd.xlane.f32.xlu0 %v7780_v33  ;;  %v3935_v14 = vmax.f32 %v3871_v48, 0.0  ;;  %v7907_v31 = vadd.f32 %v10347_v6, %v7889_v28  ;;  %v7911_v45 = vadd.f32 %v10349_v36, %v7898_v11  ;;  %v7915_v15 = vadd.f32 %v10350_v42, %v7898_v11  ;;  %v10351_v33 = vld [vmem:[#allocation244_spill] sm:$0xff]  ;;  %v10356_v6 = vld [vmem:[#allocation190_spill] sm:$0xff] }
 0x248   : > { %10344 = vst [vmem:[#allocation69_spill] sm:$0xff] %v7896_v4  ;;  %v7920_v29 = vadd.f32 %v10351_v33, %v7900_v59  ;;  %v7924_v13 = vadd.f32 %v10353_v46, %v7900_v59  ;;  %v3679_v8 = vadd.f32 %v3615_v38, %v3229_v16  ;;  %v1878_v48 = vadd.f32 %v1814_v52, %v1364_v23  ;;  %v10357_v42 = vld [vmem:[#allocation212_spill] sm:$0xff]  ;;  %v10360_v38 = vld [vmem:[#allocation217_spill] sm:$0xff] }
 0x249   : > { %10348 = vst [vmem:[#allocation130_spill] sm:$0xff] %v7907_v31  ;;  %v4321_v20 = vadd.f32 %v10355_v27, %v7382_v7  ;;  %v1173_v36 = vadd.f32 %v10356_v6, %v7229_v22  ;;  %v1623_v28 = vadd.f32 %v10357_v42, %v7229_v22  ;;  %v2073_v31 = vadd.f32 %v10358_v56, %v7229_v22 }
 0x24a   : > { %10352 = vst [vmem:[#allocation132_spill] sm:$0xff] %v7920_v29  ;;  %v4129_v33 = vadd.f32 %v4065_v26, %v3679_v8  ;;  %v2328_v4 = vadd.f32 %v2264_v32, %v1878_v48  ;;  %v10359_v29 = vld [vmem:[#allocation214_spill] sm:$0xff]  ;;  %v2973_v23 = vadd.f32 %v10360_v38, %v7229_v22  ;;  %4785 = vadd.xlane.f32.xlu2 %v4577_v58  ;;  %v10362_v8 = vld [vmem:[#allocation280_spill] sm:$0xff] }
 0x24b   : > { %10354 = vst [vmem:[#allocation83_spill] sm:$0xff] %v7924_v13  ;;  %v2523_v46 = vadd.f32 %v10359_v29, %v7229_v22  ;;  %v4385_v52 = vmax.f32 %v4321_v20, 0.0  ;;  %v1237_v16 = vmax.f32 %v1173_v36, 0.0  ;;  %v1687_v7 = vmax.f32 %v1623_v28, 0.0  ;;  %v10368_v36 = vld [vmem:[#allocation241_spill] sm:$0xff] }
 0x24c   : > { %v2137_v27 = vmax.f32 %v2073_v31, 0.0  ;;  %v4579_v6 = vadd.f32 %v4515_v18, %v4129_v33  ;;  %v2778_v59 = vadd.f32 %v2714_v3, %v2328_v4  ;;  %v3614_v42 = vmul.f32 %v6687_v57, %v3485_v53  ;;  %v7948_v28 = vpop.permute.xlu1 %1001  ;;  %v10365_v4 = vld [vmem:[#allocation281_spill] sm:$0xff]  ;;  %v10367_v31 = vld [vmem:[#allocation240_spill] sm:$0xff] }
 0x24d   : > { %v2587_v13 = vmax.f32 %v2523_v46, 0.0  ;;  %v7939_v11 = vpop.permute.xlu2 %1051  ;;  %v4064_v26 = vmul.f32 %v6752_v50, %v3935_v14  ;;  %v1366_v32 = vmul.f32 %v6669_v44, %v1237_v16  ;;  %v1816_v56 = vmul.f32 %v6672_v9, %v1687_v7  ;;  %10364 = vst [vmem:[#allocation121_spill] sm:$0xff] %v7948_v28  ;;  %v7950_v58 = vpop.permute.xlu0 %996  ;;  %v10372_v7 = vld [vmem:[#allocation224_spill] sm:$0xff] }
 0x24e   : > { %10361 = vst [vmem:[#allocation84_spill] sm:$0xff] %v7939_v11  ;;  %v3037_v29 = vmax.f32 %v2973_v23, 0.0  ;;  %v7946_v48 = vadd.f32 %v10362_v8, %v7939_v11  ;;  %4789 = vadd.xlane.f32.xlu1 %v4579_v6  ;;  %v3228_v18 = vadd.f32 %v3164_v19, %v2778_v59  ;;  %v4514_v3 = vmul.f32 %v6906_v63, %v4385_v52  ;;  %v10369_v59 = vld [vmem:[#allocation169_spill] sm:$0xff]  ;;  %v10371_v52 = vld [vmem:[#allocation218_spill] sm:$0xff] }
 0x24f   : > { %v2266_v53 = vmul.f32 %v6675_v24, %v2137_v27  ;;  %v7956_v14 = vadd.f32 %v10365_v4, %v7939_v11  ;;  %v7960_v20 = vadd.f32 %v10367_v31, %v7948_v28  ;;  %v7964_v33 = vadd.f32 %v10368_v36, %v7948_v28  ;;  %v10373_v6 = vld [vmem:[#allocation225_spill] sm:$0xff]  ;;  %v10374_v4 = vld [vmem:[#allocation247_spill] sm:$0xff] }
 0x250   : > { %10363 = vst [vmem:[#allocation120_spill] sm:$0xff] %v7946_v48  ;;  %v2716_v46 = vmul.f32 %v6678_v37, %v2587_v13  ;;  %v7969_v19 = vadd.f32 %v10369_v59, %v7950_v58  ;;  %v3678_v38 = vadd.f32 %v3614_v42, %v3228_v18  ;;  %v1880_v23 = vadd.f32 %v1816_v56, %v1366_v32  ;;  %v10375_v13 = vld [vmem:[#allocation248_spill] sm:$0xff]  ;;  %v10376_v42 = vld [vmem:[#allocation249_spill] sm:$0xff] }
 0x251   : > { %10366 = vst [vmem:[#allocation122_spill] sm:$0xff] %v7956_v14  ;;  %v3423_v16 = vadd.f32 %v10371_v52, %v7229_v22  ;;  %v3873_v27 = vadd.f32 %v10372_v7, %v7229_v22  ;;  %v4323_v8 = vadd.f32 %v10373_v6, %v7229_v22  ;;  %v1175_v31 = vadd.f32 %v10374_v4, %v7429_v25  ;;  %v10377_v4 = vld [vmem:[#allocation170_spill] sm:$0xff] }
 0x252   : > { %10370 = vst [vmem:[#allocation123_spill] sm:$0xff] %v7969_v19  ;;  %v1625_v36 = vadd.f32 %v10375_v13, %v7429_v25  ;;  %v4128_v11 = vadd.f32 %v4064_v26, %v3678_v38  ;;  %v2330_v59 = vadd.f32 %v2266_v53, %v1880_v23  ;;  %v2075_v32 = vadd.f32 %v10376_v42, %v7429_v25 }
 0x253   : > { %v3487_v14 = vmax.f32 %v3423_v16, 0.0  ;;  %v3937_v56 = vmax.f32 %v3873_v27, 0.0  ;;  %v4387_v18 = vmax.f32 %v4323_v8, 0.0  ;;  %v1239_v52 = vmax.f32 %v1175_v31, 0.0  ;;  %v10384_v31 = vld [vmem:[#allocation261_spill] sm:$0xff] }
 0x254   : > { %v1689_v48 = vmax.f32 %v1625_v36, 0.0  ;;  %v4578_v7 = vadd.f32 %v4514_v3, %v4128_v11  ;;  %v2780_v19 = vadd.f32 %v2716_v46, %v2330_v59  ;;  %v3166_v22 = vmul.f32 %v6684_v17, %v3037_v29  ;;  %v10379_v29 = vld [vmem:[#allocation286_spill] sm:$0xff]  ;;  %v7999_v27 = vpop.permute.xlu1 %1016 }
 0x255   : > { %v2139_v6 = vmax.f32 %v2075_v32, 0.0  ;;  %v7986_v28 = vadd.f32 %v10377_v4, %v7950_v58  ;;  %v3616_v26 = vmul.f32 %v6687_v57, %v3487_v14  ;;  %v7989_v53 = vpop.permute.xlu2 %1066  ;;  %v1368_v38 = vmul.f32 %v6669_v44, %v1239_v52  ;;  %10381 = vst [vmem:[#allocation131_spill] sm:$0xff] %v7999_v27  ;;  %v10382_v14 = vld [vmem:[#allocation287_spill] sm:$0xff]  ;;  %v8014_v42 = vpop.permute.xlu0 %1011 }
 0x256   : > { %10378 = vst [vmem:[#allocation126_spill] sm:$0xff] %v7989_v53  ;;  %v1818_v23 = vmul.f32 %v6672_v9, %v1689_v48  ;;  %4787 = vadd.xlane.f32.xlu0 %v4578_v7  ;;  %v3230_v16 = vadd.f32 %v3166_v22, %v2780_v19  ;;  %v4066_v11 = vmul.f32 %v6752_v50, %v3937_v56  ;;  %v10385_v48 = vld [vmem:[#allocation262_spill] sm:$0xff]  ;;  %v10389_v52 = vld [vmem:[#allocation251_spill] sm:$0xff]  ;;  %v10390_v22 = vld [vmem:[#allocation252_spill] sm:$0xff] }
 0x257   : > { %v4516_v3 = vmul.f32 %v6906_v63, %v4387_v18  ;;  %v7997_v46 = vadd.f32 %v10379_v29, %v7989_v53  ;;  %v8003_v8 = vadd.f32 %v10382_v14, %v7989_v53  ;;  %v8007_v13 = vadd.f32 %v10384_v31, %v7999_v27  ;;  %10387 = vst [vmem:[#allocation145_spill] sm:$0xff] %v8014_v42  ;;  %v10388_v56 = vld [vmem:[#allocation250_spill] sm:$0xff]  ;;  %v10391_v29 = vld [vmem:[#allocation253_spill] sm:$0xff] }
 0x258   : > { %v8011_v19 = vadd.f32 %v10385_v48, %v7999_v27  ;;  %v2268_v36 = vmul.f32 %v6675_v24, %v2139_v6  ;;  %v3680_v59 = vadd.f32 %v3616_v26, %v3230_v16  ;;  %v1882_v32 = vadd.f32 %v1818_v23, %v1368_v38  ;;  %v10392_v31 = vld [vmem:[#allocation257_spill] sm:$0xff]  ;;  %v10393_v6 = vld [vmem:[#allocation180_spill] sm:$0xff] }
 0x259   : > { %10380 = vst [vmem:[#allocation127_spill] sm:$0xff] %v7997_v46  ;;  %v2525_v18 = vadd.f32 %v10388_v56, %v7429_v25  ;;  %v2975_v7 = vadd.f32 %v10389_v52, %v7429_v25  ;;  %v3425_v4 = vadd.f32 %v10390_v22, %v7429_v25  ;;  %v3875_v14 = vadd.f32 %v10391_v29, %v7429_v25  ;;  %v10394_v56 = vld [vmem:[#allocation195_spill] sm:$0xff]  ;;  %v10396_v52 = vld [vmem:[#allocation196_spill] sm:$0xff] }
 0x25a   : > { %10383 = vst [vmem:[#allocation173_spill] sm:$0xff] %v8003_v8  ;;  %v4325_v48 = vadd.f32 %v10392_v31, %v7429_v25  ;;  %v1174_v26 = vadd.f32 %v10393_v6, %v7431_v1  ;;  %v4130_v16 = vadd.f32 %v4066_v11, %v3680_v59  ;;  %v2332_v38 = vadd.f32 %v2268_v36, %v1882_v32  ;;  %v10398_v6 = vld [vmem:[#allocation184_spill] sm:$0xff] }
 0x25b   : > { %10386 = vst [vmem:[#allocation143_spill] sm:$0xff] %v8011_v19  ;;  %v2589_v23 = vmax.f32 %v2525_v18, 0.0  ;;  %v3039_v53 = vmax.f32 %v2975_v7, 0.0  ;;  %v8030_v8 = vadd.f32 %v10394_v56, %v8014_v42  ;;  %v8034_v22 = vadd.f32 %v10396_v52, %v8014_v42  ;;  %v10402_v52 = vld [vmem:[#allocation194_spill] sm:$0xff] }
 0x25c   : > { %v3489_v46 = vmax.f32 %v3425_v4, 0.0  ;;  %v1238_v29 = vmax.f32 %v1174_v26, 0.0  ;;  %v4580_v27 = vadd.f32 %v4516_v3, %v4130_v16  ;;  %v3939_v31 = vmax.f32 %v3875_v14, 0.0  ;;  %v10399_v4 = vld [vmem:[#allocation191_spill] sm:$0xff]  ;;  %v10400_v3 = vld [vmem:[#allocation192_spill] sm:$0xff]  ;;  %v10401_v14 = vld [vmem:[#allocation193_spill] sm:$0xff] }
 0x25d   : > { %10395 = vst [vmem:[#allocation89_spill] sm:$0xff] %v8030_v8  ;;  %v2718_v25 = vmul.f32 %v6678_v37, %v2589_v23  ;;  %v1624_v11 = vadd.f32 %v10398_v6, %v7431_v1  ;;  %v3168_v36 = vmul.f32 %v6684_v17, %v3039_v53  ;;  %v4389_v32 = vmax.f32 %v4325_v48, 0.0 }
 0x25e   : > { %10397 = vst [vmem:[#allocation90_spill] sm:$0xff] %v8034_v22  ;;  %v3618_v59 = vmul.f32 %v6687_v57, %v3489_v46  ;;  %v1367_v18 = vmul.f32 %v6669_v44, %v1238_v29  ;;  %4791 = vadd.xlane.f32.xlu2 %v4580_v27  ;;  %v2074_v26 = vadd.f32 %v10399_v4, %v7431_v1  ;;  %v10403_v46 = vld [vmem:[#allocation197_spill] sm:$0xff]  ;;  %v10404_v29 = vld [vmem:[#allocation198_spill] sm:$0xff] }
 0x25f   : > { %v2782_v7 = vadd.f32 %v2718_v25, %v2332_v38  ;;  %v1688_v56 = vmax.f32 %v1624_v11, 0.0  ;;  %v2524_v16 = vadd.f32 %v10400_v3, %v7431_v1  ;;  %v2974_v23 = vadd.f32 %v10401_v14, %v7431_v1 }
 0x260   : > { %v3424_v53 = vadd.f32 %v10402_v52, %v7431_v1  ;;  %v3874_v48 = vadd.f32 %v10403_v46, %v7431_v1  ;;  %v4324_v27 = vadd.f32 %v10404_v29, %v7431_v1  ;;  %v2138_v6 = vmax.f32 %v2074_v26, 0.0 }
 0x261   : > { %v3232_v38 = vadd.f32 %v3168_v36, %v2782_v7  ;;  %v1817_v25 = vmul.f32 %v6672_v9, %v1688_v56  ;;  %v2588_v11 = vmax.f32 %v2524_v16, 0.0  ;;  %v4068_v4 = vmul.f32 %v6752_v50, %v3939_v31 }
 0x262   : > { %v4518_v3 = vmul.f32 %v6906_v63, %v4389_v32  ;;  %v3038_v42 = vmax.f32 %v2974_v23, 0.0  ;;  %v3488_v14 = vmax.f32 %v3424_v53, 0.0  ;;  %v2267_v52 = vmul.f32 %v6675_v24, %v2138_v6  ;;  %v10408_v23 = vld [vmem:[#allocation264_spill] sm:$0xff]  ;;  %v10412_v6 = vld [vmem:[#allocation270_spill] sm:$0xff] }
 0x263   : > { %v3682_v22 = vadd.f32 %v3618_v59, %v3232_v38  ;;  %v1881_v8 = vadd.f32 %v1817_v25, %v1367_v18  ;;  %v3938_v19 = vmax.f32 %v3874_v48, 0.0  ;;  %v2717_v46 = vmul.f32 %v6678_v37, %v2588_v11  ;;  %v10407_v18 = vld [vmem:[#allocation39_spill] sm:$0xff]  ;;  %v8077_v11 = vpop.permute.xlu1 %1031 }
 0x264   : > { %v3167_v1 = vmul.f32 %v6684_v17, %v3038_v42  ;;  %v3617_v36 = vmul.f32 %v6687_v57, %v3488_v14  ;;  %v4388_v7 = vmax.f32 %v4324_v27, 0.0  ;;  %v10405_v31 = vmax.f32 %v7279_v49, 0.0  ;;  %v10409_v48 = vld [vmem:[#allocation267_spill] sm:$0xff]  ;;  %v10410_v42 = vld [vmem:[#allocation268_spill] sm:$0xff]  ;;  %10413 = vst [vmem:[#allocation146_spill] sm:$0xff] %v8077_v11 }
 0x265   : > { %v4132_v56 = vadd.f32 %v4068_v4, %v3682_v22  ;;  %v2331_v26 = vadd.f32 %v2267_v52, %v1881_v8  ;;  %v10406_v16 = vmax.f32 %v7288_v21, 0.0  ;;  %v2076_v53 = vadd.f32 %v10408_v23, %v10407_v18  ;;  %v10411_v22 = vld [vmem:[#allocation269_spill] sm:$0xff] }
 0x266   : > { %v1369_v32 = vmul.f32 %v6669_v44, %v10405_v31  ;;  %v2526_v29 = vadd.f32 %v10409_v48, %v10407_v18  ;;  %v2976_v38 = vadd.f32 %v10410_v42, %v10407_v18  ;;  %v3426_v8 = vadd.f32 %v10411_v22, %v10407_v18  ;;  %v10414_v42 = vld [vmem:[#allocation277_spill] sm:$0xff] }
 0x267   : > { %v1819_v59 = vmul.f32 %v6672_v9, %v10406_v16  ;;  %v4582_v27 = vadd.f32 %v4518_v3, %v4132_v56  ;;  %v2781_v49 = vadd.f32 %v2717_v46, %v2331_v26  ;;  %v3876_v21 = vadd.f32 %v10412_v6, %v10407_v18  ;;  %v10415_v26 = vld [vmem:[#allocation274_spill] sm:$0xff] }
 0x268   : > { %v2140_v4 = vmax.f32 %v2076_v53, 0.0  ;;  %v2590_v14 = vmax.f32 %v2526_v29, 0.0  ;;  %v3040_v52 = vmax.f32 %v2976_v38, 0.0  ;;  %v3490_v31 = vmax.f32 %v3426_v8, 0.0  ;;  %v10419_v6 = vld [vmem:[#allocation202_spill] sm:$0xff] }
 0x269   : > { %v1883_v25 = vadd.f32 %v1819_v59, %v1369_v32  ;;  %4795 = vadd.xlane.f32.xlu1 %v4582_v27  ;;  %v3231_v16 = vadd.f32 %v3167_v1, %v2781_v49  ;;  %v4067_v23 = vmul.f32 %v6752_v50, %v3938_v19  ;;  %v3940_v48 = vmax.f32 %v3876_v21, 0.0  ;;  %v8089_v59 = vpop.permute.xlu0 %1026 }
 0x26a   : > { %v4326_v22 = vadd.f32 %v10414_v42, %v10407_v18  ;;  %v4517_v3 = vmul.f32 %v6906_v63, %v4388_v7  ;;  %v2269_v46 = vmul.f32 %v6675_v24, %v2140_v4  ;;  %v2719_v56 = vmul.f32 %v6678_v37, %v2590_v14  ;;  %10416 = vst [vmem:[#allocation147_spill] sm:$0xff] %v8089_v59  ;;  %v10417_v7 = vld [vmem:[#allocation275_spill] sm:$0xff]  ;;  %v10421_v4 = vld [vmem:[#allocation292_spill] sm:$0xff] }
 0x26b   : > { %v8087_v32 = vadd.f32 %v10415_v26, %v8077_v11  ;;  %v3681_v53 = vadd.f32 %v3617_v36, %v3231_v16  ;;  %v3169_v1 = vmul.f32 %v6684_v17, %v3040_v52  ;;  %v3619_v19 = vmul.f32 %v6687_v57, %v3490_v31  ;;  %v10422_v31 = vld [vmem:[#allocation293_spill] sm:$0xff] }
 0x26c   : > { %v4069_v29 = vmul.f32 %v6752_v50, %v3940_v48  ;;  %v2333_v18 = vadd.f32 %v2269_v46, %v1883_v25  ;;  %v4390_v38 = vmax.f32 %v4326_v22, 0.0  ;;  %v8096_v8 = vadd.f32 %v10417_v7, %v8077_v11  ;;  %v10423_v48 = vld [vmem:[#allocation294_spill] sm:$0xff]  ;;  %v10424_v46 = vld [vmem:[#allocation295_spill] sm:$0xff]  ;;  %v10467_v11 = vld [vmem:[#allocation52_spill] sm:$0xff] }
 0x26d   : > { %v1242_v27 = vmax.f32 %v7489_v35, 0.0  ;;  %v4131_v49 = vadd.f32 %v4067_v23, %v3681_v53  ;;  %v8101_v21 = vadd.f32 %v10419_v6, %v8089_v59  ;;  %v1692_v36 = vmax.f32 %v7493_v51, 0.0 }
 0x26e   : > { %10418 = vst [vmem:[#allocation150_spill] sm:$0xff] %v8096_v8  ;;  %v2078_v14 = vadd.f32 %v10421_v4, %v7474_v2  ;;  %v2783_v52 = vadd.f32 %v2719_v56, %v2333_v18  ;;  %v2528_v16 = vadd.f32 %v10422_v31, %v7474_v2  ;;  %v2978_v42 = vadd.f32 %v10423_v48, %v7474_v2  ;;  %v10425_v56 = vld [vmem:[#allocation296_spill] sm:$0xff]  ;;  %v10426_v31 = vld [vmem:[#allocation297_spill] sm:$0xff] }
 0x26f   : > { %10420 = vst [vmem:[#allocation151_spill] sm:$0xff] %v8101_v21  ;;  %v1371_v25 = vmul.f32 %v6669_v44, %v1242_v27  ;;  %v4581_v35 = vadd.f32 %v4517_v3, %v4131_v49  ;;  %v1821_v23 = vmul.f32 %v6672_v9, %v1692_v36  ;;  %v3428_v26 = vadd.f32 %v10424_v46, %v7474_v2  ;;  %v10428_v46 = vld [vmem:[#allocation226_spill] sm:$0xff] }
 0x270   : > { %v2142_v22 = vmax.f32 %v2078_v14, 0.0  ;;  %v3233_v51 = vadd.f32 %v3169_v1, %v2783_v52  ;;  %v2592_v53 = vmax.f32 %v2528_v16, 0.0  ;;  %v3042_v7 = vmax.f32 %v2978_v42, 0.0  ;;  %v10427_v42 = vld [vmem:[#allocation60_spill] sm:$0xff] }
 0x271   : > { %v3878_v18 = vadd.f32 %v10425_v56, %v7474_v2  ;;  %4793 = vadd.xlane.f32.xlu0 %v4581_v35  ;;  %v1885_v27 = vadd.f32 %v1821_v23, %v1371_v25  ;;  %v3492_v4 = vmax.f32 %v3428_v26, 0.0  ;;  %v4328_v3 = vadd.f32 %v10426_v31, %v7474_v2 }
 0x272   : > { %v2271_v6 = vmul.f32 %v6675_v24, %v2142_v22  ;;  %v3683_v49 = vadd.f32 %v3619_v19, %v3233_v51  ;;  %v4519_v36 = vmul.f32 %v6906_v63, %v4390_v38  ;;  %v2721_v14 = vmul.f32 %v6678_v37, %v2592_v53  ;;  %v10429_v51 = vld [vmem:[#allocation227_spill] sm:$0xff] }
 0x273   : > { %v3942_v48 = vmax.f32 %v3878_v18, 0.0  ;;  %v3171_v52 = vmul.f32 %v6684_v17, %v3042_v7  ;;  %v3621_v16 = vmul.f32 %v6687_v57, %v3492_v4  ;;  %v1241_v35 = vmax.f32 %v10427_v42, 0.0  ;;  %v10431_v4 = vld [vmem:[#allocation230_spill] sm:$0xff] }
 0x274   : > { %v2335_v1 = vadd.f32 %v2271_v6, %v1885_v27  ;;  %v4133_v25 = vadd.f32 %v4069_v29, %v3683_v49  ;;  %v4392_v23 = vmax.f32 %v4328_v3, 0.0  ;;  %v1691_v22 = vmax.f32 %v7507_v43, 0.0  ;;  %v10430_v29 = vld [vmem:[#allocation229_spill] sm:$0xff]  ;;  %v10432_v3 = vld [vmem:[#allocation231_spill] sm:$0xff] }
 0x275   : > { %v2077_v2 = vadd.f32 %v10428_v46, %v7476_v30  ;;  %v4071_v38 = vmul.f32 %v6752_v50, %v3942_v48  ;;  %v1370_v26 = vmul.f32 %v6669_v44, %v1241_v35  ;;  %v2527_v53 = vadd.f32 %v10429_v51, %v7476_v30  ;;  %v10434_v51 = vld [vmem:[#allocation41_spill] sm:$0xff] }
 0x276   : > { %v2785_v19 = vadd.f32 %v2721_v14, %v2335_v1  ;;  %v4583_v7 = vadd.f32 %v4519_v36, %v4133_v25  ;;  %v1820_v56 = vmul.f32 %v6672_v9, %v1691_v22  ;;  %v2977_v27 = vadd.f32 %v10430_v29, %v7476_v30  ;;  %v10433_v36 = vld [vmem:[#allocation232_spill] sm:$0xff] }
 0x277   : > { %v2141_v18 = vmax.f32 %v2077_v2, 0.0  ;;  %v2591_v43 = vmax.f32 %v2527_v53, 0.0  ;;  %v3427_v31 = vadd.f32 %v10431_v4, %v7476_v30  ;;  %v3877_v49 = vadd.f32 %v10432_v3, %v7476_v30  ;;  %v10438_v3 = vld [vmem:[#allocation300_spill] sm:$0xff] }
 0x278   : > { %v3235_v6 = vadd.f32 %v3171_v52, %v2785_v19  ;;  %4797 = vadd.xlane.f32.xlu2 %v4583_v7  ;;  %v1884_v14 = vadd.f32 %v1820_v56, %v1370_v26  ;;  %v3041_v1 = vmax.f32 %v2977_v27, 0.0  ;;  %v4327_v42 = vadd.f32 %v10433_v36, %v7476_v30  ;;  %v10440_v36 = vld [vmem:[#allocation302_spill] sm:$0xff] }
 0x279   : > { %v2270_v48 = vmul.f32 %v6675_v24, %v2141_v18  ;;  %v4521_v25 = vmul.f32 %v6906_v63, %v4392_v23  ;;  %v3491_v22 = vmax.f32 %v3427_v31, 0.0  ;;  %v3941_v52 = vmax.f32 %v3877_v49, 0.0  ;;  %v10435_v18 = vld [vmem:[#allocation42_spill] sm:$0xff]  ;;  %v10436_v23 = vld [vmem:[#allocation40_spill] sm:$0xff] }
 0x27a   : > { %v3685_v35 = vadd.f32 %v3621_v16, %v3235_v6  ;;  %v2720_v2 = vmul.f32 %v6678_v37, %v2591_v43  ;;  %v3170_v19 = vmul.f32 %v6684_v17, %v3041_v1  ;;  %v1243_v53 = vmax.f32 %v10434_v51, 0.0  ;;  %v10437_v6 = vld [vmem:[#allocation299_spill] sm:$0xff]  ;;  %v10443_v51 = vld [vmem:[#allocation22_spill] sm:$0xff] }
 0x27b   : > { %v2334_v46 = vadd.f32 %v2270_v48, %v1884_v14  ;;  %v3620_v26 = vmul.f32 %v6687_v57, %v3491_v22  ;;  %v4391_v56 = vmax.f32 %v4327_v42, 0.0  ;;  %v1693_v29 = vmax.f32 %v10435_v18, 0.0  ;;  %v10442_v22 = vld [vmem:[#allocation21_spill] sm:$0xff] }
 0x27c   : > { %v4135_v7 = vadd.f32 %v4071_v38, %v3685_v35  ;;  %v4070_v30 = vmul.f32 %v6752_v50, %v3941_v52  ;;  %v1372_v16 = vmul.f32 %v6669_v44, %v1243_v53  ;;  %v2079_v4 = vadd.f32 %v10437_v6, %v10436_v23  ;;  %v10439_v38 = vld [vmem:[#allocation36_spill] sm:$0xff]  ;;  %v10441_v35 = vld [vmem:[#allocation10_spill] sm:$0xff]  ;;  %v10445_v6 = vld [vmem:[#allocation203_spill] sm:$0xff] }
 0x27d   : > { %v2784_v27 = vadd.f32 %v2720_v2, %v2334_v46  ;;  %v1822_v43 = vmul.f32 %v6672_v9, %v1693_v29  ;;  %v2529_v49 = vadd.f32 %v10438_v3, %v10436_v23  ;;  %v2979_v14 = vadd.f32 %v10439_v38, %v10436_v23 }
 0x27e   : > { %v4585_v31 = vadd.f32 %v4521_v25, %v4135_v7  ;;  %v2143_v1 = vmax.f32 %v2079_v4, 0.0  ;;  %v3429_v42 = vadd.f32 %v10440_v36, %v10436_v23  ;;  %v3815_v52 = vmul.f32 %v10442_v22, %v10441_v35 }
 0x27f   : > { %v3234_v48 = vadd.f32 %v3170_v19, %v2784_v27  ;;  %v1886_v46 = vadd.f32 %v1822_v43, %v1372_v16  ;;  %v2593_v2 = vmax.f32 %v2529_v49, 0.0  ;;  %v3043_v25 = vmax.f32 %v2979_v14, 0.0  ;;  %v8164_v27 = vpop.permute.xlu1 %1046 }
 0x280   : > { %4801 = vadd.xlane.f32.xlu1 %v4585_v31  ;;  %v4265_v53 = vmul.f32 %v10443_v51, %v10441_v35  ;;  %v2272_v18 = vmul.f32 %v6675_v24, %v2143_v1  ;;  %v3493_v29 = vmax.f32 %v3429_v42, 0.0  ;;  %v3879_v19 = vadd.f32 %v3815_v52, %v10436_v23  ;;  %10444 = vst [vmem:[#allocation152_spill] sm:$0xff] %v8164_v27  ;;  %v10447_v1 = vld [vmem:[#allocation283_spill] sm:$0xff] }
 0x281   : > { %v3684_v7 = vadd.f32 %v3620_v26, %v3234_v48  ;;  %v8168_v4 = vadd.f32 %v10445_v6, %v8089_v59  ;;  %v4520_v31 = vmul.f32 %v6906_v63, %v4391_v56  ;;  %v2722_v16 = vmul.f32 %v6678_v37, %v2593_v2  ;;  %v10449_v42 = vld [vmem:[#allocation23_spill] sm:$0xff]  ;;  %v10451_v2 = vld [vmem:[#allocation49_spill] sm:$0xff] }
 0x282   : > { %v4329_v43 = vadd.f32 %v4265_v53, %v10436_v23  ;;  %v2336_v49 = vadd.f32 %v2272_v18, %v1886_v46  ;;  %v3172_v26 = vmul.f32 %v6684_v17, %v3043_v25  ;;  %v3943_v38 = vmax.f32 %v3879_v19, 0.0  ;;  %v10452_v53 = vld [vmem:[#allocation13_spill] sm:$0xff] }
 0x283   : > { %10446 = vst [vmem:[#allocation153_spill] sm:$0xff] %v8168_v4  ;;  %v4134_v3 = vadd.f32 %v4070_v30, %v3684_v7  ;;  %v3622_v14 = vmul.f32 %v6687_v57, %v3493_v29  ;;  %v8177_v36 = vadd.f32 %v10447_v1, %v8164_v27  ;;  %v8181_v35 = vadd.f32 %v10449_v42, %v8164_v27  ;;  %v10453_v7 = vld [vmem:[#allocation17_spill] sm:$0xff]  ;;  %v10454_v29 = vld [vmem:[#allocation18_spill] sm:$0xff] }
 0x284   : > { %v4393_v48 = vmax.f32 %v4329_v43, 0.0  ;;  %v2786_v52 = vadd.f32 %v2722_v16, %v2336_v49  ;;  %v4072_v23 = vmul.f32 %v6752_v50, %v3943_v38  ;;  %v1245_v30 = vmax.f32 %v7538_v34, 0.0  ;;  %v10457_v38 = vld [vmem:[#allocation46_spill] sm:$0xff] }
 0x285   : > { %10448 = vst [vmem:[#allocation154_spill] sm:$0xff] %v8177_v36  ;;  %v4584_v56 = vadd.f32 %v4520_v31, %v4134_v3  ;;  %v1695_v25 = vmax.f32 %v10451_v2, 0.0  ;;  %v2017_v18 = vmul.f32 %v10453_v7, %v10452_v53  ;;  %v2467_v19 = vmul.f32 %v10454_v29, %v10452_v53  ;;  %v10455_v31 = vld [vmem:[#allocation19_spill] sm:$0xff]  ;;  %v10456_v3 = vld [vmem:[#allocation20_spill] sm:$0xff] }
 0x286   : > { %10450 = vst [vmem:[#allocation200_spill] sm:$0xff] %v8181_v35  ;;  %v4522_v46 = vmul.f32 %v6906_v63, %v4393_v48  ;;  %v3236_v6 = vadd.f32 %v3172_v26, %v2786_v52  ;;  %v1374_v43 = vmul.f32 %v6669_v44, %v1245_v30  ;;  %v2917_v16 = vmul.f32 %v10455_v31, %v10452_v53 }
 0x287   : > { %4799 = vadd.xlane.f32.xlu0 %v4584_v56  ;;  %v3367_v34 = vmul.f32 %v10456_v3, %v10452_v53  ;;  %v1824_v49 = vmul.f32 %v6672_v9, %v1695_v25  ;;  %v2081_v48 = vadd.f32 %v2017_v18, %v10457_v38  ;;  %v2531_v1 = vadd.f32 %v2467_v19, %v10457_v38  ;;  %v8201_v56 = vpop.permute.xlu0 %1041 }
 0x288   : > { %v3817_v42 = vmul.f32 %v10442_v22, %v10452_v53  ;;  %v3686_v2 = vadd.f32 %v3622_v14, %v3236_v6  ;;  %10458 = vst [vmem:[#allocation201_spill] sm:$0xff] %v8201_v56  ;;  %v2981_v26 = vadd.f32 %v2917_v16, %v10457_v38  ;;  %v4267_v30 = vmul.f32 %v10443_v51, %v10452_v53  ;;  %v10459_v14 = vld [vmem:[#allocation215_spill] sm:$0xff]  ;;  %v10461_v16 = vld [vmem:[#allocation216_spill] sm:$0xff] }
 0x289   : > { %v3431_v52 = vadd.f32 %v3367_v34, %v10457_v38  ;;  %v1888_v27 = vadd.f32 %v1824_v49, %v1374_v43  ;;  %v2145_v35 = vmax.f32 %v2081_v48, 0.0  ;;  %v2595_v25 = vmax.f32 %v2531_v1, 0.0  ;;  %v10463_v43 = vld [vmem:[#allocation50_spill] sm:$0xff] }
 0x28a   : > { %v3881_v18 = vadd.f32 %v3817_v42, %v10457_v38  ;;  %v4136_v36 = vadd.f32 %v4072_v23, %v3686_v2  ;;  %v3045_v19 = vmax.f32 %v2981_v26, 0.0  ;;  %v4331_v4 = vadd.f32 %v4267_v30, %v10457_v38 }
 0x28b   : > { %v3495_v59 = vmax.f32 %v3431_v52, 0.0  ;;  %v8211_v6 = vadd.f32 %v10459_v14, %v8201_v56  ;;  %v8215_v34 = vadd.f32 %v10461_v16, %v8201_v56  ;;  %v2274_v53 = vmul.f32 %v6675_v24, %v2145_v35  ;;  %v10464_v52 = vld [vmem:[#allocation51_spill] sm:$0xff]  ;;  %v10465_v16 = vld [vmem:[#allocation6_spill] sm:$0xff] }
 0x28c   : > { %v1244_v49 = vmax.f32 %v10463_v43, 0.0  ;;  %v4586_v48 = vadd.f32 %v4522_v46, %v4136_v36  ;;  %v2724_v1 = vmul.f32 %v6678_v37, %v2595_v25  ;;  %v3174_v23 = vmul.f32 %v6684_v17, %v3045_v19  ;;  %v10466_v19 = vld [vmem:[#allocation47_spill] sm:$0xff] }
 0x28d   : > { %10460 = vst [vmem:[#allocation158_spill] sm:$0xff] %v8211_v6  ;;  %v3945_v42 = vmax.f32 %v3881_v18, 0.0  ;;  %v2338_v2 = vadd.f32 %v2274_v53, %v1888_v27  ;;  %v3624_v38 = vmul.f32 %v6687_v57, %v3495_v59  ;;  %v1694_v30 = vmax.f32 %v10464_v52, 0.0 }
 0x28e   : > { %10462 = vst [vmem:[#allocation159_spill] sm:$0xff] %v8215_v34  ;;  %v1373_v26 = vmul.f32 %v6669_v44, %v1244_v49  ;;  %4803 = vadd.xlane.f32.xlu2 %v4586_v48  ;;  %v4395_v14 = vmax.f32 %v4331_v4, 0.0  ;;  %v2016_v35 = vmul.f32 %v10453_v7, %v10465_v16  ;;  %v2466_v36 = vmul.f32 %v10454_v29, %v10465_v16 }
 0x28f   : > { %v2916_v46 = vmul.f32 %v10455_v31, %v10465_v16  ;;  %v2788_v25 = vadd.f32 %v2724_v1, %v2338_v2  ;;  %v1823_v27 = vmul.f32 %v6672_v9, %v1694_v30  ;;  %v3366_v59 = vmul.f32 %v10456_v3, %v10465_v16 }
 0x290   : > { %v3816_v18 = vmul.f32 %v10442_v22, %v10465_v16  ;;  %v2080_v4 = vadd.f32 %v2016_v35, %v10466_v19  ;;  %v2530_v53 = vadd.f32 %v2466_v36, %v10466_v19  ;;  %v4266_v49 = vmul.f32 %v10443_v51, %v10465_v16 }
 0x291   : > { %v2980_v43 = vadd.f32 %v2916_v46, %v10466_v19  ;;  %v3238_v48 = vadd.f32 %v3174_v23, %v2788_v25  ;;  %v1887_v52 = vadd.f32 %v1823_v27, %v1373_v26  ;;  %v3430_v1 = vadd.f32 %v3366_v59, %v10466_v19 }
 0x292   : > { %v3880_v2 = vadd.f32 %v3816_v18, %v10466_v19  ;;  %v2144_v30 = vmax.f32 %v2080_v4, 0.0  ;;  %v2594_v56 = vmax.f32 %v2530_v53, 0.0  ;;  %v4330_v6 = vadd.f32 %v4266_v49, %v10466_v19  ;;  %v10469_v53 = vld [vmem:[#allocation12_spill] sm:$0xff]  ;;  %v10470_v49 = vld [vmem:[#allocation43_spill] sm:$0xff] }
 0x293   : > { %v3044_v34 = vmax.f32 %v2980_v43, 0.0  ;;  %v3688_v21 = vadd.f32 %v3624_v38, %v3238_v48  ;;  %v4074_v35 = vmul.f32 %v6752_v50, %v3945_v42  ;;  %v3494_v36 = vmax.f32 %v3430_v1, 0.0  ;;  %v10468_v42 = vld [vmem:[#allocation53_spill] sm:$0xff] }
 0x294   : > { %v1246_v46 = vmax.f32 %v10467_v11, 0.0  ;;  %v4524_v8 = vmul.f32 %v6906_v63, %v4395_v14  ;;  %v2273_v23 = vmul.f32 %v6675_v24, %v2144_v30  ;;  %v2723_v26 = vmul.f32 %v6678_v37, %v2594_v56 }
 0x295   : > { %v3944_v16 = vmax.f32 %v3880_v2, 0.0  ;;  %v4138_v25 = vadd.f32 %v4074_v35, %v3688_v21  ;;  %v3173_v27 = vmul.f32 %v6684_v17, %v3044_v34  ;;  %v3623_v59 = vmul.f32 %v6687_v57, %v3494_v36 }
 0x296   : > { %v4394_v18 = vmax.f32 %v4330_v6, 0.0  ;;  %v2337_v19 = vadd.f32 %v2273_v23, %v1887_v52  ;;  %v1375_v38 = vmul.f32 %v6669_v44, %v1246_v46  ;;  %v1696_v4 = vmax.f32 %v10468_v42, 0.0 }
 0x297   : > { %v2018_v11 = vmul.f32 %v10453_v7, %v10469_v53  ;;  %v4588_v14 = vadd.f32 %v4524_v8, %v4138_v25  ;;  %v2468_v43 = vmul.f32 %v10454_v29, %v10469_v53  ;;  %v2918_v21 = vmul.f32 %v10455_v31, %v10469_v53 }
 0x298   : > { %v3368_v56 = vmul.f32 %v10456_v3, %v10469_v53  ;;  %v2787_v34 = vadd.f32 %v2723_v26, %v2337_v19  ;;  %v1825_v6 = vmul.f32 %v6672_v9, %v1696_v4  ;;  %v3818_v52 = vmul.f32 %v10442_v22, %v10469_v53  ;;  %v8270_v26 = vpop.permute.xlu1 %1061 }
 0x299   : > { %v2082_v48 = vadd.f32 %v2018_v11, %v10470_v49  ;;  %4807 = vadd.xlane.f32.xlu1 %v4588_v14  ;;  %v2532_v8 = vadd.f32 %v2468_v43, %v10470_v49  ;;  %v2982_v1 = vadd.f32 %v2918_v21, %v10470_v49  ;;  %v4268_v30 = vmul.f32 %v10443_v51, %v10469_v53 }
 0x29a   : > { %v3432_v2 = vadd.f32 %v3368_v56, %v10470_v49  ;;  %v3237_v35 = vadd.f32 %v3173_v27, %v2787_v34  ;;  %v1889_v36 = vadd.f32 %v1825_v6, %v1375_v38  ;;  %v3882_v23 = vadd.f32 %v3818_v52, %v10470_v49  ;;  %10471 = vst [vmem:[#allocation109_spill] sm:$0xff] %v8270_v26  ;;  %v10472_v56 = vld [vmem:[#allocation289_spill] sm:$0xff] }
 0x29b   : > { %v2146_v46 = vmax.f32 %v2082_v48, 0.0  ;;  %v2596_v25 = vmax.f32 %v2532_v8, 0.0  ;;  %v3046_v19 = vmax.f32 %v2982_v1, 0.0  ;;  %v4332_v4 = vadd.f32 %v4268_v30, %v10470_v49  ;;  %v10474_v8 = vld [vmem:[#allocation290_spill] sm:$0xff]  ;;  %v10476_v1 = vld [vmem:[#allocation76_spill] sm:$0xff] }
 0x29c   : > { %v3496_v42 = vmax.f32 %v3432_v2, 0.0  ;;  %v3687_v11 = vadd.f32 %v3623_v59, %v3237_v35  ;;  %v4073_v14 = vmul.f32 %v6752_v50, %v3944_v16  ;;  %v3946_v21 = vmax.f32 %v3882_v23, 0.0 }
 0x29d   : > { %v2275_v43 = vmul.f32 %v6675_v24, %v2146_v46  ;;  %v4523_v53 = vmul.f32 %v6906_v63, %v4394_v18  ;;  %v2725_v27 = vmul.f32 %v6678_v37, %v2596_v25  ;;  %v4396_v38 = vmax.f32 %v4332_v4, 0.0  ;;  %v10477_v46 = vld [vmem:[#allocation77_spill] sm:$0xff]  ;;  %v10478_v25 = vld [vmem:[#allocation16_spill] sm:$0xff] }
 0x29e   : > { %v8279_v34 = vadd.f32 %v10472_v56, %v8270_v26  ;;  %v4137_v6 = vadd.f32 %v4073_v14, %v3687_v11  ;;  %v3175_v52 = vmul.f32 %v6684_v17, %v3046_v19  ;;  %v3625_v59 = vmul.f32 %v6687_v57, %v3496_v42 }
 0x29f   : > { %v2339_v48 = vadd.f32 %v2275_v43, %v1889_v36  ;;  %v4075_v16 = vmul.f32 %v6752_v50, %v3946_v21  ;;  %v4525_v49 = vmul.f32 %v6906_v63, %v4396_v38  ;;  %v8287_v18 = vadd.f32 %v10474_v8, %v8270_v26  ;;  %v10479_v21 = vld [vmem:[#allocation74_spill] sm:$0xff]  ;;  %v8304_v38 = vpop.permute.xlu0 %1056 }
 0x2a0   : > { %10473 = vst [vmem:[#allocation155_spill] sm:$0xff] %v8279_v34  ;;  %v1248_v2 = vmax.f32 %v10476_v1, 0.0  ;;  %v4587_v30 = vadd.f32 %v4523_v53, %v4137_v6  ;;  %v1698_v23 = vmax.f32 %v10477_v46, 0.0  ;;  %v2020_v36 = vmul.f32 %v10453_v7, %v10478_v25 }
 0x2a1   : > { %10475 = vst [vmem:[#allocation93_spill] sm:$0xff] %v8287_v18  ;;  %v2789_v35 = vadd.f32 %v2725_v27, %v2339_v48  ;;  %v2470_v42 = vmul.f32 %v10454_v29, %v10478_v25  ;;  %v2920_v4 = vmul.f32 %v10455_v31, %v10478_v25  ;;  %v3370_v11 = vmul.f32 %v10456_v3, %v10478_v25 }
 0x2a2   : > { %v1377_v19 = vmul.f32 %v6669_v44, %v1248_v2  ;;  %4805 = vadd.xlane.f32.xlu0 %v4587_v30  ;;  %v1827_v43 = vmul.f32 %v6672_v9, %v1698_v23  ;;  %v2084_v53 = vadd.f32 %v2020_v36, %v10479_v21  ;;  %v3820_v27 = vmul.f32 %v10442_v22, %v10478_v25 }
 0x2a3   : > { %v3239_v14 = vadd.f32 %v3175_v52, %v2789_v35  ;;  %10480 = vst [vmem:[#allocation94_spill] sm:$0xff] %v8304_v38  ;;  %v2534_v56 = vadd.f32 %v2470_v42, %v10479_v21  ;;  %v2984_v6 = vadd.f32 %v2920_v4, %v10479_v21  ;;  %v3434_v48 = vadd.f32 %v3370_v11, %v10479_v21  ;;  %v10481_v42 = vld [vmem:[#allocation233_spill] sm:$0xff]  ;;  %v10482_v11 = vld [vmem:[#allocation78_spill] sm:$0xff] }
 0x2a4   : > { %v4270_v8 = vmul.f32 %v10443_v51, %v10478_v25  ;;  %v1891_v52 = vadd.f32 %v1827_v43, %v1377_v19  ;;  %v2148_v2 = vmax.f32 %v2084_v53, 0.0  ;;  %v3884_v30 = vadd.f32 %v3820_v27, %v10479_v21 }
 0x2a5   : > { %v3689_v1 = vadd.f32 %v3625_v59, %v3239_v14  ;;  %v2598_v35 = vmax.f32 %v2534_v56, 0.0  ;;  %v3048_v46 = vmax.f32 %v2984_v6, 0.0  ;;  %v3498_v23 = vmax.f32 %v3434_v48, 0.0  ;;  %v10483_v59 = vld [vmem:[#allocation234_spill] sm:$0xff]  ;;  %v10485_v6 = vld [vmem:[#allocation115_spill] sm:$0xff] }
 0x2a6   : > { %v4334_v36 = vadd.f32 %v4270_v8, %v10479_v21  ;;  %v8315_v18 = vadd.f32 %v10481_v42, %v8304_v38  ;;  %v2277_v4 = vmul.f32 %v6675_v24, %v2148_v2  ;;  %v1247_v34 = vmax.f32 %v10482_v11, 0.0  ;;  %v10486_v8 = vld [vmem:[#allocation7_spill] sm:$0xff] }
 0x2a7   : > { %v4139_v26 = vadd.f32 %v4075_v16, %v3689_v1  ;;  %v8321_v25 = vadd.f32 %v10483_v59, %v8304_v38  ;;  %v2727_v19 = vmul.f32 %v6678_v37, %v2598_v35  ;;  %v3177_v14 = vmul.f32 %v6684_v17, %v3048_v46 }
 0x2a8   : > { %v3948_v43 = vmax.f32 %v3884_v30, 0.0  ;;  %v2341_v21 = vadd.f32 %v2277_v4, %v1891_v52  ;;  %v3627_v16 = vmul.f32 %v6687_v57, %v3498_v23  ;;  %v4398_v27 = vmax.f32 %v4334_v36, 0.0  ;;  %v10487_v52 = vld [vmem:[#allocation75_spill] sm:$0xff] }
 0x2a9   : > { %10484 = vst [vmem:[#allocation110_spill] sm:$0xff] %v8321_v25  ;;  %v4589_v53 = vadd.f32 %v4525_v49, %v4139_v26  ;;  %v1376_v56 = vmul.f32 %v6669_v44, %v1247_v34  ;;  %v1697_v48 = vmax.f32 %v10485_v6, 0.0  ;;  %v2019_v1 = vmul.f32 %v10453_v7, %v10486_v8 }
 0x2aa   : > { %v2469_v2 = vmul.f32 %v10454_v29, %v10486_v8  ;;  %v2791_v35 = vadd.f32 %v2727_v19, %v2341_v21  ;;  %v2919_v30 = vmul.f32 %v10455_v31, %v10486_v8  ;;  %v3369_v26 = vmul.f32 %v10456_v3, %v10486_v8 }
 0x2ab   : > { %4809 = vadd.xlane.f32.xlu2 %v4589_v53  ;;  %v3819_v49 = vmul.f32 %v10442_v22, %v10486_v8  ;;  %v1826_v34 = vmul.f32 %v6672_v9, %v1697_v48  ;;  %v2083_v46 = vadd.f32 %v2019_v1, %v10487_v52  ;;  %v4269_v36 = vmul.f32 %v10443_v51, %v10486_v8 }
 0x2ac   : > { %v2533_v23 = vadd.f32 %v2469_v2, %v10487_v52  ;;  %v3241_v42 = vadd.f32 %v3177_v14, %v2791_v35  ;;  %v2983_v4 = vadd.f32 %v2919_v30, %v10487_v52  ;;  %v3433_v11 = vadd.f32 %v3369_v26, %v10487_v52  ;;  %v10488_v35 = vld [vmem:[#allocation55_spill] sm:$0xff] }
 0x2ad   : > { %v3883_v59 = vadd.f32 %v3819_v49, %v10487_v52  ;;  %v1890_v19 = vadd.f32 %v1826_v34, %v1376_v56  ;;  %v2147_v53 = vmax.f32 %v2083_v46, 0.0  ;;  %v4333_v6 = vadd.f32 %v4269_v36, %v10487_v52  ;;  %v10489_v52 = vld [vmem:[#allocation56_spill] sm:$0xff] }
 0x2ae   : > { %v2597_v21 = vmax.f32 %v2533_v23, 0.0  ;;  %v3691_v48 = vadd.f32 %v3627_v16, %v3241_v42  ;;  %v4077_v1 = vmul.f32 %v6752_v50, %v3948_v43  ;;  %v3047_v38 = vmax.f32 %v2983_v4, 0.0 }
 0x2af   : > { %v3497_v2 = vmax.f32 %v3433_v11, 0.0  ;;  %v4527_v25 = vmul.f32 %v6906_v63, %v4398_v27  ;;  %v2276_v14 = vmul.f32 %v6675_v24, %v2147_v53  ;;  %v3947_v8 = vmax.f32 %v3883_v59, 0.0  ;;  %v10490_v27 = vld [vmem:[#allocation15_spill] sm:$0xff] }
 0x2b0   : > { %v1249_v30 = vmax.f32 %v10488_v35, 0.0  ;;  %v4141_v26 = vadd.f32 %v4077_v1, %v3691_v48  ;;  %v2726_v49 = vmul.f32 %v6678_v37, %v2597_v21  ;;  %v3176_v56 = vmul.f32 %v6684_v17, %v3047_v38 }
 0x2b1   : > { %v4397_v34 = vmax.f32 %v4333_v6, 0.0  ;;  %v2340_v46 = vadd.f32 %v2276_v14, %v1890_v19  ;;  %v3626_v16 = vmul.f32 %v6687_v57, %v3497_v2  ;;  %v1699_v23 = vmax.f32 %v10489_v52, 0.0 }
 0x2b2   : > { %v1378_v43 = vmul.f32 %v6669_v44, %v1249_v30  ;;  %v4591_v36 = vadd.f32 %v4527_v25, %v4141_v26  ;;  %v2021_v42 = vmul.f32 %v10453_v7, %v10490_v27  ;;  %v2471_v4 = vmul.f32 %v10454_v29, %v10490_v27  ;;  %v10491_v25 = vld [vmem:[#allocation54_spill] sm:$0xff]  ;;  %v8374_v26 = vpop.permute.xlu1 %1076 }
 0x2b3   : > { %v2921_v11 = vmul.f32 %v10455_v31, %v10490_v27  ;;  %v2790_v59 = vadd.f32 %v2726_v49, %v2340_v46  ;;  %v1828_v38 = vmul.f32 %v6672_v9, %v1699_v23  ;;  %v3371_v19 = vmul.f32 %v10456_v3, %v10490_v27  ;;  %10492 = vst [vmem:[#allocation95_spill] sm:$0xff] %v8374_v26 }
 0x2b4   : > { %v3821_v53 = vmul.f32 %v10442_v22, %v10490_v27  ;;  %4813 = vadd.xlane.f32.xlu1 %v4591_v36  ;;  %v2085_v21 = vadd.f32 %v2021_v42, %v10491_v25  ;;  %v2535_v6 = vadd.f32 %v2471_v4, %v10491_v25  ;;  %v4271_v1 = vmul.f32 %v10443_v51, %v10490_v27 }
 0x2b5   : > { %v2985_v48 = vadd.f32 %v2921_v11, %v10491_v25  ;;  %v3240_v2 = vadd.f32 %v3176_v56, %v2790_v59  ;;  %v1892_v14 = vadd.f32 %v1828_v38, %v1378_v43  ;;  %v3435_v35 = vadd.f32 %v3371_v19, %v10491_v25  ;;  %v10493_v59 = vld [vmem:[#allocation301_spill] sm:$0xff] }
 0x2b6   : > { %v3885_v30 = vadd.f32 %v3821_v53, %v10491_v25  ;;  %v2149_v49 = vmax.f32 %v2085_v21, 0.0  ;;  %v2599_v46 = vmax.f32 %v2535_v6, 0.0  ;;  %v4335_v23 = vadd.f32 %v4271_v1, %v10491_v25 }
 0x2b7   : > { %v3049_v52 = vmax.f32 %v2985_v48, 0.0  ;;  %v3690_v36 = vadd.f32 %v3626_v16, %v3240_v2  ;;  %v4076_v42 = vmul.f32 %v6752_v50, %v3947_v8  ;;  %v3499_v4 = vmax.f32 %v3435_v35, 0.0  ;;  %v10497_v2 = vld [vmem:[#allocation32_spill] sm:$0xff] }
 0x2b8   : > { %v3949_v11 = vmax.f32 %v3885_v30, 0.0  ;;  %v4526_v27 = vmul.f32 %v6906_v63, %v4397_v34  ;;  %v2278_v56 = vmul.f32 %v6675_v24, %v2149_v49  ;;  %v4399_v43 = vmax.f32 %v4335_v23, 0.0  ;;  %v10495_v34 = vld [vmem:[#allocation37_spill] sm:$0xff]  ;;  %v10499_v23 = vld [vmem:[#allocation31_spill] sm:$0xff] }
 0x2b9   : > { %v8382_v38 = vadd.f32 %v10493_v59, %v8374_v26  ;;  %v4140_v19 = vadd.f32 %v4076_v42, %v3690_v36  ;;  %v2728_v53 = vmul.f32 %v6678_v37, %v2599_v46  ;;  %v3178_v21 = vmul.f32 %v6684_v17, %v3049_v52  ;;  %v10498_v30 = vld [vmem:[#allocation33_spill] sm:$0xff] }
 0x2ba   : > { %v3628_v16 = vmul.f32 %v6687_v57, %v3499_v4  ;;  %v2342_v25 = vadd.f32 %v2278_v56, %v1892_v14  ;;  %v4078_v8 = vmul.f32 %v6752_v50, %v3949_v11  ;;  %v4528_v6 = vmul.f32 %v6906_v63, %v4399_v43 }
 0x2bb   : > { %10494 = vst [vmem:[#allocation96_spill] sm:$0xff] %v8382_v38  ;;  %v8391_v48 = vadd.f32 %v10495_v34, %v8374_v26  ;;  %v4590_v1 = vadd.f32 %v4526_v27, %v4140_v19  ;;  %v1251_v35 = vmax.f32 %v10497_v2, 0.0  ;;  %v1701_v49 = vmax.f32 %v10498_v30, 0.0  ;;  %v10500_v27 = vld [vmem:[#allocation29_spill] sm:$0xff]  ;;  %v8411_v34 = vpop.permute.xlu0 %1071 }
 0x2bc   : > { %v2023_v46 = vmul.f32 %v10453_v7, %v10499_v23  ;;  %v2792_v52 = vadd.f32 %v2728_v53, %v2342_v25  ;;  %v2473_v14 = vmul.f32 %v10454_v29, %v10499_v23  ;;  %v2923_v36 = vmul.f32 %v10455_v31, %v10499_v23 }
 0x2bd   : > { %10496 = vst [vmem:[#allocation97_spill] sm:$0xff] %v8391_v48  ;;  %v3373_v42 = vmul.f32 %v10456_v3, %v10499_v23  ;;  %4811 = vadd.xlane.f32.xlu0 %v4590_v1  ;;  %v1380_v4 = vmul.f32 %v6669_v44, %v1251_v35  ;;  %v1830_v11 = vmul.f32 %v6672_v9, %v1701_v49 }
 0x2be   : > { %v2087_v56 = vadd.f32 %v2023_v46, %v10500_v27  ;;  %v3823_v43 = vmul.f32 %v10442_v22, %v10499_v23  ;;  %v3242_v59 = vadd.f32 %v3178_v21, %v2792_v52  ;;  %v2537_v19 = vadd.f32 %v2473_v14, %v10500_v27 }
 0x2bf   : > { %v2987_v53 = vadd.f32 %v2923_v36, %v10500_v27  ;;  %v3437_v25 = vadd.f32 %v3373_v42, %v10500_v27  ;;  %v1894_v2 = vadd.f32 %v1830_v11, %v1380_v4  ;;  %v4273_v30 = vmul.f32 %v10443_v51, %v10499_v23  ;;  %v10501_v36 = vld [vmem:[#allocation34_spill] sm:$0xff] }
 0x2c0   : > { %v2151_v1 = vmax.f32 %v2087_v56, 0.0  ;;  %v3887_v35 = vadd.f32 %v3823_v43, %v10500_v27  ;;  %v3692_v49 = vadd.f32 %v3628_v16, %v3242_v59  ;;  %v2601_v46 = vmax.f32 %v2537_v19, 0.0  ;;  %v10502_v4 = vld [vmem:[#allocation254_spill] sm:$0xff] }
 0x2c1   : > { %v3051_v26 = vmax.f32 %v2987_v53, 0.0  ;;  %v3501_v48 = vmax.f32 %v3437_v25, 0.0  ;;  %v4337_v14 = vadd.f32 %v4273_v30, %v10500_v27  ;;  %v1250_v42 = vmax.f32 %v10501_v36, 0.0  ;;  %v10503_v25 = vld [vmem:[#allocation8_spill] sm:$0xff] }
 0x2c2   : > { %v2280_v21 = vmul.f32 %v6675_v24, %v2151_v1  ;;  %v3951_v52 = vmax.f32 %v3887_v35, 0.0  ;;  %v4142_v38 = vadd.f32 %v4078_v8, %v3692_v49  ;;  %v8421_v11 = vadd.f32 %v10502_v4, %v8411_v34 }
 0x2c3   : > { %v2730_v56 = vmul.f32 %v6678_v37, %v2601_v46  ;;  %v3180_v23 = vmul.f32 %v6684_v17, %v3051_v26  ;;  %v3630_v43 = vmul.f32 %v6687_v57, %v3501_v48  ;;  %v1379_v19 = vmul.f32 %v6669_v44, %v1250_v42 }
 0x2c4   : > { %v2344_v16 = vadd.f32 %v2280_v21, %v1894_v2  ;;  %v4080_v59 = vmul.f32 %v6752_v50, %v3951_v52  ;;  %v4592_v53 = vadd.f32 %v4528_v6, %v4142_v38  ;;  %v1700_v27 = vmax.f32 %v7662_v54, 0.0 }
 0x2c5   : > { %v2022_v8 = vmul.f32 %v10453_v7, %v10503_v25  ;;  %v2472_v1 = vmul.f32 %v10454_v29, %v10503_v25  ;;  %v4401_v30 = vmax.f32 %v4337_v14, 0.0  ;;  %v2922_v26 = vmul.f32 %v10455_v31, %v10503_v25 }
 0x2c6   : > { %v2794_v35 = vadd.f32 %v2730_v56, %v2344_v16  ;;  %v3372_v48 = vmul.f32 %v10456_v3, %v10503_v25  ;;  %4815 = vadd.xlane.f32.xlu2 %v4592_v53  ;;  %v1829_v2 = vmul.f32 %v6672_v9, %v1700_v27  ;;  %v3822_v6 = vmul.f32 %v10442_v22, %v10503_v25 }
 0x2c7   : > { %v2086_v38 = vadd.f32 %v2022_v8, %v7638_v40  ;;  %v2536_v54 = vadd.f32 %v2472_v1, %v7638_v40  ;;  %v2986_v46 = vadd.f32 %v2922_v26, %v7638_v40  ;;  %v4272_v52 = vmul.f32 %v10443_v51, %v10503_v25 }
 0x2c8   : > { %v3244_v49 = vadd.f32 %v3180_v23, %v2794_v35  ;;  %v3436_v21 = vadd.f32 %v3372_v48, %v7638_v40  ;;  %v1893_v14 = vadd.f32 %v1829_v2, %v1379_v19  ;;  %v3886_v4 = vadd.f32 %v3822_v6, %v7638_v40  ;;  %v10504_v35 = vld [vmem:[#allocation58_spill] sm:$0xff]  ;;  %v10505_v6 = vld [vmem:[#allocation81_spill] sm:$0xff] }
 0x2c9   : > { %v2150_v36 = vmax.f32 %v2086_v38, 0.0  ;;  %v2600_v42 = vmax.f32 %v2536_v54, 0.0  ;;  %v3050_v16 = vmax.f32 %v2986_v46, 0.0  ;;  %v4336_v27 = vadd.f32 %v4272_v52, %v7638_v40  ;;  %v10506_v46 = vld [vmem:[#allocation30_spill] sm:$0xff] }
 0x2ca   : > { %v3694_v56 = vadd.f32 %v3630_v43, %v3244_v49  ;;  %v3500_v53 = vmax.f32 %v3436_v21, 0.0  ;;  %v4530_v8 = vmul.f32 %v6906_v63, %v4401_v30  ;;  %v3950_v1 = vmax.f32 %v3886_v4, 0.0  ;;  %v10507_v4 = vld [vmem:[#allocation57_spill] sm:$0xff] }
 0x2cb   : > { %v2279_v23 = vmul.f32 %v6675_v24, %v2150_v36  ;;  %v1252_v26 = vmax.f32 %v10504_v35, 0.0  ;;  %v2729_v25 = vmul.f32 %v6678_v37, %v2600_v42  ;;  %v3179_v19 = vmul.f32 %v6684_v17, %v3050_v16 }
 0x2cc   : > { %v4144_v48 = vadd.f32 %v4080_v59, %v3694_v56  ;;  %v3629_v2 = vmul.f32 %v6687_v57, %v3500_v53  ;;  %v4400_v43 = vmax.f32 %v4336_v27, 0.0  ;;  %v1702_v40 = vmax.f32 %v10505_v6, 0.0 }
 0x2cd   : > { %v2343_v38 = vadd.f32 %v2279_v23, %v1893_v14  ;;  %v1381_v54 = vmul.f32 %v6669_v44, %v1252_v26  ;;  %v4079_v30 = vmul.f32 %v6752_v50, %v3950_v1  ;;  %v2024_v21 = vmul.f32 %v10453_v7, %v10506_v46 }
 0x2ce   : > { %v4594_v49 = vadd.f32 %v4530_v8, %v4144_v48  ;;  %v2474_v59 = vmul.f32 %v10454_v29, %v10506_v46  ;;  %v1831_v36 = vmul.f32 %v6672_v9, %v1702_v40  ;;  %v2924_v14 = vmul.f32 %v10455_v31, %v10506_v46 }
 0x2cf   : > { %v2793_v52 = vadd.f32 %v2729_v25, %v2343_v38  ;;  %v3374_v42 = vmul.f32 %v10456_v3, %v10506_v46  ;;  %v2088_v56 = vadd.f32 %v2024_v21, %v10507_v4  ;;  %v3824_v53 = vmul.f32 %v10442_v22, %v10506_v46 }
 0x2d0   : > { %4819 = vadd.xlane.f32.xlu1 %v4594_v49  ;;  %v2538_v16 = vadd.f32 %v2474_v59, %v10507_v4  ;;  %v4274_v27 = vmul.f32 %v10443_v51, %v10506_v46  ;;  %v1895_v23 = vadd.f32 %v1831_v36, %v1381_v54  ;;  %v2988_v1 = vadd.f32 %v2924_v14, %v10507_v4 }
 0x2d1   : > { %v3243_v8 = vadd.f32 %v3179_v19, %v2793_v52  ;;  %v3438_v35 = vadd.f32 %v3374_v42, %v10507_v4  ;;  %v2152_v26 = vmax.f32 %v2088_v56, 0.0  ;;  %v3888_v25 = vadd.f32 %v3824_v53, %v10507_v4 }
 0x2d2   : > { %v2602_v48 = vmax.f32 %v2538_v16, 0.0  ;;  %v4338_v38 = vadd.f32 %v4274_v27, %v10507_v4  ;;  %v3052_v40 = vmax.f32 %v2988_v1, 0.0  ;;  %v1254_v21 = vmax.f32 %v7695_v0, 0.0  ;;  %v10508_v16 = vld [vmem:[#allocation86_spill] sm:$0xff] }
 0x2d3   : > { %v3693_v6 = vadd.f32 %v3629_v2, %v3243_v8  ;;  %v3502_v49 = vmax.f32 %v3438_v35, 0.0  ;;  %v4529_v59 = vmul.f32 %v6906_v63, %v4400_v43  ;;  %v2281_v19 = vmul.f32 %v6675_v24, %v2152_v26  ;;  %v10509_v43 = vld [vmem:[#allocation62_spill] sm:$0xff] }
 0x2d4   : > { %v2731_v54 = vmul.f32 %v6678_v37, %v2602_v48  ;;  %v3952_v46 = vmax.f32 %v3888_v25, 0.0  ;;  %v3181_v36 = vmul.f32 %v6684_v17, %v3052_v40  ;;  %v4402_v42 = vmax.f32 %v4338_v38, 0.0  ;;  %v10510_v48 = vld [vmem:[#allocation129_spill] sm:$0xff] }
 0x2d5   : > { %v4143_v52 = vadd.f32 %v4079_v30, %v3693_v6  ;;  %v3631_v14 = vmul.f32 %v6687_v57, %v3502_v49  ;;  %v2345_v56 = vadd.f32 %v2281_v19, %v1895_v23  ;;  %v1383_v4 = vmul.f32 %v6669_v44, %v1254_v21 }
 0x2d6   : > { %v4081_v2 = vmul.f32 %v6752_v50, %v3952_v46  ;;  %v1704_v0 = vmax.f32 %v10508_v16, 0.0  ;;  %v2026_v27 = vmul.f32 %v10453_v7, %v10509_v43  ;;  %v2476_v8 = vmul.f32 %v10454_v29, %v10509_v43 }
 0x2d7   : > { %v4593_v53 = vadd.f32 %v4529_v59, %v4143_v52  ;;  %v2926_v30 = vmul.f32 %v10455_v31, %v10509_v43  ;;  %v2795_v1 = vadd.f32 %v2731_v54, %v2345_v56  ;;  %v3376_v23 = vmul.f32 %v10456_v3, %v10509_v43 }
 0x2d8   : > { %v1833_v35 = vmul.f32 %v6672_v9, %v1704_v0  ;;  %v3826_v26 = vmul.f32 %v10442_v22, %v10509_v43  ;;  %v2090_v25 = vadd.f32 %v2026_v27, %v10510_v48  ;;  %v2540_v38 = vadd.f32 %v2476_v8, %v10510_v48 }
 0x2d9   : > { %4817 = vadd.xlane.f32.xlu0 %v4593_v53  ;;  %v2990_v6 = vadd.f32 %v2926_v30, %v10510_v48  ;;  %v4276_v40 = vmul.f32 %v10443_v51, %v10509_v43  ;;  %v3245_v49 = vadd.f32 %v3181_v36, %v2795_v1  ;;  %v3440_v59 = vadd.f32 %v3376_v23, %v10510_v48 }
 0x2da   : > { %v1897_v21 = vadd.f32 %v1833_v35, %v1383_v4  ;;  %v3890_v19 = vadd.f32 %v3826_v26, %v10510_v48  ;;  %v2154_v54 = vmax.f32 %v2090_v25, 0.0  ;;  %v2604_v46 = vmax.f32 %v2540_v38, 0.0 }
 0x2db   : > { %v3054_v52 = vmax.f32 %v2990_v6, 0.0  ;;  %v4340_v56 = vadd.f32 %v4276_v40, %v10510_v48  ;;  %v3695_v16 = vadd.f32 %v3631_v14, %v3245_v49  ;;  %v3504_v0 = vmax.f32 %v3440_v59, 0.0 }
 0x2dc   : > { %v3954_v53 = vmax.f32 %v3890_v19, 0.0  ;;  %v1253_v27 = vmax.f32 %v7703_v55, 0.0  ;;  %v4531_v8 = vmul.f32 %v6906_v63, %v4402_v42  ;;  %v2283_v43 = vmul.f32 %v6675_v24, %v2154_v54  ;;  %v10511_v55 = vld [vmem:[#allocation9_spill] sm:$0xff] }
 0x2dd   : > { %v2733_v36 = vmul.f32 %v6678_v37, %v2604_v46  ;;  %v3183_v4 = vmul.f32 %v6684_v17, %v3054_v52  ;;  %v4145_v30 = vadd.f32 %v4081_v2, %v3695_v16  ;;  %v3633_v1 = vmul.f32 %v6687_v57, %v3504_v0 }
 0x2de   : > { %v4083_v35 = vmul.f32 %v6752_v50, %v3954_v53  ;;  %v4404_v23 = vmax.f32 %v4340_v56, 0.0  ;;  %v2347_v26 = vadd.f32 %v2283_v43, %v1897_v21  ;;  %v1382_v14 = vmul.f32 %v6669_v44, %v1253_v27 }
 0x2df   : > { %v1703_v48 = vmax.f32 %v7717_v47, 0.0  ;;  %v2025_v42 = vmul.f32 %v10453_v7, %v10511_v55  ;;  %v4595_v25 = vadd.f32 %v4531_v8, %v4145_v30  ;;  %v2475_v38 = vmul.f32 %v10454_v29, %v10511_v55 }
 0x2e0   : > { %v2925_v2 = vmul.f32 %v10455_v31, %v10511_v55  ;;  %v3375_v6 = vmul.f32 %v10456_v3, %v10511_v55  ;;  %v2797_v40 = vadd.f32 %v2733_v36, %v2347_v26  ;;  %v3825_v47 = vmul.f32 %v10442_v22, %v10511_v55 }
 0x2e1   : > { %v1832_v49 = vmul.f32 %v6672_v9, %v1703_v48  ;;  %v2089_v21 = vadd.f32 %v2025_v42, %v7686_v10  ;;  %4821 = vadd.xlane.f32.xlu2 %v4595_v25  ;;  %v2539_v59 = vadd.f32 %v2475_v38, %v7686_v10  ;;  %v4275_v46 = vmul.f32 %v10443_v51, %v10511_v55  ;;  %v10512_v48 = vld [vmem:[#allocation45_spill] sm:$0xff] }
 0x2e2   : > { %v2989_v19 = vadd.f32 %v2925_v2, %v7686_v10  ;;  %v3439_v54 = vadd.f32 %v3375_v6, %v7686_v10  ;;  %v3247_v52 = vadd.f32 %v3183_v4, %v2797_v40  ;;  %v3889_v0 = vadd.f32 %v3825_v47, %v7686_v10 }
 0x2e3   : > { %v1896_v56 = vadd.f32 %v1832_v49, %v1382_v14  ;;  %v2153_v16 = vmax.f32 %v2089_v21, 0.0  ;;  %v2603_v53 = vmax.f32 %v2539_v59, 0.0  ;;  %v4339_v43 = vadd.f32 %v4275_v46, %v7686_v10  ;;  %v10514_v21 = vld [vmem:[#allocation61_spill] sm:$0xff] }
 0x2e4   : > { %v3053_v27 = vmax.f32 %v2989_v19, 0.0  ;;  %v3503_v8 = vmax.f32 %v3439_v54, 0.0  ;;  %v3697_v36 = vadd.f32 %v3633_v1, %v3247_v52  ;;  %v3953_v26 = vmax.f32 %v3889_v0, 0.0  ;;  %v10513_v1 = vld [vmem:[#allocation48_spill] sm:$0xff] }
 0x2e5   : > { %v2282_v30 = vmul.f32 %v6675_v24, %v2153_v16  ;;  %v1255_v42 = vmax.f32 %v10512_v48, 0.0  ;;  %v4533_v25 = vmul.f32 %v6906_v63, %v4404_v23  ;;  %v2732_v55 = vmul.f32 %v6678_v37, %v2603_v53  ;;  %v10515_v52 = vld [vmem:[#allocation44_spill] sm:$0xff] }
 0x2e6   : > { %v3182_v4 = vmul.f32 %v6684_v17, %v3053_v27  ;;  %v3632_v14 = vmul.f32 %v6687_v57, %v3503_v8  ;;  %v4147_v38 = vadd.f32 %v4083_v35, %v3697_v36  ;;  %v4082_v6 = vmul.f32 %v6752_v50, %v3953_v26 }
 0x2e7   : > { %v2346_v2 = vadd.f32 %v2282_v30, %v1896_v56  ;;  %v4403_v40 = vmax.f32 %v4339_v43, 0.0  ;;  %v1384_v10 = vmul.f32 %v6669_v44, %v1255_v42  ;;  %v1705_v49 = vmax.f32 %v10513_v1, 0.0 }
 0x2e8   : > { %v2027_v47 = vmul.f32 %v10453_v7, %v10514_v21  ;;  %v2477_v23 = vmul.f32 %v10454_v29, %v10514_v21  ;;  %v4597_v59 = vadd.f32 %v4533_v25, %v4147_v38  ;;  %v2927_v54 = vmul.f32 %v10455_v31, %v10514_v21 }
 0x2e9   : > { %v2796_v19 = vadd.f32 %v2732_v55, %v2346_v2  ;;  %v3377_v35 = vmul.f32 %v10456_v3, %v10514_v21  ;;  %v1834_v46 = vmul.f32 %v6672_v9, %v1705_v49  ;;  %v3827_v0 = vmul.f32 %v10442_v22, %v10514_v21 }
 0x2ea   : > { %v2091_v56 = vadd.f32 %v2027_v47, %v10515_v52  ;;  %v2541_v16 = vadd.f32 %v2477_v23, %v10515_v52  ;;  %4825 = vadd.xlane.f32.xlu1 %v4597_v59  ;;  %v2991_v27 = vadd.f32 %v2927_v54, %v10515_v52  ;;  %v4277_v43 = vmul.f32 %v10443_v51, %v10514_v21 }
 0x2eb   : > { %v3246_v53 = vadd.f32 %v3182_v4, %v2796_v19  ;;  %v3441_v8 = vadd.f32 %v3377_v35, %v10515_v52  ;;  %v1898_v36 = vadd.f32 %v1834_v46, %v1384_v10  ;;  %v3891_v48 = vadd.f32 %v3827_v0, %v10515_v52  ;;  %v10516_v46 = vld [vmem:[#allocation88_spill] sm:$0xff] }
 0x2ec   : > { %v2155_v30 = vmax.f32 %v2091_v56, 0.0  ;;  %v2605_v26 = vmax.f32 %v2541_v16, 0.0  ;;  %v3055_v25 = vmax.f32 %v2991_v27, 0.0  ;;  %v4341_v38 = vadd.f32 %v4277_v43, %v10515_v52 }
 0x2ed   : > { %v3696_v42 = vadd.f32 %v3632_v14, %v3246_v53  ;;  %v3505_v55 = vmax.f32 %v3441_v8, 0.0  ;;  %v4532_v2 = vmul.f32 %v6906_v63, %v4403_v40  ;;  %v3955_v1 = vmax.f32 %v3891_v48, 0.0 }
 0x2ee   : > { %v2284_v4 = vmul.f32 %v6675_v24, %v2155_v30  ;;  %v1257_v49 = vmax.f32 %v7748_v61, 0.0  ;;  %v2734_v21 = vmul.f32 %v6678_v37, %v2605_v26  ;;  %v3184_v10 = vmul.f32 %v6684_v17, %v3055_v25 }
 0x2ef   : > { %v4146_v47 = vadd.f32 %v4082_v6, %v3696_v42  ;;  %v3634_v23 = vmul.f32 %v6687_v57, %v3505_v55  ;;  %v4405_v14 = vmax.f32 %v4341_v38, 0.0  ;;  %v1707_v54 = vmax.f32 %v7752_v62, 0.0  ;;  %v10517_v62 = vld [vmem:[#allocation101_spill] sm:$0xff] }
 0x2f0   : > { %v2348_v59 = vadd.f32 %v2284_v4, %v1898_v36  ;;  %v1386_v19 = vmul.f32 %v6669_v44, %v1257_v49  ;;  %v4084_v40 = vmul.f32 %v6752_v50, %v3955_v1  ;;  %v2029_v52 = vmul.f32 %v10453_v7, %v10516_v46  ;;  %v10518_v49 = vld [vmem:[#allocation103_spill] sm:$0xff] }
 0x2f1   : > { %v4596_v35 = vadd.f32 %v4532_v2, %v4146_v47  ;;  %v2479_v61 = vmul.f32 %v10454_v29, %v10516_v46  ;;  %v1836_v56 = vmul.f32 %v6672_v9, %v1707_v54  ;;  %v2929_v16 = vmul.f32 %v10455_v31, %v10516_v46 }
 0x2f2   : > { %v2798_v6 = vadd.f32 %v2734_v21, %v2348_v59  ;;  %v3379_v0 = vmul.f32 %v10456_v3, %v10516_v46  ;;  %v2093_v53 = vadd.f32 %v2029_v52, %v10517_v62  ;;  %v3829_v8 = vmul.f32 %v10442_v22, %v10516_v46 }
 0x2f3   : > { %4823 = vadd.xlane.f32.xlu0 %v4596_v35  ;;  %v2543_v27 = vadd.f32 %v2479_v61, %v10517_v62  ;;  %v4279_v43 = vmul.f32 %v10443_v51, %v10516_v46  ;;  %v1900_v30 = vadd.f32 %v1836_v56, %v1386_v19  ;;  %v2993_v26 = vadd.f32 %v2929_v16, %v10517_v62 }
 0x2f4   : > { %v3248_v36 = vadd.f32 %v3184_v10, %v2798_v6  ;;  %v3443_v48 = vadd.f32 %v3379_v0, %v10517_v62  ;;  %v2157_v42 = vmax.f32 %v2093_v53, 0.0  ;;  %v3893_v55 = vadd.f32 %v3829_v8, %v10517_v62 }
 0x2f5   : > { %v2607_v25 = vmax.f32 %v2543_v27, 0.0  ;;  %v4343_v38 = vadd.f32 %v4279_v43, %v10517_v62  ;;  %v3057_v4 = vmax.f32 %v2993_v26, 0.0  ;;  %v1256_v47 = vmax.f32 %v10518_v49, 0.0 }
 0x2f6   : > { %v3698_v2 = vadd.f32 %v3634_v23, %v3248_v36  ;;  %v3507_v1 = vmax.f32 %v3443_v48, 0.0  ;;  %v4534_v21 = vmul.f32 %v6906_v63, %v4405_v14  ;;  %v2286_v10 = vmul.f32 %v6675_v24, %v2157_v42  ;;  %v10519_v14 = vld [vmem:[#allocation11_spill] sm:$0xff] }
 0x2f7   : > { %v2736_v59 = vmul.f32 %v6678_v37, %v2607_v25  ;;  %v3957_v19 = vmax.f32 %v3893_v55, 0.0  ;;  %v3186_v35 = vmul.f32 %v6684_v17, %v3057_v4  ;;  %v4407_v52 = vmax.f32 %v4343_v38, 0.0 }
 0x2f8   : > { %v4148_v54 = vadd.f32 %v4084_v40, %v3698_v2  ;;  %v3636_v46 = vmul.f32 %v6687_v57, %v3507_v1  ;;  %v2350_v61 = vadd.f32 %v2286_v10, %v1900_v30  ;;  %v1385_v6 = vmul.f32 %v6669_v44, %v1256_v47  ;;  %v10520_v10 = vld [vmem:[#allocation71_spill] sm:$0xff] }
 0x2f9   : > { %v4086_v23 = vmul.f32 %v6752_v50, %v3957_v19  ;;  %v1706_v56 = vmax.f32 %v7773_v60, 0.0  ;;  %v2028_v0 = vmul.f32 %v10453_v7, %v10519_v14  ;;  %v2478_v62 = vmul.f32 %v10454_v29, %v10519_v14 }
 0x2fa   : > { %v4598_v16 = vadd.f32 %v4534_v21, %v4148_v54  ;;  %v2928_v40 = vmul.f32 %v10455_v31, %v10519_v14  ;;  %v2800_v53 = vadd.f32 %v2736_v59, %v2350_v61  ;;  %v3378_v8 = vmul.f32 %v10456_v3, %v10519_v14 }
 0x2fb   : > { %v1835_v27 = vmul.f32 %v6672_v9, %v1706_v56  ;;  %v3828_v43 = vmul.f32 %v10442_v22, %v10519_v14  ;;  %v2092_v60 = vadd.f32 %v2028_v0, %v7737_v41  ;;  %v2542_v36 = vadd.f32 %v2478_v62, %v7737_v41  ;;  %v10521_v0 = vld [vmem:[#allocation72_spill] sm:$0xff] }
 0x2fc   : > { %4827 = vadd.xlane.f32.xlu2 %v4598_v16  ;;  %v2992_v30 = vadd.f32 %v2928_v40, %v7737_v41  ;;  %v4278_v26 = vmul.f32 %v10443_v51, %v10519_v14  ;;  %v3250_v48 = vadd.f32 %v3186_v35, %v2800_v53  ;;  %v3442_v25 = vadd.f32 %v3378_v8, %v7737_v41  ;;  %v10522_v40 = vld [vmem:[#allocation87_spill] sm:$0xff] }
 0x2fd   : > { %v1899_v42 = vadd.f32 %v1835_v27, %v1385_v6  ;;  %v3892_v55 = vadd.f32 %v3828_v43, %v7737_v41  ;;  %v2156_v38 = vmax.f32 %v2092_v60, 0.0  ;;  %v2606_v2 = vmax.f32 %v2542_v36, 0.0  ;;  %v10523_v36 = vld [vmem:[#allocation70_spill] sm:$0xff] }
 0x2fe   : > { %v3056_v4 = vmax.f32 %v2992_v30, 0.0  ;;  %v4342_v1 = vadd.f32 %v4278_v26, %v7737_v41  ;;  %v3700_v49 = vadd.f32 %v3636_v46, %v3250_v48  ;;  %v3506_v47 = vmax.f32 %v3442_v25, 0.0 }
 0x2ff   : > { %v3956_v21 = vmax.f32 %v3892_v55, 0.0  ;;  %v1258_v59 = vmax.f32 %v10520_v10, 0.0  ;;  %v4536_v19 = vmul.f32 %v6906_v63, %v4407_v52  ;;  %v2285_v54 = vmul.f32 %v6675_v24, %v2156_v38 }
 0x300   : > { %v2735_v35 = vmul.f32 %v6678_v37, %v2606_v2  ;;  %v3185_v61 = vmul.f32 %v6684_v17, %v3056_v4  ;;  %v4150_v6 = vadd.f32 %v4086_v23, %v3700_v49  ;;  %v3635_v56 = vmul.f32 %v6687_v57, %v3506_v47 }
 0x301   : > { %v4085_v16 = vmul.f32 %v6752_v50, %v3956_v21  ;;  %v4406_v14 = vmax.f32 %v4342_v1, 0.0  ;;  %v2349_v41 = vadd.f32 %v2285_v54, %v1899_v42  ;;  %v1387_v46 = vmul.f32 %v6669_v44, %v1258_v59 }
 0x302   : > { %v1708_v62 = vmax.f32 %v10521_v0, 0.0  ;;  %v2030_v52 = vmul.f32 %v10453_v7, %v10522_v40  ;;  %v4600_v53 = vadd.f32 %v4536_v19, %v4150_v6  ;;  %v2480_v27 = vmul.f32 %v10454_v29, %v10522_v40 }
 0x303   : > { %v2930_v23 = vmul.f32 %v10455_v31, %v10522_v40  ;;  %v3380_v8 = vmul.f32 %v10456_v3, %v10522_v40  ;;  %v2799_v43 = vadd.f32 %v2735_v35, %v2349_v41  ;;  %v3830_v26 = vmul.f32 %v10442_v22, %v10522_v40  ;;  %v10524_v35 = vld [vmem:[#allocation108_spill] sm:$0xff] }
 0x304   : > { %v1837_v60 = vmul.f32 %v6672_v9, %v1708_v62  ;;  %v2094_v30 = vadd.f32 %v2030_v52, %v10523_v36  ;;  %4831 = vadd.xlane.f32.xlu1 %v4600_v53  ;;  %v2544_v48 = vadd.f32 %v2480_v27, %v10523_v36  ;;  %v4280_v55 = vmul.f32 %v10443_v51, %v10522_v40  ;;  %v10525_v27 = vld [vmem:[#allocation63_spill] sm:$0xff] }
 0x305   : > { %v2994_v42 = vadd.f32 %v2930_v23, %v10523_v36  ;;  %v3444_v25 = vadd.f32 %v3380_v8, %v10523_v36  ;;  %v3249_v38 = vadd.f32 %v3185_v61, %v2799_v43  ;;  %v3894_v1 = vadd.f32 %v3830_v26, %v10523_v36  ;;  %v10526_v8 = vld [vmem:[#allocation119_spill] sm:$0xff] }
 0x306   : > { %v1901_v2 = vadd.f32 %v1837_v60, %v1387_v46  ;;  %v2158_v4 = vmax.f32 %v2094_v30, 0.0  ;;  %v2608_v49 = vmax.f32 %v2544_v48, 0.0  ;;  %v4344_v10 = vadd.f32 %v4280_v55, %v10523_v36  ;;  %v10527_v48 = vld [vmem:[#allocation107_spill] sm:$0xff] }
 0x307   : > { %v3058_v47 = vmax.f32 %v2994_v42, 0.0  ;;  %v3508_v21 = vmax.f32 %v3444_v25, 0.0  ;;  %v3699_v59 = vadd.f32 %v3635_v56, %v3249_v38  ;;  %v3958_v54 = vmax.f32 %v3894_v1, 0.0 }
 0x308   : > { %v2287_v19 = vmul.f32 %v6675_v24, %v2158_v4  ;;  %v1260_v6 = vmax.f32 %v10524_v35, 0.0  ;;  %v4535_v41 = vmul.f32 %v6906_v63, %v4406_v14  ;;  %v2737_v0 = vmul.f32 %v6678_v37, %v2608_v49 }
 0x309   : > { %v3187_v61 = vmul.f32 %v6684_v17, %v3058_v47  ;;  %v3637_v46 = vmul.f32 %v6687_v57, %v3508_v21  ;;  %v4149_v62 = vadd.f32 %v4085_v16, %v3699_v59  ;;  %v4087_v52 = vmul.f32 %v6752_v50, %v3958_v54 }
 0x30a   : > { %v2351_v40 = vadd.f32 %v2287_v19, %v1901_v2  ;;  %v4408_v53 = vmax.f32 %v4344_v10, 0.0  ;;  %v1389_v56 = vmul.f32 %v6669_v44, %v1260_v6  ;;  %v1710_v23 = vmax.f32 %v10525_v27, 0.0 }
 0x30b   : > { %v2032_v43 = vmul.f32 %v10453_v7, %v10526_v8  ;;  %v2482_v14 = vmul.f32 %v10454_v29, %v10526_v8  ;;  %v4599_v60 = vadd.f32 %v4535_v41, %v4149_v62  ;;  %v2932_v30 = vmul.f32 %v10455_v31, %v10526_v8 }
 0x30c   : > { %v2801_v36 = vadd.f32 %v2737_v0, %v2351_v40  ;;  %v3382_v16 = vmul.f32 %v10456_v3, %v10526_v8  ;;  %v1839_v26 = vmul.f32 %v6672_v9, %v1710_v23  ;;  %v3832_v55 = vmul.f32 %v10442_v22, %v10526_v8 }
 0x30d   : > { %v2096_v42 = vadd.f32 %v2032_v43, %v10527_v48  ;;  %v2546_v25 = vadd.f32 %v2482_v14, %v10527_v48  ;;  %4829 = vadd.xlane.f32.xlu0 %v4599_v60  ;;  %v2996_v2 = vadd.f32 %v2932_v30, %v10527_v48  ;;  %v4282_v1 = vmul.f32 %v10443_v51, %v10526_v8 }
 0x30e   : > { %v3251_v38 = vadd.f32 %v3187_v61, %v2801_v36  ;;  %v3446_v4 = vadd.f32 %v3382_v16, %v10527_v48  ;;  %v1903_v49 = vadd.f32 %v1839_v26, %v1389_v56  ;;  %v3896_v10 = vadd.f32 %v3832_v55, %v10527_v48  ;;  %v10528_v61 = vld [vmem:[#allocation64_spill] sm:$0xff]  ;;  %v10529_v36 = vld [vmem:[#allocation14_spill] sm:$0xff] }
 0x30f   : > { %v2160_v47 = vmax.f32 %v2096_v42, 0.0  ;;  %v2610_v21 = vmax.f32 %v2546_v25, 0.0  ;;  %v3060_v19 = vmax.f32 %v2996_v2, 0.0  ;;  %v4346_v35 = vadd.f32 %v4282_v1, %v10527_v48 }
 0x310   : > { %v3701_v59 = vadd.f32 %v3637_v46, %v3251_v38  ;;  %v3510_v54 = vmax.f32 %v3446_v4, 0.0  ;;  %v4537_v6 = vmul.f32 %v6906_v63, %v4408_v53  ;;  %v3960_v0 = vmax.f32 %v3896_v10, 0.0 }
 0x311   : > { %v2289_v41 = vmul.f32 %v6675_v24, %v2160_v47  ;;  %v1259_v62 = vmax.f32 %v10528_v61, 0.0  ;;  %v2739_v27 = vmul.f32 %v6678_v37, %v2610_v21  ;;  %v3189_v56 = vmul.f32 %v6684_v17, %v3060_v19 }
 0x312   : > { %v4151_v40 = vadd.f32 %v4087_v52, %v3701_v59  ;;  %v3639_v23 = vmul.f32 %v6687_v57, %v3510_v54  ;;  %v4410_v46 = vmax.f32 %v4346_v35, 0.0  ;;  %v1709_v14 = vmax.f32 %v7829_v12, 0.0 }
 0x313   : > { %v2353_v8 = vadd.f32 %v2289_v41, %v1903_v49  ;;  %v1388_v43 = vmul.f32 %v6669_v44, %v1259_v62  ;;  %v4089_v53 = vmul.f32 %v6752_v50, %v3960_v0  ;;  %v2031_v30 = vmul.f32 %v10453_v7, %v10529_v36 }
 0x314   : > { %v4601_v60 = vadd.f32 %v4537_v6, %v4151_v40  ;;  %v2481_v52 = vmul.f32 %v10454_v29, %v10529_v36  ;;  %v1838_v26 = vmul.f32 %v6672_v9, %v1709_v14  ;;  %v2931_v48 = vmul.f32 %v10455_v31, %v10529_v36  ;;  %v10530_v6 = vld [vmem:[#allocation27_spill] sm:$0xff] }
 0x315   : > { %v2803_v16 = vadd.f32 %v2739_v27, %v2353_v8  ;;  %v3381_v42 = vmul.f32 %v10456_v3, %v10529_v36  ;;  %v2095_v12 = vadd.f32 %v2031_v30, %v7795_v39  ;;  %v3831_v55 = vmul.f32 %v10442_v22, %v10529_v36 }
 0x316   : > { %4833 = vadd.xlane.f32.xlu2 %v4601_v60  ;;  %v2545_v25 = vadd.f32 %v2481_v52, %v7795_v39  ;;  %v4281_v38 = vmul.f32 %v10443_v51, %v10529_v36  ;;  %v1902_v4 = vadd.f32 %v1838_v26, %v1388_v43  ;;  %v2995_v1 = vadd.f32 %v2931_v48, %v7795_v39  ;;  %v10531_v60 = vld [vmem:[#allocation28_spill] sm:$0xff] }
 0x317   : > { %v3253_v2 = vadd.f32 %v3189_v56, %v2803_v16  ;;  %v3445_v49 = vadd.f32 %v3381_v42, %v7795_v39  ;;  %v2159_v47 = vmax.f32 %v2095_v12, 0.0  ;;  %v3895_v10 = vadd.f32 %v3831_v55, %v7795_v39 }
 0x318   : > { %v2609_v21 = vmax.f32 %v2545_v25, 0.0  ;;  %v4345_v59 = vadd.f32 %v4281_v38, %v7795_v39  ;;  %v3059_v54 = vmax.f32 %v2995_v1, 0.0  ;;  %v1261_v41 = vmax.f32 %v10530_v6, 0.0  ;;  %v10533_v25 = vld [vmem:[#allocation26_spill] sm:$0xff] }
 0x319   : > { %v3703_v19 = vadd.f32 %v3639_v23, %v3253_v2  ;;  %v3509_v35 = vmax.f32 %v3445_v49, 0.0  ;;  %v4539_v0 = vmul.f32 %v6906_v63, %v4410_v46  ;;  %v2288_v61 = vmul.f32 %v6675_v24, %v2159_v47  ;;  %v10532_v46 = vld [vmem:[#allocation118_spill] sm:$0xff] }
 0x31a   : > { %v2738_v62 = vmul.f32 %v6678_v37, %v2609_v21  ;;  %v3959_v40 = vmax.f32 %v3895_v10, 0.0  ;;  %v3188_v56 = vmul.f32 %v6684_v17, %v3059_v54  ;;  %v4409_v43 = vmax.f32 %v4345_v59, 0.0 }
 0x31b   : > { %v4153_v27 = vadd.f32 %v4089_v53, %v3703_v19  ;;  %v3638_v8 = vmul.f32 %v6687_v57, %v3509_v35  ;;  %v2352_v14 = vadd.f32 %v2288_v61, %v1902_v4  ;;  %v1390_v23 = vmul.f32 %v6669_v44, %v1261_v41 }
 0x31c   : > { %v4088_v39 = vmul.f32 %v6752_v50, %v3959_v40  ;;  %v1711_v36 = vmax.f32 %v10531_v60, 0.0  ;;  %v2033_v52 = vmul.f32 %v10453_v7, %v10532_v46  ;;  %v2483_v16 = vmul.f32 %v10454_v29, %v10532_v46 }
 0x31d   : > { %v4603_v30 = vadd.f32 %v4539_v0, %v4153_v27  ;;  %v2933_v53 = vmul.f32 %v10455_v31, %v10532_v46  ;;  %v2802_v26 = vadd.f32 %v2738_v62, %v2352_v14  ;;  %v3383_v42 = vmul.f32 %v10456_v3, %v10532_v46 }
 0x31e   : > { %v1840_v48 = vmul.f32 %v6672_v9, %v1711_v36  ;;  %v3833_v12 = vmul.f32 %v10442_v22, %v10532_v46  ;;  %v2097_v55 = vadd.f32 %v2033_v52, %v10533_v25  ;;  %v2547_v38 = vadd.f32 %v2483_v16, %v10533_v25 }
 0x31f   : > { %4837 = vadd.xlane.f32.xlu1 %v4603_v30  ;;  %v2997_v2 = vadd.f32 %v2933_v53, %v10533_v25  ;;  %v4283_v4 = vmul.f32 %v10443_v51, %v10532_v46  ;;  %v3252_v1 = vadd.f32 %v3188_v56, %v2802_v26  ;;  %v3447_v47 = vadd.f32 %v3383_v42, %v10533_v25  ;;  %v10534_v30 = vld [vmem:[#allocation66_spill] sm:$0xff]  ;;  %v10536_v42 = vld [vmem:[#allocation117_spill] sm:$0xff] }
 0x320   : > { %v1904_v49 = vadd.f32 %v1840_v48, %v1390_v23  ;;  %v3897_v21 = vadd.f32 %v3833_v12, %v10533_v25  ;;  %v2161_v10 = vmax.f32 %v2097_v55, 0.0  ;;  %v2611_v59 = vmax.f32 %v2547_v38, 0.0 }
 0x321   : > { %v3061_v19 = vmax.f32 %v2997_v2, 0.0  ;;  %v4347_v54 = vadd.f32 %v4283_v4, %v10533_v25  ;;  %v3702_v35 = vadd.f32 %v3638_v8, %v3252_v1  ;;  %v3511_v6 = vmax.f32 %v3447_v47, 0.0 }
 0x322   : > { %v3961_v41 = vmax.f32 %v3897_v21, 0.0  ;;  %v1263_v0 = vmax.f32 %v7857_v5, 0.0  ;;  %v4538_v61 = vmul.f32 %v6906_v63, %v4409_v43  ;;  %v2290_v62 = vmul.f32 %v6675_v24, %v2161_v10  ;;  %v10535_v5 = vld [vmem:[#allocation149_spill] sm:$0xff] }
 0x323   : > { %v2740_v40 = vmul.f32 %v6678_v37, %v2611_v59  ;;  %v3190_v27 = vmul.f32 %v6684_v17, %v3061_v19  ;;  %v4152_v56 = vadd.f32 %v4088_v39, %v3702_v35  ;;  %v3640_v14 = vmul.f32 %v6687_v57, %v3511_v6 }
 0x324   : > { %v4090_v23 = vmul.f32 %v6752_v50, %v3961_v41  ;;  %v4411_v60 = vmax.f32 %v4347_v54, 0.0  ;;  %v2354_v36 = vadd.f32 %v2290_v62, %v1904_v49  ;;  %v1392_v8 = vmul.f32 %v6669_v44, %v1263_v0  ;;  %v10537_v0 = vld [vmem:[#allocation67_spill] sm:$0xff] }
 0x325   : > { %v1713_v46 = vmax.f32 %v10534_v30, 0.0  ;;  %v2035_v43 = vmul.f32 %v10453_v7, %v10535_v5  ;;  %v4602_v52 = vadd.f32 %v4538_v61, %v4152_v56  ;;  %v2485_v16 = vmul.f32 %v10454_v29, %v10535_v5 }
 0x326   : > { %v2935_v39 = vmul.f32 %v10455_v31, %v10535_v5  ;;  %v3385_v53 = vmul.f32 %v10456_v3, %v10535_v5  ;;  %v2804_v26 = vadd.f32 %v2740_v40, %v2354_v36  ;;  %v3835_v25 = vmul.f32 %v10442_v22, %v10535_v5 }
 0x327   : > { %v1842_v48 = vmul.f32 %v6672_v9, %v1713_v46  ;;  %v2099_v12 = vadd.f32 %v2035_v43, %v10536_v42  ;;  %4835 = vadd.xlane.f32.xlu0 %v4602_v52  ;;  %v2549_v55 = vadd.f32 %v2485_v16, %v10536_v42  ;;  %v4285_v4 = vmul.f32 %v10443_v51, %v10535_v5  ;;  %v10538_v5 = vld [vmem:[#allocation68_spill] sm:$0xff]  ;;  %v10539_v52 = vld [vmem:[#allocation25_spill] sm:$0xff] }
 0x328   : > { %v2999_v38 = vadd.f32 %v2935_v39, %v10536_v42  ;;  %v3449_v2 = vadd.f32 %v3385_v53, %v10536_v42  ;;  %v3254_v1 = vadd.f32 %v3190_v27, %v2804_v26  ;;  %v3899_v21 = vadd.f32 %v3835_v25, %v10536_v42 }
 0x329   : > { %v1906_v49 = vadd.f32 %v1842_v48, %v1392_v8  ;;  %v2163_v47 = vmax.f32 %v2099_v12, 0.0  ;;  %v2613_v10 = vmax.f32 %v2549_v55, 0.0  ;;  %v4349_v54 = vadd.f32 %v4285_v4, %v10536_v42  ;;  %v10540_v42 = vld [vmem:[#allocation79_spill] sm:$0xff] }
 0x32a   : > { %v3063_v59 = vmax.f32 %v2999_v38, 0.0  ;;  %v3513_v19 = vmax.f32 %v3449_v2, 0.0  ;;  %v3704_v35 = vadd.f32 %v3640_v14, %v3254_v1  ;;  %v3963_v41 = vmax.f32 %v3899_v21, 0.0 }
 0x32b   : > { %v2292_v6 = vmul.f32 %v6675_v24, %v2163_v47  ;;  %v1262_v61 = vmax.f32 %v10537_v0, 0.0  ;;  %v4540_v62 = vmul.f32 %v6906_v63, %v4411_v60  ;;  %v2742_v40 = vmul.f32 %v6678_v37, %v2613_v10 }
 0x32c   : > { %v3192_v27 = vmul.f32 %v6684_v17, %v3063_v59  ;;  %v3642_v56 = vmul.f32 %v6687_v57, %v3513_v19  ;;  %v4154_v36 = vadd.f32 %v4090_v23, %v3704_v35  ;;  %v4092_v30 = vmul.f32 %v6752_v50, %v3963_v41 }
 0x32d   : > { %v2356_v8 = vadd.f32 %v2292_v6, %v1906_v49  ;;  %v4413_v46 = vmax.f32 %v4349_v54, 0.0  ;;  %v1391_v14 = vmul.f32 %v6669_v44, %v1262_v61  ;;  %v1712_v43 = vmax.f32 %v10538_v5, 0.0  ;;  %v4760_v49 = vpop.xlane.xlu2 %4759 }
 0x32e   : > { %v2034_v16 = vmul.f32 %v10453_v7, %v10539_v52  ;;  %v2484_v60 = vmul.f32 %v10454_v29, %v10539_v52  ;;  %v4604_v39 = vadd.f32 %v4540_v62, %v4154_v36  ;;  %v2934_v26 = vmul.f32 %v10455_v31, %v10539_v52  ;;  %v4951_v62 = vld [vmem:[%s9647_s3] sm:$0xff] }
 0x32f   : > { %v2806_v53 = vadd.f32 %v2742_v40, %v2356_v8  ;;  %v3384_v23 = vmul.f32 %v10456_v3, %v10539_v52  ;;  %v1841_v48 = vmul.f32 %v6672_v9, %v1712_v43  ;;  %v3834_v55 = vmul.f32 %v10442_v22, %v10539_v52 }
 0x330   : > { %v2098_v12 = vadd.f32 %v2034_v16, %v10540_v42  ;;  %v2548_v25 = vadd.f32 %v2484_v60, %v10540_v42  ;;  %4839 = vadd.xlane.f32.xlu2 %v4604_v39  ;;  %v2998_v2 = vadd.f32 %v2934_v26, %v10540_v42  ;;  %v4284_v1 = vmul.f32 %v10443_v51, %v10539_v52  ;;  %v10542_v39 = vld [vmem:[#allocation85_spill] sm:$0xff]  ;;  %v10543_v26 = vld [vmem:[#allocation148_spill] sm:$0xff] }
 0x331   : > { %v3256_v38 = vadd.f32 %v3192_v27, %v2806_v53  ;;  %v3448_v4 = vadd.f32 %v3384_v23, %v10540_v42  ;;  %v1905_v47 = vadd.f32 %v1841_v48, %v1391_v14  ;;  %v3898_v59 = vadd.f32 %v3834_v55, %v10540_v42  ;;  %v10544_v55 = vld [vmem:[#allocation35_spill] sm:$0xff] }
 0x332   : > { %v2162_v21 = vmax.f32 %v2098_v12, 0.0  ;;  %v2612_v10 = vmax.f32 %v2548_v25, 0.0  ;;  %v3062_v54 = vmax.f32 %v2998_v2, 0.0  ;;  %v4348_v6 = vadd.f32 %v4284_v1, %v10540_v42 }
 0x333   : > { %v3706_v19 = vadd.f32 %v3642_v56, %v3256_v38  ;;  %v3512_v35 = vmax.f32 %v3448_v4, 0.0  ;;  %v4542_v41 = vmul.f32 %v6906_v63, %v4413_v46  ;;  %v3962_v61 = vmax.f32 %v3898_v59, 0.0  ;;  %v10541_v46 = vld [vmem:[#allocation128_spill] sm:$0xff] }
 0x334   : > { %v2291_v0 = vmul.f32 %v6675_v24, %v2162_v21  ;;  %v4887_v40 = vmul.f32 0.00390625, %v4760_v49  ;;  %v2741_v36 = vmul.f32 %v6678_v37, %v2612_v10  ;;  %v3191_v8 = vmul.f32 %v6684_v17, %v3062_v54 }
 0x335   : > { %v4156_v27 = vadd.f32 %v4092_v30, %v3706_v19  ;;  %v3641_v56 = vmul.f32 %v6687_v57, %v3512_v35  ;;  %v4091_v5 = vmul.f32 %v6752_v50, %v3962_v61  ;;  %v4412_v43 = vmax.f32 %v4348_v6, 0.0 }
 0x336   : > { %v2355_v14 = vadd.f32 %v2291_v0, %v1905_v47  ;;  %v1264_v52 = vmax.f32 %v10541_v46, 0.0  ;;  %v8794_v60 = vmul.f32 %v4951_v62, %v4887_v40  ;;  %v1714_v53 = vmax.f32 %v10542_v39, 0.0 }
 0x337   : > { %v4606_v16 = vadd.f32 %v4542_v41, %v4156_v27  ;;  %v2036_v30 = vmul.f32 %v10453_v7, %v10543_v26  ;;  %v2486_v42 = vmul.f32 %v10454_v29, %v10543_v26  ;;  %v2936_v12 = vmul.f32 %v10455_v31, %v10543_v26 }
 0x338   : > { %v2805_v23 = vadd.f32 %v2741_v36, %v2355_v14  ;;  %v1393_v48 = vmul.f32 %v6669_v44, %v1264_v52  ;;  %v1843_v25 = vmul.f32 %v6672_v9, %v1714_v53  ;;  %v3386_v2 = vmul.f32 %v10456_v3, %v10543_v26 }
 0x339   : > { %4843 = vadd.xlane.f32.xlu1 %v4606_v16  ;;  %v2100_v38 = vadd.f32 %v2036_v30, %v10544_v55  ;;  %v3836_v4 = vmul.f32 %v10442_v22, %v10543_v26  ;;  %v2550_v49 = vadd.f32 %v2486_v42, %v10544_v55  ;;  %v3000_v47 = vadd.f32 %v2936_v12, %v10544_v55 }
 0x33a   : > { %v3255_v1 = vadd.f32 %v3191_v8, %v2805_v23  ;;  %v4286_v21 = vmul.f32 %v10443_v51, %v10543_v26  ;;  %v1907_v10 = vadd.f32 %v1843_v25, %v1393_v48  ;;  %v3450_v19 = vadd.f32 %v3386_v2, %v10544_v55  ;;  %v10545_v23 = vld [vmem:[#allocation73_spill] sm:$0xff] }
 0x33b   : > { %v2164_v59 = vmax.f32 %v2100_v38, 0.0  ;;  %v3900_v54 = vadd.f32 %v3836_v4, %v10544_v55  ;;  %v2614_v6 = vmax.f32 %v2550_v49, 0.0  ;;  %v3064_v41 = vmax.f32 %v3000_v47, 0.0 }
 0x33c   : > { %v3705_v35 = vadd.f32 %v3641_v56, %v3255_v1  ;;  %v4350_v0 = vadd.f32 %v4286_v21, %v10544_v55  ;;  %v3514_v62 = vmax.f32 %v3450_v19, 0.0  ;;  %v1266_v27 = vmax.f32 %v7911_v45, 0.0  ;;  %v10546_v45 = vld [vmem:[#allocation223_spill] sm:$0xff] }
 0x33d   : > { %v2293_v61 = vmul.f32 %v6675_v24, %v2164_v59  ;;  %v3964_v40 = vmax.f32 %v3900_v54, 0.0  ;;  %v4541_v8 = vmul.f32 %v6906_v63, %v4412_v43  ;;  %v2743_v14 = vmul.f32 %v6678_v37, %v2614_v6  ;;  %v10547_v43 = vld [vmem:[#allocation176_spill] sm:$0xff] }
 0x33e   : > { %v4155_v36 = vadd.f32 %v4091_v5, %v3705_v35  ;;  %v3193_v46 = vmul.f32 %v6684_v17, %v3064_v41  ;;  %v3643_v56 = vmul.f32 %v6687_v57, %v3514_v62  ;;  %v4414_v39 = vmax.f32 %v4350_v0, 0.0 }
 0x33f   : > { %v2357_v52 = vadd.f32 %v2293_v61, %v1907_v10  ;;  %v4093_v16 = vmul.f32 %v6752_v50, %v3964_v40  ;;  %v1395_v26 = vmul.f32 %v6669_v44, %v1266_v27  ;;  %v1716_v30 = vmax.f32 %v7915_v15, 0.0  ;;  %v10548_v40 = vld [vmem:[#allocation132_spill] sm:$0xff] }
 0x340   : > { %v4605_v53 = vadd.f32 %v4541_v8, %v4155_v36  ;;  %v2102_v5 = vadd.f32 %v10546_v45, %v10545_v23  ;;  %v2488_v42 = vmul.f32 %v10454_v29, %v10547_v43  ;;  %v2938_v12 = vmul.f32 %v10455_v31, %v10547_v43  ;;  %v10550_v45 = vld [vmem:[#allocation59_spill] sm:$0xff] }
 0x341   : > { %v2807_v48 = vadd.f32 %v2743_v14, %v2357_v52  ;;  %v3388_v25 = vmul.f32 %v10456_v3, %v10547_v43  ;;  %v1845_v55 = vmul.f32 %v6672_v9, %v1716_v30  ;;  %v3838_v15 = vmul.f32 %v10442_v22, %v10547_v43 }
 0x342   : > { %4841 = vadd.xlane.f32.xlu0 %v4605_v53  ;;  %v2166_v38 = vmax.f32 %v2102_v5, 0.0  ;;  %v4288_v2 = vmul.f32 %v10443_v51, %v10547_v43  ;;  %v2552_v1 = vadd.f32 %v2488_v42, %v10545_v23  ;;  %v3002_v49 = vadd.f32 %v2938_v12, %v10545_v23 }
 0x343   : > { %v3257_v4 = vadd.f32 %v3193_v46, %v2807_v48  ;;  %v3452_v47 = vadd.f32 %v3388_v25, %v10545_v23  ;;  %v1909_v21 = vadd.f32 %v1845_v55, %v1395_v26  ;;  %v3902_v59 = vadd.f32 %v3838_v15, %v10545_v23  ;;  %v10549_v26 = vld [vmem:[#allocation83_spill] sm:$0xff] }
 0x344   : > { %v2295_v10 = vmul.f32 %v6675_v24, %v2166_v38  ;;  %v4352_v19 = vadd.f32 %v4288_v2, %v10545_v23  ;;  %v2616_v35 = vmax.f32 %v2552_v1, 0.0  ;;  %v3066_v6 = vmax.f32 %v3002_v49, 0.0  ;;  %v10551_v55 = vld [vmem:[#allocation111_spill] sm:$0xff]  ;;  %v4766_v2 = vpop.xlane.xlu2 %4765 }
 0x345   : > { %v3707_v54 = vadd.f32 %v3643_v56, %v3257_v4  ;;  %v3516_v41 = vmax.f32 %v3452_v47, 0.0  ;;  %v4543_v0 = vmul.f32 %v6906_v63, %v4414_v39  ;;  %v3966_v62 = vmax.f32 %v3902_v59, 0.0 }
 0x346   : > { %v2359_v61 = vadd.f32 %v2295_v10, %v1909_v21  ;;  %v1265_v27 = vmax.f32 %v10548_v40, 0.0  ;;  %v2745_v8 = vmul.f32 %v6678_v37, %v2616_v35  ;;  %v3195_v14 = vmul.f32 %v6684_v17, %v3066_v6 }
 0x347   : > { %v4157_v36 = vadd.f32 %v4093_v16, %v3707_v54  ;;  %v4416_v46 = vmax.f32 %v4352_v19, 0.0  ;;  %v3645_v52 = vmul.f32 %v6687_v57, %v3516_v41  ;;  %v4095_v53 = vmul.f32 %v6752_v50, %v3966_v62  ;;  %v4954_v41 = vld [vmem:[%s9647_s3 + $0x18] sm:$0xff] }
 0x348   : > { %v1394_v56 = vmul.f32 %v6669_v44, %v1265_v27  ;;  %v1715_v30 = vmax.f32 %v10549_v26, 0.0  ;;  %v2809_v39 = vadd.f32 %v2745_v8, %v2359_v61  ;;  %v2037_v5 = vmul.f32 %v10453_v7, %v10550_v45  ;;  %v4764_v61 = vpop.xlane.xlu1 %4763  ;;  %v4762_v8 = vpop.xlane.xlu0 %4761 }
 0x349   : > { %v4607_v23 = vadd.f32 %v4543_v0, %v4157_v36  ;;  %v2487_v16 = vmul.f32 %v10454_v29, %v10550_v45  ;;  %v2937_v43 = vmul.f32 %v10455_v31, %v10550_v45  ;;  %v3387_v42 = vmul.f32 %v10456_v3, %v10550_v45 }
 0x34a   : > { %v1844_v48 = vmul.f32 %v6672_v9, %v1715_v30  ;;  %v3837_v12 = vmul.f32 %v10442_v22, %v10550_v45  ;;  %v3259_v25 = vadd.f32 %v3195_v14, %v2809_v39  ;;  %v2101_v38 = vadd.f32 %v2037_v5, %v10551_v55  ;;  %v4953_v30 = vld [vmem:[%s9647_s3 + $0x10] sm:$0xff] }
 0x34b   : > { %4845 = vadd.xlane.f32.xlu2 %v4607_v23  ;;  %v2551_v7 = vadd.f32 %v2487_v16, %v10551_v55  ;;  %v4287_v15 = vmul.f32 %v10443_v51, %v10550_v45  ;;  %v3001_v1 = vadd.f32 %v2937_v43, %v10551_v55  ;;  %v3451_v49 = vadd.f32 %v3387_v42, %v10551_v55  ;;  %v4952_v45 = vld [vmem:[%s9647_s3 + $0x8] sm:$0xff]  ;;  %v10552_v16 = vld [vmem:[#allocation92_spill] sm:$0xff]  ;;  %v10553_v43 = vld [vmem:[#allocation102_spill] sm:$0xff] }
 0x34c   : > { %v1908_v4 = vadd.f32 %v1844_v48, %v1394_v56  ;;  %v3901_v47 = vadd.f32 %v3837_v12, %v10551_v55  ;;  %v3709_v21 = vadd.f32 %v3645_v52, %v3259_v25  ;;  %v2165_v10 = vmax.f32 %v2101_v38, 0.0  ;;  %v10554_v12 = vld [vmem:[#allocation91_spill] sm:$0xff]  ;;  %v10555_v25 = vld [vmem:[#allocation220_spill] sm:$0xff] }
 0x34d   : > { %v2615_v59 = vmax.f32 %v2551_v7, 0.0  ;;  %v4351_v19 = vadd.f32 %v4287_v15, %v10551_v55  ;;  %v3065_v54 = vmax.f32 %v3001_v1, 0.0  ;;  %v3515_v35 = vmax.f32 %v3451_v49, 0.0  ;;  %v10556_v15 = vld [vmem:[#allocation175_spill] sm:$0xff] }
 0x34e   : > { %v3965_v6 = vmax.f32 %v3901_v47, 0.0  ;;  %v4890_v0 = vmul.f32 0.00390625, %v4766_v2  ;;  %v4159_v62 = vadd.f32 %v4095_v53, %v3709_v21  ;;  %v4545_v40 = vmul.f32 %v6906_v63, %v4416_v46 }
 0x34f   : > { %v2294_v27 = vmul.f32 %v6675_v24, %v2165_v10  ;;  %v2744_v36 = vmul.f32 %v6678_v37, %v2615_v59  ;;  %v3194_v14 = vmul.f32 %v6684_v17, %v3065_v54  ;;  %v3644_v52 = vmul.f32 %v6687_v57, %v3515_v35 }
 0x350   : > { %v4094_v56 = vmul.f32 %v6752_v50, %v3965_v6  ;;  %v4415_v26 = vmax.f32 %v4351_v19, 0.0  ;;  %v4609_v23 = vadd.f32 %v4545_v40, %v4159_v62  ;;  %v8884_v39 = vmul.f32 %v4954_v41, %v4890_v0 }
 0x351   : > { %v2358_v53 = vadd.f32 %v2294_v27, %v1908_v4  ;;  %v4889_v46 = vmul.f32 0.00390625, %v4764_v61  ;;  %v4888_v5 = vmul.f32 0.00390625, %v4762_v8  ;;  %v1267_v48 = vmax.f32 %v10552_v16, 0.0 }
 0x352   : > { %v1717_v42 = vmax.f32 %v10553_v43, 0.0  ;;  %v2103_v55 = vadd.f32 %v10555_v25, %v10554_v12  ;;  %4849 = vadd.xlane.f32.xlu1 %v4609_v23  ;;  %v2489_v2 = vmul.f32 %v10454_v29, %v10556_v15  ;;  %v2939_v4 = vmul.f32 %v10455_v31, %v10556_v15 }
 0x353   : > { %v2808_v38 = vadd.f32 %v2744_v36, %v2358_v53  ;;  %v5017_v7 = vmul.f32 %v4953_v30, %v4889_v46  ;;  %v5016_v1 = vmul.f32 %v4952_v45, %v4888_v5  ;;  %v1396_v49 = vmul.f32 %v6669_v44, %v1267_v48 }
 0x354   : > { %v1846_v47 = vmul.f32 %v6672_v9, %v1717_v42  ;;  %v2167_v21 = vmax.f32 %v2103_v55, 0.0  ;;  %v2553_v59 = vadd.f32 %v2489_v2, %v10554_v12  ;;  %v3003_v19 = vadd.f32 %v2939_v4, %v10554_v12  ;;  %v10559_v4 = vld [vmem:[#allocation209_spill] sm:$0xff] }
 0x355   : > { %v3258_v10 = vadd.f32 %v3194_v14, %v2808_v38  ;;  %v3389_v54 = vmul.f32 %v10456_v3, %v10556_v15  ;;  %v5079_v35 = vadd.f32 %v5016_v1, %v8794_v60  ;;  %v3839_v0 = vmul.f32 %v10442_v22, %v10556_v15  ;;  %v10557_v38 = vld [vmem:[#allocation121_spill] sm:$0xff] }
 0x356   : > { %v1910_v6 = vadd.f32 %v1846_v47, %v1396_v49  ;;  %v2296_v41 = vmul.f32 %v6675_v24, %v2167_v21  ;;  %v2617_v62 = vmax.f32 %v2553_v59, 0.0  ;;  %v3067_v40 = vmax.f32 %v3003_v19, 0.0 }
 0x357   : > { %v3708_v61 = vadd.f32 %v3644_v52, %v3258_v10  ;;  %v3453_v27 = vadd.f32 %v3389_v54, %v10554_v12  ;;  %v4544_v36 = vmul.f32 %v6906_v63, %v4415_v26  ;;  %v3903_v14 = vadd.f32 %v3839_v0, %v10554_v12 }
 0x358   : > { %v2360_v8 = vadd.f32 %v2296_v41, %v1910_v6  ;;  %v4289_v30 = vmul.f32 %v10443_v51, %v10556_v15  ;;  %v5080_v23 = vadd.f32 %v5079_v35, %v5017_v7  ;;  %v2746_v53 = vmul.f32 %v6678_v37, %v2617_v62  ;;  %v10558_v7 = vld [vmem:[#allocation242_spill] sm:$0xff] }
 0x359   : > { %v4158_v60 = vadd.f32 %v4094_v56, %v3708_v61  ;;  %v3517_v46 = vmax.f32 %v3453_v27, 0.0  ;;  %v3196_v45 = vmul.f32 %v6684_v17, %v3067_v40  ;;  %v3967_v52 = vmax.f32 %v3903_v14, 0.0  ;;  %v10560_v27 = vld [vmem:[#allocation123_spill] sm:$0xff] }
 0x35a   : > { %v4353_v5 = vadd.f32 %v4289_v30, %v10554_v12  ;;  %v1269_v16 = vmax.f32 %v7960_v20, 0.0  ;;  %v2810_v26 = vadd.f32 %v2746_v53, %v2360_v8  ;;  %v1719_v42 = vmax.f32 %v7964_v33, 0.0 }
 0x35b   : > { %v4608_v48 = vadd.f32 %v4544_v36, %v4158_v60  ;;  %v3646_v43 = vmul.f32 %v6687_v57, %v3517_v46  ;;  %v4096_v25 = vmul.f32 %v6752_v50, %v3967_v52  ;;  %v2105_v15 = vadd.f32 %v10558_v7, %v10557_v38 }
 0x35c   : > { %v4417_v56 = vmax.f32 %v4353_v5, 0.0  ;;  %v1398_v55 = vmul.f32 %v6669_v44, %v1269_v16  ;;  %v3260_v2 = vadd.f32 %v3196_v45, %v2810_v26  ;;  %v1848_v12 = vmul.f32 %v6672_v9, %v1719_v42  ;;  %v10561_v42 = vld [vmem:[#allocation171_spill] sm:$0xff] }
 0x35d   : > { %4847 = vadd.xlane.f32.xlu0 %v4608_v48  ;;  %v2491_v20 = vmul.f32 %v10454_v29, %v10559_v4  ;;  %v2941_v1 = vmul.f32 %v10455_v31, %v10559_v4  ;;  %v2169_v49 = vmax.f32 %v2105_v15, 0.0  ;;  %v3391_v47 = vmul.f32 %v10456_v3, %v10559_v4 }
 0x35e   : > { %v4546_v33 = vmul.f32 %v6906_v63, %v4417_v56  ;;  %v3841_v21 = vmul.f32 %v10442_v22, %v10559_v4  ;;  %v3710_v10 = vadd.f32 %v3646_v43, %v3260_v2  ;;  %v1912_v59 = vadd.f32 %v1848_v12, %v1398_v55  ;;  %v10562_v56 = vld [vmem:[#allocation82_spill] sm:$0xff] }
 0x35f   : > { %v2555_v19 = vadd.f32 %v2491_v20, %v10557_v38  ;;  %v3005_v54 = vadd.f32 %v2941_v1, %v10557_v38  ;;  %v2298_v35 = vmul.f32 %v6675_v24, %v2169_v49  ;;  %v3455_v6 = vadd.f32 %v3391_v47, %v10557_v38  ;;  %v4768_v20 = vpop.xlane.xlu2 %4767 }
 0x360   : > { %v3905_v41 = vadd.f32 %v3841_v21, %v10557_v38  ;;  %v4291_v0 = vmul.f32 %v10443_v51, %v10559_v4  ;;  %v4160_v61 = vadd.f32 %v4096_v25, %v3710_v10  ;;  %v1268_v36 = vmax.f32 %v10560_v27, 0.0 }
 0x361   : > { %v2619_v62 = vmax.f32 %v2555_v19, 0.0  ;;  %v3069_v40 = vmax.f32 %v3005_v54, 0.0  ;;  %v2362_v8 = vadd.f32 %v2298_v35, %v1912_v59  ;;  %v3519_v14 = vmax.f32 %v3455_v6, 0.0  ;;  %v4955_v54 = vld [vmem:[%s9647_s3 + $0x20] sm:$0xff] }
 0x362   : > { %v3969_v30 = vmax.f32 %v3905_v41, 0.0  ;;  %v4355_v60 = vadd.f32 %v4291_v0, %v10557_v38  ;;  %v5081_v53 = vadd.f32 %v5080_v23, %v8884_v39  ;;  %v4610_v46 = vadd.f32 %v4546_v33, %v4160_v61  ;;  %v4772_v61 = vpop.xlane.xlu1 %4771 }
 0x363   : > { %v2748_v45 = vmul.f32 %v6678_v37, %v2619_v62  ;;  %v3198_v52 = vmul.f32 %v6684_v17, %v3069_v40  ;;  %v3648_v5 = vmul.f32 %v6687_v57, %v3519_v14  ;;  %v1397_v48 = vmul.f32 %v6669_v44, %v1268_v36  ;;  %v4770_v62 = vpop.xlane.xlu0 %4769 }
 0x364   : > { %v4098_v16 = vmul.f32 %v6752_v50, %v3969_v30  ;;  %v1718_v26 = vmax.f32 %v7986_v28, 0.0  ;;  %4851 = vadd.xlane.f32.xlu2 %v4610_v46  ;;  %v2104_v25 = vadd.f32 %v10561_v42, %v7950_v58  ;;  %v2490_v39 = vmul.f32 %v10454_v29, %v10562_v56  ;;  %v10563_v42 = vld [vmem:[#allocation105_spill] sm:$0xff] }
 0x365   : > { %v2812_v43 = vadd.f32 %v2748_v45, %v2362_v8  ;;  %v2940_v23 = vmul.f32 %v10455_v31, %v10562_v56  ;;  %v4419_v55 = vmax.f32 %v4355_v60, 0.0  ;;  %v3390_v7 = vmul.f32 %v10456_v3, %v10562_v56  ;;  %v4956_v45 = vld [vmem:[%s9647_s3 + $0x28] sm:$0xff] }
 0x366   : > { %v1847_v38 = vmul.f32 %v6672_v9, %v1718_v26  ;;  %v3840_v28 = vmul.f32 %v10442_v22, %v10562_v56  ;;  %v2168_v2 = vmax.f32 %v2104_v25, 0.0  ;;  %v2554_v12 = vadd.f32 %v2490_v39, %v7950_v58 }
 0x367   : > { %v3262_v15 = vadd.f32 %v3198_v52, %v2812_v43  ;;  %v3004_v4 = vadd.f32 %v2940_v23, %v7950_v58  ;;  %v3454_v33 = vadd.f32 %v3390_v7, %v7950_v58  ;;  %v4290_v47 = vmul.f32 %v10443_v51, %v10562_v56  ;;  %v4957_v43 = vld [vmem:[%s9647_s3 + $0x30] sm:$0xff]  ;;  %v10565_v7 = vld [vmem:[#allocation104_spill] sm:$0xff] }
 0x368   : > { %v1911_v1 = vadd.f32 %v1847_v38, %v1397_v48  ;;  %v3904_v49 = vadd.f32 %v3840_v28, %v7950_v58  ;;  %v2297_v10 = vmul.f32 %v6675_v24, %v2168_v2  ;;  %v2618_v59 = vmax.f32 %v2554_v12, 0.0  ;;  %v10564_v56 = vld [vmem:[#allocation106_spill] sm:$0xff]  ;;  %v10566_v28 = vld [vmem:[#allocation239_spill] sm:$0xff] }
 0x369   : > { %v3712_v21 = vadd.f32 %v3648_v5, %v3262_v15  ;;  %v3068_v19 = vmax.f32 %v3004_v4, 0.0  ;;  %v3518_v35 = vmax.f32 %v3454_v33, 0.0  ;;  %v4354_v41 = vadd.f32 %v4290_v47, %v7950_v58  ;;  %v10567_v4 = vld [vmem:[#allocation208_spill] sm:$0xff] }
 0x36a   : > { %v3968_v6 = vmax.f32 %v3904_v49, 0.0  ;;  %v4891_v0 = vmul.f32 0.00390625, %v4768_v20  ;;  %v4548_v27 = vmul.f32 %v6906_v63, %v4419_v55  ;;  %v2361_v36 = vadd.f32 %v2297_v10, %v1911_v1 }
 0x36b   : > { %v4162_v40 = vadd.f32 %v4098_v16, %v3712_v21  ;;  %v2747_v8 = vmul.f32 %v6678_v37, %v2618_v59  ;;  %v3197_v14 = vmul.f32 %v6684_v17, %v3068_v19  ;;  %v3647_v30 = vmul.f32 %v6687_v57, %v3518_v35 }
 0x36c   : > { %v4418_v60 = vmax.f32 %v4354_v41, 0.0  ;;  %v5019_v46 = vmul.f32 %v4955_v54, %v4891_v0  ;;  %v4893_v5 = vmul.f32 0.00390625, %v4772_v61  ;;  %v4892_v48 = vmul.f32 0.00390625, %v4770_v62 }
 0x36d   : > { %v4612_v58 = vadd.f32 %v4548_v27, %v4162_v40  ;;  %v2811_v52 = vadd.f32 %v2747_v8, %v2361_v36  ;;  %v4097_v16 = vmul.f32 %v6752_v50, %v3968_v6  ;;  %v1270_v25 = vmax.f32 %v10563_v42, 0.0 }
 0x36e   : > { %v4547_v26 = vmul.f32 %v6906_v63, %v4418_v60  ;;  %v1720_v39 = vmax.f32 %v10564_v56, 0.0  ;;  %v5082_v55 = vadd.f32 %v5081_v53, %v5019_v46  ;;  %v5020_v38 = vmul.f32 %v4956_v45, %v4892_v48  ;;  %v10571_v56 = vld [vmem:[#allocation237_spill] sm:$0xff] }
 0x36f   : > { %4855 = vadd.xlane.f32.xlu1 %v4612_v58  ;;  %v3261_v23 = vadd.f32 %v3197_v14, %v2811_v52  ;;  %v2106_v15 = vadd.f32 %v10566_v28, %v10565_v7  ;;  %v1399_v2 = vmul.f32 %v6669_v44, %v1270_v25  ;;  %v2492_v20 = vmul.f32 %v10454_v29, %v10567_v4 }
 0x370   : > { %v1849_v12 = vmul.f32 %v6672_v9, %v1720_v39  ;;  %v2942_v1 = vmul.f32 %v10455_v31, %v10567_v4  ;;  %v8992_v49 = vmul.f32 %v4957_v43, %v4893_v5  ;;  %v3392_v53 = vmul.f32 %v10456_v3, %v10567_v4  ;;  %v10568_v5 = vld [vmem:[#allocation143_spill] sm:$0xff] }
 0x371   : > { %v3711_v33 = vadd.f32 %v3647_v30, %v3261_v23  ;;  %v2170_v47 = vmax.f32 %v2106_v15, 0.0  ;;  %v2556_v10 = vadd.f32 %v2492_v20, %v10565_v7  ;;  %v3842_v19 = vmul.f32 %v10442_v22, %v10567_v4 }
 0x372   : > { %v1913_v21 = vadd.f32 %v1849_v12, %v1399_v2  ;;  %v3006_v59 = vadd.f32 %v2942_v1, %v10565_v7  ;;  %v9000_v35 = vadd.f32 %v5082_v55, %v5020_v38  ;;  %v3456_v41 = vadd.f32 %v3392_v53, %v10565_v7 }
 0x373   : > { %v4161_v54 = vadd.f32 %v4097_v16, %v3711_v33  ;;  %v2299_v6 = vmul.f32 %v6675_v24, %v2170_v47  ;;  %v2620_v0 = vmax.f32 %v2556_v10, 0.0  ;;  %v3906_v62 = vadd.f32 %v3842_v19, %v10565_v7  ;;  %v10569_v16 = vld [vmem:[#allocation131_spill] sm:$0xff] }
 0x374   : > { %v3070_v61 = vmax.f32 %v3006_v59, 0.0  ;;  %v4292_v40 = vmul.f32 %v10443_v51, %v10567_v4  ;;  %v3520_v8 = vmax.f32 %v3456_v41, 0.0  ;;  %v1272_v14 = vmax.f32 %v8007_v13, 0.0 }
 0x375   : > { %v4611_v27 = vadd.f32 %v4547_v26, %v4161_v54  ;;  %v2363_v36 = vadd.f32 %v2299_v6, %v1913_v21  ;;  %v2749_v30 = vmul.f32 %v6678_v37, %v2620_v0  ;;  %v3970_v46 = vmax.f32 %v3906_v62, 0.0  ;;  %v10570_v26 = vld [vmem:[#allocation263_spill] sm:$0xff]  ;;  %v10572_v6 = vld [vmem:[#allocation89_spill] sm:$0xff] }
 0x376   : > { %v3199_v60 = vmul.f32 %v6684_v17, %v3070_v61  ;;  %v4356_v45 = vadd.f32 %v4292_v40, %v10565_v7  ;;  %v3649_v58 = vmul.f32 %v6687_v57, %v3520_v8  ;;  %v1401_v52 = vmul.f32 %v6669_v44, %v1272_v14  ;;  %v10573_v14 = vld [vmem:[#allocation90_spill] sm:$0xff] }
 0x377   : > { %4853 = vadd.xlane.f32.xlu0 %v4611_v27  ;;  %v1722_v48 = vmax.f32 %v10568_v5, 0.0  ;;  %v2108_v43 = vadd.f32 %v10570_v26, %v10569_v16  ;;  %v2813_v42 = vadd.f32 %v2749_v30, %v2363_v36  ;;  %v4099_v13 = vmul.f32 %v6752_v50, %v3970_v46  ;;  %v10574_v5 = vld [vmem:[#allocation145_spill] sm:$0xff] }
 0x378   : > { %v4420_v25 = vmax.f32 %v4356_v45, 0.0  ;;  %v2494_v39 = vmul.f32 %v10454_v29, %v10571_v56  ;;  %v2944_v38 = vmul.f32 %v10455_v31, %v10571_v56  ;;  %v3394_v7 = vmul.f32 %v10456_v3, %v10571_v56 }
 0x379   : > { %v1851_v23 = vmul.f32 %v6672_v9, %v1722_v48  ;;  %v2172_v55 = vmax.f32 %v2108_v43, 0.0  ;;  %v3263_v28 = vadd.f32 %v3199_v60, %v2813_v42  ;;  %v3844_v12 = vmul.f32 %v10442_v22, %v10571_v56  ;;  %v10575_v48 = vld [vmem:[#allocation199_spill] sm:$0xff]  ;;  %v10576_v43 = vld [vmem:[#allocation114_spill] sm:$0xff] }
 0x37a   : > { %v4549_v15 = vmul.f32 %v6906_v63, %v4420_v25  ;;  %v2558_v2 = vadd.f32 %v2494_v39, %v10569_v16  ;;  %v3008_v1 = vadd.f32 %v2944_v38, %v10569_v16  ;;  %v3458_v33 = vadd.f32 %v3394_v7, %v10569_v16 }
 0x37b   : > { %v1915_v4 = vadd.f32 %v1851_v23, %v1401_v52  ;;  %v2301_v20 = vmul.f32 %v6675_v24, %v2172_v55  ;;  %v3713_v47 = vadd.f32 %v3649_v58, %v3263_v28  ;;  %v3908_v21 = vadd.f32 %v3844_v12, %v10569_v16  ;;  %v4774_v23 = vpop.xlane.xlu2 %4773 }
 0x37c   : > { %v2622_v53 = vmax.f32 %v2558_v2, 0.0  ;;  %v4294_v10 = vmul.f32 %v10443_v51, %v10571_v56  ;;  %v3072_v19 = vmax.f32 %v3008_v1, 0.0  ;;  %v3522_v54 = vmax.f32 %v3458_v33, 0.0 }
 0x37d   : > { %v2365_v59 = vadd.f32 %v2301_v20, %v1915_v4  ;;  %v1271_v41 = vmax.f32 %v10572_v6, 0.0  ;;  %v4163_v0 = vadd.f32 %v4099_v13, %v3713_v47  ;;  %v3972_v62 = vmax.f32 %v3908_v21, 0.0  ;;  %v4958_v20 = vld [vmem:[%s9647_s3 + $0x38] sm:$0xff]  ;;  %v4776_v6 = vpop.xlane.xlu0 %4775 }
 0x37e   : > { %v2751_v61 = vmul.f32 %v6678_v37, %v2622_v53  ;;  %v4358_v40 = vadd.f32 %v4294_v10, %v10569_v16  ;;  %v3201_v27 = vmul.f32 %v6684_v17, %v3072_v19  ;;  %v3651_v36 = vmul.f32 %v6687_v57, %v3522_v54  ;;  %v4778_v54 = vpop.xlane.xlu1 %4777 }
 0x37f   : > { %v1400_v8 = vmul.f32 %v6669_v44, %v1271_v41  ;;  %v1721_v30 = vmax.f32 %v10573_v14, 0.0  ;;  %v4613_v60 = vadd.f32 %v4549_v15, %v4163_v0  ;;  %v4101_v45 = vmul.f32 %v6752_v50, %v3972_v62  ;;  %v4959_v14 = vld [vmem:[%s9647_s3 + $0x40] sm:$0xff] }
 0x380   : > { %v2815_v46 = vadd.f32 %v2751_v61, %v2365_v59  ;;  %v4422_v58 = vmax.f32 %v4358_v40, 0.0  ;;  %v2107_v26 = vadd.f32 %v10575_v48, %v10574_v5  ;;  %v2493_v16 = vmul.f32 %v10454_v29, %v10576_v43 }
 0x381   : > { %v1850_v52 = vmul.f32 %v6672_v9, %v1721_v30  ;;  %v2943_v42 = vmul.f32 %v10455_v31, %v10576_v43  ;;  %4857 = vadd.xlane.f32.xlu2 %v4613_v60  ;;  %v3393_v56 = vmul.f32 %v10456_v3, %v10576_v43  ;;  %v3843_v39 = vmul.f32 %v10442_v22, %v10576_v43 }
 0x382   : > { %v3265_v13 = vadd.f32 %v3201_v27, %v2815_v46  ;;  %v4551_v25 = vmul.f32 %v6906_v63, %v4422_v58  ;;  %v2171_v38 = vmax.f32 %v2107_v26, 0.0  ;;  %v2557_v7 = vadd.f32 %v2493_v16, %v10574_v5  ;;  %v10577_v58 = vld [vmem:[#allocation157_spill] sm:$0xff] }
 0x383   : > { %v1914_v55 = vadd.f32 %v1850_v52, %v1400_v8  ;;  %v3007_v28 = vadd.f32 %v2943_v42, %v10574_v5  ;;  %v3457_v2 = vadd.f32 %v3393_v56, %v10574_v5  ;;  %v3907_v12 = vadd.f32 %v3843_v39, %v10574_v5  ;;  %v10579_v26 = vld [vmem:[#allocation65_spill] sm:$0xff]  ;;  %v10581_v56 = vld [vmem:[#allocation236_spill] sm:$0xff] }
 0x384   : > { %v3715_v15 = vadd.f32 %v3651_v36, %v3265_v13  ;;  %v4293_v4 = vmul.f32 %v10443_v51, %v10576_v43  ;;  %v2300_v1 = vmul.f32 %v6675_v24, %v2171_v38  ;;  %v2621_v33 = vmax.f32 %v2557_v7, 0.0  ;;  %v10580_v43 = vld [vmem:[#allocation260_spill] sm:$0xff] }
 0x385   : > { %v3071_v47 = vmax.f32 %v3007_v28, 0.0  ;;  %v4894_v53 = vmul.f32 0.00390625, %v4774_v23  ;;  %v3521_v10 = vmax.f32 %v3457_v2, 0.0  ;;  %v3971_v59 = vmax.f32 %v3907_v12, 0.0 }
 0x386   : > { %v4165_v21 = vadd.f32 %v4101_v45, %v3715_v15  ;;  %v4357_v19 = vadd.f32 %v4293_v4, %v10574_v5  ;;  %v5084_v41 = vadd.f32 %v9000_v35, %v8992_v49  ;;  %v2364_v0 = vadd.f32 %v2300_v1, %v1914_v55  ;;  %v4960_v35 = vld [vmem:[%s9647_s3 + $0x48] sm:$0xff]  ;;  %v10578_v5 = vld [vmem:[#allocation116_spill] sm:$0xff] }
 0x387   : > { %v2750_v61 = vmul.f32 %v6678_v37, %v2621_v33  ;;  %v5022_v62 = vmul.f32 %v4958_v20, %v4894_v53  ;;  %v3200_v27 = vmul.f32 %v6684_v17, %v3071_v47  ;;  %v3650_v36 = vmul.f32 %v6687_v57, %v3521_v10 }
 0x388   : > { %v4615_v40 = vadd.f32 %v4551_v25, %v4165_v21  ;;  %v4421_v8 = vmax.f32 %v4357_v19, 0.0  ;;  %v4100_v60 = vmul.f32 %v6752_v50, %v3971_v59  ;;  %v4896_v46 = vmul.f32 0.00390625, %v4778_v54 }
 0x389   : > { %v2814_v30 = vadd.f32 %v2750_v61, %v2364_v0  ;;  %v4895_v45 = vmul.f32 0.00390625, %v4776_v6  ;;  %v5085_v49 = vadd.f32 %v5084_v41, %v5022_v62  ;;  %v1273_v52 = vmax.f32 %v10577_v58, 0.0 }
 0x38a   : > { %4861 = vadd.xlane.f32.xlu1 %v4615_v40  ;;  %v1723_v48 = vmax.f32 %v10578_v5, 0.0  ;;  %v2109_v16 = vadd.f32 %v10580_v43, %v10579_v26  ;;  %v4550_v13 = vmul.f32 %v6906_v63, %v4421_v8  ;;  %v2495_v39 = vmul.f32 %v10454_v29, %v10581_v56  ;;  %v10582_v8 = vld [vmem:[#allocation150_spill] sm:$0xff] }
 0x38b   : > { %v3264_v42 = vadd.f32 %v3200_v27, %v2814_v30  ;;  %v5023_v25 = vmul.f32 %v4959_v14, %v4895_v45  ;;  %v1402_v23 = vmul.f32 %v6669_v44, %v1273_v52  ;;  %v2945_v7 = vmul.f32 %v10455_v31, %v10581_v56  ;;  %v10583_v45 = vld [vmem:[#allocation146_spill] sm:$0xff] }
 0x38c   : > { %v1852_v55 = vmul.f32 %v6672_v9, %v1723_v48  ;;  %v2173_v38 = vmax.f32 %v2109_v16, 0.0  ;;  %v9088_v15 = vmul.f32 %v4960_v35, %v4896_v46  ;;  %v2559_v2 = vadd.f32 %v2495_v39, %v10579_v26  ;;  %v10585_v5 = vld [vmem:[#allocation266_spill] sm:$0xff] }
 0x38d   : > { %v3714_v28 = vadd.f32 %v3650_v36, %v3264_v42  ;;  %v3395_v12 = vmul.f32 %v10456_v3, %v10581_v56  ;;  %v3009_v1 = vadd.f32 %v2945_v7, %v10579_v26  ;;  %v3845_v33 = vmul.f32 %v10442_v22, %v10581_v56 }
 0x38e   : > { %v1916_v4 = vadd.f32 %v1852_v55, %v1402_v23  ;;  %v2302_v20 = vmul.f32 %v6675_v24, %v2173_v38  ;;  %v9097_v53 = vadd.f32 %v5085_v49, %v5023_v25  ;;  %v2623_v21 = vmax.f32 %v2559_v2, 0.0  ;;  %v10584_v49 = vld [vmem:[#allocation276_spill] sm:$0xff] }
 0x38f   : > { %v4164_v47 = vadd.f32 %v4100_v60, %v3714_v28  ;;  %v3459_v10 = vadd.f32 %v3395_v12, %v10579_v26  ;;  %v3073_v19 = vmax.f32 %v3009_v1, 0.0  ;;  %v3909_v54 = vadd.f32 %v3845_v33, %v10579_v26 }
 0x390   : > { %v2366_v59 = vadd.f32 %v2302_v20, %v1916_v4  ;;  %v4295_v6 = vmul.f32 %v10443_v51, %v10581_v56  ;;  %v2752_v0 = vmul.f32 %v6678_v37, %v2623_v21  ;;  %v1275_v62 = vmax.f32 %v8087_v32, 0.0  ;;  %v10586_v4 = vld [vmem:[#allocation151_spill] sm:$0xff] }
 0x391   : > { %v4614_v41 = vadd.f32 %v4550_v13, %v4164_v47  ;;  %v3523_v61 = vmax.f32 %v3459_v10, 0.0  ;;  %v3202_v40 = vmul.f32 %v6684_v17, %v3073_v19  ;;  %v3973_v27 = vmax.f32 %v3909_v54, 0.0 }
 0x392   : > { %v4359_v36 = vadd.f32 %v4295_v6, %v10579_v26  ;;  %v1725_v14 = vmax.f32 %v10582_v8, 0.0  ;;  %v2816_v30 = vadd.f32 %v2752_v0, %v2366_v59  ;;  %v1404_v46 = vmul.f32 %v6669_v44, %v1275_v62  ;;  %v10588_v8 = vld [vmem:[#allocation147_spill] sm:$0xff] }
 0x393   : > { %4859 = vadd.xlane.f32.xlu0 %v4614_v41  ;;  %v3652_v60 = vmul.f32 %v6687_v57, %v3523_v61  ;;  %v2111_v35 = vadd.f32 %v10584_v49, %v10583_v45  ;;  %v4102_v58 = vmul.f32 %v6752_v50, %v3973_v27  ;;  %v2497_v48 = vmul.f32 %v10454_v29, %v10585_v5  ;;  %v10587_v61 = vld [vmem:[#allocation153_spill] sm:$0xff] }
 0x394   : > { %v4423_v52 = vmax.f32 %v4359_v36, 0.0  ;;  %v1854_v32 = vmul.f32 %v6672_v9, %v1725_v14  ;;  %v3266_v26 = vadd.f32 %v3202_v40, %v2816_v30  ;;  %v2947_v16 = vmul.f32 %v10455_v31, %v10585_v5  ;;  %v10589_v14 = vld [vmem:[#allocation207_spill] sm:$0xff] }
 0x395   : > { %v2175_v43 = vmax.f32 %v2111_v35, 0.0  ;;  %v3397_v42 = vmul.f32 %v10456_v3, %v10585_v5  ;;  %v2561_v56 = vadd.f32 %v2497_v48, %v10583_v45  ;;  %v3847_v39 = vmul.f32 %v10442_v22, %v10585_v5  ;;  %v4780_v48 = vpop.xlane.xlu2 %4779 }
 0x396   : > { %v4552_v13 = vmul.f32 %v6906_v63, %v4423_v52  ;;  %v1918_v25 = vadd.f32 %v1854_v32, %v1404_v46  ;;  %v3716_v23 = vadd.f32 %v3652_v60, %v3266_v26  ;;  %v3011_v38 = vadd.f32 %v2947_v16, %v10583_v45  ;;  %v10590_v46 = vld [vmem:[#allocation144_spill] sm:$0xff] }
 0x397   : > { %v2304_v55 = vmul.f32 %v6675_v24, %v2175_v43  ;;  %v3461_v7 = vadd.f32 %v3397_v42, %v10583_v45  ;;  %v2625_v28 = vmax.f32 %v2561_v56, 0.0  ;;  %v3911_v2 = vadd.f32 %v3847_v39, %v10583_v45 }
 0x398   : > { %v4297_v12 = vmul.f32 %v10443_v51, %v10585_v5  ;;  %v1274_v20 = vmax.f32 %v10586_v4, 0.0  ;;  %v4166_v1 = vadd.f32 %v4102_v58, %v3716_v23  ;;  %v3075_v47 = vmax.f32 %v3011_v38, 0.0  ;;  %v4961_v23 = vld [vmem:[%s9647_s3 + $0x50] sm:$0xff] }
 0x399   : > { %v2368_v33 = vadd.f32 %v2304_v55, %v1918_v25  ;;  %v3525_v21 = vmax.f32 %v3461_v7, 0.0  ;;  %v2754_v10 = vmul.f32 %v6678_v37, %v2625_v28  ;;  %v3975_v59 = vmax.f32 %v3911_v2, 0.0 }
 0x39a   : > { %v4361_v19 = vadd.f32 %v4297_v12, %v10583_v45  ;;  %v1403_v54 = vmul.f32 %v6669_v44, %v1274_v20  ;;  %v4616_v6 = vadd.f32 %v4552_v13, %v4166_v1  ;;  %v3204_v41 = vmul.f32 %v6684_v17, %v3075_v47  ;;  %v4784_v1 = vpop.xlane.xlu1 %4783 }
 0x39b   : > { %v3654_v0 = vmul.f32 %v6687_v57, %v3525_v21  ;;  %v1724_v62 = vmax.f32 %v10587_v61, 0.0  ;;  %v2818_v40 = vadd.f32 %v2754_v10, %v2368_v33  ;;  %v4104_v27 = vmul.f32 %v6752_v50, %v3975_v59  ;;  %v4782_v33 = vpop.xlane.xlu0 %4781 }
 0x39c   : > { %v4425_v36 = vmax.f32 %v4361_v19, 0.0  ;;  %v2110_v30 = vadd.f32 %v10589_v14, %v10588_v8  ;;  %4863 = vadd.xlane.f32.xlu2 %v4616_v6  ;;  %v2496_v45 = vmul.f32 %v10454_v29, %v10590_v46  ;;  %v2946_v49 = vmul.f32 %v10455_v31, %v10590_v46  ;;  %v10592_v14 = vld [vmem:[#allocation130_spill] sm:$0xff] }
 0x39d   : > { %v1853_v60 = vmul.f32 %v6672_v9, %v1724_v62  ;;  %v3396_v35 = vmul.f32 %v10456_v3, %v10590_v46  ;;  %v3268_v58 = vadd.f32 %v3204_v41, %v2818_v40  ;;  %v3846_v5 = vmul.f32 %v10442_v22, %v10590_v46 }
 0x39e   : > { %v4554_v52 = vmul.f32 %v6906_v63, %v4425_v36  ;;  %v2174_v32 = vmax.f32 %v2110_v30, 0.0  ;;  %v2560_v43 = vadd.f32 %v2496_v45, %v10588_v8  ;;  %v3010_v16 = vadd.f32 %v2946_v49, %v10588_v8 }
 0x39f   : > { %v1917_v26 = vadd.f32 %v1853_v60, %v1403_v54  ;;  %v3460_v42 = vadd.f32 %v3396_v35, %v10588_v8  ;;  %v3718_v13 = vadd.f32 %v3654_v0, %v3268_v58  ;;  %v3910_v56 = vadd.f32 %v3846_v5, %v10588_v8  ;;  %v4962_v0 = vld [vmem:[%s9647_s3 + $0x58] sm:$0xff]  ;;  %v10593_v60 = vld [vmem:[#allocation80_spill] sm:$0xff] }
 0x3a0   : > { %v2303_v25 = vmul.f32 %v6675_v24, %v2174_v32  ;;  %v4296_v39 = vmul.f32 %v10443_v51, %v10590_v46  ;;  %v2624_v55 = vmax.f32 %v2560_v43, 0.0  ;;  %v3074_v38 = vmax.f32 %v3010_v16, 0.0  ;;  %v10594_v46 = vld [vmem:[#allocation273_spill] sm:$0xff] }
 0x3a1   : > { %v3524_v7 = vmax.f32 %v3460_v42, 0.0  ;;  %v4897_v28 = vmul.f32 0.00390625, %v4780_v48  ;;  %v4168_v2 = vadd.f32 %v4104_v27, %v3718_v13  ;;  %v3974_v4 = vmax.f32 %v3910_v56, 0.0  ;;  %v10591_v27 = vld [vmem:[#allocation69_spill] sm:$0xff] }
 0x3a2   : > { %v2367_v12 = vadd.f32 %v2303_v25, %v1917_v26  ;;  %v4360_v20 = vadd.f32 %v4296_v39, %v10588_v8  ;;  %v5087_v47 = vadd.f32 %v9097_v53, %v9088_v15  ;;  %v2753_v21 = vmul.f32 %v6678_v37, %v2624_v55  ;;  %v4963_v8 = vld [vmem:[%s9647_s3 + $0x60] sm:$0xff] }
 0x3a3   : > { %v3203_v10 = vmul.f32 %v6684_v17, %v3074_v38  ;;  %v5025_v59 = vmul.f32 %v4961_v23, %v4897_v28  ;;  %v4618_v19 = vadd.f32 %v4554_v52, %v4168_v2  ;;  %v3653_v54 = vmul.f32 %v6687_v57, %v3524_v7  ;;  %v10595_v52 = vld [vmem:[#allocation265_spill] sm:$0xff] }
 0x3a4   : > { %v4103_v6 = vmul.f32 %v6752_v50, %v3974_v4  ;;  %v4424_v41 = vmax.f32 %v4360_v20, 0.0  ;;  %v2817_v61 = vadd.f32 %v2753_v21, %v2367_v12  ;;  %v4899_v62 = vmul.f32 0.00390625, %v4784_v1 }
 0x3a5   : > { %v4898_v40 = vmul.f32 0.00390625, %v4782_v33  ;;  %v1276_v15 = vmax.f32 %v10591_v27, 0.0  ;;  %4867 = vadd.xlane.f32.xlu1 %v4618_v19  ;;  %v5088_v36 = vadd.f32 %v5087_v47, %v5025_v59  ;;  %v1726_v30 = vmax.f32 %v10592_v14, 0.0  ;;  %v10598_v27 = vld [vmem:[#allocation152_spill] sm:$0xff]  ;;  %v10600_v14 = vld [vmem:[#allocation279_spill] sm:$0xff] }
 0x3a6   : > { %v4553_v53 = vmul.f32 %v6906_v63, %v4424_v41  ;;  %v2112_v45 = vadd.f32 %v10594_v46, %v10593_v60  ;;  %v3267_v49 = vadd.f32 %v3203_v10, %v2817_v61  ;;  %v2498_v32 = vmul.f32 %v10454_v29, %v10595_v52  ;;  %v10596_v10 = vld [vmem:[#allocation154_spill] sm:$0xff]  ;;  %v10597_v41 = vld [vmem:[#allocation200_spill] sm:$0xff] }
 0x3a7   : > { %v5026_v35 = vmul.f32 %v4962_v0, %v4898_v40  ;;  %v1405_v58 = vmul.f32 %v6669_v44, %v1276_v15  ;;  %v1855_v5 = vmul.f32 %v6672_v9, %v1726_v30  ;;  %v2948_v26 = vmul.f32 %v10455_v31, %v10595_v52  ;;  %v10599_v15 = vld [vmem:[#allocation24_spill] sm:$0xff] }
 0x3a8   : > { %v2176_v48 = vmax.f32 %v2112_v45, 0.0  ;;  %v3398_v43 = vmul.f32 %v10456_v3, %v10595_v52  ;;  %v3717_v16 = vadd.f32 %v3653_v54, %v3267_v49  ;;  %v9186_v42 = vmul.f32 %v4963_v8, %v4899_v62 }
 0x3a9   : > { %v2562_v13 = vadd.f32 %v2498_v32, %v10593_v60  ;;  %v3848_v25 = vmul.f32 %v10442_v22, %v10595_v52  ;;  %v1919_v56 = vadd.f32 %v1855_v5, %v1405_v58  ;;  %v3012_v23 = vadd.f32 %v2948_v26, %v10593_v60 }
 0x3aa   : > { %v2305_v39 = vmul.f32 %v6675_v24, %v2176_v48  ;;  %v3462_v55 = vadd.f32 %v3398_v43, %v10593_v60  ;;  %v4167_v38 = vadd.f32 %v4103_v6, %v3717_v16  ;;  %v9194_v7 = vadd.f32 %v5088_v36, %v5026_v35 }
 0x3ab   : > { %v2626_v28 = vmax.f32 %v2562_v13, 0.0  ;;  %v3912_v2 = vadd.f32 %v3848_v25, %v10593_v60  ;;  %v3076_v4 = vmax.f32 %v3012_v23, 0.0  ;;  %v4298_v1 = vmul.f32 %v10443_v51, %v10595_v52 }
 0x3ac   : > { %v2369_v12 = vadd.f32 %v2305_v39, %v1919_v56  ;;  %v3526_v20 = vmax.f32 %v3462_v55, 0.0  ;;  %v4617_v33 = vadd.f32 %v4553_v53, %v4167_v38  ;;  %v1278_v59 = vmax.f32 %v10596_v10, 0.0  ;;  %v10601_v39 = vld [vmem:[#allocation158_spill] sm:$0xff]  ;;  %v10602_v10 = vld [vmem:[#allocation159_spill] sm:$0xff] }
 0x3ad   : > { %v2755_v47 = vmul.f32 %v6678_v37, %v2626_v28  ;;  %v3976_v21 = vmax.f32 %v3912_v2, 0.0  ;;  %v3205_v19 = vmul.f32 %v6684_v17, %v3076_v4  ;;  %v4362_v6 = vadd.f32 %v4298_v1, %v10593_v60 }
 0x3ae   : > { %v3655_v54 = vmul.f32 %v6687_v57, %v3526_v20  ;;  %v1728_v0 = vmax.f32 %v10597_v41, 0.0  ;;  %4865 = vadd.xlane.f32.xlu0 %v4617_v33  ;;  %v1407_v40 = vmul.f32 %v6669_v44, %v1278_v59  ;;  %v2114_v53 = vadd.f32 %v10599_v15, %v10598_v27  ;;  %v10604_v41 = vld [vmem:[#allocation219_spill] sm:$0xff] }
 0x3af   : > { %v2819_v61 = vadd.f32 %v2755_v47, %v2369_v12  ;;  %v4105_v62 = vmul.f32 %v6752_v50, %v3976_v21  ;;  %v4426_v36 = vmax.f32 %v4362_v6, 0.0  ;;  %v2500_v30 = vmul.f32 %v10454_v29, %v10600_v14  ;;  %v10603_v6 = vld [vmem:[#allocation201_spill] sm:$0xff] }
 0x3b0   : > { %v1857_v8 = vmul.f32 %v6672_v9, %v1728_v0  ;;  %v2950_v60 = vmul.f32 %v10455_v31, %v10600_v14  ;;  %v2178_v45 = vmax.f32 %v2114_v53, 0.0  ;;  %v3400_v49 = vmul.f32 %v10456_v3, %v10600_v14 }
 0x3b1   : > { %v3269_v46 = vadd.f32 %v3205_v19, %v2819_v61  ;;  %v3850_v35 = vmul.f32 %v10442_v22, %v10600_v14  ;;  %v4555_v58 = vmul.f32 %v6906_v63, %v4426_v36  ;;  %v2564_v32 = vadd.f32 %v2500_v30, %v10598_v27  ;;  %v10605_v61 = vld [vmem:[#allocation172_spill] sm:$0xff] }
 0x3b2   : > { %v1921_v52 = vadd.f32 %v1857_v8, %v1407_v40  ;;  %v3014_v5 = vadd.f32 %v2950_v60, %v10598_v27  ;;  %v2307_v26 = vmul.f32 %v6675_v24, %v2178_v45  ;;  %v3464_v43 = vadd.f32 %v3400_v49, %v10598_v27  ;;  %v4786_v60 = vpop.xlane.xlu2 %4785 }
 0x3b3   : > { %v3719_v48 = vadd.f32 %v3655_v54, %v3269_v46  ;;  %v3914_v16 = vadd.f32 %v3850_v35, %v10598_v27  ;;  %v2628_v13 = vmax.f32 %v2564_v32, 0.0  ;;  %v4300_v56 = vmul.f32 %v10443_v51, %v10600_v14 }
 0x3b4   : > { %v3078_v25 = vmax.f32 %v3014_v5, 0.0  ;;  %v1277_v23 = vmax.f32 %v10601_v39, 0.0  ;;  %v2371_v38 = vadd.f32 %v2307_v26, %v1921_v52  ;;  %v3528_v28 = vmax.f32 %v3464_v43, 0.0 }
 0x3b5   : > { %v4169_v55 = vadd.f32 %v4105_v62, %v3719_v48  ;;  %v3978_v2 = vmax.f32 %v3914_v16, 0.0  ;;  %v2757_v12 = vmul.f32 %v6678_v37, %v2628_v13  ;;  %v4364_v20 = vadd.f32 %v4300_v56, %v10598_v27  ;;  %v4964_v48 = vld [vmem:[%s9647_s3 + $0x68] sm:$0xff] }
 0x3b6   : > { %v3207_v4 = vmul.f32 %v6684_v17, %v3078_v25  ;;  %v1406_v1 = vmul.f32 %v6669_v44, %v1277_v23  ;;  %v3657_v47 = vmul.f32 %v6687_v57, %v3528_v28  ;;  %v1727_v59 = vmax.f32 %v10602_v10, 0.0 }
 0x3b7   : > { %v4619_v33 = vadd.f32 %v4555_v58, %v4169_v55  ;;  %v4107_v21 = vmul.f32 %v6752_v50, %v3978_v2  ;;  %v2821_v19 = vadd.f32 %v2757_v12, %v2371_v38  ;;  %v4428_v54 = vmax.f32 %v4364_v20, 0.0  ;;  %v4790_v55 = vpop.xlane.xlu1 %4789  ;;  %v4788_v38 = vpop.xlane.xlu0 %4787 }
 0x3b8   : > { %v2113_v0 = vadd.f32 %v10604_v41, %v10603_v6  ;;  %v2499_v62 = vmul.f32 %v10454_v29, %v10605_v61  ;;  %v1856_v40 = vmul.f32 %v6672_v9, %v1727_v59  ;;  %v2949_v27 = vmul.f32 %v10455_v31, %v10605_v61 }
 0x3b9   : > { %4869 = vadd.xlane.f32.xlu2 %v4619_v33  ;;  %v3399_v15 = vmul.f32 %v10456_v3, %v10605_v61  ;;  %v3849_v53 = vmul.f32 %v10442_v22, %v10605_v61  ;;  %v3271_v36 = vadd.f32 %v3207_v4, %v2821_v19  ;;  %v4557_v8 = vmul.f32 %v6906_v63, %v4428_v54  ;;  %v10606_v19 = vld [vmem:[#allocation120_spill] sm:$0xff] }
 0x3ba   : > { %v2177_v14 = vmax.f32 %v2113_v0, 0.0  ;;  %v2563_v30 = vadd.f32 %v2499_v62, %v10603_v6  ;;  %v1920_v46 = vadd.f32 %v1856_v40, %v1406_v1  ;;  %v3013_v45 = vadd.f32 %v2949_v27, %v10603_v6  ;;  %v10608_v62 = vld [vmem:[#allocation84_spill] sm:$0xff]  ;;  %v10609_v40 = vld [vmem:[#allocation282_spill] sm:$0xff] }
 0x3bb   : > { %v3463_v49 = vadd.f32 %v3399_v15, %v10603_v6  ;;  %v3913_v35 = vadd.f32 %v3849_v53, %v10603_v6  ;;  %v3721_v58 = vadd.f32 %v3657_v47, %v3271_v36  ;;  %v4299_v5 = vmul.f32 %v10443_v51, %v10605_v61  ;;  %v4966_v61 = vld [vmem:[%s9647_s3 + $0x78] sm:$0xff] }
 0x3bc   : > { %v2306_v52 = vmul.f32 %v6675_v24, %v2177_v14  ;;  %v2627_v32 = vmax.f32 %v2563_v30, 0.0  ;;  %v3077_v26 = vmax.f32 %v3013_v45, 0.0  ;;  %v4900_v13 = vmul.f32 0.00390625, %v4786_v60 }
 0x3bd   : > { %v3527_v43 = vmax.f32 %v3463_v49, 0.0  ;;  %v3977_v16 = vmax.f32 %v3913_v35, 0.0  ;;  %v4171_v25 = vadd.f32 %v4107_v21, %v3721_v58  ;;  %v4363_v23 = vadd.f32 %v4299_v5, %v10603_v6  ;;  %v4965_v21 = vld [vmem:[%s9647_s3 + $0x70] sm:$0xff] }
 0x3be   : > { %v2370_v56 = vadd.f32 %v2306_v52, %v1920_v46  ;;  %v2756_v39 = vmul.f32 %v6678_v37, %v2627_v32  ;;  %v5090_v28 = vadd.f32 %v9194_v7, %v9186_v42  ;;  %v3206_v2 = vmul.f32 %v6684_v17, %v3077_v26  ;;  %v10607_v6 = vld [vmem:[#allocation122_spill] sm:$0xff] }
 0x3bf   : > { %v3656_v12 = vmul.f32 %v6687_v57, %v3527_v43  ;;  %v5028_v4 = vmul.f32 %v4964_v48, %v4900_v13  ;;  %v4621_v20 = vadd.f32 %v4557_v8, %v4171_v25  ;;  %v4106_v33 = vmul.f32 %v6752_v50, %v3977_v16  ;;  %v10610_v8 = vld [vmem:[#allocation278_spill] sm:$0xff] }
 0x3c0   : > { %v2820_v1 = vadd.f32 %v2756_v39, %v2370_v56  ;;  %v4427_v47 = vmax.f32 %v4363_v23, 0.0  ;;  %v4902_v10 = vmul.f32 0.00390625, %v4790_v55  ;;  %v4901_v59 = vmul.f32 0.00390625, %v4788_v38 }
 0x3c1   : > { %v1279_v54 = vmax.f32 %v10606_v19, 0.0  ;;  %v1729_v42 = vmax.f32 %v10607_v6, 0.0  ;;  %4873 = vadd.xlane.f32.xlu1 %v4621_v20  ;;  %v5091_v0 = vadd.f32 %v5090_v28, %v5028_v4  ;;  %v2115_v27 = vadd.f32 %v10609_v40, %v10608_v62 }
 0x3c2   : > { %v3270_v7 = vadd.f32 %v3206_v2, %v2820_v1  ;;  %v4556_v41 = vmul.f32 %v6906_v63, %v4427_v47  ;;  %v5029_v15 = vmul.f32 %v4965_v21, %v4901_v59  ;;  %v2501_v14 = vmul.f32 %v10454_v29, %v10610_v8  ;;  %v10613_v21 = vld [vmem:[#allocation109_spill] sm:$0xff] }
 0x3c3   : > { %v1408_v53 = vmul.f32 %v6669_v44, %v1279_v54  ;;  %v1858_v36 = vmul.f32 %v6672_v9, %v1729_v42  ;;  %v2179_v60 = vmax.f32 %v2115_v27, 0.0  ;;  %v2951_v46 = vmul.f32 %v10455_v31, %v10610_v8 }
 0x3c4   : > { %v3720_v30 = vadd.f32 %v3656_v12, %v3270_v7  ;;  %v3401_v45 = vmul.f32 %v10456_v3, %v10610_v8  ;;  %v9282_v49 = vmul.f32 %v4966_v61, %v4902_v10  ;;  %v2565_v58 = vadd.f32 %v2501_v14, %v10608_v62  ;;  %v10611_v12 = vld [vmem:[#allocation155_spill] sm:$0xff] }
 0x3c5   : > { %v1922_v35 = vadd.f32 %v1858_v36, %v1408_v53  ;;  %v3851_v52 = vmul.f32 %v10442_v22, %v10610_v8  ;;  %v2308_v5 = vmul.f32 %v6675_v24, %v2179_v60  ;;  %v3015_v48 = vadd.f32 %v2951_v46, %v10608_v62  ;;  %v10614_v10 = vld [vmem:[#allocation291_spill] sm:$0xff] }
 0x3c6   : > { %v4170_v32 = vadd.f32 %v4106_v33, %v3720_v30  ;;  %v3465_v26 = vadd.f32 %v3401_v45, %v10608_v62  ;;  %v9290_v43 = vadd.f32 %v5091_v0, %v5029_v15  ;;  %v2629_v16 = vmax.f32 %v2565_v58, 0.0  ;;  %v10612_v33 = vld [vmem:[#allocation93_spill] sm:$0xff] }
 0x3c7   : > { %v3915_v13 = vadd.f32 %v3851_v52, %v10608_v62  ;;  %v4301_v25 = vmul.f32 %v10443_v51, %v10610_v8  ;;  %v2372_v39 = vadd.f32 %v2308_v5, %v1922_v35  ;;  %v3079_v23 = vmax.f32 %v3015_v48, 0.0  ;;  %v10615_v0 = vld [vmem:[#allocation285_spill] sm:$0xff] }
 0x3c8   : > { %v4620_v56 = vadd.f32 %v4556_v41, %v4170_v32  ;;  %v3529_v55 = vmax.f32 %v3465_v26, 0.0  ;;  %v2758_v38 = vmul.f32 %v6678_v37, %v2629_v16  ;;  %v1281_v4 = vmax.f32 %v10611_v12, 0.0 }
 0x3c9   : > { %v3979_v28 = vmax.f32 %v3915_v13, 0.0  ;;  %v4365_v2 = vadd.f32 %v4301_v25, %v10608_v62  ;;  %v3208_v20 = vmul.f32 %v6684_v17, %v3079_v23  ;;  %v1731_v47 = vmax.f32 %v10612_v33, 0.0  ;;  %v10616_v23 = vld [vmem:[#allocation110_spill] sm:$0xff] }
 0x3ca   : > { %4871 = vadd.xlane.f32.xlu0 %v4620_v56  ;;  %v3658_v1 = vmul.f32 %v6687_v57, %v3529_v55  ;;  %v2117_v59 = vadd.f32 %v10614_v10, %v10613_v21  ;;  %v2822_v19 = vadd.f32 %v2758_v38, %v2372_v39  ;;  %v1410_v42 = vmul.f32 %v6669_v44, %v1281_v4 }
 0x3cb   : > { %v4108_v54 = vmul.f32 %v6752_v50, %v3979_v28  ;;  %v4429_v6 = vmax.f32 %v4365_v2, 0.0  ;;  %v1860_v7 = vmul.f32 %v6672_v9, %v1731_v47  ;;  %v2503_v61 = vmul.f32 %v10454_v29, %v10615_v0  ;;  %v10619_v47 = vld [vmem:[#allocation204_spill] sm:$0xff] }
 0x3cc   : > { %v2181_v41 = vmax.f32 %v2117_v59, 0.0  ;;  %v2953_v62 = vmul.f32 %v10455_v31, %v10615_v0  ;;  %v3272_v40 = vadd.f32 %v3208_v20, %v2822_v19  ;;  %v3403_v15 = vmul.f32 %v10456_v3, %v10615_v0  ;;  %v10617_v20 = vld [vmem:[#allocation94_spill] sm:$0xff] }
 0x3cd   : > { %v4558_v27 = vmul.f32 %v6906_v63, %v4429_v6  ;;  %v3853_v53 = vmul.f32 %v10442_v22, %v10615_v0  ;;  %v1924_v36 = vadd.f32 %v1860_v7, %v1410_v42  ;;  %v2567_v14 = vadd.f32 %v2503_v61, %v10613_v21  ;;  %v4792_v6 = vpop.xlane.xlu2 %4791 }
 0x3ce   : > { %v2310_v8 = vmul.f32 %v6675_v24, %v2181_v41  ;;  %v3017_v30 = vadd.f32 %v2953_v62, %v10613_v21  ;;  %v3722_v60 = vadd.f32 %v3658_v1, %v3272_v40  ;;  %v3467_v46 = vadd.f32 %v3403_v15, %v10613_v21  ;;  %v10618_v1 = vld [vmem:[#allocation235_spill] sm:$0xff]  ;;  %v4967_v15 = vld [vmem:[%s9647_s3 + $0x80] sm:$0xff] }
 0x3cf   : > { %v3917_v45 = vadd.f32 %v3853_v53, %v10613_v21  ;;  %v4303_v35 = vmul.f32 %v10443_v51, %v10615_v0  ;;  %v2631_v52 = vmax.f32 %v2567_v14, 0.0  ;;  %v1280_v5 = vmax.f32 %v8315_v18, 0.0 }
 0x3d0   : > { %v2374_v58 = vadd.f32 %v2310_v8, %v1924_v36  ;;  %v3081_v32 = vmax.f32 %v3017_v30, 0.0  ;;  %v4172_v48 = vadd.f32 %v4108_v54, %v3722_v60  ;;  %v3531_v26 = vmax.f32 %v3467_v46, 0.0 }
 0x3d1   : > { %v3981_v16 = vmax.f32 %v3917_v45, 0.0  ;;  %v4367_v13 = vadd.f32 %v4303_v35, %v10613_v21  ;;  %v2760_v25 = vmul.f32 %v6678_v37, %v2631_v52  ;;  %v1409_v39 = vmul.f32 %v6669_v44, %v1280_v5  ;;  %v4794_v35 = vpop.xlane.xlu0 %4793 }
 0x3d2   : > { %v3210_v56 = vmul.f32 %v6684_v17, %v3081_v32  ;;  %v1730_v55 = vmax.f32 %v10616_v23, 0.0  ;;  %v4622_v38 = vadd.f32 %v4558_v27, %v4172_v48  ;;  %v3660_v28 = vmul.f32 %v6687_v57, %v3531_v26  ;;  %v4796_v48 = vpop.xlane.xlu1 %4795  ;;  %v10620_v26 = vld [vmem:[#allocation255_spill] sm:$0xff] }
 0x3d3   : > { %v4110_v2 = vmul.f32 %v6752_v50, %v3981_v16  ;;  %v4431_v12 = vmax.f32 %v4367_v13, 0.0  ;;  %v2824_v18 = vadd.f32 %v2760_v25, %v2374_v58  ;;  %v2116_v33 = vadd.f32 %v10618_v1, %v10617_v20 }
 0x3d4   : > { %v1859_v4 = vmul.f32 %v6672_v9, %v1730_v55  ;;  %v2502_v21 = vmul.f32 %v10454_v29, %v10619_v47  ;;  %4875 = vadd.xlane.f32.xlu2 %v4622_v38  ;;  %v2952_v59 = vmul.f32 %v10455_v31, %v10619_v47  ;;  %v3402_v19 = vmul.f32 %v10456_v3, %v10619_v47 }
 0x3d5   : > { %v4560_v10 = vmul.f32 %v6906_v63, %v4431_v12  ;;  %v3852_v54 = vmul.f32 %v10442_v22, %v10619_v47  ;;  %v3274_v42 = vadd.f32 %v3210_v56, %v2824_v18  ;;  %v2180_v41 = vmax.f32 %v2116_v33, 0.0  ;;  %v10621_v12 = vld [vmem:[#allocation127_spill] sm:$0xff]  ;;  %v10623_v33 = vld [vmem:[#allocation126_spill] sm:$0xff] }
 0x3d6   : > { %v1923_v7 = vadd.f32 %v1859_v4, %v1409_v39  ;;  %v2566_v0 = vadd.f32 %v2502_v21, %v10617_v20  ;;  %v3016_v61 = vadd.f32 %v2952_v59, %v10617_v20  ;;  %v3466_v62 = vadd.f32 %v3402_v19, %v10617_v20  ;;  %v10622_v4 = vld [vmem:[#allocation173_spill] sm:$0xff] }
 0x3d7   : > { %v3916_v40 = vadd.f32 %v3852_v54, %v10617_v20  ;;  %v4302_v27 = vmul.f32 %v10443_v51, %v10619_v47  ;;  %v3724_v53 = vadd.f32 %v3660_v28, %v3274_v42  ;;  %v2309_v36 = vmul.f32 %v6675_v24, %v2180_v41  ;;  %v10624_v47 = vld [vmem:[#allocation288_spill] sm:$0xff]  ;;  %v4968_v41 = vld [vmem:[%s9647_s3 + $0x88] sm:$0xff] }
 0x3d8   : > { %v2630_v8 = vmax.f32 %v2566_v0, 0.0  ;;  %v4903_v14 = vmul.f32 0.00390625, %v4792_v6  ;;  %v3080_v30 = vmax.f32 %v3016_v61, 0.0  ;;  %v3530_v60 = vmax.f32 %v3466_v62, 0.0 }
 0x3d9   : > { %v3980_v46 = vmax.f32 %v3916_v40, 0.0  ;;  %v4366_v45 = vadd.f32 %v4302_v27, %v10617_v20  ;;  %v4174_v58 = vadd.f32 %v4110_v2, %v3724_v53  ;;  %v2373_v52 = vadd.f32 %v2309_v36, %v1923_v7 }
 0x3da   : > { %v2759_v32 = vmul.f32 %v6678_v37, %v2630_v8  ;;  %v5031_v5 = vmul.f32 %v4967_v15, %v4903_v14  ;;  %v9356_v16 = vadd.f32 %v10620_v26, %v8411_v34  ;;  %v5093_v13 = vadd.f32 %v9290_v43, %v9282_v49  ;;  %v4969_v43 = vld [vmem:[%s9647_s3 + $0x90] sm:$0xff] }
 0x3db   : > { %v3209_v25 = vmul.f32 %v6684_v17, %v3080_v30  ;;  %v4430_v56 = vmax.f32 %v4366_v45, 0.0  ;;  %v4624_v39 = vadd.f32 %v4560_v10, %v4174_v58  ;;  %v3659_v55 = vmul.f32 %v6687_v57, %v3530_v60  ;;  %v10625_v10 = vld [vmem:[#allocation284_spill] sm:$0xff]  ;;  %v9392_v60 = vpop.xlane.xlu2 %4797 }
 0x3dc   : > { %v2823_v23 = vadd.f32 %v2759_v32, %v2373_v52  ;;  %v4109_v38 = vmul.f32 %v6752_v50, %v3980_v46  ;;  %v9363_v28 = vadd.f32 %v5093_v13, %v5031_v5  ;;  %v4905_v2 = vmul.f32 0.00390625, %v4796_v48  ;;  %v9397_v52 = vpop.xlane.xlu0 %4799 }
 0x3dd   : > { %v1282_v18 = vmax.f32 %v10621_v12, 0.0  ;;  %v1732_v20 = vmax.f32 %v10622_v4, 0.0  ;;  %4879 = vadd.xlane.f32.xlu1 %v4624_v39  ;;  %v4559_v49 = vmul.f32 %v6906_v63, %v4430_v56  ;;  %v2118_v21 = vadd.f32 %v10624_v47, %v10623_v33  ;;  %v10626_v39 = vld [vmem:[#allocation96_spill] sm:$0xff]  ;;  %v10629_v4 = vld [vmem:[#allocation38_spill] sm:$0xff] }
 0x3de   : > { %v3273_v1 = vadd.f32 %v3209_v25, %v2823_v23  ;;  %v2504_v59 = vmul.f32 %v10454_v29, %v10625_v10  ;;  %v4904_v19 = vmul.f32 0.00390625, %v4794_v35  ;;  %v2954_v42 = vmul.f32 %v10455_v31, %v10625_v10  ;;  %v10630_v47 = vld [vmem:[#allocation298_spill] sm:$0xff] }
 0x3df   : > { %v1411_v54 = vmul.f32 %v6669_v44, %v1282_v18  ;;  %v1861_v6 = vmul.f32 %v6672_v9, %v1732_v20  ;;  %v2182_v0 = vmax.f32 %v2118_v21, 0.0  ;;  %v3404_v62 = vmul.f32 %v10456_v3, %v10625_v10  ;;  %v10628_v18 = vld [vmem:[#allocation95_spill] sm:$0xff] }
 0x3e0   : > { %v3723_v7 = vadd.f32 %v3659_v55, %v3273_v1  ;;  %v2568_v61 = vadd.f32 %v2504_v59, %v10623_v33  ;;  %v9385_v40 = vmul.f32 %v4969_v43, %v4905_v2  ;;  %v3018_v15 = vadd.f32 %v2954_v42, %v10623_v33  ;;  %v10627_v2 = vld [vmem:[#allocation97_spill] sm:$0xff] }
 0x3e1   : > { %v1925_v27 = vadd.f32 %v1861_v6, %v1411_v54  ;;  %v3854_v53 = vmul.f32 %v10442_v22, %v10625_v10  ;;  %v2311_v8 = vmul.f32 %v6675_v24, %v2182_v0  ;;  %v3468_v30 = vadd.f32 %v3404_v62, %v10623_v33 }
 0x3e2   : > { %v4173_v36 = vadd.f32 %v4109_v38, %v3723_v7  ;;  %v2632_v14 = vmax.f32 %v2568_v61, 0.0  ;;  %v5032_v46 = vmul.f32 %v4968_v41, %v4904_v19  ;;  %v3082_v45 = vmax.f32 %v3018_v15, 0.0 }
 0x3e3   : > { %v3918_v35 = vadd.f32 %v3854_v53, %v10623_v33  ;;  %v4304_v58 = vmul.f32 %v10443_v51, %v10625_v10  ;;  %v2375_v5 = vadd.f32 %v2311_v8, %v1925_v27  ;;  %v3532_v26 = vmax.f32 %v3468_v30, 0.0  ;;  %v9424_v15 = vpop.xlane.xlu2 %4803 }
 0x3e4   : > { %v4623_v32 = vadd.f32 %v4559_v49, %v4173_v36  ;;  %v2761_v48 = vmul.f32 %v6678_v37, %v2632_v14  ;;  %v3211_v13 = vmul.f32 %v6684_v17, %v3082_v45  ;;  %v1284_v23 = vmax.f32 %v10626_v39, 0.0 }
 0x3e5   : > { %v3982_v25 = vmax.f32 %v3918_v35, 0.0  ;;  %v4368_v56 = vadd.f32 %v4304_v58, %v10623_v33  ;;  %v3661_v38 = vmul.f32 %v6687_v57, %v3532_v26  ;;  %v1734_v12 = vmax.f32 %v10627_v2, 0.0  ;;  %v9411_v33 = vpop.xlane.xlu1 %4801 }
 0x3e6   : > { %4877 = vadd.xlane.f32.xlu0 %v4623_v32  ;;  %v2825_v55 = vadd.f32 %v2761_v48, %v2375_v5  ;;  %v2120_v20 = vadd.f32 %v10629_v4, %v10628_v18  ;;  %v1413_v43 = vmul.f32 %v6669_v44, %v1284_v23  ;;  %v2506_v21 = vmul.f32 %v10454_v29, %v10630_v47 }
 0x3e7   : > { %v4111_v1 = vmul.f32 %v6752_v50, %v3982_v25  ;;  %v4432_v49 = vmax.f32 %v4368_v56, 0.0  ;;  %v1863_v59 = vmul.f32 %v6672_v9, %v1734_v12  ;;  %v2956_v54 = vmul.f32 %v10455_v31, %v10630_v47 }
 0x3e8   : > { %v3275_v10 = vadd.f32 %v3211_v13, %v2825_v55  ;;  %v2184_v19 = vmax.f32 %v2120_v20, 0.0  ;;  %v2570_v42 = vadd.f32 %v2506_v21, %v10628_v18  ;;  %v3406_v7 = vmul.f32 %v10456_v3, %v10630_v47  ;;  %v4806_v13 = vpop.xlane.xlu0 %4805  ;;  %v10632_v20 = vld [vmem:[#allocation228_spill] sm:$0xff] }
 0x3e9   : > { %v4561_v6 = vmul.f32 %v6906_v63, %v4432_v49  ;;  %v3856_v41 = vmul.f32 %v10442_v22, %v10630_v47  ;;  %v1927_v61 = vadd.f32 %v1863_v59, %v1413_v43  ;;  %v3020_v27 = vadd.f32 %v2956_v54, %v10628_v18 }
 0x3ea   : > { %v3725_v0 = vadd.f32 %v3661_v38, %v3275_v10  ;;  %v2313_v62 = vmul.f32 %v6675_v24, %v2184_v19  ;;  %v2634_v53 = vmax.f32 %v2570_v42, 0.0  ;;  %v3470_v36 = vadd.f32 %v3406_v7, %v10628_v18 }
 0x3eb   : > { %v3920_v8 = vadd.f32 %v3856_v41, %v10628_v18  ;;  %v4306_v14 = vmul.f32 %v10443_v51, %v10630_v47  ;;  %v3084_v35 = vmax.f32 %v3020_v27, 0.0  ;;  %v1283_v58 = vmax.f32 %v8421_v11, 0.0 }
 0x3ec   : > { %v4175_v30 = vadd.f32 %v4111_v1, %v3725_v0  ;;  %v2377_v45 = vadd.f32 %v2313_v62, %v1927_v61  ;;  %v2763_v32 = vmul.f32 %v6678_v37, %v2634_v53  ;;  %v3534_v5 = vmax.f32 %v3470_v36, 0.0 }
 0x3ed   : > { %v3984_v48 = vmax.f32 %v3920_v8, 0.0  ;;  %v4370_v26 = vadd.f32 %v4306_v14, %v10628_v18  ;;  %v5095_v25 = vadd.f32 %v9363_v28, %v5032_v46  ;;  %v1412_v39 = vmul.f32 %v6669_v44, %v1283_v58  ;;  %v10631_v18 = vld [vmem:[#allocation256_spill] sm:$0xff]  ;;  %v4808_v43 = vpop.xlane.xlu1 %4807 }
 0x3ee   : > { %v4625_v56 = vadd.f32 %v4561_v6, %v4175_v30  ;;  %v1733_v23 = vmax.f32 %v9356_v16, 0.0  ;;  %v2827_v55 = vadd.f32 %v2763_v32, %v2377_v45  ;;  %v3213_v38 = vmul.f32 %v6684_v17, %v3084_v35 }
 0x3ef   : > { %v3663_v2 = vmul.f32 %v6687_v57, %v3534_v5  ;;  %v4113_v11 = vmul.f32 %v6752_v50, %v3984_v48  ;;  %v2119_v4 = vadd.f32 %v10631_v18, %v8411_v34  ;;  %v2505_v28 = vmul.f32 %v10454_v29, %v10632_v20 }
 0x3f0   : > { %4881 = vadd.xlane.f32.xlu2 %v4625_v56  ;;  %v1862_v12 = vmul.f32 %v6672_v9, %v1733_v23  ;;  %v2955_v44 = vmul.f32 %v10455_v31, %v10632_v20  ;;  %v3277_v16 = vadd.f32 %v3213_v38, %v2827_v55  ;;  %v4434_v46 = vmax.f32 %v4370_v26, 0.0  ;;  %v4812_v30 = vpop.xlane.xlu0 %4811 }
 0x3f1   : > { %v3405_v1 = vmul.f32 %v10456_v3, %v10632_v20  ;;  %v3855_v49 = vmul.f32 %v10442_v22, %v10632_v20  ;;  %v2183_v9 = vmax.f32 %v2119_v4, 0.0  ;;  %v2569_v21 = vadd.f32 %v2505_v28, %v8411_v34  ;;  %v4970_v3 = vld [vmem:[%s9647_s3 + $0x98] sm:$0xff]  ;;  %v4810_v22 = vpop.xlane.xlu2 %4809 }
 0x3f2   : > { %v1926_v47 = vadd.f32 %v1862_v12, %v1412_v39  ;;  %v3019_v10 = vadd.f32 %v2955_v44, %v8411_v34  ;;  %v3727_v59 = vadd.f32 %v3663_v2, %v3277_v16  ;;  %v4305_v19 = vmul.f32 %v10443_v51, %v10632_v20 }
 0x3f3   : > { %v3469_v29 = vadd.f32 %v3405_v1, %v8411_v34  ;;  %v3919_v31 = vadd.f32 %v3855_v49, %v8411_v34  ;;  %v2312_v54 = vmul.f32 %v6675_v24, %v2183_v9  ;;  %v2633_v6 = vmax.f32 %v2569_v21, 0.0 }
 0x3f4   : > { %v3083_v42 = vmax.f32 %v3019_v10, 0.0  ;;  %v4906_v7 = vmul.f32 0.00390625, %v9392_v60  ;;  %v5096_v41 = vadd.f32 %v5095_v25, %v9385_v40  ;;  %v4177_v0 = vadd.f32 %v4113_v11, %v3727_v59  ;;  %v4971_v60 = vld [vmem:[%s9647_s3 + $0xa0] sm:$0xff]  ;;  %v4978_v10 = vld [vmem:[%s9647_s3 + $0xd8] sm:$0xff] }
 0x3f5   : > { %v4563_v61 = vmul.f32 %v6906_v63, %v4434_v46  ;;  %v4369_v62 = vadd.f32 %v4305_v19, %v8411_v34  ;;  %v2376_v27 = vadd.f32 %v2312_v54, %v1926_v47  ;;  %v2762_v51 = vmul.f32 %v6678_v37, %v2633_v6  ;;  %v4972_v37 = vld [vmem:[%s9647_s3 + $0xa8] sm:$0xff]  ;;  %v4814_v56 = vpop.xlane.xlu1 %4813  ;;  %v4979_v59 = vld [vmem:[%s9647_s3 + $0xe0] sm:$0xff] }
 0x3f6   : > { %v3533_v53 = vmax.f32 %v3469_v29, 0.0  ;;  %v5034_v36 = vmul.f32 %v4970_v3, %v4906_v7  ;;  %v3212_v14 = vmul.f32 %v6684_v17, %v3083_v42  ;;  %v3983_v24 = vmax.f32 %v3919_v31, 0.0  ;;  %v4973_v17 = vld [vmem:[%s9647_s3 + $0xb0] sm:$0xff]  ;;  %v4980_v3 = vld [vmem:[%s9647_s3 + $0xe8] sm:$0xff] }
 0x3f7   : > { %v4627_v8 = vadd.f32 %v4563_v61, %v4177_v0  ;;  %v2826_v40 = vadd.f32 %v2762_v51, %v2376_v27  ;;  %v4908_v35 = vmul.f32 0.00390625, %v9411_v33  ;;  %v4907_v34 = vmul.f32 0.00390625, %v9397_v52  ;;  %v4974_v52 = vld [vmem:[%s9647_s3 + $0xb8] sm:$0xff] }
 0x3f8   : > { %v5097_v45 = vadd.f32 %v5096_v41, %v5034_v36  ;;  %v4433_v58 = vmax.f32 %v4369_v62, 0.0  ;;  %v4909_v32 = vmul.f32 0.00390625, %v9424_v15  ;;  %v3662_v48 = vmul.f32 %v6687_v57, %v3533_v53  ;;  %v4818_v16 = vpop.xlane.xlu0 %4817  ;;  %v4981_v62 = vld [vmem:[%s9647_s3 + $0xf0] sm:$0xff]  ;;  %v4982_v27 = vld [vmem:[%s9647_s3 + $0xf8] sm:$0xff] }
 0x3f9   : > { %4885 = vadd.xlane.f32.xlu1 %v4627_v8  ;;  %v3276_v5 = vadd.f32 %v3212_v14, %v2826_v40  ;;  %v5035_v26 = vmul.f32 %v4971_v60, %v4907_v34  ;;  %v4910_v25 = vmul.f32 0.00390625, %v4806_v13  ;;  %v4112_v33 = vmul.f32 %v6752_v50, %v3983_v24  ;;  %v4816_v15 = vpop.xlane.xlu2 %4815  ;;  %v4975_v50 = vld [vmem:[%s9647_s3 + $0xc0] sm:$0xff]  ;;  %v4976_v13 = vld [vmem:[%s9647_s3 + $0xc8] sm:$0xff] }
 0x3fa   : > { %v5036_v23 = vmul.f32 %v4972_v37, %v4908_v35  ;;  %v5037_v38 = vmul.f32 %v4973_v17, %v4909_v32  ;;  %v4562_v2 = vmul.f32 %v6906_v63, %v4433_v58  ;;  %v4911_v11 = vmul.f32 0.00390625, %v4808_v43  ;;  %v4977_v63 = vld [vmem:[%s9647_s3 + $0xd0] sm:$0xff]  ;;  %v4984_v17 = vld [vmem:[%s9647_s3 + $0x108] sm:$0xff] }
 0x3fb   : > { %v3726_v39 = vadd.f32 %v3662_v48, %v3276_v5  ;;  %v5098_v55 = vadd.f32 %v5097_v45, %v5035_v26  ;;  %v5038_v57 = vmul.f32 %v4974_v52, %v4910_v25  ;;  %v4912_v4 = vmul.f32 0.00390625, %v4810_v22  ;;  %v4985_v32 = vld [vmem:[%s9647_s3 + $0x110] sm:$0xff] }
 0x3fc   : > { %v4913_v44 = vmul.f32 0.00390625, %v4812_v30  ;;  %v5039_v46 = vmul.f32 %v4975_v50, %v4911_v11  ;;  %v4914_v47 = vmul.f32 0.00390625, %v4814_v56  ;;  %v4915_v21 = vmul.f32 0.00390625, %v4816_v15  ;;  %v4983_v30 = vld [vmem:[%s9647_s3 + $0x100] sm:$0xff]  ;;  %v4986_v56 = vld [vmem:[%s9647_s3 + $0x118] sm:$0xff] }
 0x3fd   : > { %v4176_v12 = vadd.f32 %v4112_v33, %v3726_v39  ;;  %v5099_v18 = vadd.f32 %v5098_v55, %v5036_v23  ;;  %v5040_v49 = vmul.f32 %v4976_v13, %v4912_v4  ;;  %v4820_v29 = vpop.xlane.xlu1 %4819  ;;  %v4916_v19 = vmul.f32 0.00390625, %v4818_v16  ;;  %v4987_v15 = vld [vmem:[%s9647_s3 + $0x120] sm:$0xff] }
 0x3fe   : > { %v5041_v9 = vmul.f32 %v4977_v63, %v4913_v44  ;;  %v5042_v54 = vmul.f32 %v4978_v10, %v4914_v47  ;;  %v5043_v42 = vmul.f32 %v4979_v59, %v4915_v21  ;;  %v4917_v41 = vmul.f32 0.00390625, %v4820_v29  ;;  %v4991_v47 = vld [vmem:[%s9647_s3 + $0x140] sm:$0xff] }
 0x3ff   : > { %v4626_v20 = vadd.f32 %v4562_v2, %v4176_v12  ;;  %v5100_v28 = vadd.f32 %v5099_v18, %v5037_v38  ;;  %v5044_v0 = vmul.f32 %v4980_v3, %v4916_v19  ;;  %v4988_v12 = vld [vmem:[%s9647_s3 + $0x128] sm:$0xff] }
 0x400   : > { %v4824_v51 = vpop.xlane.xlu0 %4823  ;;  %v5045_v36 = vmul.f32 %v4981_v62, %v4917_v41  ;;  %v4992_v19 = vld [vmem:[%s9647_s3 + $0x148] sm:$0xff]  ;;  %v4993_v41 = vld [vmem:[%s9647_s3 + $0x150] sm:$0xff] }
 0x401   : > { %4883 = vadd.xlane.f32.xlu0 %v4626_v20  ;;  %v5101_v1 = vadd.f32 %v5100_v28, %v5038_v57  ;;  %v4822_v22 = vpop.xlane.xlu2 %4821  ;;  %v4919_v24 = vmul.f32 0.00390625, %v4824_v51  ;;  %v4989_v28 = vld [vmem:[%s9647_s3 + $0x130] sm:$0xff] }
 0x402   : > { %v4918_v61 = vmul.f32 0.00390625, %v4822_v22 }
 0x403   : > { %v5102_v43 = vadd.f32 %v5101_v1, %v5039_v46  ;;  %v5047_v34 = vmul.f32 %v4983_v30, %v4919_v24 }
 0x404   : > { %v5046_v14 = vmul.f32 %v4982_v27, %v4918_v61 }
 0x405   : > { %v5103_v31 = vadd.f32 %v5102_v43, %v5040_v49  ;;  %v4826_v60 = vpop.xlane.xlu1 %4825  ;;  %v4990_v43 = vld [vmem:[%s9647_s3 + $0x138] sm:$0xff] }
 0x406   : > { %v4920_v58 = vmul.f32 0.00390625, %v4826_v60 }
 0x407   : > { %v5104_v6 = vadd.f32 %v5103_v31, %v5041_v9 }
 0x408   : > { %v4830_v5 = vpop.xlane.xlu0 %4829  ;;  %v5048_v26 = vmul.f32 %v4984_v17, %v4920_v58 }
 0x409   : > { %v5105_v7 = vadd.f32 %v5104_v6, %v5042_v54  ;;  %v4828_v45 = vpop.xlane.xlu2 %4827  ;;  %v4922_v33 = vmul.f32 0.00390625, %v4830_v5 }
 0x40a   : > { %v4921_v37 = vmul.f32 0.00390625, %v4828_v45 }
 0x40b   : > { %v5106_v53 = vadd.f32 %v5105_v7, %v5043_v42  ;;  %v5050_v38 = vmul.f32 %v4986_v56, %v4922_v33 }
 0x40c   : > { %v5049_v25 = vmul.f32 %v4985_v32, %v4921_v37 }
 0x40d   : > { %v5107_v8 = vadd.f32 %v5106_v53, %v5044_v0  ;;  %v4832_v52 = vpop.xlane.xlu1 %4831  ;;  %v4994_v0 = vld [vmem:[%s9647_s3 + $0x158] sm:$0xff] }
 0x40e   : > { %v4923_v2 = vmul.f32 0.00390625, %v4832_v52 }
 0x40f   : > { %v5108_v40 = vadd.f32 %v5107_v8, %v5045_v36  ;;  %v4995_v8 = vld [vmem:[%s9647_s3 + $0x160] sm:$0xff] }
 0x410   : > { %v4836_v18 = vpop.xlane.xlu0 %4835  ;;  %v5051_v4 = vmul.f32 %v4987_v15, %v4923_v2 }
 0x411   : > { %v5109_v35 = vadd.f32 %v5108_v40, %v5046_v14  ;;  %v4834_v23 = vpop.xlane.xlu2 %4833  ;;  %v4925_v13 = vmul.f32 0.00390625, %v4836_v18 }
 0x412   : > { %v4924_v11 = vmul.f32 0.00390625, %v4834_v23 }
 0x413   : > { %v5110_v48 = vadd.f32 %v5109_v35, %v5047_v34  ;;  %v5053_v46 = vmul.f32 %v4989_v28, %v4925_v13  ;;  %v4996_v35 = vld [vmem:[%s9647_s3 + $0x168] sm:$0xff]  ;;  %v4997_v34 = vld [vmem:[%s9647_s3 + $0x170] sm:$0xff] }
 0x414   : > { %v5052_v50 = vmul.f32 %v4988_v12, %v4924_v11 }
 0x415   : > { %v5111_v39 = vadd.f32 %v5110_v48, %v5048_v26  ;;  %v4838_v20 = vpop.xlane.xlu1 %4837  ;;  %v4998_v26 = vld [vmem:[%s9647_s3 + $0x178] sm:$0xff] }
 0x416   : > { %v4926_v1 = vmul.f32 0.00390625, %v4838_v20 }
 0x417   : > { %v5112_v55 = vadd.f32 %v5111_v39, %v5049_v25 }
 0x418   : > { %v4842_v9 = vpop.xlane.xlu0 %4841  ;;  %v5054_v10 = vmul.f32 %v4990_v43, %v4926_v1 }
 0x419   : > { %v5113_v57 = vadd.f32 %v5112_v55, %v5050_v38  ;;  %v4840_v63 = vpop.xlane.xlu2 %4839  ;;  %v4928_v29 = vmul.f32 0.00390625, %v4842_v9  ;;  %v4999_v55 = vld [vmem:[%s9647_s3 + $0x180] sm:$0xff]  ;;  %v5000_v38 = vld [vmem:[%s9647_s3 + $0x188] sm:$0xff] }
 0x41a   : > { %v4927_v49 = vmul.f32 0.00390625, %v4840_v63 }
 0x41b   : > { %v5114_v44 = vadd.f32 %v5113_v57, %v5051_v4  ;;  %v5056_v6 = vmul.f32 %v4992_v19, %v4928_v29  ;;  %v5001_v4 = vld [vmem:[%s9647_s3 + $0x190] sm:$0xff] }
 0x41c   : > { %v5055_v59 = vmul.f32 %v4991_v47, %v4927_v49 }
 0x41d   : > { %v5115_v16 = vadd.f32 %v5114_v44, %v5052_v50  ;;  %v4844_v31 = vpop.xlane.xlu1 %4843 }
 0x41e   : > { %v4929_v42 = vmul.f32 0.00390625, %v4844_v31 }
 0x41f   : > { %v5116_v21 = vadd.f32 %v5115_v16, %v5053_v46  ;;  %v5002_v16 = vld [vmem:[%s9647_s3 + $0x198] sm:$0xff]  ;;  %v5003_v46 = vld [vmem:[%s9647_s3 + $0x1a0] sm:$0xff] }
 0x420   : > { %v4848_v61 = vpop.xlane.xlu0 %4847  ;;  %v5057_v27 = vmul.f32 %v4993_v41, %v4929_v42 }
 0x421   : > { %v5117_v3 = vadd.f32 %v5116_v21, %v5054_v10  ;;  %v4846_v22 = vpop.xlane.xlu2 %4845  ;;  %v4931_v53 = vmul.f32 0.00390625, %v4848_v61  ;;  %v5004_v10 = vld [vmem:[%s9647_s3 + $0x1a8] sm:$0xff] }
 0x422   : > { %v4930_v7 = vmul.f32 0.00390625, %v4846_v22 }
 0x423   : > { %v5118_v54 = vadd.f32 %v5117_v3, %v5055_v59  ;;  %v5059_v30 = vmul.f32 %v4995_v8, %v4931_v53 }
 0x424   : > { %v5058_v51 = vmul.f32 %v4994_v0, %v4930_v7 }
 0x425   : > { %v5119_v62 = vadd.f32 %v5118_v54, %v5056_v6  ;;  %v4850_v36 = vpop.xlane.xlu1 %4849  ;;  %v5005_v54 = vld [vmem:[%s9647_s3 + $0x1b0] sm:$0xff]  ;;  %v5006_v6 = vld [vmem:[%s9647_s3 + $0x1b8] sm:$0xff] }
 0x426   : > { %v4932_v40 = vmul.f32 0.00390625, %v4850_v36 }
 0x427   : > { %v5120_v14 = vadd.f32 %v5119_v62, %v5057_v27  ;;  %v5007_v27 = vld [vmem:[%s9647_s3 + $0x1c0] sm:$0xff] }
 0x428   : > { %v4854_v58 = vpop.xlane.xlu0 %4853  ;;  %v5060_v17 = vmul.f32 %v4996_v35, %v4932_v40 }
 0x429   : > { %v4852_v24 = vpop.xlane.xlu2 %4851  ;;  %v5121_v60 = vadd.f32 %v5120_v14, %v5058_v51  ;;  %v4934_v5 = vmul.f32 0.00390625, %v4854_v58 }
 0x42a   : > { %v4933_v45 = vmul.f32 0.00390625, %v4852_v24 }
 0x42b   : > { %v5122_v37 = vadd.f32 %v5121_v60, %v5059_v30  ;;  %v5062_v56 = vmul.f32 %v4998_v26, %v4934_v5  ;;  %v5008_v60 = vld [vmem:[%s9647_s3 + $0x1c8] sm:$0xff]  ;;  %v5009_v30 = vld [vmem:[%s9647_s3 + $0x1d0] sm:$0xff] }
 0x42c   : > { %v5061_v32 = vmul.f32 %v4997_v34, %v4933_v45 }
 0x42d   : > { %v4856_v48 = vpop.xlane.xlu1 %4855  ;;  %v5123_v25 = vadd.f32 %v5122_v37, %v5060_v17  ;;  %v5010_v17 = vld [vmem:[%s9647_s3 + $0x1d8] sm:$0xff] }
 0x42e   : > { %v4935_v39 = vmul.f32 0.00390625, %v4856_v48 }
 0x42f   : > { %v5124_v52 = vadd.f32 %v5123_v25, %v5061_v32 }
 0x430   : > { %v4860_v2 = vpop.xlane.xlu0 %4859  ;;  %v5063_v15 = vmul.f32 %v4999_v55, %v4935_v39 }
 0x431   : > { %v4858_v33 = vpop.xlane.xlu2 %4857  ;;  %v5125_v11 = vadd.f32 %v5124_v52, %v5062_v56  ;;  %v4937_v18 = vmul.f32 0.00390625, %v4860_v2  ;;  %v5011_v52 = vld [vmem:[%s9647_s3 + $0x1e0] sm:$0xff]  ;;  %v5012_v56 = vld [vmem:[%s9647_s3 + $0x1e8] sm:$0xff] }
 0x432   : > { %v4936_v23 = vmul.f32 0.00390625, %v4858_v33 }
 0x433   : > { %v5126_v50 = vadd.f32 %v5125_v11, %v5063_v15  ;;  %v5065_v28 = vmul.f32 %v5001_v4, %v4937_v18  ;;  %v5013_v11 = vld [vmem:[%s9647_s3 + $0x1f0] sm:$0xff]  ;;  %v5014_v4 = vld [vmem:[%s9647_s3 + $0x1f8] sm:$0xff] }
 0x434   : > { %v5064_v12 = vmul.f32 %v5000_v38, %v4936_v23 }
 0x435   : > { %v4862_v57 = vpop.xlane.xlu1 %4861 }
 0x436   : > { %v5127_v20 = vadd.f32 %v5126_v50, %v5064_v12  ;;  %v4938_v44 = vmul.f32 0.00390625, %v4862_v57 }
 0x438   : > { %v4866_v1 = vpop.xlane.xlu0 %4865  ;;  %v5128_v49 = vadd.f32 %v5127_v20, %v5065_v28  ;;  %v5066_v43 = vmul.f32 %v5002_v16, %v4938_v44 }
 0x439   : > { %v4864_v13 = vpop.xlane.xlu2 %4863  ;;  %v4940_v9 = vmul.f32 0.00390625, %v4866_v1 }
 0x43a   : > { %v4939_v63 = vmul.f32 0.00390625, %v4864_v13  ;;  %v5129_v59 = vadd.f32 %v5128_v49, %v5066_v43  ;;  %v5148_v49 = vld [vmem:[%s9648_s4] sm:$0x1] }
 0x43b   : > { %v5068_v19 = vmul.f32 %v5004_v10, %v4940_v9 }
 0x43c   : > { %v5067_v47 = vmul.f32 %v5003_v46, %v4939_v63 }
 0x43d   : > { %v4868_v21 = vpop.xlane.xlu1 %4867 }
 0x43e   : > { %v5130_v31 = vadd.f32 %v5129_v59, %v5067_v47  ;;  %v4941_v3 = vmul.f32 0.00390625, %v4868_v21 }
 0x440   : > { %v4872_v42 = vpop.xlane.xlu0 %4871  ;;  %v5131_v7 = vadd.f32 %v5130_v31, %v5068_v19  ;;  %v5069_v41 = vmul.f32 %v5005_v54, %v4941_v3 }
 0x441   : > { %v4870_v29 = vpop.xlane.xlu2 %4869  ;;  %v4943_v61 = vmul.f32 0.00390625, %v4872_v42 }
 0x442   : > { %v4942_v22 = vmul.f32 0.00390625, %v4870_v29  ;;  %v5132_v51 = vadd.f32 %v5131_v7, %v5069_v41 }
 0x443   : > { %v5071_v8 = vmul.f32 %v5007_v27, %v4943_v61 }
 0x444   : > { %v5070_v0 = vmul.f32 %v5006_v6, %v4942_v22 }
 0x445   : > { %v4874_v62 = vpop.xlane.xlu1 %4873 }
 0x446   : > { %v5133_v36 = vadd.f32 %v5132_v51, %v5070_v0  ;;  %v4944_v14 = vmul.f32 0.00390625, %v4874_v62 }
 0x448   : > { %v5134_v45 = vadd.f32 %v5133_v36, %v5071_v8  ;;  %v5072_v35 = vmul.f32 %v5008_v60, %v4944_v14 }
 0x449   : > { %v4876_v53 = vpop.xlane.xlu2 %4875 }
 0x44a   : > { %v4945_v24 = vmul.f32 0.00390625, %v4876_v53  ;;  %v5135_v32 = vadd.f32 %v5134_v45, %v5072_v35 }
 0x44c   : > { %v5073_v34 = vmul.f32 %v5009_v30, %v4945_v24 }
 0x44e   : > { %v5136_v48 = vadd.f32 %v5135_v32, %v5073_v34 }
 0x450   : > { %v4880_v37 = vpop.xlane.xlu1 %4879 }
 0x451   : > { %v4947_v25 = vmul.f32 0.00390625, %v4880_v37 }
 0x453   : > { %v5075_v23 = vmul.f32 %v5011_v52, %v4947_v25 }
 0x459   : > { %v4878_v40 = vpop.xlane.xlu0 %4877 }
 0x45a   : > { %v4946_v58 = vmul.f32 0.00390625, %v4878_v40 }
 0x45c   : > { %v5074_v26 = vmul.f32 %v5010_v17, %v4946_v58 }
 0x45e   : > { %v5137_v39 = vadd.f32 %v5136_v48, %v5074_v26 }
 0x460   : > { %v5138_v2 = vadd.f32 %v5137_v39, %v5075_v23 }
 0x463   : > { %v4882_v5 = vpop.xlane.xlu2 %4881 }
 0x464   : > { %v4948_v33 = vmul.f32 0.00390625, %v4882_v5 }
 0x466   : > { %v5076_v55 = vmul.f32 %v5012_v56, %v4948_v33 }
 0x468   : > { %v5139_v12 = vadd.f32 %v5138_v2, %v5076_v55 }
 0x46c   : > { %v4886_v38 = vpop.xlane.xlu1 %4885 }
 0x46d   : > { %v4950_v18 = vmul.f32 0.00390625, %v4886_v38 }
 0x46f   : > { %v5078_v13 = vmul.f32 %v5014_v4, %v4950_v18 }
 0x474   : > { %v4884_v15 = vpop.xlane.xlu0 %4883 }
 0x475   : > { %v4949_v57 = vmul.f32 0.00390625, %v4884_v15 }
 0x477   : > { %v5077_v50 = vmul.f32 %v5013_v11, %v4949_v57 }
 0x479   : > { %v5140_v20 = vadd.f32 %v5139_v12, %v5077_v50 }
 0x47b   : > { %v5141_v28 = vadd.f32 %v5140_v20, %v5078_v13 }
 0x47d   : > { %v5142_v44 = vrot.slane %v5141_v28, 4 }
 0x47f   : > { %v5143_v63 = vadd.f32 %v5142_v44, %v5141_v28 }
 0x481   : > { %v5144_v16 = vrot.slane %v5143_v63, 2 }
 0x483   : > { %v5145_v46 = vadd.f32 %v5144_v16, %v5143_v63 }
 0x485   : > { %v5146_v1 = vrot.slane %v5145_v46, 1 }
 0x487   : > { %v5147_v43 = vadd.f32 %v5146_v1, %v5145_v46 }
 0x489   : > { %v5149_v47 = vadd.f32 %v5148_v49, %v5147_v43 }
 0x48b   : > { %v5150_v9 = vperm.slane %v5149_v47, 0 }
 0x48d   : > { %5151 = vst [vmem:[%s235_s14] sm:$0xff] %v5150_v9 }
 0x48e   : > { %5337 = shalt.err (!%p5334_p5)
}
 0x48f   : > { %5250 = dma.vmem_to_hbm [thread:$0]  (%p5462_p4), %s5166_s15, 128, %s5168_s16, %s5153_s21  }
 0x490 PF: > { %p5256_p6 = scmp.ge.s32.totalorder %s5388_s23, 2  ;;  %s5179_s29 = sand.u32 1, %s5368_s18  }
 0x491   : > { %s5180_s10 = scalar_lea.sflag [#allocation4], %s5179_s29 }
 0x492   : > { %p5253_p7 = pnand %p5256_p6, %p5469_p8 }
 0x494   : > { %p5254_p9 = pneg %p5253_p7 }
 0x496   : > { %5363 = dma.done.wait (%p5254_p9), %s5180_s10, 128  }
 0x497   : > { %5365 = vsyncadd (%p5254_p9), %s5180_s10, 4294967168  ;;  %s18_s23 = sadd.s32 1, %s5388_s23   ;;  %s10633_s18 = smov %s5372_s19 }
 0x498   : > { %p15_p10 = scmp.ge.s32.totalorder %s18_s23, 4   ;;  %s10634_s19 = smov %s5376_s20 }
 0x499   : > { %s10635_s20 = smov %s5475_s6  ;;  %s10636_s21 = smov %s5384_s22 }
 0x49a   : > { %s10637_s22 = smov %s10639_s26  ;;  %17 = sbr.rel (!%p15_p10) target bundleno = 4 (0x4), region = 83 }
 0x49f   :  { %5186 = vsyncpa [#allocation4], 1 }
 0x4a0   :  { %5188 = vsyncpa [#allocation4 + $0x1], 1 }

</bundles_post_ra>
